<compile_context>
chip_gen: v7x
topology: tpu7x:2x2x1
jax: 0.10.0
libtpu: 0.0.40
codegen_flags: <defaults>
</compile_context>

<pallas_src>
import jax
import jax.numpy as jnp
from jax.experimental import pallas as pl
from jax.experimental.pallas import tpu as pltpu

# ----------------- scaled-down, deterministic configuration -----------------
B, T = 2, 4                       # batch, sequence length
C_IN, H_IN, W_IN = 3, 56, 28      # input frames (NCHW per frame)
PATCH = 4                         # stand-in "base" downsample factor
H_F, W_F = H_IN // PATCH, W_IN // PATCH   # 14 x 7 (matches attention_conv [14, 7])
FEAT = 256                        # stand-in for feat_dim = 2048
MID = 64                          # stand-in for middle_dim = 256
NUM_CLASSES = 16
EPS = 1e-5
TB = T * B                        # number of frames, ordered (t, b)
S = H_F * W_F                     # 98 spatial positions
PK = PATCH * PATCH * C_IN         # 48 im2col columns
NK_ATT = 2                        # K-grid steps for the attention_conv matmul


# ----------------------------- Pallas kernels -------------------------------
def _base_gap_kernel(p_ref, wb_ref, bb_ref, m_ref, feat_ref, gap_ref):
    """Stand-in base conv (im2col @ W + b, ReLU) fused with AdaptiveAvgPool2d(1).
    GAP is done as a (TB, TB*S) averaging-matrix matmul so no in-kernel reshape
    of the (TB*S, FEAT) feature map is needed."""
    feats = jnp.dot(p_ref[...], wb_ref[...], preferred_element_type=jnp.float32)
    feats = jnp.maximum(feats + bb_ref[...], 0.0)                  # (TB*S, FEAT) f32
    feat_ref[...] = feats.astype(jnp.bfloat16)                     # bf16 activation to HBM
    gap_ref[...] = jnp.dot(m_ref[...], feats,
                           preferred_element_type=jnp.float32)     # (TB, FEAT) f32


def _att_head_kernel(x_ref, w_ref, ba_ref, k_ref, tb_ref, g_ref,
                     gamma_ref, beta_ref, mean_ref, var_ref, wc_ref,
                     y_ref, f_ref, av_ref, acc_ref):
    """attention_conv (Conv2d FEAT->MID, kernel [14,7] == full map) as a K-tiled
    bf16 matmul with an f32 VMEM accumulator; the full temporal-attention head
    (Conv1d k=3 + ReLU + softmax + weighted pooling + BN1d + Linear) runs in a
    pl.when epilogue on the last K step."""
    kk = pl.program_id(0)

    @pl.when(kk == 0)
    def _():
        acc_ref[...] = jnp.zeros_like(acc_ref)

    # (TB, tk) bf16 @ (tk, MID) bf16 -> f32 accumulate
    acc_ref[...] += jnp.dot(x_ref[...], w_ref[...],
                            preferred_element_type=jnp.float32)

    @pl.when(kk == pl.num_programs(0) - 1)
    def _():
        # a = relu(attention_conv(x)); rows are frames in (t, b) order.
        a_mid = jnp.maximum(acc_ref[...] + ba_ref[...], 0.0)       # (TB, MID)
        acc_ref[...] = a_mid   # reuse scratch so per-time slices are plain ref reads

        # attention_tconv: Conv1d(MID -> 1, kernel=3, padding=1) over t, folded into
        # the banded matrix k_ref and evaluated as T tiny matmuls (one per input time).
        pre = jnp.zeros((B, T), jnp.float32)
        for tp in range(T):
            lhs = acc_ref[pl.ds(tp * B, B), :]                     # (B, MID) frames at time tp
            rhs = k_ref[pl.ds(tp * MID, MID), :]                   # (MID, T)
            pre = pre + jnp.dot(lhs, rhs, preferred_element_type=jnp.float32)
        a_vals = jnp.maximum(pre + tb_ref[...], 0.0)               # (B, T) ReLU'd logits
        av_ref[...] = a_vals

        # softmax over the temporal dim
        z = a_vals - jnp.max(a_vals, axis=1, keepdims=True)
        e = jnp.exp(z)
        attn = e / jnp.sum(e, axis=1, keepdims=True)               # (B, T)

        # attention-weighted temporal sum of GAP features
        att_x = jnp.sum(g_ref[...] * jnp.expand_dims(attn, -1), axis=1)   # (B, FEAT)

        # BNClassifier: eval-mode BatchNorm1d then bias-free Linear
        inv_std = jax.lax.rsqrt(var_ref[...] + EPS)
        f = (att_x - mean_ref[...]) * inv_std * gamma_ref[...] + beta_ref[...]
        f_ref[...] = f
        y_ref[...] = jnp.dot(f, wc_ref[...], preferred_element_type=jnp.float32)


# ----------------------------- pallas_call wrappers --------------------------
def base_gap(patches, w_base, b_base, mavg):
    n, k = patches.shape
    f = w_base.shape[1]
    tb = mavg.shape[0]
    return pl.pallas_call(
        _base_gap_kernel,
        out_shape=(jax.ShapeDtypeStruct((n, f), jnp.bfloat16),
                   jax.ShapeDtypeStruct((tb, f), jnp.float32)),
        grid=(1,),
        in_specs=[pl.BlockSpec((n, k), lambda i: (0, 0)),
                  pl.BlockSpec((k, f), lambda i: (0, 0)),
                  pl.BlockSpec((1, f), lambda i: (0, 0)),
                  pl.BlockSpec((tb, n), lambda i: (0, 0))],
        out_specs=(pl.BlockSpec((n, f), lambda i: (0, 0)),
                   pl.BlockSpec((tb, f), lambda i: (0, 0))),
    )(patches, w_base, b_base, mavg)


def att_head(feats_flat, w_att, b_att, kmat, b_t, g3,
             gamma, beta, rmean, rvar, w_cls, *, nk=NK_ATT):
    tb, kdim = feats_flat.shape
    mid = w_att.shape[1]
    assert kdim % nk == 0
    tk = kdim // nk
    b, t, f = g3.shape
    nc = w_cls.shape[1]
    return pl.pallas_call(
        _att_head_kernel,
        out_shape=(jax.ShapeDtypeStruct((b, nc), jnp.float32),
                   jax.ShapeDtypeStruct((b, f), jnp.float32),
                   jax.ShapeDtypeStruct((b, t), jnp.float32)),
        grid_spec=pltpu.PrefetchScalarGridSpec(
            num_scalar_prefetch=0,
            grid=(nk,),
            in_specs=[pl.BlockSpec((tb, tk), lambda k: (0, k)),
                      pl.BlockSpec((tk, mid), lambda k: (k, 0)),
                      pl.BlockSpec((1, mid), lambda k: (0, 0)),
                      pl.BlockSpec((t * mid, t), lambda k: (0, 0)),
                      pl.BlockSpec((1, 1), lambda k: (0, 0)),
                      pl.BlockSpec((b, t, f), lambda k: (0, 0, 0)),
                      pl.BlockSpec((1, f), lambda k: (0, 0)),
                      pl.BlockSpec((1, f), lambda k: (0, 0)),
                      pl.BlockSpec((1, f), lambda k: (0, 0)),
                      pl.BlockSpec((1, f), lambda k: (0, 0)),
                      pl.BlockSpec((f, nc), lambda k: (0, 0))],
            out_specs=(pl.BlockSpec((b, nc), lambda k: (0, 0)),
                       pl.BlockSpec((b, f), lambda k: (0, 0)),
                       pl.BlockSpec((b, t), lambda k: (0, 0))),
            scratch_shapes=[pltpu.VMEM((tb, mid), jnp.float32)]),
        compiler_params=pltpu.CompilerParams(
            dimension_semantics=("arbitrary",)),
    )(feats_flat, w_att, b_att, kmat, b_t, g3,
      gamma, beta, rmean, rvar, w_cls)


# -------------------------------- glue (JAX) ---------------------------------
def extract_patches(x):
    """(b, t, C, H, W) -> im2col rows for the stand-in base conv, frames ordered
    (t, b), spatial stride = kernel = PATCH."""
    xt = jnp.transpose(x, (1, 0, 2, 3, 4)).reshape(TB, C_IN, H_IN, W_IN)
    xt = xt.reshape(TB, C_IN, H_F, PATCH, W_F, PATCH)
    xt = jnp.transpose(xt, (0, 2, 4, 3, 5, 1))          # (tb, H_F, W_F, ph, pw, C)
    return xt.reshape(TB * S, PK)


def build_tconv_matrix(w_t):
    """Fold Conv1d(MID -> 1, kernel=3, padding=1) over t into a (T*MID, T) matrix:
    out[b, t] = sum_{t', m} a[b, t', m] * K[t'*MID + m, t], banded with |t'-t| <= 1.
    Precomputed once at init (not rebuilt every forward call)."""
    K = jnp.zeros((T, MID, T), dtype=jnp.float32)
    for tp in range(T):
        for t in range(T):
            k = tp - t + 1
            if 0 <= k < 3:
                K = K.at[tp, :, t].set(w_t[0, :, k])
    return K.reshape(T * MID, T)


def build_gap_matrix():
    """(TB, TB*S) averaging matrix: gap = M @ feats (mean over spatial positions)."""
    rows = jnp.arange(TB)[:, None]
    cols = jnp.arange(TB * S)[None, :]
    return jnp.where(cols // S == rows, 1.0 / S, 0.0).astype(jnp.float32)


def init_params(key):
    ks = jax.random.split(key, 11)
    sc = 0.05
    w_base = sc * jax.random.normal(ks[0], (PK, FEAT), jnp.float32)
    b_base = sc * jax.random.normal(ks[1], (1, FEAT), jnp.float32)
    # attention_conv weight in PyTorch layout (MID, FEAT, 14, 7) -> (kh, kw, c, out) flat,
    # stored bf16: kernel B streams it as bf16 and accumulates in f32 on the MXU.
    w_att_pt = sc * jax.random.normal(ks[2], (MID, FEAT, H_F, W_F), jnp.float32)
    w_att = jnp.transpose(w_att_pt, (2, 3, 1, 0)).reshape(S * FEAT, MID)
    w_att = w_att.astype(jnp.bfloat16)
    b_att = sc * jax.random.normal(ks[3], (1, MID), jnp.float32)
    # attention_tconv: Conv1d weight (1, MID, 3), bias (1, 1); folded once.
    w_t = sc * jax.random.normal(ks[4], (1, MID, 3), jnp.float32)
    b_t = sc * jax.random.normal(ks[5], (1, 1), jnp.float32)
    # BNClassifier: BatchNorm1d(FEAT) eval-mode stats + bias-free Linear(FEAT, NUM_CLASSES)
    gamma = 1.0 + 0.1 * jax.random.normal(ks[6], (1, FEAT), jnp.float32)
    beta = 0.1 * jax.random.normal(ks[7], (1, FEAT), jnp.float32)
    rmean = 0.1 * jax.random.normal(ks[8], (1, FEAT), jnp.float32)
    rvar = jnp.abs(0.5 * jax.random.normal(ks[9], (1, FEAT), jnp.float32)) + 0.5
    w_cls = sc * jax.random.normal(ks[10], (FEAT, NUM_CLASSES), jnp.float32)
    return dict(w_base=w_base, b_base=b_base, w_att=w_att, b_att=b_att,
                kmat=build_tconv_matrix(w_t), b_t=b_t,
                gamma=gamma, beta=beta, rmean=rmean, rvar=rvar, w_cls=w_cls,
                mavg=build_gap_matrix())


@jax.jit
def forward(params, x):
    # base (stand-in) + GAP, fused; frames in (t, b) order.
    patches = extract_patches(x)                                    # (TB*S, PK) f32
    feats_bf, g = base_gap(patches, params["w_base"], params["b_base"],
                           params["mavg"])                          # (TB*S, FEAT) bf16, (TB, FEAT) f32
    # free HBM re-view of feats as attention_conv matmul rows
    feats_flat = feats_bf.reshape(TB, S * FEAT)                     # (TB, S*FEAT) bf16
    g3 = jnp.transpose(g.reshape(T, B, FEAT), (1, 0, 2))            # (B, T, FEAT)

    # attention_conv + temporal attention + pooling + BN classifier, fused.
    y, f, a_vals = att_head(feats_flat, params["w_att"], params["b_att"],
                            params["kmat"], params["b_t"], g3,
                            params["gamma"], params["beta"],
                            params["rmean"], params["rvar"], params["w_cls"])
    return y, f, a_vals            # training-mode return (y, f, a_vals)


if __name__ == "__main__":
    key = jax.random.PRNGKey(0)
    kx, kp = jax.random.split(key)
    x = jax.random.normal(kx, (B, T, C_IN, H_IN, W_IN), dtype=jnp.float32)
    params = init_params(kp)

    y, f, a_vals = forward(params, x)
    jax.block_until_ready((y, f, a_vals))

    assert y.shape == (B, NUM_CLASSES)
    assert f.shape == (B, FEAT)
    assert a_vals.shape == (B, T)
    assert bool(jnp.all(jnp.isfinite(y)))
    assert bool(jnp.all(jnp.isfinite(f)))
    assert bool(jnp.all(jnp.isfinite(a_vals)))
    print("KERNEL_OK")
</pallas_src>

<mosaic_0001>
module attributes {stable_mosaic.version = 11 : i64} {
  func.func @_base_gap_kernel(%arg0: i32, %arg1: memref<784x48xf32, #tpu.memory_space<vmem>>, %arg2: memref<48x256xf32, #tpu.memory_space<vmem>>, %arg3: memref<1x256xf32, #tpu.memory_space<vmem>>, %arg4: memref<8x784xf32, #tpu.memory_space<vmem>>, %arg5: memref<784x256xbf16, #tpu.memory_space<vmem>>, %arg6: memref<8x256xf32, #tpu.memory_space<vmem>>) attributes {dimension_semantics = [#tpu.dimension_semantics<arbitrary>], iteration_bounds = array<i64: 1>, scalar_prefetch = 0 : i64, scratch_operands = 0 : i64, tpu.core_type = #tpu.core_type<tc>, window_params = [{pipeline_mode = #tpu.pipeline_mode<synchronous>, transform_indices = @transform_0, window_bounds = array<i64: 784, 48>}, {pipeline_mode = #tpu.pipeline_mode<synchronous>, transform_indices = @transform_1, window_bounds = array<i64: 48, 256>}, {pipeline_mode = #tpu.pipeline_mode<synchronous>, transform_indices = @transform_2, window_bounds = array<i64: 1, 256>}, {pipeline_mode = #tpu.pipeline_mode<synchronous>, transform_indices = @transform_3, window_bounds = array<i64: 8, 784>}, {pipeline_mode = #tpu.pipeline_mode<synchronous>, transform_indices = @transform_4, window_bounds = array<i64: 784, 256>}, {pipeline_mode = #tpu.pipeline_mode<synchronous>, transform_indices = @transform_5, window_bounds = array<i64: 8, 256>}]} {
    %c0 = arith.constant 0 : index
    %c0_0 = arith.constant 0 : index
    %0 = vector.load %arg1[%c0, %c0_0] : memref<784x48xf32, #tpu.memory_space<vmem>>, vector<784x48xf32>
    %c0_1 = arith.constant 0 : index
    %c0_2 = arith.constant 0 : index
    %1 = vector.load %arg2[%c0_1, %c0_2] : memref<48x256xf32, #tpu.memory_space<vmem>>, vector<48x256xf32>
    %cst = arith.constant dense<0.000000e+00> : vector<784x256xf32>
    %2 = tpu.matmul %0, %1, %cst {dimension_numbers = #tpu.dot_dimension_numbers<[1], [0], [0], [1], [0, 0, 1, 1], [], []>} : vector<784x48xf32>, vector<48x256xf32>, vector<784x256xf32> -> vector<784x256xf32>
    %c0_3 = arith.constant 0 : index
    %c0_4 = arith.constant 0 : index
    %3 = vector.load %arg3[%c0_3, %c0_4] : memref<1x256xf32, #tpu.memory_space<vmem>>, vector<1x256xf32>
    %4 = vector.broadcast %3 : vector<1x256xf32> to vector<784x256xf32>
    %5 = arith.addf %2, %4 : vector<784x256xf32>
    %cst_5 = arith.constant 0.000000e+00 : f32
    %6 = vector.broadcast %cst_5 : f32 to vector<784x256xf32>
    %7 = arith.maximumf %5, %6 : vector<784x256xf32>
    %8 = arith.truncf %7 : vector<784x256xf32> to vector<784x256xbf16>
    %c0_6 = arith.constant 0 : index
    %c0_7 = arith.constant 0 : index
    %9 = vector.load %arg5[%c0_6, %c0_7] : memref<784x256xbf16, #tpu.memory_space<vmem>>, vector<784x256xbf16>
    tpu.vector_store %arg5[%c0_6, %c0_7], %8 {strides = array<i32>} : memref<784x256xbf16, #tpu.memory_space<vmem>>, vector<784x256xbf16>,
    %c0_8 = arith.constant 0 : index
    %c0_9 = arith.constant 0 : index
    %10 = vector.load %arg4[%c0_8, %c0_9] : memref<8x784xf32, #tpu.memory_space<vmem>>, vector<8x784xf32>
    %cst_10 = arith.constant dense<0.000000e+00> : vector<8x256xf32>
    %11 = tpu.matmul %10, %7, %cst_10 {dimension_numbers = #tpu.dot_dimension_numbers<[1], [0], [0], [1], [0, 0, 1, 1], [], []>} : vector<8x784xf32>, vector<784x256xf32>, vector<8x256xf32> -> vector<8x256xf32>
    %c0_11 = arith.constant 0 : index
    %c0_12 = arith.constant 0 : index
    %12 = vector.load %arg6[%c0_11, %c0_12] : memref<8x256xf32, #tpu.memory_space<vmem>>, vector<8x256xf32>
    tpu.vector_store %arg6[%c0_11, %c0_12], %11 {strides = array<i32>} : memref<8x256xf32, #tpu.memory_space<vmem>>, vector<8x256xf32>,
    return
  }
  func.func @transform_0(%arg0: i32) -> (i32, i32) {
    %c0_i32 = arith.constant 0 : i32
    %c0_i32_0 = arith.constant 0 : i32
    %c0_i32_1 = arith.constant 0 : i32
    return %c0_i32, %c0_i32_0 : i32, i32
  }
  func.func @transform_1(%arg0: i32) -> (i32, i32) {
    %c0_i32 = arith.constant 0 : i32
    %c0_i32_0 = arith.constant 0 : i32
    %c0_i32_1 = arith.constant 0 : i32
    return %c0_i32, %c0_i32_0 : i32, i32
  }
  func.func @transform_2(%arg0: i32) -> (i32, i32) {
    %c0_i32 = arith.constant 0 : i32
    %c0_i32_0 = arith.constant 0 : i32
    %c0_i32_1 = arith.constant 0 : i32
    return %c0_i32, %c0_i32_0 : i32, i32
  }
  func.func @transform_3(%arg0: i32) -> (i32, i32) {
    %c0_i32 = arith.constant 0 : i32
    %c0_i32_0 = arith.constant 0 : i32
    %c0_i32_1 = arith.constant 0 : i32
    return %c0_i32, %c0_i32_0 : i32, i32
  }
  func.func @transform_4(%arg0: i32) -> (i32, i32) {
    %c0_i32 = arith.constant 0 : i32
    %c0_i32_0 = arith.constant 0 : i32
    %c0_i32_1 = arith.constant 0 : i32
    return %c0_i32, %c0_i32_0 : i32, i32
  }
  func.func @transform_5(%arg0: i32) -> (i32, i32) {
    %c0_i32 = arith.constant 0 : i32
    %c0_i32_0 = arith.constant 0 : i32
    %c0_i32_1 = arith.constant 0 : i32
    return %c0_i32, %c0_i32_0 : i32, i32
  }
}

module attributes {stable_mosaic.version = 11 : i64} {
  func.func @_att_head_kernel(%arg0: i32, %arg1: memref<8x12544xbf16, #tpu.memory_space<vmem>>, %arg2: memref<12544x64xbf16, #tpu.memory_space<vmem>>, %arg3: memref<1x64xf32, #tpu.memory_space<vmem>>, %arg4: memref<256x4xf32, #tpu.memory_space<vmem>>, %arg5: memref<1x1xf32, #tpu.memory_space<vmem>>, %arg6: memref<2x4x256xf32, #tpu.memory_space<vmem>>, %arg7: memref<1x256xf32, #tpu.memory_space<vmem>>, %arg8: memref<1x256xf32, #tpu.memory_space<vmem>>, %arg9: memref<1x256xf32, #tpu.memory_space<vmem>>, %arg10: memref<1x256xf32, #tpu.memory_space<vmem>>, %arg11: memref<256x16xf32, #tpu.memory_space<vmem>>, %arg12: memref<2x16xf32, #tpu.memory_space<vmem>>, %arg13: memref<2x256xf32, #tpu.memory_space<vmem>>, %arg14: memref<2x4xf32, #tpu.memory_space<vmem>>, %arg15: memref<8x64xf32, #tpu.memory_space<vmem>>) attributes {dimension_semantics = [#tpu.dimension_semantics<arbitrary>], iteration_bounds = array<i64: 2>, scalar_prefetch = 0 : i64, scratch_operands = 1 : i64, tpu.core_type = #tpu.core_type<tc>, window_params = [{transform_indices = @transform_0, window_bounds = array<i64: 8, 12544>}, {transform_indices = @transform_1, window_bounds = array<i64: 12544, 64>}, {pipeline_mode = #tpu.pipeline_mode<synchronous>, transform_indices = @transform_2, window_bounds = array<i64: 1, 64>}, {pipeline_mode = #tpu.pipeline_mode<synchronous>, transform_indices = @transform_3, window_bounds = array<i64: 256, 4>}, {pipeline_mode = #tpu.pipeline_mode<synchronous>, transform_indices = @transform_4, window_bounds = array<i64: 1, 1>}, {pipeline_mode = #tpu.pipeline_mode<synchronous>, transform_indices = @transform_5, window_bounds = array<i64: 2, 4, 256>}, {pipeline_mode = #tpu.pipeline_mode<synchronous>, transform_indices = @transform_6, window_bounds = array<i64: 1, 256>}, {pipeline_mode = #tpu.pipeline_mode<synchronous>, transform_indices = @transform_7, window_bounds = array<i64: 1, 256>}, {pipeline_mode = #tpu.pipeline_mode<synchronous>, transform_indices = @transform_8, window_bounds = array<i64: 1, 256>}, {pipeline_mode = #tpu.pipeline_mode<synchronous>, transform_indices = @transform_9, window_bounds = array<i64: 1, 256>}, {pipeline_mode = #tpu.pipeline_mode<synchronous>, transform_indices = @transform_10, window_bounds = array<i64: 256, 16>}, {pipeline_mode = #tpu.pipeline_mode<synchronous>, transform_indices = @transform_11, window_bounds = array<i64: 2, 16>}, {pipeline_mode = #tpu.pipeline_mode<synchronous>, transform_indices = @transform_12, window_bounds = array<i64: 2, 256>}, {pipeline_mode = #tpu.pipeline_mode<synchronous>, transform_indices = @transform_13, window_bounds = array<i64: 2, 4>}]} {
    %c0_i32 = arith.constant 0 : i32
    %0 = arith.cmpi eq, %arg0, %c0_i32 : i32
    %1 = arith.extui %0 : i1 to i32
    %c0_i32_0 = arith.constant 0 : i32
    %2 = arith.cmpi ne, %1, %c0_i32_0 : i32
    scf.if %2 {
      %cst_9 = arith.constant 0.000000e+00 : f32
      %12 = vector.broadcast %cst_9 : f32 to vector<8x64xf32>
      %c0_10 = arith.constant 0 : index
      %c0_11 = arith.constant 0 : index
      %13 = vector.load %arg15[%c0_10, %c0_11] : memref<8x64xf32, #tpu.memory_space<vmem>>, vector<8x64xf32>
      tpu.vector_store %arg15[%c0_10, %c0_11], %12 {strides = array<i32>} : memref<8x64xf32, #tpu.memory_space<vmem>>, vector<8x64xf32>,
    } else {
    }
    %c0 = arith.constant 0 : index
    %c0_1 = arith.constant 0 : index
    %3 = vector.load %arg15[%c0, %c0_1] : memref<8x64xf32, #tpu.memory_space<vmem>>, vector<8x64xf32>
    %c0_2 = arith.constant 0 : index
    %c0_3 = arith.constant 0 : index
    %4 = vector.load %arg1[%c0_2, %c0_3] : memref<8x12544xbf16, #tpu.memory_space<vmem>>, vector<8x12544xbf16>
    %c0_4 = arith.constant 0 : index
    %c0_5 = arith.constant 0 : index
    %5 = vector.load %arg2[%c0_4, %c0_5] : memref<12544x64xbf16, #tpu.memory_space<vmem>>, vector<12544x64xbf16>
    %cst = arith.constant dense<0.000000e+00> : vector<8x64xf32>
    %6 = tpu.matmul %4, %5, %cst {dimension_numbers = #tpu.dot_dimension_numbers<[1], [0], [0], [1], [0, 0, 1, 1], [], []>} : vector<8x12544xbf16>, vector<12544x64xbf16>, vector<8x64xf32> -> vector<8x64xf32>
    %7 = arith.addf %3, %6 : vector<8x64xf32>
    %c0_6 = arith.constant 0 : index
    %c0_7 = arith.constant 0 : index
    %8 = vector.load %arg15[%c0_6, %c0_7] : memref<8x64xf32, #tpu.memory_space<vmem>>, vector<8x64xf32>
    tpu.vector_store %arg15[%c0_6, %c0_7], %7 {strides = array<i32>} : memref<8x64xf32, #tpu.memory_space<vmem>>, vector<8x64xf32>,
    %c1_i32 = arith.constant 1 : i32
    %9 = arith.cmpi eq, %arg0, %c1_i32 : i32
    %10 = arith.extui %9 : i1 to i32
    %c0_i32_8 = arith.constant 0 : i32
    %11 = arith.cmpi ne, %10, %c0_i32_8 : i32
    scf.if %11 {
      %c0_9 = arith.constant 0 : index
      %c0_10 = arith.constant 0 : index
      %12 = vector.load %arg15[%c0_9, %c0_10] : memref<8x64xf32, #tpu.memory_space<vmem>>, vector<8x64xf32>
      %c0_11 = arith.constant 0 : index
      %c0_12 = arith.constant 0 : index
      %13 = vector.load %arg3[%c0_11, %c0_12] : memref<1x64xf32, #tpu.memory_space<vmem>>, vector<1x64xf32>
      %14 = vector.broadcast %13 : vector<1x64xf32> to vector<8x64xf32>
      %15 = arith.addf %12, %14 : vector<8x64xf32>
      %cst_13 = arith.constant 0.000000e+00 : f32
      %16 = vector.broadcast %cst_13 : f32 to vector<8x64xf32>
      %17 = arith.maximumf %15, %16 : vector<8x64xf32>
      %c0_14 = arith.constant 0 : index
      %c0_15 = arith.constant 0 : index
      %18 = vector.load %arg15[%c0_14, %c0_15] : memref<8x64xf32, #tpu.memory_space<vmem>>, vector<8x64xf32>
      tpu.vector_store %arg15[%c0_14, %c0_15], %17 {strides = array<i32>} : memref<8x64xf32, #tpu.memory_space<vmem>>, vector<8x64xf32>,
      %cst_16 = arith.constant 0.000000e+00 : f32
      %19 = vector.broadcast %cst_16 : f32 to vector<2x4xf32>
      %c0_17 = arith.constant 0 : index
      %c0_18 = arith.constant 0 : index
      %20 = vector.load %arg15[%c0_17, %c0_18] : memref<8x64xf32, #tpu.memory_space<vmem>>, vector<2x64xf32>
      %c0_19 = arith.constant 0 : index
      %c0_20 = arith.constant 0 : index
      %21 = vector.load %arg4[%c0_19, %c0_20] : memref<256x4xf32, #tpu.memory_space<vmem>>, vector<64x4xf32>
      %cst_21 = arith.constant dense<0.000000e+00> : vector<2x4xf32>
      %22 = tpu.matmul %20, %21, %cst_21 {dimension_numbers = #tpu.dot_dimension_numbers<[1], [0], [0], [1], [0, 0, 1, 1], [], []>} : vector<2x64xf32>, vector<64x4xf32>, vector<2x4xf32> -> vector<2x4xf32>
      %23 = arith.addf %19, %22 : vector<2x4xf32>
      %c2 = arith.constant 2 : index
      %c0_22 = arith.constant 0 : index
      %24 = vector.load %arg15[%c2, %c0_22] : memref<8x64xf32, #tpu.memory_space<vmem>>, vector<2x64xf32>
      %c64 = arith.constant 64 : index
      %c0_23 = arith.constant 0 : index
      %25 = vector.load %arg4[%c64, %c0_23] : memref<256x4xf32, #tpu.memory_space<vmem>>, vector<64x4xf32>
      %cst_24 = arith.constant dense<0.000000e+00> : vector<2x4xf32>
      %26 = tpu.matmul %24, %25, %cst_24 {dimension_numbers = #tpu.dot_dimension_numbers<[1], [0], [0], [1], [0, 0, 1, 1], [], []>} : vector<2x64xf32>, vector<64x4xf32>, vector<2x4xf32> -> vector<2x4xf32>
      %27 = arith.addf %23, %26 : vector<2x4xf32>
      %c4 = arith.constant 4 : index
      %c0_25 = arith.constant 0 : index
      %28 = vector.load %arg15[%c4, %c0_25] : memref<8x64xf32, #tpu.memory_space<vmem>>, vector<2x64xf32>
      %c128 = arith.constant 128 : index
      %c0_26 = arith.constant 0 : index
      %29 = vector.load %arg4[%c128, %c0_26] : memref<256x4xf32, #tpu.memory_space<vmem>>, vector<64x4xf32>
      %cst_27 = arith.constant dense<0.000000e+00> : vector<2x4xf32>
      %30 = tpu.matmul %28, %29, %cst_27 {dimension_numbers = #tpu.dot_dimension_numbers<[1], [0], [0], [1], [0, 0, 1, 1], [], []>} : vector<2x64xf32>, vector<64x4xf32>, vector<2x4xf32> -> vector<2x4xf32>
      %31 = arith.addf %27, %30 : vector<2x4xf32>
      %c6 = arith.constant 6 : index
      %c0_28 = arith.constant 0 : index
      %32 = vector.load %arg15[%c6, %c0_28] : memref<8x64xf32, #tpu.memory_space<vmem>>, vector<2x64xf32>
      %c192 = arith.constant 192 : index
      %c0_29 = arith.constant 0 : index
      %33 = vector.load %arg4[%c192, %c0_29] : memref<256x4xf32, #tpu.memory_space<vmem>>, vector<64x4xf32>
      %cst_30 = arith.constant dense<0.000000e+00> : vector<2x4xf32>
      %34 = tpu.matmul %32, %33, %cst_30 {dimension_numbers = #tpu.dot_dimension_numbers<[1], [0], [0], [1], [0, 0, 1, 1], [], []>} : vector<2x64xf32>, vector<64x4xf32>, vector<2x4xf32> -> vector<2x4xf32>
      %35 = arith.addf %31, %34 : vector<2x4xf32>
      %c0_31 = arith.constant 0 : index
      %c0_32 = arith.constant 0 : index
      %36 = vector.load %arg5[%c0_31, %c0_32] : memref<1x1xf32, #tpu.memory_space<vmem>>, vector<1x1xf32>
      %37 = vector.broadcast %36 : vector<1x1xf32> to vector<2x4xf32>
      %38 = arith.addf %35, %37 : vector<2x4xf32>
      %cst_33 = arith.constant 0.000000e+00 : f32
      %39 = vector.broadcast %cst_33 : f32 to vector<2x4xf32>
      %40 = arith.maximumf %38, %39 : vector<2x4xf32>
      %c0_34 = arith.constant 0 : index
      %c0_35 = arith.constant 0 : index
      %41 = vector.load %arg14[%c0_34, %c0_35] : memref<2x4xf32, #tpu.memory_space<vmem>>, vector<2x4xf32>
      tpu.vector_store %arg14[%c0_34, %c0_35], %40 {strides = array<i32>} : memref<2x4xf32, #tpu.memory_space<vmem>>, vector<2x4xf32>,
      %cst_36 = arith.constant dense<0xFF800000> : vector<2xf32>
      %42 = vector.multi_reduction <maximumf>, %40, %cst_36 [1] : vector<2x4xf32> to vector<2xf32>
      %43 = vector.shape_cast %42 : vector<2xf32> to vector<2x1xf32>
      %44 = vector.broadcast %43 : vector<2x1xf32> to vector<2x4xf32>
      %45 = arith.subf %40, %44 : vector<2x4xf32>
      %46 = math.exp %45 : vector<2x4xf32>
      %cst_37 = arith.constant dense<0.000000e+00> : vector<2xf32>
      %47 = vector.multi_reduction <add>, %46, %cst_37 [1] : vector<2x4xf32> to vector<2xf32>
      %48 = vector.shape_cast %47 : vector<2xf32> to vector<2x1xf32>
      %49 = vector.broadcast %48 : vector<2x1xf32> to vector<2x4xf32>
      %50 = arith.divf %46, %49 : vector<2x4xf32>
      %c0_38 = arith.constant 0 : index
      %c0_39 = arith.constant 0 : index
      %c0_40 = arith.constant 0 : index
      %51 = vector.load %arg6[%c0_38, %c0_39, %c0_40] : memref<2x4x256xf32, #tpu.memory_space<vmem>>, vector<2x4x256xf32>
      %52 = vector.shape_cast %50 : vector<2x4xf32> to vector<2x4x1xf32>
      %53 = vector.broadcast %52 : vector<2x4x1xf32> to vector<2x4x256xf32>
      %54 = arith.mulf %51, %53 : vector<2x4x256xf32>
      %cst_41 = arith.constant dense<0.000000e+00> : vector<2x256xf32>
      %55 = vector.multi_reduction <add>, %54, %cst_41 [1] : vector<2x4x256xf32> to vector<2x256xf32>
      %c0_42 = arith.constant 0 : index
      %c0_43 = arith.constant 0 : index
      %56 = vector.load %arg10[%c0_42, %c0_43] : memref<1x256xf32, #tpu.memory_space<vmem>>, vector<1x256xf32>
      %cst_44 = arith.constant 9.99999974E-6 : f32
      %57 = vector.broadcast %cst_44 : f32 to vector<1x256xf32>
      %58 = arith.addf %56, %57 : vector<1x256xf32>
      %59 = math.rsqrt %58 : vector<1x256xf32>
      %c0_45 = arith.constant 0 : index
      %c0_46 = arith.constant 0 : index
      %60 = vector.load %arg9[%c0_45, %c0_46] : memref<1x256xf32, #tpu.memory_space<vmem>>, vector<1x256xf32>
      %61 = vector.broadcast %60 : vector<1x256xf32> to vector<2x256xf32>
      %62 = arith.subf %55, %61 : vector<2x256xf32>
      %63 = vector.broadcast %59 : vector<1x256xf32> to vector<2x256xf32>
      %64 = arith.mulf %62, %63 : vector<2x256xf32>
      %c0_47 = arith.constant 0 : index
      %c0_48 = arith.constant 0 : index
      %65 = vector.load %arg7[%c0_47, %c0_48] : memref<1x256xf32, #tpu.memory_space<vmem>>, vector<1x256xf32>
      %66 = vector.broadcast %65 : vector<1x256xf32> to vector<2x256xf32>
      %67 = arith.mulf %64, %66 : vector<2x256xf32>
      %c0_49 = arith.constant 0 : index
      %c0_50 = arith.constant 0 : index
      %68 = vector.load %arg8[%c0_49, %c0_50] : memref<1x256xf32, #tpu.memory_space<vmem>>, vector<1x256xf32>
      %69 = vector.broadcast %68 : vector<1x256xf32> to vector<2x256xf32>
      %70 = arith.addf %67, %69 : vector<2x256xf32>
      %c0_51 = arith.constant 0 : index
      %c0_52 = arith.constant 0 : index
      %71 = vector.load %arg13[%c0_51, %c0_52] : memref<2x256xf32, #tpu.memory_space<vmem>>, vector<2x256xf32>
      tpu.vector_store %arg13[%c0_51, %c0_52], %70 {strides = array<i32>} : memref<2x256xf32, #tpu.memory_space<vmem>>, vector<2x256xf32>,
      %c0_53 = arith.constant 0 : index
      %c0_54 = arith.constant 0 : index
      %72 = vector.load %arg11[%c0_53, %c0_54] : memref<256x16xf32, #tpu.memory_space<vmem>>, vector<256x16xf32>
      %cst_55 = arith.constant dense<0.000000e+00> : vector<2x16xf32>
      %73 = tpu.matmul %70, %72, %cst_55 {dimension_numbers = #tpu.dot_dimension_numbers<[1], [0], [0], [1], [0, 0, 1, 1], [], []>} : vector<2x256xf32>, vector<256x16xf32>, vector<2x16xf32> -> vector<2x16xf32>
      %c0_56 = arith.constant 0 : index
      %c0_57 = arith.constant 0 : index
      %74 = vector.load %arg12[%c0_56, %c0_57] : memref<2x16xf32, #tpu.memory_space<vmem>>, vector<2x16xf32>
      tpu.vector_store %arg12[%c0_56, %c0_57], %73 {strides = array<i32>} : memref<2x16xf32, #tpu.memory_space<vmem>>, vector<2x16xf32>,
    } else {
    }
    return
  }
  func.func @transform_0(%arg0: i32) -> (i32, i32) {
    %c0_i32 = arith.constant 0 : i32
    %c0_i32_0 = arith.constant 0 : i32
    return %c0_i32, %arg0 : i32, i32
  }
  func.func @transform_1(%arg0: i32) -> (i32, i32) {
    %c0_i32 = arith.constant 0 : i32
    %c0_i32_0 = arith.constant 0 : i32
    return %arg0, %c0_i32 : i32, i32
  }
  func.func @transform_2(%arg0: i32) -> (i32, i32) {
    %c0_i32 = arith.constant 0 : i32
    %c0_i32_0 = arith.constant 0 : i32
    %c0_i32_1 = arith.constant 0 : i32
    return %c0_i32, %c0_i32_0 : i32, i32
  }
  func.func @transform_3(%arg0: i32) -> (i32, i32) {
    %c0_i32 = arith.constant 0 : i32
    %c0_i32_0 = arith.constant 0 : i32
    %c0_i32_1 = arith.constant 0 : i32
    return %c0_i32, %c0_i32_0 : i32, i32
  }
  func.func @transform_4(%arg0: i32) -> (i32, i32) {
    %c0_i32 = arith.constant 0 : i32
    %c0_i32_0 = arith.constant 0 : i32
    %c0_i32_1 = arith.constant 0 : i32
    return %c0_i32, %c0_i32_0 : i32, i32
  }
  func.func @transform_5(%arg0: i32) -> (i32, i32, i32) {
    %c0_i32 = arith.constant 0 : i32
    %c0_i32_0 = arith.constant 0 : i32
    %c0_i32_1 = arith.constant 0 : i32
    %c0_i32_2 = arith.constant 0 : i32
    return %c0_i32, %c0_i32_0, %c0_i32_1 : i32, i32, i32
  }
  func.func @transform_6(%arg0: i32) -> (i32, i32) {
    %c0_i32 = arith.constant 0 : i32
    %c0_i32_0 = arith.constant 0 : i32
    %c0_i32_1 = arith.constant 0 : i32
    return %c0_i32, %c0_i32_0 : i32, i32
  }
  func.func @transform_7(%arg0: i32) -> (i32, i32) {
    %c0_i32 = arith.constant 0 : i32
    %c0_i32_0 = arith.constant 0 : i32
    %c0_i32_1 = arith.constant 0 : i32
    return %c0_i32, %c0_i32_0 : i32, i32
  }
  func.func @transform_8(%arg0: i32) -> (i32, i32) {
    %c0_i32 = arith.constant 0 : i32
    %c0_i32_0 = arith.constant 0 : i32
    %c0_i32_1 = arith.constant 0 : i32
    return %c0_i32, %c0_i32_0 : i32, i32
  }
  func.func @transform_9(%arg0: i32) -> (i32, i32) {
    %c0_i32 = arith.constant 0 : i32
    %c0_i32_0 = arith.constant 0 : i32
    %c0_i32_1 = arith.constant 0 : i32
    return %c0_i32, %c0_i32_0 : i32, i32
  }
  func.func @transform_10(%arg0: i32) -> (i32, i32) {
    %c0_i32 = arith.constant 0 : i32
    %c0_i32_0 = arith.constant 0 : i32
    %c0_i32_1 = arith.constant 0 : i32
    return %c0_i32, %c0_i32_0 : i32, i32
  }
  func.func @transform_11(%arg0: i32) -> (i32, i32) {
    %c0_i32 = arith.constant 0 : i32
    %c0_i32_0 = arith.constant 0 : i32
    %c0_i32_1 = arith.constant 0 : i32
    return %c0_i32, %c0_i32_0 : i32, i32
  }
  func.func @transform_12(%arg0: i32) -> (i32, i32) {
    %c0_i32 = arith.constant 0 : i32
    %c0_i32_0 = arith.constant 0 : i32
    %c0_i32_1 = arith.constant 0 : i32
    return %c0_i32, %c0_i32_0 : i32, i32
  }
  func.func @transform_13(%arg0: i32) -> (i32, i32) {
    %c0_i32 = arith.constant 0 : i32
    %c0_i32_0 = arith.constant 0 : i32
    %c0_i32_1 = arith.constant 0 : i32
    return %c0_i32, %c0_i32_0 : i32, i32
  }
}

</mosaic_0001>

<bundles_post_ra>
// kernel: forward.2
= control target key start
LH: loop header
LB: loop body
LE: loop exit
PB: predicated region body
PF: predicated region fallthrough
CT: control target
= control target key end

     0   :  { %v2792_v3 = vmov 0.0   ;;  %vm141_vm0 = vcmask 392192   ;;  %vm1978_vm1 = vcmask 130048   ;;  %s3970_s1 = inlined_call_operand.vmem [shape: f32[48,256], index: 1, kind: input, shape index: {}]   ;;  %s3971_s0 = inlined_call_operand.vmem [shape: f32[784,48], index: 0, kind: input, shape index: {}]   ;;  %s3972_s2 = inlined_call_operand.vmem [shape: f32[1,256], index: 2, kind: input, shape index: {}]   ;;  %s3973_s4 = inlined_call_operand.vmem [shape: bf16[784,256], index: 4, kind: output, shape index: {0}]   ;;  %s3974_s3 = inlined_call_operand.vmem [shape: f32[8,784], index: 3, kind: input, shape index: {}]   ;;  %s3975_s5 = inlined_call_operand.vmem [shape: f32[8,256], index: 5, kind: output, shape index: {1}]  }
   0x1   :  { %v118_v0 = vld [vmem:[%s3970_s1 + $0x8] sm:$0xff]  ;;  %v120_v1 = vld [vmem:[%s3970_s1 + $0x18] sm:$0xff]  ;;  %v117_v2 = vld [vmem:[%s3970_s1] sm:$0xff]  ;;  %500 = vmatprep.mubr.f32.mxu0 %v2792_v3  ;;  %896 = vmatprep.mubr.f32.mxu1 %v2792_v3 }
   0x2   :  { %v2571_v4 = vpack.c.bf16 %v120_v1, %v118_v0  ;;  %v119_v5 = vld [vmem:[%s3970_s1 + $0x10] sm:$0xff]  ;;  %v122_v6 = vld [vmem:[%s3970_s1 + $0x28] sm:$0xff]  ;;  %v124_v7 = vld [vmem:[%s3970_s1 + $0x38] sm:$0xff] }
   0x3   :  { %v2573_v8 = vpack.c.bf16 %v119_v5, %v117_v2  ;;  %v2575_v9 = vpack.c.bf16 %v124_v7, %v122_v6  ;;  %v121_v10 = vld [vmem:[%s3970_s1 + $0x20] sm:$0xff]  ;;  %v123_v11 = vld [vmem:[%s3970_s1 + $0x30] sm:$0xff]  ;;  %v126_v12 = vld [vmem:[%s3970_s1 + $0x48] sm:$0xff] }
   0x4   :  { %2572 = vmatprep.subr.bf16.mxu0 %v2571_v4  ;;  %v128_v13 = vld [vmem:[%s3970_s1 + $0x58] sm:$0xff]  ;;  %2779 = vmatprep.subr.bf16.mxu1 %v2571_v4  ;;  %v2577_v14 = vpack.c.bf16 %v123_v11, %v121_v10  ;;  %v125_v16 = vld [vmem:[%s3970_s1 + $0x40] sm:$0xff]  ;;  %v127_v17 = vld [vmem:[%s3970_s1 + $0x50] sm:$0xff] }
   0x5   :  { %2574 = vmatpush1.bf16.msra.mxu0 %v2573_v8  ;;  %2782 = vmatpush1.bf16.msra.mxu1 %v2573_v8  ;;  %v2579_v15 = vpack.c.bf16 %v128_v13, %v126_v12  ;;  %v2581_v18 = vpack.c.bf16 %v127_v17, %v125_v16  ;;  %v19_v19 = vld [vmem:[%s3971_s0] sm:$0xff]  ;;  %v20_v20 = vld [vmem:[%s3971_s0 + $0x8] sm:$0xff]  ;;  %v21_v21 = vld [vmem:[%s3971_s0 + $0x10] sm:$0xff] }
   0x6   :  { %2576 = vmatprep.subr.bf16.mxu0 %v2575_v9  ;;  %2780 = vmatprep.subr.bf16.mxu1 %v2575_v9  ;;  %v22_v22 = vld [vmem:[%s3971_s0 + $0x18] sm:$0xff]  ;;  %v23_v23 = vld [vmem:[%s3971_s0 + $0x20] sm:$0xff]  ;;  %v24_v24 = vld [vmem:[%s3971_s0 + $0x28] sm:$0xff] }
   0x7   :  { %v25_v25 = vld [vmem:[%s3971_s0 + $0x30] sm:$0xff]  ;;  %v26_v26 = vld [vmem:[%s3971_s0 + $0x38] sm:$0xff]  ;;  %v27_v27 = vld [vmem:[%s3971_s0 + $0x40] sm:$0xff] }
   0x8   :  { %v28_v28 = vld [vmem:[%s3971_s0 + $0x48] sm:$0xff]  ;;  %v29_v29 = vld [vmem:[%s3971_s0 + $0x50] sm:$0xff]  ;;  %v30_v30 = vld [vmem:[%s3971_s0 + $0x58] sm:$0xff] }
   0x9   :  { %2578 = vmatpush1.bf16.msra.mxu0 %v2577_v14  ;;  %2783 = vmatpush1.bf16.msra.mxu1 %v2577_v14  ;;  %v31_v31 = vld [vmem:[%s3971_s0 + $0x60] sm:$0xff]  ;;  %v32_v32 = vld [vmem:[%s3971_s0 + $0x68] sm:$0xff]  ;;  %v33_v33 = vld [vmem:[%s3971_s0 + $0x70] sm:$0xff] }
   0xa   :  { %2580 = vmatprep.subr.bf16.mxu0 %v2579_v15  ;;  %2781 = vmatprep.subr.bf16.mxu1 %v2579_v15  ;;  %v34_v34 = vld [vmem:[%s3971_s0 + $0x78] sm:$0xff]  ;;  %v35_v35 = vld [vmem:[%s3971_s0 + $0x80] sm:$0xff]  ;;  %v36_v36 = vld [vmem:[%s3971_s0 + $0x88] sm:$0xff] }
   0xb   :  { %v85_v37 = vld [vmem:[%s3971_s0 + $0x210] sm:$0xff]  ;;  %v86_v39 = vld [vmem:[%s3971_s0 + $0x218] sm:$0xff]  ;;  %v87_v41 = vld [vmem:[%s3971_s0 + $0x220] sm:$0xff] }
   0xc   :  { %v37_v38 = vld [vmem:[%s3971_s0 + $0x90] sm:$0xff]  ;;  %v38_v40 = vld [vmem:[%s3971_s0 + $0x98] sm:$0xff]  ;;  %v39_v42 = vld [vmem:[%s3971_s0 + $0xa0] sm:$0xff] }
   0xd   :  { %2582 = vmatpush1.bf16.msra.mxu0 %v2581_v18  ;;  %2784 = vmatpush1.bf16.msra.mxu1 %v2581_v18  ;;  %v88_v43 = vld [vmem:[%s3971_s0 + $0x228] sm:$0xff]  ;;  %v41_v45 = vld [vmem:[%s3971_s0 + $0xb0] sm:$0xff]  ;;  %v42_v47 = vld [vmem:[%s3971_s0 + $0xb8] sm:$0xff] }
   0xe   :  { %v40_v44 = vld [vmem:[%s3971_s0 + $0xa8] sm:$0xff]  ;;  %v89_v46 = vld [vmem:[%s3971_s0 + $0x230] sm:$0xff]  ;;  %v90_v48 = vld [vmem:[%s3971_s0 + $0x238] sm:$0xff] }
   0xf   :  { %v43_v49 = vld [vmem:[%s3971_s0 + $0xc0] sm:$0xff]  ;;  %v44_v51 = vld [vmem:[%s3971_s0 + $0xc8] sm:$0xff]  ;;  %v45_v53 = vld [vmem:[%s3971_s0 + $0xd0] sm:$0xff] }
  0x10   :  { %2276 = vmatmul.mubr.msk.f32.vlgmr.msra.gmra.mrb[0].mxu0 %vm141_vm0, %v19_v19  ;;  %2342 = vmatmul.mubr.msk.f32.vlgmr.msra.gmra.mrb[0].mxu1 %vm141_vm0, %v85_v37  ;;  %v91_v50 = vld [vmem:[%s3971_s0 + $0x240] sm:$0xff]  ;;  %v92_v52 = vld [vmem:[%s3971_s0 + $0x248] sm:$0xff]  ;;  %v93_v54 = vld [vmem:[%s3971_s0 + $0x250] sm:$0xff] }
  0x11   :  { %506 = vmatprep.mubr.f32.mxu0 %v2792_v3  ;;  %902 = vmatprep.mubr.f32.mxu1 %v2792_v3  ;;  %v46_v55 = vld [vmem:[%s3971_s0 + $0xd8] sm:$0xff]  ;;  %v47_v57 = vld [vmem:[%s3971_s0 + $0xe0] sm:$0xff]  ;;  %v48_v59 = vld [vmem:[%s3971_s0 + $0xe8] sm:$0xff] }
  0x12   :  { %v94_v56 = vld [vmem:[%s3971_s0 + $0x258] sm:$0xff]  ;;  %v95_v58 = vld [vmem:[%s3971_s0 + $0x260] sm:$0xff]  ;;  %v96_v60 = vld [vmem:[%s3971_s0 + $0x268] sm:$0xff] }
  0x13   :  { %v49_v61 = vld [vmem:[%s3971_s0 + $0xf0] sm:$0xff]  ;;  %v50_v63 = vld [vmem:[%s3971_s0 + $0xf8] sm:$0xff]  ;;  %v51_v1 = vld [vmem:[%s3971_s0 + $0x100] sm:$0xff] }
  0x14   :  { %2277 = vmatmul.mubr.msk.f32.gmra.mrb[2].mxu0 %vm141_vm0, %v20_v20  ;;  %2343 = vmatmul.mubr.msk.f32.gmra.mrb[2].mxu1 %vm141_vm0, %v86_v39  ;;  %v97_v62 = vld [vmem:[%s3971_s0 + $0x270] sm:$0xff]  ;;  %v98_v0 = vld [vmem:[%s3971_s0 + $0x278] sm:$0xff]  ;;  %v99_v2 = vld [vmem:[%s3971_s0 + $0x280] sm:$0xff] }
  0x15   :  { %512 = vmatprep.mubr.f32.mxu0 %v2792_v3  ;;  %908 = vmatprep.mubr.f32.mxu1 %v2792_v3  ;;  %v52_v4 = vld [vmem:[%s3971_s0 + $0x108] sm:$0xff]  ;;  %v53_v6 = vld [vmem:[%s3971_s0 + $0x110] sm:$0xff]  ;;  %v54_v8 = vld [vmem:[%s3971_s0 + $0x118] sm:$0xff] }
  0x16   :  { %v100_v5 = vld [vmem:[%s3971_s0 + $0x288] sm:$0xff]  ;;  %v101_v7 = vld [vmem:[%s3971_s0 + $0x290] sm:$0xff]  ;;  %v102_v9 = vld [vmem:[%s3971_s0 + $0x298] sm:$0xff] }
  0x17   :  { %v55_v10 = vld [vmem:[%s3971_s0 + $0x120] sm:$0xff]  ;;  %v56_v12 = vld [vmem:[%s3971_s0 + $0x128] sm:$0xff]  ;;  %v57_v14 = vld [vmem:[%s3971_s0 + $0x130] sm:$0xff] }
  0x18   :  { %2278 = vmatmul.mubr.msk.f32.gmra.mrb[4].mxu0 %vm141_vm0, %v21_v21  ;;  %2344 = vmatmul.mubr.msk.f32.gmra.mrb[4].mxu1 %vm141_vm0, %v87_v41  ;;  %v103_v11 = vld [vmem:[%s3971_s0 + $0x2a0] sm:$0xff]  ;;  %v104_v13 = vld [vmem:[%s3971_s0 + $0x2a8] sm:$0xff]  ;;  %v105_v15 = vld [vmem:[%s3971_s0 + $0x2b0] sm:$0xff] }
  0x19   :  { %518 = vmatprep.mubr.f32.mxu0 %v2792_v3  ;;  %914 = vmatprep.mubr.f32.mxu1 %v2792_v3  ;;  %v58_v16 = vld [vmem:[%s3971_s0 + $0x138] sm:$0xff]  ;;  %v59_v18 = vld [vmem:[%s3971_s0 + $0x140] sm:$0xff]  ;;  %v60_v20 = vld [vmem:[%s3971_s0 + $0x148] sm:$0xff] }
  0x1a   :  { %v106_v17 = vld [vmem:[%s3971_s0 + $0x2b8] sm:$0xff]  ;;  %v107_v19 = vld [vmem:[%s3971_s0 + $0x2c0] sm:$0xff]  ;;  %v108_v21 = vld [vmem:[%s3971_s0 + $0x2c8] sm:$0xff] }
  0x1b   :  { %v116_v37 = vld [vmem:[%s3971_s0 + $0x308] sm:$0xff]  ;;  %v69_v39 = vld [vmem:[%s3971_s0 + $0x190] sm:$0xff]  ;;  %v70_v41 = vld [vmem:[%s3971_s0 + $0x198] sm:$0xff] }
  0x1c   :  { %2279 = vmatmul.mubr.msk.f32.gmra.mrb[6].mxu0 %vm141_vm0, %v22_v22  ;;  %2345 = vmatmul.mubr.msk.f32.gmra.mrb[6].mxu1 %vm141_vm0, %v88_v43  ;;  %v61_v22 = vld [vmem:[%s3971_s0 + $0x150] sm:$0xff]  ;;  %v71_v43 = vld [vmem:[%s3971_s0 + $0x1a0] sm:$0xff] }
  0x1d   :  { %524 = vmatprep.mubr.f32.mxu0 %v2792_v3  ;;  %920 = vmatprep.mubr.f32.mxu1 %v2792_v3 }
  0x20   :  { %2280 = vmatmul.mubr.msk.f32.gmra.mrb[8].mxu0 %vm141_vm0, %v23_v23  ;;  %2346 = vmatmul.mubr.msk.f32.gmra.mrb[8].mxu1 %vm141_vm0, %v89_v46  ;;  %v109_v23 = vld [vmem:[%s3971_s0 + $0x2d0] sm:$0xff] }
  0x21   :  { %530 = vmatprep.mubr.f32.mxu0 %v2792_v3  ;;  %926 = vmatprep.mubr.f32.mxu1 %v2792_v3 }
  0x24   :  { %2281 = vmatmul.mubr.msk.f32.gmra.mrb[10].mxu0 %vm141_vm0, %v24_v24  ;;  %2347 = vmatmul.mubr.msk.f32.gmra.mrb[10].mxu1 %vm141_vm0, %v90_v48  ;;  %v62_v24 = vld [vmem:[%s3971_s0 + $0x158] sm:$0xff]  ;;  %v72_v48 = vld [vmem:[%s3971_s0 + $0x1a8] sm:$0xff] }
  0x25   :  { %536 = vmatprep.mubr.f32.mxu0 %v2792_v3  ;;  %932 = vmatprep.mubr.f32.mxu1 %v2792_v3 }
  0x28   :  { %2282 = vmatmul.mubr.msk.f32.gmra.mrb[12].mxu0 %vm141_vm0, %v25_v25  ;;  %2348 = vmatmul.mubr.msk.f32.gmra.mrb[12].mxu1 %vm141_vm0, %v91_v50  ;;  %v110_v25 = vld [vmem:[%s3971_s0 + $0x2d8] sm:$0xff] }
  0x29   :  { %542 = vmatprep.mubr.f32.mxu0 %v2792_v3  ;;  %938 = vmatprep.mubr.f32.mxu1 %v2792_v3 }
  0x2c   :  { %2283 = vmatmul.mubr.msk.f32.gmra.mrb[14].mxu0 %vm141_vm0, %v26_v26  ;;  %2349 = vmatmul.mubr.msk.f32.gmra.mrb[14].mxu1 %vm141_vm0, %v92_v52  ;;  %v63_v26 = vld [vmem:[%s3971_s0 + $0x160] sm:$0xff] }
  0x2d   :  { %548 = vmatprep.mubr.f32.mxu0 %v2792_v3  ;;  %944 = vmatprep.mubr.f32.mxu1 %v2792_v3 }
  0x30   :  { %2284 = vmatmul.mubr.msk.f32.gmra.mrb[16].mxu0 %vm141_vm0, %v27_v27  ;;  %2350 = vmatmul.mubr.msk.f32.gmra.mrb[16].mxu1 %vm141_vm0, %v93_v54  ;;  %v111_v27 = vld [vmem:[%s3971_s0 + $0x2e0] sm:$0xff] }
  0x31   :  { %554 = vmatprep.mubr.f32.mxu0 %v2792_v3  ;;  %950 = vmatprep.mubr.f32.mxu1 %v2792_v3 }
  0x34   :  { %2285 = vmatmul.mubr.msk.f32.gmra.mrb[18].mxu0 %vm141_vm0, %v28_v28  ;;  %2351 = vmatmul.mubr.msk.f32.gmra.mrb[18].mxu1 %vm141_vm0, %v94_v56  ;;  %v64_v28 = vld [vmem:[%s3971_s0 + $0x168] sm:$0xff] }
  0x35   :  { %560 = vmatprep.mubr.f32.mxu0 %v2792_v3  ;;  %956 = vmatprep.mubr.f32.mxu1 %v2792_v3 }
  0x38   :  { %2286 = vmatmul.mubr.msk.f32.gmra.mrb[20].mxu0 %vm141_vm0, %v29_v29  ;;  %2352 = vmatmul.mubr.msk.f32.gmra.mrb[20].mxu1 %vm141_vm0, %v95_v58  ;;  %v112_v29 = vld [vmem:[%s3971_s0 + $0x2e8] sm:$0xff] }
  0x39   :  { %566 = vmatprep.mubr.f32.mxu0 %v2792_v3  ;;  %962 = vmatprep.mubr.f32.mxu1 %v2792_v3 }
  0x3c   :  { %2287 = vmatmul.mubr.msk.f32.gmra.mrb[22].mxu0 %vm141_vm0, %v30_v30  ;;  %2353 = vmatmul.mubr.msk.f32.gmra.mrb[22].mxu1 %vm141_vm0, %v96_v60  ;;  %v65_v30 = vld [vmem:[%s3971_s0 + $0x170] sm:$0xff] }
  0x3d   :  { %572 = vmatprep.mubr.f32.mxu0 %v2792_v3  ;;  %968 = vmatprep.mubr.f32.mxu1 %v2792_v3 }
  0x40   :  { %2288 = vmatmul.mubr.msk.f32.gmra.mrb[24].mxu0 %vm141_vm0, %v31_v31  ;;  %2354 = vmatmul.mubr.msk.f32.gmra.mrb[24].mxu1 %vm141_vm0, %v97_v62  ;;  %v113_v31 = vld [vmem:[%s3971_s0 + $0x2f0] sm:$0xff] }
  0x41   :  { %578 = vmatprep.mubr.f32.mxu0 %v2792_v3  ;;  %974 = vmatprep.mubr.f32.mxu1 %v2792_v3 }
  0x44   :  { %2289 = vmatmul.mubr.msk.f32.gmra.mrb[26].mxu0 %vm141_vm0, %v32_v32  ;;  %2355 = vmatmul.mubr.msk.f32.gmra.mrb[26].mxu1 %vm141_vm0, %v98_v0  ;;  %v66_v32 = vld [vmem:[%s3971_s0 + $0x178] sm:$0xff] }
  0x45   :  { %584 = vmatprep.mubr.f32.mxu0 %v2792_v3  ;;  %980 = vmatprep.mubr.f32.mxu1 %v2792_v3 }
  0x48   :  { %2290 = vmatmul.mubr.msk.f32.gmra.mrb[28].mxu0 %vm141_vm0, %v33_v33  ;;  %2356 = vmatmul.mubr.msk.f32.gmra.mrb[28].mxu1 %vm141_vm0, %v99_v2  ;;  %v114_v33 = vld [vmem:[%s3971_s0 + $0x2f8] sm:$0xff] }
  0x49   :  { %590 = vmatprep.mubr.f32.mxu0 %v2792_v3  ;;  %986 = vmatprep.mubr.f32.mxu1 %v2792_v3 }
  0x4c   :  { %2291 = vmatmul.mubr.msk.f32.gmra.mrb[30].mxu0 %vm141_vm0, %v34_v34  ;;  %2357 = vmatmul.mubr.msk.f32.gmra.mrb[30].mxu1 %vm141_vm0, %v100_v5  ;;  %v67_v34 = vld [vmem:[%s3971_s0 + $0x180] sm:$0xff] }
  0x4d   :  { %596 = vmatprep.mubr.f32.mxu0 %v2792_v3  ;;  %992 = vmatprep.mubr.f32.mxu1 %v2792_v3 }
  0x50   :  { %2292 = vmatmul.mubr.msk.f32.gmra.mrb[32].mxu0 %vm141_vm0, %v35_v35  ;;  %2358 = vmatmul.mubr.msk.f32.gmra.mrb[32].mxu1 %vm141_vm0, %v101_v7  ;;  %v115_v35 = vld [vmem:[%s3971_s0 + $0x300] sm:$0xff] }
  0x51   :  { %602 = vmatprep.mubr.f32.mxu0 %v2792_v3  ;;  %998 = vmatprep.mubr.f32.mxu1 %v2792_v3 }
  0x54   :  { %2293 = vmatmul.mubr.msk.f32.gmra.mrb[34].mxu0 %vm141_vm0, %v36_v36  ;;  %2359 = vmatmul.mubr.msk.f32.gmra.mrb[34].mxu1 %vm141_vm0, %v102_v9  ;;  %v68_v36 = vld [vmem:[%s3971_s0 + $0x188] sm:$0xff] }
  0x55   :  { %608 = vmatprep.mubr.f32.mxu0 %v2792_v3  ;;  %1004 = vmatprep.mubr.f32.mxu1 %v2792_v3 }
  0x58   :  { %2294 = vmatmul.mubr.msk.f32.gmra.mrb[36].mxu0 %vm141_vm0, %v37_v38  ;;  %2360 = vmatmul.mubr.msk.f32.gmra.mrb[36].mxu1 %vm141_vm0, %v103_v11  ;;  %v131_v38 = vlaneseq }
  0x59   :  { %614 = vmatprep.mubr.f32.mxu0 %v2792_v3  ;;  %1010 = vmatprep.mubr.f32.mxu1 %v2792_v3 }
  0x5c   :  { %2295 = vmatmul.mubr.msk.f32.gmra.mrb[38].mxu0 %vm141_vm0, %v38_v40  ;;  %2361 = vmatmul.mubr.msk.f32.gmra.mrb[38].mxu1 %vm141_vm0, %v104_v13  ;;  %v132_v40 = vshrl.u32 %v131_v38, 7 }
  0x5d   :  { %620 = vmatprep.mubr.f32.mxu0 %v2792_v3  ;;  %1016 = vmatprep.mubr.f32.mxu1 %v2792_v3 }
  0x60   :  { %2296 = vmatmul.mubr.msk.f32.gmra.mrb[40].mxu0 %vm141_vm0, %v39_v42  ;;  %2362 = vmatmul.mubr.msk.f32.gmra.mrb[40].mxu1 %vm141_vm0, %v105_v15  ;;  %v133_v42 = vsub.s32 0, %v132_v40 }
  0x61   :  { %626 = vmatprep.mubr.f32.mxu0 %v2792_v3  ;;  %1022 = vmatprep.mubr.f32.mxu1 %v2792_v3 }
  0x64   :  { %2297 = vmatmul.mubr.msk.f32.gmra.mrb[42].mxu0 %vm141_vm0, %v40_v44  ;;  %2363 = vmatmul.mubr.msk.f32.gmra.mrb[42].mxu1 %vm141_vm0, %v106_v17  ;;  %v129_v44 = vld [vmem:[%s3972_s2] sm:$0x3]  ;;  %v76_v17 = vld [vmem:[%s3971_s0 + $0x1c8] sm:$0xff] }
  0x65   :  { %632 = vmatprep.mubr.f32.mxu0 %v2792_v3  ;;  %1028 = vmatprep.mubr.f32.mxu1 %v2792_v3  ;;  %v3287_v46 = vrot.slane %v129_v44, %v133_v42 }
  0x68   :  { %2298 = vmatmul.mubr.msk.f32.gmra.mrb[44].mxu0 %vm141_vm0, %v41_v45  ;;  %2364 = vmatmul.mubr.msk.f32.gmra.mrb[44].mxu1 %vm141_vm0, %v107_v19  ;;  %v137_v45 = vsub.s32 1, %v132_v40 }
  0x69   :  { %638 = vmatprep.mubr.f32.mxu0 %v2792_v3  ;;  %1034 = vmatprep.mubr.f32.mxu1 %v2792_v3 }
  0x6c   :  { %2299 = vmatmul.mubr.msk.f32.gmra.mrb[46].mxu0 %vm141_vm0, %v42_v47  ;;  %2365 = vmatmul.mubr.msk.f32.gmra.mrb[46].mxu1 %vm141_vm0, %v108_v21  ;;  %v3290_v47 = vrot.slane %v129_v44, %v137_v45  ;;  %v79_v45 = vld [vmem:[%s3971_s0 + $0x1e0] sm:$0xff] }
  0x6d   :  { %644 = vmatprep.mubr.f32.mxu0 %v2792_v3  ;;  %1040 = vmatprep.mubr.f32.mxu1 %v2792_v3 }
  0x70   :  { %2300 = vmatmul.mubr.msk.f32.gmra.mrb[48].mxu0 %vm141_vm0, %v43_v49  ;;  %2366 = vmatmul.mubr.msk.f32.gmra.mrb[48].mxu1 %vm141_vm0, %v109_v23 }
  0x71   :  { %650 = vmatprep.mubr.f32.mxu0 %v2792_v3  ;;  %1046 = vmatprep.mubr.f32.mxu1 %v2792_v3 }
  0x74   :  { %2301 = vmatmul.mubr.msk.f32.gmra.mrb[50].mxu0 %vm141_vm0, %v44_v51  ;;  %2367 = vmatmul.mubr.msk.f32.gmra.mrb[50].mxu1 %vm141_vm0, %v110_v25 }
  0x75   :  { %656 = vmatprep.mubr.f32.mxu0 %v2792_v3  ;;  %1052 = vmatprep.mubr.f32.mxu1 %v2792_v3 }
  0x78   :  { %2302 = vmatmul.mubr.msk.f32.gmra.mrb[52].mxu0 %vm141_vm0, %v45_v53  ;;  %2368 = vmatmul.mubr.msk.f32.gmra.mrb[52].mxu1 %vm141_vm0, %v111_v27  ;;  %v73_v53 = vld [vmem:[%s3971_s0 + $0x1b0] sm:$0xff] }
  0x79   :  { %662 = vmatprep.mubr.f32.mxu0 %v2792_v3  ;;  %1058 = vmatprep.mubr.f32.mxu1 %v2792_v3  ;;  %v77_v27 = vld [vmem:[%s3971_s0 + $0x1d0] sm:$0xff] }
  0x7c   :  { %2303 = vmatmul.mubr.msk.f32.gmra.mrb[54].mxu0 %vm141_vm0, %v46_v55  ;;  %2369 = vmatmul.mubr.msk.f32.gmra.mrb[54].mxu1 %vm141_vm0, %v112_v29 }
  0x7d   :  { %668 = vmatprep.mubr.f32.mxu0 %v2792_v3  ;;  %1064 = vmatprep.mubr.f32.mxu1 %v2792_v3 }
  0x80   :  { %2304 = vmatmul.mubr.msk.f32.gmra.mrb[56].mxu0 %vm141_vm0, %v47_v57  ;;  %2370 = vmatmul.mubr.msk.f32.gmra.mrb[56].mxu1 %vm141_vm0, %v113_v31 }
  0x81   :  { %674 = vmatprep.mubr.f32.mxu0 %v2792_v3  ;;  %1070 = vmatprep.mubr.f32.mxu1 %v2792_v3 }
  0x84   :  { %2305 = vmatmul.mubr.msk.f32.gmra.mrb[58].mxu0 %vm141_vm0, %v48_v59  ;;  %2371 = vmatmul.mubr.msk.f32.gmra.mrb[58].mxu1 %vm141_vm0, %v114_v33 }
  0x85   :  { %680 = vmatprep.mubr.f32.mxu0 %v2792_v3  ;;  %1076 = vmatprep.mubr.f32.mxu1 %v2792_v3 }
  0x88   :  { %2306 = vmatmul.mubr.msk.f32.gmra.mrb[60].mxu0 %vm141_vm0, %v49_v61  ;;  %2372 = vmatmul.mubr.msk.f32.gmra.mrb[60].mxu1 %vm141_vm0, %v115_v35  ;;  %v74_v61 = vld [vmem:[%s3971_s0 + $0x1b8] sm:$0xff] }
  0x89   :  { %686 = vmatprep.mubr.f32.mxu0 %v2792_v3  ;;  %1082 = vmatprep.mubr.f32.mxu1 %v2792_v3  ;;  %v78_v35 = vld [vmem:[%s3971_s0 + $0x1d8] sm:$0xff] }
  0x8c   :  { %2307 = vmatmul.mubr.msk.f32.gmra.mrb[62].mxu0 %vm141_vm0, %v50_v63  ;;  %2373 = vmatmul.mubr.msk.f32.gmra.mrb[62].mxu1 %vm141_vm0, %v116_v37 }
  0x8d   :  { %692 = vmatprep.mubr.f32.mxu0 %v2792_v3 }
  0x90   :  { %2308 = vmatmul.mubr.msk.f32.gmra.mrb[64].mxu0 %vm141_vm0, %v51_v1 }
  0x91   :  { %698 = vmatprep.mubr.f32.mxu0 %v2792_v3 }
  0x94   :  { %2309 = vmatmul.mubr.msk.f32.gmra.mrb[66].mxu0 %vm141_vm0, %v52_v4 }
  0x95   :  { %704 = vmatprep.mubr.f32.mxu0 %v2792_v3 }
  0x98   :  { %2310 = vmatmul.mubr.msk.f32.gmra.mrb[68].mxu0 %vm141_vm0, %v53_v6 }
  0x99   :  { %710 = vmatprep.mubr.f32.mxu0 %v2792_v3 }
  0x9c   :  { %2311 = vmatmul.mubr.msk.f32.gmra.mrb[70].mxu0 %vm141_vm0, %v54_v8  ;;  %v75_v8 = vld [vmem:[%s3971_s0 + $0x1c0] sm:$0xff] }
  0x9d   :  { %716 = vmatprep.mubr.f32.mxu0 %v2792_v3 }
  0xa0   :  { %2312 = vmatmul.mubr.msk.f32.gmra.mrb[72].mxu0 %vm141_vm0, %v55_v10  ;;  %v1972_v10 = vld [vmem:[%s3974_s3 + $0x8] sm:$0xff] }
  0xa1   :  { %722 = vmatprep.mubr.f32.mxu0 %v2792_v3  ;;  %2046 = vmatprep.mubr.f32.mxu1 %v1972_v10  ;;  %v82_v10 = vld [vmem:[%s3971_s0 + $0x1f8] sm:$0xff] }
  0xa4   :  { %2313 = vmatmul.mubr.msk.f32.gmra.mrb[74].mxu0 %vm141_vm0, %v56_v12 }
  0xa5   :  { %728 = vmatprep.mubr.f32.mxu0 %v2792_v3 }
  0xa8   :  { %2314 = vmatmul.mubr.msk.f32.gmra.mrb[76].mxu0 %vm141_vm0, %v57_v14 }
  0xa9   :  { %734 = vmatprep.mubr.f32.mxu0 %v2792_v3 }
  0xac   :  { %2315 = vmatmul.mubr.msk.f32.gmra.mrb[78].mxu0 %vm141_vm0, %v58_v16 }
  0xad   :  { %740 = vmatprep.mubr.f32.mxu0 %v2792_v3 }
  0xb0   :  { %2316 = vmatmul.mubr.msk.f32.gmra.mrb[80].mxu0 %vm141_vm0, %v59_v18 }
  0xb1   :  { %746 = vmatprep.mubr.f32.mxu0 %v2792_v3 }
  0xb4   :  { %2317 = vmatmul.mubr.msk.f32.gmra.mrb[82].mxu0 %vm141_vm0, %v60_v20 }
  0xb5   :  { %752 = vmatprep.mubr.f32.mxu0 %v2792_v3 }
  0xb8   :  { %2318 = vmatmul.mubr.msk.f32.gmra.mrb[84].mxu0 %vm141_vm0, %v61_v22 }
  0xb9   :  { %758 = vmatprep.mubr.f32.mxu0 %v2792_v3 }
  0xbc   :  { %2319 = vmatmul.mubr.msk.f32.gmra.mrb[86].mxu0 %vm141_vm0, %v62_v24 }
  0xbd   :  { %764 = vmatprep.mubr.f32.mxu0 %v2792_v3 }
  0xc0   :  { %2320 = vmatmul.mubr.msk.f32.gmra.mrb[88].mxu0 %vm141_vm0, %v63_v26 }
  0xc1   :  { %770 = vmatprep.mubr.f32.mxu0 %v2792_v3 }
  0xc4   :  { %2321 = vmatmul.mubr.msk.f32.gmra.mrb[90].mxu0 %vm141_vm0, %v64_v28 }
  0xc5   :  { %776 = vmatprep.mubr.f32.mxu0 %v2792_v3 }
  0xc8   :  { %2322 = vmatmul.mubr.msk.f32.gmra.mrb[92].mxu0 %vm141_vm0, %v65_v30 }
  0xc9   :  { %782 = vmatprep.mubr.f32.mxu0 %v2792_v3 }
  0xcc   :  { %2323 = vmatmul.mubr.msk.f32.gmra.mrb[94].mxu0 %vm141_vm0, %v66_v32 }
  0xcd   :  { %788 = vmatprep.mubr.f32.mxu0 %v2792_v3 }
  0xd0   :  { %2324 = vmatmul.mubr.msk.f32.gmra.mrb[96].mxu0 %vm141_vm0, %v67_v34 }
  0xd1   :  { %794 = vmatprep.mubr.f32.mxu0 %v2792_v3 }
  0xd4   :  { %2325 = vmatmul.mubr.msk.f32.gmra.mrb[98].mxu0 %vm141_vm0, %v68_v36 }
  0xd5   :  { %800 = vmatprep.mubr.f32.mxu0 %v2792_v3 }
  0xd8   :  { %2326 = vmatmul.mubr.msk.f32.gmra.mrb[100].mxu0 %vm141_vm0, %v69_v39 }
  0xd9   :  { %806 = vmatprep.mubr.f32.mxu0 %v2792_v3 }
  0xdc   :  { %2327 = vmatmul.mubr.msk.f32.gmra.mrb[102].mxu0 %vm141_vm0, %v70_v41 }
  0xdd   :  { %812 = vmatprep.mubr.f32.mxu0 %v2792_v3 }
  0xe0   :  { %2328 = vmatmul.mubr.msk.f32.gmra.mrb[104].mxu0 %vm141_vm0, %v71_v43 }
  0xe1   :  { %818 = vmatprep.mubr.f32.mxu0 %v2792_v3 }
  0xe3   :  { %v502_v49 = vpop.f32.mrb[0].mxu0 }
  0xe4   :  { %v503_v50 = vadd.f32 %v502_v49, %v3287_v46  ;;  %v504_v51 = vpop.f32.mrb[1].mxu0  ;;  %2329 = vmatmul.mubr.msk.f32.gmra.mrb[106].mxu0 %vm141_vm0, %v72_v48 }
  0xe5   :  { %v505_v52 = vadd.f32 %v504_v51, %v3290_v47  ;;  %824 = vmatprep.mubr.f32.mxu0 %v2792_v3 }
  0xe6   :  { %v1089_v54 = vmax.f32 %v503_v50, 0.0 }
  0xe7   :  { %v1090_v55 = vmax.f32 %v505_v52, 0.0  ;;  %v508_v56 = vpop.f32.mrb[2].mxu0 }
  0xe8   :  { %v509_v57 = vadd.f32 %v508_v56, %v3287_v46  ;;  %v510_v58 = vpop.f32.mrb[3].mxu0  ;;  %2330 = vmatmul.mubr.msk.f32.gmra.mrb[108].mxu0 %vm141_vm0, %v73_v53 }
  0xe9   :  { %v2473_v59 = vpack.c.bf16 %v1090_v55, %v1089_v54  ;;  %v511_v60 = vadd.f32 %v510_v58, %v3290_v47  ;;  %830 = vmatprep.mubr.f32.mxu0 %v2792_v3 }
  0xea   :  { %v1091_v62 = vmax.f32 %v509_v57, 0.0 }
  0xeb   :  { %1873 = vst [vmem:[%s3973_s4] sm:$0xff] %v2473_v59  ;;  %v1092_v63 = vmax.f32 %v511_v60, 0.0  ;;  %v514_v0 = vpop.f32.mrb[4].mxu0 }
  0xec   :  { %v2585_v1 = vpack.c.bf16 %v1091_v62, %v1089_v54  ;;  %v515_v2 = vadd.f32 %v514_v0, %v3287_v46  ;;  %v516_v4 = vpop.f32.mrb[5].mxu0  ;;  %2331 = vmatmul.mubr.msk.f32.gmra.mrb[110].mxu0 %vm141_vm0, %v74_v61 }
  0xed   :  { %v2474_v5 = vpack.c.bf16 %v1092_v63, %v1091_v62  ;;  %v2583_v6 = vpack.c.bf16 %v1092_v63, %v1090_v55  ;;  %v517_v7 = vadd.f32 %v516_v4, %v3290_v47  ;;  %836 = vmatprep.mubr.f32.mxu0 %v2792_v3  ;;  %v80_v55 = vld [vmem:[%s3971_s0 + $0x1e8] sm:$0xff] }
  0xee   :  { %v1093_v9 = vmax.f32 %v515_v2, 0.0 }
  0xef   :  { %1874 = vst [vmem:[%s3973_s4 + $0x8] sm:$0xff] %v2474_v5  ;;  %v1094_v11 = vmax.f32 %v517_v7, 0.0  ;;  %v520_v12 = vpop.f32.mrb[6].mxu0  ;;  %2584 = vmatprep.subr.bf16.mxu1 %v2583_v6 }
  0xf0   :  { %v521_v13 = vadd.f32 %v520_v12, %v3287_v46  ;;  %v522_v14 = vpop.f32.mrb[7].mxu0  ;;  %2332 = vmatmul.mubr.msk.f32.gmra.mrb[112].mxu0 %vm141_vm0, %v75_v8  ;;  %2586 = vmatpush1.bf16.msra.mxu1 %v2585_v1  ;;  %v81_v1 = vld [vmem:[%s3971_s0 + $0x1f0] sm:$0xff] }
  0xf1   :  { %v2475_v15 = vpack.c.bf16 %v1094_v11, %v1093_v9  ;;  %v523_v16 = vadd.f32 %v522_v14, %v3290_v47  ;;  %842 = vmatprep.mubr.f32.mxu0 %v2792_v3 }
  0xf2   :  { %v1095_v18 = vmax.f32 %v521_v13, 0.0 }
  0xf3   :  { %1875 = vst [vmem:[%s3973_s4 + $0x10] sm:$0xff] %v2475_v15  ;;  %v1096_v19 = vmax.f32 %v523_v16, 0.0  ;;  %v526_v20 = vpop.f32.mrb[8].mxu0 }
  0xf4   :  { %v2589_v21 = vpack.c.bf16 %v1095_v18, %v1093_v9  ;;  %v527_v22 = vadd.f32 %v526_v20, %v3287_v46  ;;  %v528_v23 = vpop.f32.mrb[9].mxu0  ;;  %2333 = vmatmul.mubr.msk.f32.gmra.mrb[114].mxu0 %vm141_vm0, %v76_v17  ;;  %v83_v20 = vld [vmem:[%s3971_s0 + $0x200] sm:$0xff] }
  0xf5   :  { %v2476_v24 = vpack.c.bf16 %v1096_v19, %v1095_v18  ;;  %v2587_v25 = vpack.c.bf16 %v1096_v19, %v1094_v11  ;;  %v529_v26 = vadd.f32 %v528_v23, %v3290_v47  ;;  %848 = vmatprep.mubr.f32.mxu0 %v2792_v3 }
  0xf6   :  { %v1097_v28 = vmax.f32 %v527_v22, 0.0 }
  0xf7   :  { %1876 = vst [vmem:[%s3973_s4 + $0x18] sm:$0xff] %v2476_v24  ;;  %v1098_v29 = vmax.f32 %v529_v26, 0.0  ;;  %v532_v30 = vpop.f32.mrb[10].mxu0  ;;  %2588 = vmatprep.subr.bf16.mxu1 %v2587_v25 }
  0xf8   :  { %v533_v31 = vadd.f32 %v532_v30, %v3287_v46  ;;  %v534_v32 = vpop.f32.mrb[11].mxu0  ;;  %2334 = vmatmul.mubr.msk.f32.gmra.mrb[116].mxu0 %vm141_vm0, %v77_v27  ;;  %2590 = vmatpush1.bf16.msra.mxu1 %v2589_v21 }
  0xf9   :  { %v2477_v33 = vpack.c.bf16 %v1098_v29, %v1097_v28  ;;  %v535_v34 = vadd.f32 %v534_v32, %v3290_v47  ;;  %854 = vmatprep.mubr.f32.mxu0 %v2792_v3 }
  0xfa   :  { %v1099_v36 = vmax.f32 %v533_v31, 0.0 }
  0xfb   :  { %1877 = vst [vmem:[%s3973_s4 + $0x20] sm:$0xff] %v2477_v33  ;;  %v1100_v37 = vmax.f32 %v535_v34, 0.0  ;;  %v538_v38 = vpop.f32.mrb[12].mxu0 }
  0xfc   :  { %v2593_v39 = vpack.c.bf16 %v1099_v36, %v1097_v28  ;;  %v539_v40 = vadd.f32 %v538_v38, %v3287_v46  ;;  %v540_v41 = vpop.f32.mrb[13].mxu0  ;;  %2335 = vmatmul.mubr.msk.f32.gmra.mrb[118].mxu0 %vm141_vm0, %v78_v35  ;;  %v84_v28 = vld [vmem:[%s3971_s0 + $0x208] sm:$0xff] }
  0xfd   :  { %v2478_v42 = vpack.c.bf16 %v1100_v37, %v1099_v36  ;;  %v2591_v43 = vpack.c.bf16 %v1100_v37, %v1098_v29  ;;  %v541_v44 = vadd.f32 %v540_v41, %v3290_v47  ;;  %860 = vmatprep.mubr.f32.mxu0 %v2792_v3 }
  0xfe   :  { %v1101_v48 = vmax.f32 %v539_v40, 0.0 }
  0xff   :  { %1878 = vst [vmem:[%s3973_s4 + $0x28] sm:$0xff] %v2478_v42  ;;  %v1102_v49 = vmax.f32 %v541_v44, 0.0  ;;  %v544_v50 = vpop.f32.mrb[14].mxu0  ;;  %2592 = vmatprep.subr.bf16.mxu1 %v2591_v43 }
 0x100   :  { %v545_v51 = vadd.f32 %v544_v50, %v3287_v46  ;;  %v546_v52 = vpop.f32.mrb[15].mxu0  ;;  %2336 = vmatmul.mubr.msk.f32.gmra.mrb[120].mxu0 %vm141_vm0, %v79_v45  ;;  %2594 = vmatpush1.bf16.msra.mxu1 %v2593_v39 }
 0x101   :  { %v2479_v53 = vpack.c.bf16 %v1102_v49, %v1101_v48  ;;  %v547_v54 = vadd.f32 %v546_v52, %v3290_v47  ;;  %866 = vmatprep.mubr.f32.mxu0 %v2792_v3 }
 0x102   :  { %v1103_v56 = vmax.f32 %v545_v51, 0.0 }
 0x103   :  { %1879 = vst [vmem:[%s3973_s4 + $0x30] sm:$0xff] %v2479_v53  ;;  %v1104_v57 = vmax.f32 %v547_v54, 0.0  ;;  %v550_v58 = vpop.f32.mrb[16].mxu0 }
 0x104   :  { %v2597_v59 = vpack.c.bf16 %v1103_v56, %v1101_v48  ;;  %v551_v60 = vadd.f32 %v550_v58, %v3287_v46  ;;  %v552_v61 = vpop.f32.mrb[17].mxu0  ;;  %2337 = vmatmul.mubr.msk.f32.gmra.mrb[122].mxu0 %vm141_vm0, %v80_v55 }
 0x105   :  { %v2480_v62 = vpack.c.bf16 %v1104_v57, %v1103_v56  ;;  %v2595_v63 = vpack.c.bf16 %v1104_v57, %v1102_v49  ;;  %v553_v0 = vadd.f32 %v552_v61, %v3290_v47  ;;  %872 = vmatprep.mubr.f32.mxu0 %v2792_v3 }
 0x106   :  { %v1105_v2 = vmax.f32 %v551_v60, 0.0 }
 0x107   :  { %1880 = vst [vmem:[%s3973_s4 + $0x38] sm:$0xff] %v2480_v62  ;;  %v1106_v4 = vmax.f32 %v553_v0, 0.0  ;;  %v556_v5 = vpop.f32.mrb[18].mxu0  ;;  %2596 = vmatprep.subr.bf16.mxu1 %v2595_v63 }
 0x108   :  { %v557_v6 = vadd.f32 %v556_v5, %v3287_v46  ;;  %v558_v7 = vpop.f32.mrb[19].mxu0  ;;  %2338 = vmatmul.mubr.msk.f32.gmra.mrb[124].mxu0 %vm141_vm0, %v81_v1  ;;  %2598 = vmatpush1.bf16.msra.mxu1 %v2597_v59 }
 0x109   :  { %v2481_v8 = vpack.c.bf16 %v1106_v4, %v1105_v2  ;;  %v559_v9 = vadd.f32 %v558_v7, %v3290_v47  ;;  %878 = vmatprep.mubr.f32.mxu0 %v2792_v3 }
 0x10a   :  { %v1107_v11 = vmax.f32 %v557_v6, 0.0 }
 0x10b   :  { %1881 = vst [vmem:[%s3973_s4 + $0x40] sm:$0xff] %v2481_v8  ;;  %v1108_v12 = vmax.f32 %v559_v9, 0.0  ;;  %v562_v13 = vpop.f32.mrb[20].mxu0 }
 0x10c   :  { %v2601_v14 = vpack.c.bf16 %v1107_v11, %v1105_v2  ;;  %v563_v15 = vadd.f32 %v562_v13, %v3287_v46  ;;  %v564_v16 = vpop.f32.mrb[21].mxu0  ;;  %2339 = vmatmul.mubr.msk.f32.gmra.mrb[126].mxu0 %vm141_vm0, %v82_v10 }
 0x10d   :  { %v2482_v17 = vpack.c.bf16 %v1108_v12, %v1107_v11  ;;  %v2599_v18 = vpack.c.bf16 %v1108_v12, %v1106_v4  ;;  %v565_v19 = vadd.f32 %v564_v16, %v3290_v47  ;;  %884 = vmatprep.mubr.f32.mxu0 %v2792_v3 }
 0x10e   :  { %v1109_v21 = vmax.f32 %v563_v15, 0.0 }
 0x10f   :  { %1882 = vst [vmem:[%s3973_s4 + $0x48] sm:$0xff] %v2482_v17  ;;  %v1110_v22 = vmax.f32 %v565_v19, 0.0  ;;  %v568_v23 = vpop.f32.mrb[22].mxu0  ;;  %2600 = vmatprep.subr.bf16.mxu1 %v2599_v18 }
 0x110   :  { %v569_v24 = vadd.f32 %v568_v23, %v3287_v46  ;;  %v570_v25 = vpop.f32.mrb[23].mxu0  ;;  %2340 = vmatmul.mubr.msk.f32.gmra.mrb[128].mxu0 %vm141_vm0, %v83_v20  ;;  %2602 = vmatpush1.bf16.msra.mxu1 %v2601_v14 }
 0x111   :  { %v2483_v26 = vpack.c.bf16 %v1110_v22, %v1109_v21  ;;  %v571_v27 = vadd.f32 %v570_v25, %v3290_v47  ;;  %890 = vmatprep.mubr.f32.mxu0 %v2792_v3 }
 0x112   :  { %v1111_v29 = vmax.f32 %v569_v24, 0.0 }
 0x113   :  { %1883 = vst [vmem:[%s3973_s4 + $0x50] sm:$0xff] %v2483_v26  ;;  %v1112_v30 = vmax.f32 %v571_v27, 0.0  ;;  %v574_v31 = vpop.f32.mrb[24].mxu0 }
 0x114   :  { %v2605_v32 = vpack.c.bf16 %v1111_v29, %v1109_v21  ;;  %v575_v33 = vadd.f32 %v574_v31, %v3287_v46  ;;  %v576_v34 = vpop.f32.mrb[25].mxu0  ;;  %2341 = vmatmul.mubr.msk.f32.gmra.mrb[130].mxu0 %vm141_vm0, %v84_v28 }
 0x115   :  { %v2484_v35 = vpack.c.bf16 %v1112_v30, %v1111_v29  ;;  %v2603_v36 = vpack.c.bf16 %v1112_v30, %v1110_v22  ;;  %v577_v37 = vadd.f32 %v576_v34, %v3290_v47  ;;  %v898_v22 = vpop.f32.mrb[0].mxu1 }
 0x116   :  { %v1113_v38 = vmax.f32 %v575_v33, 0.0  ;;  %v900_v26 = vpop.f32.mrb[1].mxu1  ;;  %v899_v31 = vadd.f32 %v898_v22, %v3287_v46 }
 0x117   :  { %1884 = vst [vmem:[%s3973_s4 + $0x58] sm:$0xff] %v2484_v35  ;;  %v1114_v39 = vmax.f32 %v577_v37, 0.0  ;;  %v580_v40 = vpop.f32.mrb[26].mxu0  ;;  %2604 = vmatprep.subr.bf16.mxu1 %v2603_v36  ;;  %v904_v28 = vpop.f32.mrb[2].mxu1 }
 0x118   :  { %v581_v41 = vadd.f32 %v580_v40, %v3287_v46  ;;  %v582_v42 = vpop.f32.mrb[27].mxu0  ;;  %2606 = vmatpush1.bf16.msra.mxu1 %v2605_v32  ;;  %v901_v32 = vadd.f32 %v900_v26, %v3290_v47  ;;  %v905_v33 = vadd.f32 %v904_v28, %v3287_v46  ;;  %v906_v34 = vpop.f32.mrb[3].mxu1  ;;  %v1221_v40 = vmax.f32 %v899_v31, 0.0 }
 0x119   :  { %v2485_v43 = vpack.c.bf16 %v1114_v39, %v1113_v38  ;;  %v583_v44 = vadd.f32 %v582_v42, %v3290_v47  ;;  %v907_v37 = vadd.f32 %v906_v34, %v3290_v47 }
 0x11a   :  { %v1115_v45 = vmax.f32 %v581_v41, 0.0  ;;  %v1222_v41 = vmax.f32 %v901_v32, 0.0 }
 0x11b   :  { %1885 = vst [vmem:[%s3973_s4 + $0x60] sm:$0xff] %v2485_v43  ;;  %v1116_v48 = vmax.f32 %v583_v44, 0.0  ;;  %v586_v49 = vpop.f32.mrb[28].mxu0  ;;  %v1223_v43 = vmax.f32 %v905_v33, 0.0  ;;  %v1224_v44 = vmax.f32 %v907_v37, 0.0 }
 0x11c   :  { %v2609_v50 = vpack.c.bf16 %v1115_v45, %v1113_v38  ;;  %v587_v51 = vadd.f32 %v586_v49, %v3287_v46  ;;  %v588_v52 = vpop.f32.mrb[29].mxu0  ;;  %v2539_v49 = vpack.c.bf16 %v1222_v41, %v1221_v40 }
 0x11d   :  { %v2486_v53 = vpack.c.bf16 %v1116_v48, %v1115_v45  ;;  %v2607_v54 = vpack.c.bf16 %v1116_v48, %v1114_v39  ;;  %v589_v55 = vadd.f32 %v588_v52, %v3290_v47 }
 0x11e   :  { %v1117_v56 = vmax.f32 %v587_v51, 0.0  ;;  %1939 = vst [vmem:[%s3973_s4 + $0x210] sm:$0xff] %v2539_v49 }
 0x11f   :  { %1886 = vst [vmem:[%s3973_s4 + $0x68] sm:$0xff] %v2486_v53  ;;  %v1118_v57 = vmax.f32 %v589_v55, 0.0  ;;  %v592_v58 = vpop.f32.mrb[30].mxu0  ;;  %2608 = vmatprep.subr.bf16.mxu1 %v2607_v54  ;;  %v3461_v53 = vpack.c.bf16 %v1223_v43, %v1221_v40  ;;  %v2540_v54 = vpack.c.bf16 %v1224_v44, %v1223_v43  ;;  %v910_v55 = vpop.f32.mrb[4].mxu1 }
 0x120   :  { %v593_v59 = vadd.f32 %v592_v58, %v3287_v46  ;;  %v594_v60 = vpop.f32.mrb[31].mxu0  ;;  %2610 = vmatpush1.bf16.msra.mxu1 %v2609_v50 }
 0x121   :  { %v2487_v61 = vpack.c.bf16 %v1118_v57, %v1117_v56  ;;  %v595_v62 = vadd.f32 %v594_v60, %v3290_v47  ;;  %v912_v60 = vpop.f32.mrb[5].mxu1  ;;  %1940 = vst [vmem:[%s3973_s4 + $0x218] sm:$0xff] %v2540_v54 }
 0x122   :  { %v1119_v63 = vmax.f32 %v593_v59, 0.0  ;;  %v3467_v59 = vpack.c.bf16 %v1224_v44, %v1222_v41 }
 0x123   :  { %1887 = vst [vmem:[%s3973_s4 + $0x70] sm:$0xff] %v2487_v61  ;;  %v1120_v0 = vmax.f32 %v595_v62, 0.0  ;;  %v598_v1 = vpop.f32.mrb[32].mxu0  ;;  %v916_v62 = vpop.f32.mrb[6].mxu1 }
 0x124   :  { %v2613_v2 = vpack.c.bf16 %v1119_v63, %v1117_v56  ;;  %v599_v4 = vadd.f32 %v598_v1, %v3287_v46  ;;  %v600_v5 = vpop.f32.mrb[33].mxu0  ;;  %v911_v1 = vadd.f32 %v910_v55, %v3287_v46 }
 0x125   :  { %v2488_v6 = vpack.c.bf16 %v1120_v0, %v1119_v63  ;;  %v2611_v7 = vpack.c.bf16 %v1120_v0, %v1118_v57  ;;  %v601_v8 = vadd.f32 %v600_v5, %v3290_v47  ;;  %v918_v5 = vpop.f32.mrb[7].mxu1 }
 0x126   :  { %v1121_v9 = vmax.f32 %v599_v4, 0.0  ;;  %v917_v4 = vadd.f32 %v916_v62, %v3287_v46 }
 0x127   :  { %1888 = vst [vmem:[%s3973_s4 + $0x78] sm:$0xff] %v2488_v6  ;;  %v1122_v10 = vmax.f32 %v601_v8, 0.0  ;;  %v604_v11 = vpop.f32.mrb[34].mxu0  ;;  %2612 = vmatprep.subr.bf16.mxu1 %v2611_v7  ;;  %v919_v8 = vadd.f32 %v918_v5, %v3290_v47 }
 0x128   :  { %v605_v12 = vadd.f32 %v604_v11, %v3287_v46  ;;  %v606_v13 = vpop.f32.mrb[35].mxu0  ;;  %2614 = vmatpush1.bf16.msra.mxu1 %v2613_v2  ;;  %v913_v2 = vadd.f32 %v912_v60, %v3290_v47  ;;  %v1225_v11 = vmax.f32 %v911_v1, 0.0 }
 0x129   :  { %v2489_v14 = vpack.c.bf16 %v1122_v10, %v1121_v9  ;;  %v607_v15 = vadd.f32 %v606_v13, %v3290_v47 }
 0x12a   :  { %v1123_v16 = vmax.f32 %v605_v12, 0.0  ;;  %v1226_v12 = vmax.f32 %v913_v2, 0.0 }
 0x12b   :  { %1889 = vst [vmem:[%s3973_s4 + $0x80] sm:$0xff] %v2489_v14  ;;  %v1124_v17 = vmax.f32 %v607_v15, 0.0  ;;  %v610_v18 = vpop.f32.mrb[36].mxu0  ;;  %v1227_v14 = vmax.f32 %v917_v4, 0.0  ;;  %v1228_v15 = vmax.f32 %v919_v8, 0.0 }
 0x12c   :  { %v2617_v19 = vpack.c.bf16 %v1123_v16, %v1121_v9  ;;  %v611_v20 = vadd.f32 %v610_v18, %v3287_v46  ;;  %v612_v21 = vpop.f32.mrb[37].mxu0  ;;  %v2541_v18 = vpack.c.bf16 %v1226_v12, %v1225_v11 }
 0x12d   :  { %v2490_v23 = vpack.c.bf16 %v1124_v17, %v1123_v16  ;;  %v2615_v24 = vpack.c.bf16 %v1124_v17, %v1122_v10  ;;  %v613_v25 = vadd.f32 %v612_v21, %v3290_v47  ;;  %v3485_v22 = vpack.c.bf16 %v1227_v14, %v1225_v11 }
 0x12e   :  { %v1125_v27 = vmax.f32 %v611_v20, 0.0  ;;  %1941 = vst [vmem:[%s3973_s4 + $0x220] sm:$0xff] %v2541_v18  ;;  %v3491_v28 = vpack.c.bf16 %v1228_v15, %v1226_v12 }
 0x12f   :  { %1890 = vst [vmem:[%s3973_s4 + $0x88] sm:$0xff] %v2490_v23  ;;  %v1126_v29 = vmax.f32 %v613_v25, 0.0  ;;  %v616_v30 = vpop.f32.mrb[38].mxu0  ;;  %2616 = vmatprep.subr.bf16.mxu1 %v2615_v24  ;;  %v2542_v23 = vpack.c.bf16 %v1228_v15, %v1227_v14  ;;  %v922_v24 = vpop.f32.mrb[8].mxu1 }
 0x130   :  { %v617_v35 = vadd.f32 %v616_v30, %v3287_v46  ;;  %v618_v36 = vpop.f32.mrb[39].mxu0  ;;  %2618 = vmatpush1.bf16.msra.mxu1 %v2617_v19  ;;  %v923_v34 = vadd.f32 %v922_v24, %v3287_v46 }
 0x131   :  { %v2491_v38 = vpack.c.bf16 %v1126_v29, %v1125_v27  ;;  %v619_v39 = vadd.f32 %v618_v36, %v3290_v47  ;;  %1942 = vst [vmem:[%s3973_s4 + $0x228] sm:$0xff] %v2542_v23 }
 0x132   :  { %v1127_v42 = vmax.f32 %v617_v35, 0.0  ;;  %v1229_v43 = vmax.f32 %v923_v34, 0.0 }
 0x133   :  { %1891 = vst [vmem:[%s3973_s4 + $0x90] sm:$0xff] %v2491_v38  ;;  %v1128_v45 = vmax.f32 %v619_v39, 0.0  ;;  %v622_v48 = vpop.f32.mrb[40].mxu0 }
 0x134   :  { %v2621_v50 = vpack.c.bf16 %v1127_v42, %v1125_v27  ;;  %v623_v51 = vadd.f32 %v622_v48, %v3287_v46  ;;  %v624_v52 = vpop.f32.mrb[41].mxu0 }
 0x135   :  { %v2492_v56 = vpack.c.bf16 %v1128_v45, %v1127_v42  ;;  %v2619_v57 = vpack.c.bf16 %v1128_v45, %v1126_v29  ;;  %v625_v58 = vadd.f32 %v624_v52, %v3290_v47  ;;  %v924_v29 = vpop.f32.mrb[9].mxu1 }
 0x136   :  { %v1129_v61 = vmax.f32 %v623_v51, 0.0  ;;  %v928_v31 = vpop.f32.mrb[10].mxu1  ;;  %v925_v35 = vadd.f32 %v924_v29, %v3290_v47 }
 0x137   :  { %1892 = vst [vmem:[%s3973_s4 + $0x98] sm:$0xff] %v2492_v56  ;;  %v1130_v63 = vmax.f32 %v625_v58, 0.0  ;;  %v628_v0 = vpop.f32.mrb[42].mxu0  ;;  %2620 = vmatprep.subr.bf16.mxu1 %v2619_v57  ;;  %v929_v36 = vadd.f32 %v928_v31, %v3287_v46  ;;  %v930_v37 = vpop.f32.mrb[11].mxu1 }
 0x138   :  { %v629_v6 = vadd.f32 %v628_v0, %v3287_v46  ;;  %v630_v7 = vpop.f32.mrb[43].mxu0  ;;  %2622 = vmatpush1.bf16.msra.mxu1 %v2621_v50  ;;  %v931_v40 = vadd.f32 %v930_v37, %v3290_v47  ;;  %v1230_v44 = vmax.f32 %v925_v35, 0.0  ;;  %v934_v60 = vpop.f32.mrb[12].mxu1 }
 0x139   :  { %v2493_v9 = vpack.c.bf16 %v1130_v63, %v1129_v61  ;;  %v631_v10 = vadd.f32 %v630_v7, %v3290_v47  ;;  %v1231_v48 = vmax.f32 %v929_v36, 0.0  ;;  %v936_v1 = vpop.f32.mrb[13].mxu1  ;;  %v935_v7 = vadd.f32 %v934_v60, %v3287_v46 }
 0x13a   :  { %v1131_v13 = vmax.f32 %v629_v6, 0.0  ;;  %v1232_v49 = vmax.f32 %v931_v40, 0.0  ;;  %v2543_v52 = vpack.c.bf16 %v1230_v44, %v1229_v43  ;;  %v940_v4 = vpop.f32.mrb[14].mxu1  ;;  %v937_v8 = vadd.f32 %v936_v1, %v3290_v47 }
 0x13b   :  { %1893 = vst [vmem:[%s3973_s4 + $0xa0] sm:$0xff] %v2493_v9  ;;  %v1132_v16 = vmax.f32 %v631_v10, 0.0  ;;  %v634_v17 = vpop.f32.mrb[44].mxu0  ;;  %v3509_v57 = vpack.c.bf16 %v1231_v48, %v1229_v43  ;;  %v941_v9 = vadd.f32 %v940_v4, %v3287_v46  ;;  %v942_v10 = vpop.f32.mrb[15].mxu1 }
 0x13c   :  { %v2625_v19 = vpack.c.bf16 %v1131_v13, %v1129_v61  ;;  %v635_v20 = vadd.f32 %v634_v17, %v3287_v46  ;;  %v636_v21 = vpop.f32.mrb[45].mxu0  ;;  %v2544_v58 = vpack.c.bf16 %v1232_v49, %v1231_v48  ;;  %1943 = vst [vmem:[%s3973_s4 + $0x230] sm:$0xff] %v2543_v52  ;;  %v3515_v0 = vpack.c.bf16 %v1232_v49, %v1230_v44  ;;  %v946_v31 = vpop.f32.mrb[16].mxu1 }
 0x13d   :  { %v2494_v25 = vpack.c.bf16 %v1132_v16, %v1131_v13  ;;  %v2623_v26 = vpack.c.bf16 %v1132_v16, %v1130_v63  ;;  %v637_v27 = vadd.f32 %v636_v21, %v3290_v47  ;;  %v943_v13 = vadd.f32 %v942_v10, %v3290_v47  ;;  %v948_v36 = vpop.f32.mrb[17].mxu1 }
 0x13e   :  { %v1133_v30 = vmax.f32 %v635_v20, 0.0  ;;  %1944 = vst [vmem:[%s3973_s4 + $0x238] sm:$0xff] %v2544_v58  ;;  %v1233_v16 = vmax.f32 %v935_v7, 0.0  ;;  %v1234_v17 = vmax.f32 %v937_v8, 0.0 }
 0x13f   :  { %1894 = vst [vmem:[%s3973_s4 + $0xa8] sm:$0xff] %v2494_v25  ;;  %v1134_v32 = vmax.f32 %v637_v27, 0.0  ;;  %v640_v33 = vpop.f32.mrb[46].mxu0  ;;  %2624 = vmatprep.subr.bf16.mxu1 %v2623_v26  ;;  %v1236_v20 = vmax.f32 %v943_v13, 0.0 }
 0x140   :  { %v641_v38 = vadd.f32 %v640_v33, %v3287_v46  ;;  %v642_v39 = vpop.f32.mrb[47].mxu0  ;;  %2626 = vmatpush1.bf16.msra.mxu1 %v2625_v19  ;;  %v1235_v19 = vmax.f32 %v941_v9, 0.0  ;;  %v2545_v24 = vpack.c.bf16 %v1234_v17, %v1233_v16 }
 0x141   :  { %v2495_v41 = vpack.c.bf16 %v1134_v32, %v1133_v30  ;;  %v643_v42 = vadd.f32 %v642_v39, %v3290_v47  ;;  %v3539_v35 = vpack.c.bf16 %v1236_v20, %v1234_v17 }
 0x142   :  { %v1135_v45 = vmax.f32 %v641_v38, 0.0  ;;  %v3533_v29 = vpack.c.bf16 %v1235_v19, %v1233_v16  ;;  %1945 = vst [vmem:[%s3973_s4 + $0x240] sm:$0xff] %v2545_v24  ;;  %v952_v38 = vpop.f32.mrb[18].mxu1 }
 0x143   :  { %1895 = vst [vmem:[%s3973_s4 + $0xb0] sm:$0xff] %v2495_v41  ;;  %v1136_v50 = vmax.f32 %v643_v42, 0.0  ;;  %v646_v51 = vpop.f32.mrb[48].mxu0  ;;  %v947_v41 = vadd.f32 %v946_v31, %v3287_v46  ;;  %v949_v42 = vadd.f32 %v948_v36, %v3290_v47  ;;  %v953_v43 = vadd.f32 %v952_v38, %v3287_v46  ;;  %v954_v44 = vpop.f32.mrb[19].mxu1 }
 0x144   :  { %v2629_v54 = vpack.c.bf16 %v1135_v45, %v1133_v30  ;;  %v647_v55 = vadd.f32 %v646_v51, %v3287_v46  ;;  %v648_v56 = vpop.f32.mrb[49].mxu0  ;;  %v2546_v30 = vpack.c.bf16 %v1236_v20, %v1235_v19  ;;  %v955_v49 = vadd.f32 %v954_v44, %v3290_v47 }
 0x145   :  { %v2496_v61 = vpack.c.bf16 %v1136_v50, %v1135_v45  ;;  %v2627_v62 = vpack.c.bf16 %v1136_v50, %v1134_v32  ;;  %v649_v63 = vadd.f32 %v648_v56, %v3290_v47  ;;  %v1237_v52 = vmax.f32 %v947_v41, 0.0 }
 0x146   :  { %v1137_v2 = vmax.f32 %v647_v55, 0.0  ;;  %1946 = vst [vmem:[%s3973_s4 + $0x248] sm:$0xff] %v2546_v30  ;;  %v1239_v56 = vmax.f32 %v953_v43, 0.0  ;;  %v1240_v58 = vmax.f32 %v955_v49, 0.0 }
 0x147   :  { %1896 = vst [vmem:[%s3973_s4 + $0xb8] sm:$0xff] %v2496_v61  ;;  %v1138_v5 = vmax.f32 %v649_v63, 0.0  ;;  %v652_v6 = vpop.f32.mrb[50].mxu0  ;;  %2628 = vmatprep.subr.bf16.mxu1 %v2627_v62 }
 0x148   :  { %v653_v11 = vadd.f32 %v652_v6, %v3287_v46  ;;  %v654_v12 = vpop.f32.mrb[51].mxu0  ;;  %2630 = vmatpush1.bf16.msra.mxu1 %v2629_v54  ;;  %v1238_v54 = vmax.f32 %v949_v42, 0.0  ;;  %v3557_v4 = vpack.c.bf16 %v1239_v56, %v1237_v52  ;;  %v958_v6 = vpop.f32.mrb[20].mxu1 }
 0x149   :  { %v2497_v14 = vpack.c.bf16 %v1138_v5, %v1137_v2  ;;  %v655_v15 = vadd.f32 %v654_v12, %v3290_v47  ;;  %v959_v16 = vadd.f32 %v958_v6, %v3287_v46 }
 0x14a   :  { %v1139_v18 = vmax.f32 %v653_v11, 0.0  ;;  %v2547_v62 = vpack.c.bf16 %v1238_v54, %v1237_v52  ;;  %v3563_v10 = vpack.c.bf16 %v1240_v58, %v1238_v54  ;;  %v960_v11 = vpop.f32.mrb[21].mxu1 }
 0x14b   :  { %1897 = vst [vmem:[%s3973_s4 + $0xc0] sm:$0xff] %v2497_v14  ;;  %v1140_v21 = vmax.f32 %v655_v15, 0.0  ;;  %v658_v23 = vpop.f32.mrb[52].mxu0  ;;  %v964_v13 = vpop.f32.mrb[22].mxu1  ;;  %v961_v17 = vadd.f32 %v960_v11, %v3290_v47 }
 0x14c   :  { %v2633_v25 = vpack.c.bf16 %v1139_v18, %v1137_v2  ;;  %v659_v26 = vadd.f32 %v658_v23, %v3287_v46  ;;  %v660_v27 = vpop.f32.mrb[53].mxu0  ;;  %1947 = vst [vmem:[%s3973_s4 + $0x250] sm:$0xff] %v2547_v62  ;;  %v966_v19 = vpop.f32.mrb[23].mxu1 }
 0x14d   :  { %v2498_v32 = vpack.c.bf16 %v1140_v21, %v1139_v18  ;;  %v2631_v33 = vpack.c.bf16 %v1140_v21, %v1138_v5  ;;  %v661_v34 = vadd.f32 %v660_v27, %v3290_v47  ;;  %v2548_v5 = vpack.c.bf16 %v1240_v58, %v1239_v56  ;;  %v970_v42 = vpop.f32.mrb[24].mxu1 }
 0x14e   :  { %v1141_v37 = vmax.f32 %v659_v26, 0.0  ;;  %v965_v18 = vadd.f32 %v964_v13, %v3287_v46  ;;  %v967_v23 = vadd.f32 %v966_v19, %v3290_v47  ;;  %v1241_v26 = vmax.f32 %v959_v16, 0.0  ;;  %v972_v49 = vpop.f32.mrb[25].mxu1 }
 0x14f   :  { %1898 = vst [vmem:[%s3973_s4 + $0xc8] sm:$0xff] %v2498_v32  ;;  %v1142_v39 = vmax.f32 %v661_v34, 0.0  ;;  %v664_v40 = vpop.f32.mrb[54].mxu0  ;;  %2632 = vmatprep.subr.bf16.mxu1 %v2631_v33  ;;  %1948 = vst [vmem:[%s3973_s4 + $0x258] sm:$0xff] %v2548_v5  ;;  %v1242_v27 = vmax.f32 %v961_v17, 0.0  ;;  %v973_v56 = vadd.f32 %v972_v49, %v3290_v47 }
 0x150   :  { %v665_v45 = vadd.f32 %v664_v40, %v3287_v46  ;;  %v666_v48 = vpop.f32.mrb[55].mxu0  ;;  %2634 = vmatpush1.bf16.msra.mxu1 %v2633_v25  ;;  %v1243_v31 = vmax.f32 %v965_v18, 0.0  ;;  %v1244_v32 = vmax.f32 %v967_v23, 0.0 }
 0x151   :  { %v2499_v50 = vpack.c.bf16 %v1142_v39, %v1141_v37  ;;  %v667_v51 = vadd.f32 %v666_v48, %v3290_v47  ;;  %v2549_v36 = vpack.c.bf16 %v1242_v27, %v1241_v26  ;;  %v1246_v6 = vmax.f32 %v973_v56, 0.0 }
 0x152   :  { %v1143_v55 = vmax.f32 %v665_v45, 0.0  ;;  %v3581_v40 = vpack.c.bf16 %v1243_v31, %v1241_v26  ;;  %v2550_v41 = vpack.c.bf16 %v1244_v32, %v1243_v31  ;;  %v3587_v48 = vpack.c.bf16 %v1244_v32, %v1242_v27 }
 0x153   :  { %1899 = vst [vmem:[%s3973_s4 + $0xd0] sm:$0xff] %v2499_v50  ;;  %v1144_v60 = vmax.f32 %v667_v51, 0.0  ;;  %v670_v61 = vpop.f32.mrb[56].mxu0  ;;  %1949 = vst [vmem:[%s3973_s4 + $0x260] sm:$0xff] %v2549_v36  ;;  %v976_v51 = vpop.f32.mrb[26].mxu1 }
 0x154   :  { %v2637_v63 = vpack.c.bf16 %v1143_v55, %v1141_v37  ;;  %v671_v1 = vadd.f32 %v670_v61, %v3287_v46  ;;  %v672_v2 = vpop.f32.mrb[57].mxu0  ;;  %1950 = vst [vmem:[%s3973_s4 + $0x268] sm:$0xff] %v2550_v41  ;;  %v977_v58 = vadd.f32 %v976_v51, %v3287_v46 }
 0x155   :  { %v2500_v7 = vpack.c.bf16 %v1144_v60, %v1143_v55  ;;  %v2635_v8 = vpack.c.bf16 %v1144_v60, %v1142_v39  ;;  %v673_v9 = vadd.f32 %v672_v2, %v3290_v47  ;;  %v971_v55 = vadd.f32 %v970_v42, %v3287_v46  ;;  %v978_v60 = vpop.f32.mrb[27].mxu1 }
 0x156   :  { %v1145_v12 = vmax.f32 %v671_v1, 0.0  ;;  %v982_v19 = vpop.f32.mrb[28].mxu1 }
 0x157   :  { %1900 = vst [vmem:[%s3973_s4 + $0xd8] sm:$0xff] %v2500_v7  ;;  %v1146_v14 = vmax.f32 %v673_v9, 0.0  ;;  %v676_v15 = vpop.f32.mrb[58].mxu0  ;;  %2636 = vmatprep.subr.bf16.mxu1 %v2635_v8  ;;  %v1245_v5 = vmax.f32 %v971_v55, 0.0  ;;  %v1247_v8 = vmax.f32 %v977_v58, 0.0  ;;  %v983_v32 = vadd.f32 %v982_v19, %v3287_v46 }
 0x158   :  { %v677_v20 = vadd.f32 %v676_v15, %v3287_v46  ;;  %v678_v21 = vpop.f32.mrb[59].mxu0  ;;  %2638 = vmatpush1.bf16.msra.mxu1 %v2637_v63  ;;  %v979_v63 = vadd.f32 %v978_v60, %v3290_v47 }
 0x159   :  { %v2501_v24 = vpack.c.bf16 %v1146_v14, %v1145_v12  ;;  %v679_v25 = vadd.f32 %v678_v21, %v3290_v47  ;;  %v2551_v13 = vpack.c.bf16 %v1246_v6, %v1245_v5  ;;  %v3605_v17 = vpack.c.bf16 %v1247_v8, %v1245_v5 }
 0x15a   :  { %v1147_v30 = vmax.f32 %v677_v20, 0.0  ;;  %v1248_v9 = vmax.f32 %v979_v63, 0.0 }
 0x15b   :  { %1901 = vst [vmem:[%s3973_s4 + $0xe0] sm:$0xff] %v2501_v24  ;;  %v1148_v33 = vmax.f32 %v679_v25, 0.0  ;;  %v682_v34 = vpop.f32.mrb[60].mxu0  ;;  %1951 = vst [vmem:[%s3973_s4 + $0x270] sm:$0xff] %v2551_v13  ;;  %v984_v25 = vpop.f32.mrb[29].mxu1 }
 0x15c   :  { %v2641_v37 = vpack.c.bf16 %v1147_v30, %v1145_v12  ;;  %v683_v38 = vadd.f32 %v682_v34, %v3287_v46  ;;  %v684_v39 = vpop.f32.mrb[61].mxu0  ;;  %v2552_v18 = vpack.c.bf16 %v1248_v9, %v1247_v8  ;;  %v3611_v24 = vpack.c.bf16 %v1248_v9, %v1246_v6  ;;  %v988_v27 = vpop.f32.mrb[30].mxu1 }
 0x15d   :  { %v2502_v43 = vpack.c.bf16 %v1148_v33, %v1147_v30  ;;  %v2639_v44 = vpack.c.bf16 %v1148_v33, %v1146_v14  ;;  %v685_v45 = vadd.f32 %v684_v39, %v3290_v47  ;;  %v985_v33 = vadd.f32 %v984_v25, %v3290_v47  ;;  %v990_v36 = vpop.f32.mrb[31].mxu1  ;;  %v1971_v39 = vld [vmem:[%s3974_s3] sm:$0xff] }
 0x15e   :  { %v1149_v50 = vmax.f32 %v683_v38, 0.0  ;;  %1952 = vst [vmem:[%s3973_s4 + $0x278] sm:$0xff] %v2552_v18  ;;  %v989_v34 = vadd.f32 %v988_v27, %v3287_v46  ;;  %v991_v41 = vadd.f32 %v990_v36, %v3290_v47  ;;  %v994_v63 = vpop.f32.mrb[32].mxu1 }
 0x15f   :  { %1902 = vst [vmem:[%s3973_s4 + $0xe8] sm:$0xff] %v2502_v43  ;;  %v1150_v52 = vmax.f32 %v685_v45, 0.0  ;;  %v688_v54 = vpop.f32.mrb[62].mxu0  ;;  %2640 = vmatprep.subr.bf16.mxu1 %v2639_v44  ;;  %v1249_v44 = vmax.f32 %v983_v32, 0.0  ;;  %v1250_v45 = vmax.f32 %v985_v33, 0.0 }
 0x160   :  { %v689_v61 = vadd.f32 %v688_v54, %v3287_v46  ;;  %v690_v62 = vpop.f32.mrb[63].mxu0  ;;  %2642 = vmatpush1.bf16.msra.mxu1 %v2641_v37  ;;  %v1252_v51 = vmax.f32 %v991_v41, 0.0 }
 0x161   :  { %v2503_v1 = vpack.c.bf16 %v1150_v52, %v1149_v50  ;;  %v691_v2 = vadd.f32 %v690_v62, %v3290_v47  ;;  %v2553_v55 = vpack.c.bf16 %v1250_v45, %v1249_v44 }
 0x162   :  { %v1151_v7 = vmax.f32 %v689_v61, 0.0  ;;  %v3638_v6 = vpack.c.bf16 %v1252_v51, %v1250_v45 }
 0x163   :  { %1903 = vst [vmem:[%s3973_s4 + $0xf0] sm:$0xff] %v2503_v1  ;;  %v1152_v11 = vmax.f32 %v691_v2, 0.0  ;;  %v694_v12 = vpop.f32.mrb[64].mxu0  ;;  %1953 = vst [vmem:[%s3973_s4 + $0x280] sm:$0xff] %v2553_v55 }
 0x164   :  { %v2645_v14 = vpack.c.bf16 %v1151_v7, %v1149_v50  ;;  %v695_v15 = vadd.f32 %v694_v12, %v3287_v46  ;;  %v696_v16 = vpop.f32.mrb[65].mxu0  ;;  %v1251_v50 = vmax.f32 %v989_v34, 0.0 }
 0x165   :  { %v2504_v20 = vpack.c.bf16 %v1152_v11, %v1151_v7  ;;  %v2643_v21 = vpack.c.bf16 %v1152_v11, %v1150_v52  ;;  %v697_v23 = vadd.f32 %v696_v16, %v3290_v47  ;;  %v996_v7 = vpop.f32.mrb[33].mxu1  ;;  %v1974_v11 = vld [vmem:[%s3974_s3 + $0x18] sm:$0xff] }
 0x166   :  { %v1153_v26 = vmax.f32 %v695_v15, 0.0  ;;  %v3632_v61 = vpack.c.bf16 %v1251_v50, %v1249_v44  ;;  %v2554_v62 = vpack.c.bf16 %v1252_v51, %v1251_v50  ;;  %v1000_v9 = vpop.f32.mrb[34].mxu1  ;;  %v997_v15 = vadd.f32 %v996_v7, %v3290_v47 }
 0x167   :  { %1904 = vst [vmem:[%s3973_s4 + $0xf8] sm:$0xff] %v2504_v20  ;;  %v1154_v30 = vmax.f32 %v697_v23, 0.0  ;;  %v700_v31 = vpop.f32.mrb[66].mxu0  ;;  %2644 = vmatprep.subr.bf16.mxu1 %v2643_v21  ;;  %v1001_v16 = vadd.f32 %v1000_v9, %v3287_v46  ;;  %v1002_v18 = vpop.f32.mrb[35].mxu1 }
 0x168   :  { %v701_v37 = vadd.f32 %v700_v31, %v3287_v46  ;;  %v702_v38 = vpop.f32.mrb[67].mxu0  ;;  %2646 = vmatpush1.bf16.msra.mxu1 %v2645_v14  ;;  %1954 = vst [vmem:[%s3973_s4 + $0x288] sm:$0xff] %v2554_v62  ;;  %v995_v14 = vadd.f32 %v994_v63, %v3287_v46  ;;  %v1003_v21 = vadd.f32 %v1002_v18, %v3290_v47  ;;  %v1254_v27 = vmax.f32 %v997_v15, 0.0  ;;  %v1006_v33 = vpop.f32.mrb[36].mxu1 }
 0x169   :  { %v2505_v42 = vpack.c.bf16 %v1154_v30, %v1153_v26  ;;  %v703_v43 = vadd.f32 %v702_v38, %v3290_v47  ;;  %v1255_v31 = vmax.f32 %v1001_v16, 0.0  ;;  %v1007_v38 = vadd.f32 %v1006_v33, %v3287_v46 }
 0x16a   :  { %v1155_v49 = vmax.f32 %v701_v37, 0.0  ;;  %v1256_v32 = vmax.f32 %v1003_v21, 0.0 }
 0x16b   :  { %1905 = vst [vmem:[%s3973_s4 + $0x100] sm:$0xff] %v2505_v42  ;;  %v1156_v52 = vmax.f32 %v703_v43, 0.0  ;;  %v706_v54 = vpop.f32.mrb[68].mxu0  ;;  %2047 = vmatmul.mubr.f32.vlgmr.msra.gmra.mrb[64].mxu1 %v1971_v39  ;;  %v1008_v39 = vpop.f32.mrb[37].mxu1  ;;  %v1257_v55 = vmax.f32 %v1007_v38, 0.0 }
 0x16c   :  { %v2649_v56 = vpack.c.bf16 %v1155_v49, %v1153_v26  ;;  %v707_v58 = vadd.f32 %v706_v54, %v3287_v46  ;;  %v708_v60 = vpop.f32.mrb[69].mxu0  ;;  %2117 = vmatprep.mubr.f32.mxu1 %v1974_v11  ;;  %v1253_v26 = vmax.f32 %v995_v14, 0.0  ;;  %v2556_v45 = vpack.c.bf16 %v1256_v32, %v1255_v31 }
 0x16d   :  { %v2506_v1 = vpack.c.bf16 %v1156_v52, %v1155_v49  ;;  %v2647_v2 = vpack.c.bf16 %v1156_v52, %v1154_v30  ;;  %v709_v5 = vadd.f32 %v708_v60, %v3290_v47  ;;  %v3666_v52 = vpack.c.bf16 %v1256_v32, %v1254_v27 }
 0x16e   :  { %v1157_v8 = vmax.f32 %v707_v58, 0.0  ;;  %v2555_v37 = vpack.c.bf16 %v1254_v27, %v1253_v26  ;;  %v3660_v44 = vpack.c.bf16 %v1255_v31, %v1253_v26  ;;  %1956 = vst [vmem:[%s3973_s4 + $0x298] sm:$0xff] %v2556_v45  ;;  %v1012_v58 = vpop.f32.mrb[38].mxu1 }
 0x16f   :  { %1906 = vst [vmem:[%s3973_s4 + $0x108] sm:$0xff] %v2506_v1  ;;  %v1158_v12 = vmax.f32 %v709_v5, 0.0  ;;  %v712_v13 = vpop.f32.mrb[70].mxu0  ;;  %2648 = vmatprep.subr.bf16.mxu1 %v2647_v2  ;;  %v1013_v63 = vadd.f32 %v1012_v58, %v3287_v46  ;;  %v1014_v1 = vpop.f32.mrb[39].mxu1 }
 0x170   :  { %v713_v19 = vadd.f32 %v712_v13, %v3287_v46  ;;  %v714_v20 = vpop.f32.mrb[71].mxu0  ;;  %2650 = vmatpush1.bf16.msra.mxu1 %v2649_v56  ;;  %1955 = vst [vmem:[%s3973_s4 + $0x290] sm:$0xff] %v2555_v37  ;;  %v1009_v56 = vadd.f32 %v1008_v39, %v3290_v47  ;;  %v1018_v16 = vpop.f32.mrb[40].mxu1 }
 0x171   :  { %v2507_v23 = vpack.c.bf16 %v1158_v12, %v1157_v8  ;;  %v715_v25 = vadd.f32 %v714_v20, %v3290_v47  ;;  %v1019_v21 = vadd.f32 %v1018_v16, %v3287_v46 }
 0x172   :  { %v1159_v30 = vmax.f32 %v713_v19, 0.0  ;;  %v1258_v7 = vmax.f32 %v1009_v56, 0.0 }
 0x173   :  { %1907 = vst [vmem:[%s3973_s4 + $0x110] sm:$0xff] %v2507_v23  ;;  %v1160_v34 = vmax.f32 %v715_v25, 0.0  ;;  %v718_v36 = vpop.f32.mrb[72].mxu0  ;;  %v1020_v23 = vpop.f32.mrb[41].mxu1  ;;  %v1261_v37 = vmax.f32 %v1019_v21, 0.0 }
 0x174   :  { %v2653_v41 = vpack.c.bf16 %v1159_v30, %v1157_v8  ;;  %v719_v42 = vadd.f32 %v718_v36, %v3287_v46  ;;  %v720_v43 = vpop.f32.mrb[73].mxu0  ;;  %v1015_v8 = vadd.f32 %v1014_v1, %v3290_v47  ;;  %v2557_v14 = vpack.c.bf16 %v1258_v7, %v1257_v55  ;;  %v1024_v39 = vpop.f32.mrb[42].mxu1 }
 0x175   :  { %v2508_v49 = vpack.c.bf16 %v1160_v34, %v1159_v30  ;;  %v2651_v50 = vpack.c.bf16 %v1160_v34, %v1158_v12  ;;  %v721_v51 = vadd.f32 %v720_v43, %v3290_v47  ;;  %v1259_v12 = vmax.f32 %v1013_v63, 0.0  ;;  %v1026_v45 = vpop.f32.mrb[43].mxu1 }
 0x176   :  { %v1161_v54 = vmax.f32 %v719_v42, 0.0  ;;  %v1260_v15 = vmax.f32 %v1015_v8, 0.0  ;;  %1957 = vst [vmem:[%s3973_s4 + $0x2a0] sm:$0xff] %v2557_v14  ;;  %v1021_v38 = vadd.f32 %v1020_v23, %v3290_v47  ;;  %v1025_v43 = vadd.f32 %v1024_v39, %v3287_v46  ;;  %v1030_v1 = vpop.f32.mrb[44].mxu1 }
 0x177   :  { %1908 = vst [vmem:[%s3973_s4 + $0x118] sm:$0xff] %v2508_v49  ;;  %v1162_v60 = vmax.f32 %v721_v51, 0.0  ;;  %v724_v62 = vpop.f32.mrb[74].mxu0  ;;  %2652 = vmatprep.subr.bf16.mxu1 %v2651_v50  ;;  %v3682_v20 = vpack.c.bf16 %v1259_v12, %v1257_v55  ;;  %v1031_v8 = vadd.f32 %v1030_v1, %v3287_v46 }
 0x178   :  { %v725_v2 = vadd.f32 %v724_v62, %v3287_v46  ;;  %v726_v5 = vpop.f32.mrb[75].mxu0  ;;  %2654 = vmatpush1.bf16.msra.mxu1 %v2653_v41  ;;  %v2558_v30 = vpack.c.bf16 %v1260_v15, %v1259_v12  ;;  %v3689_v31 = vpack.c.bf16 %v1260_v15, %v1258_v7  ;;  %v1262_v51 = vmax.f32 %v1021_v38, 0.0 }
 0x179   :  { %v2509_v9 = vpack.c.bf16 %v1162_v60, %v1161_v54  ;;  %v727_v11 = vadd.f32 %v726_v5, %v3290_v47  ;;  %v1263_v58 = vmax.f32 %v1025_v43, 0.0  ;;  %v1265_v23 = vmax.f32 %v1031_v8, 0.0 }
 0x17a   :  { %v1163_v13 = vmax.f32 %v725_v2, 0.0  ;;  %1958 = vst [vmem:[%s3973_s4 + $0x2a8] sm:$0xff] %v2558_v30  ;;  %v2559_v62 = vpack.c.bf16 %v1262_v51, %v1261_v37 }
 0x17b   :  { %1909 = vst [vmem:[%s3973_s4 + $0x120] sm:$0xff] %v2509_v9  ;;  %v1164_v18 = vmax.f32 %v727_v11, 0.0  ;;  %v730_v19 = vpop.f32.mrb[76].mxu0  ;;  %v3706_v7 = vpack.c.bf16 %v1263_v58, %v1261_v37  ;;  %v1032_v9 = vpop.f32.mrb[45].mxu1 }
 0x17c   :  { %v2657_v25 = vpack.c.bf16 %v1163_v13, %v1161_v54  ;;  %v731_v26 = vadd.f32 %v730_v19, %v3287_v46  ;;  %v732_v27 = vpop.f32.mrb[77].mxu0  ;;  %v1027_v54 = vadd.f32 %v1026_v45, %v3290_v47  ;;  %1959 = vst [vmem:[%s3973_s4 + $0x2b0] sm:$0xff] %v2559_v62 }
 0x17d   :  { %v2510_v32 = vpack.c.bf16 %v1164_v18, %v1163_v13  ;;  %v2655_v33 = vpack.c.bf16 %v1164_v18, %v1162_v60  ;;  %v733_v34 = vadd.f32 %v732_v27, %v3290_v47 }
 0x17e   :  { %v1165_v36 = vmax.f32 %v731_v26, 0.0  ;;  %v1264_v63 = vmax.f32 %v1027_v54, 0.0  ;;  %v1036_v26 = vpop.f32.mrb[46].mxu1 }
 0x17f   :  { %1910 = vst [vmem:[%s3973_s4 + $0x128] sm:$0xff] %v2510_v32  ;;  %v1166_v41 = vmax.f32 %v733_v34, 0.0  ;;  %v736_v42 = vpop.f32.mrb[78].mxu0  ;;  %2656 = vmatprep.subr.bf16.mxu1 %v2655_v33  ;;  %v1037_v32 = vadd.f32 %v1036_v26, %v3287_v46  ;;  %v1038_v33 = vpop.f32.mrb[47].mxu1 }
 0x180   :  { %v737_v49 = vadd.f32 %v736_v42, %v3287_v46  ;;  %v738_v50 = vpop.f32.mrb[79].mxu0  ;;  %2658 = vmatpush1.bf16.msra.mxu1 %v2657_v25  ;;  %v2560_v14 = vpack.c.bf16 %v1264_v63, %v1263_v58  ;;  %v3713_v15 = vpack.c.bf16 %v1264_v63, %v1262_v51  ;;  %v1033_v25 = vadd.f32 %v1032_v9, %v3290_v47 }
 0x181   :  { %v2511_v55 = vpack.c.bf16 %v1166_v41, %v1165_v36  ;;  %v739_v56 = vadd.f32 %v738_v50, %v3290_v47  ;;  %v1039_v38 = vadd.f32 %v1038_v33, %v3290_v47  ;;  %v1267_v42 = vmax.f32 %v1037_v32, 0.0  ;;  %v1042_v50 = vpop.f32.mrb[48].mxu1 }
 0x182   :  { %v1167_v60 = vmax.f32 %v737_v49, 0.0  ;;  %1960 = vst [vmem:[%s3973_s4 + $0x2b8] sm:$0xff] %v2560_v14  ;;  %v1266_v37 = vmax.f32 %v1033_v25, 0.0  ;;  %v1044_v58 = vpop.f32.mrb[49].mxu1 }
 0x183   :  { %1911 = vst [vmem:[%s3973_s4 + $0x130] sm:$0xff] %v2511_v55  ;;  %v1168_v2 = vmax.f32 %v739_v56, 0.0  ;;  %v742_v5 = vpop.f32.mrb[80].mxu0  ;;  %v1268_v49 = vmax.f32 %v1039_v38, 0.0  ;;  %v3730_v55 = vpack.c.bf16 %v1267_v42, %v1265_v23  ;;  %v1043_v56 = vadd.f32 %v1042_v50, %v3287_v46  ;;  %v1048_v14 = vpop.f32.mrb[50].mxu1 }
 0x184   :  { %v2661_v11 = vpack.c.bf16 %v1167_v60, %v1165_v36  ;;  %v743_v12 = vadd.f32 %v742_v5, %v3287_v46  ;;  %v744_v13 = vpop.f32.mrb[81].mxu0  ;;  %v2561_v45 = vpack.c.bf16 %v1266_v37, %v1265_v23 }
 0x185   :  { %v2512_v16 = vpack.c.bf16 %v1168_v2, %v1167_v60  ;;  %v2659_v18 = vpack.c.bf16 %v1168_v2, %v1166_v41  ;;  %v745_v19 = vadd.f32 %v744_v13, %v3290_v47  ;;  %v2562_v1 = vpack.c.bf16 %v1268_v49, %v1267_v42 }
 0x186   :  { %v1169_v21 = vmax.f32 %v743_v12, 0.0  ;;  %1961 = vst [vmem:[%s3973_s4 + $0x2c0] sm:$0xff] %v2561_v45  ;;  %v3737_v2 = vpack.c.bf16 %v1268_v49, %v1266_v37  ;;  %v1269_v12 = vmax.f32 %v1043_v56, 0.0  ;;  %v1045_v13 = vadd.f32 %v1044_v58, %v3290_v47 }
 0x187   :  { %1912 = vst [vmem:[%s3973_s4 + $0x138] sm:$0xff] %v2512_v16  ;;  %v1170_v27 = vmax.f32 %v745_v19, 0.0  ;;  %v748_v30 = vpop.f32.mrb[82].mxu0  ;;  %2660 = vmatprep.subr.bf16.mxu1 %v2659_v18  ;;  %1962 = vst [vmem:[%s3973_s4 + $0x2c8] sm:$0xff] %v2562_v1  ;;  %v1049_v19 = vadd.f32 %v1048_v14, %v3287_v46 }
 0x188   :  { %v749_v34 = vadd.f32 %v748_v30, %v3287_v46  ;;  %v750_v36 = vpop.f32.mrb[83].mxu0  ;;  %2662 = vmatpush1.bf16.msra.mxu1 %v2661_v11  ;;  %v1270_v26 = vmax.f32 %v1045_v13, 0.0 }
 0x189   :  { %v2513_v39 = vpack.c.bf16 %v1170_v27, %v1169_v21  ;;  %v751_v41 = vadd.f32 %v750_v36, %v3290_v47  ;;  %v1271_v33 = vmax.f32 %v1049_v19, 0.0 }
 0x18a   :  { %v1171_v43 = vmax.f32 %v749_v34, 0.0  ;;  %v2563_v36 = vpack.c.bf16 %v1270_v26, %v1269_v12 }
 0x18b   :  { %1913 = vst [vmem:[%s3973_s4 + $0x140] sm:$0xff] %v2513_v39  ;;  %v1172_v51 = vmax.f32 %v751_v41, 0.0  ;;  %v754_v54 = vpop.f32.mrb[84].mxu0  ;;  %v3754_v42 = vpack.c.bf16 %v1271_v33, %v1269_v12 }
 0x18c   :  { %v2665_v60 = vpack.c.bf16 %v1171_v43, %v1169_v21  ;;  %v755_v62 = vadd.f32 %v754_v54, %v3287_v46  ;;  %v756_v63 = vpop.f32.mrb[85].mxu0  ;;  %v1050_v21 = vpop.f32.mrb[51].mxu1  ;;  %1963 = vst [vmem:[%s3973_s4 + $0x2d0] sm:$0xff] %v2563_v36 }
 0x18d   :  { %v2514_v5 = vpack.c.bf16 %v1172_v51, %v1171_v43  ;;  %v2663_v8 = vpack.c.bf16 %v1172_v51, %v1170_v27  ;;  %v757_v9 = vadd.f32 %v756_v63, %v3290_v47  ;;  %v1051_v27 = vadd.f32 %v1050_v21, %v3290_v47  ;;  %v1054_v38 = vpop.f32.mrb[52].mxu1 }
 0x18e   :  { %v1173_v11 = vmax.f32 %v755_v62, 0.0  ;;  %v1055_v43 = vadd.f32 %v1054_v38, %v3287_v46  ;;  %v1056_v45 = vpop.f32.mrb[53].mxu1 }
 0x18f   :  { %1914 = vst [vmem:[%s3973_s4 + $0x148] sm:$0xff] %v2514_v5  ;;  %v1174_v16 = vmax.f32 %v757_v9, 0.0  ;;  %v760_v18 = vpop.f32.mrb[86].mxu0  ;;  %2664 = vmatprep.subr.bf16.mxu1 %v2663_v8  ;;  %v1272_v37 = vmax.f32 %v1051_v27, 0.0  ;;  %v1057_v5 = vadd.f32 %v1056_v45, %v3290_v47  ;;  %v1060_v8 = vpop.f32.mrb[54].mxu1 }
 0x190   :  { %v761_v23 = vadd.f32 %v760_v18, %v3287_v46  ;;  %v762_v25 = vpop.f32.mrb[87].mxu0  ;;  %2666 = vmatpush1.bf16.msra.mxu1 %v2665_v60  ;;  %v1273_v1 = vmax.f32 %v1055_v43, 0.0  ;;  %v1061_v12 = vadd.f32 %v1060_v8, %v3287_v46  ;;  %v1062_v13 = vpop.f32.mrb[55].mxu1 }
 0x191   :  { %v2515_v30 = vpack.c.bf16 %v1174_v16, %v1173_v11  ;;  %v763_v32 = vadd.f32 %v762_v25, %v3290_v47  ;;  %v2564_v54 = vpack.c.bf16 %v1272_v37, %v1271_v33  ;;  %v3761_v56 = vpack.c.bf16 %v1272_v37, %v1270_v26 }
 0x192   :  { %v1175_v34 = vmax.f32 %v761_v23, 0.0  ;;  %v1274_v18 = vmax.f32 %v1057_v5, 0.0  ;;  %v1063_v19 = vadd.f32 %v1062_v13, %v3290_v47  ;;  %v1275_v25 = vmax.f32 %v1061_v12, 0.0 }
 0x193   :  { %1915 = vst [vmem:[%s3973_s4 + $0x150] sm:$0xff] %v2515_v30  ;;  %v1176_v39 = vmax.f32 %v763_v32, 0.0  ;;  %v766_v41 = vpop.f32.mrb[88].mxu0  ;;  %1964 = vst [vmem:[%s3973_s4 + $0x2d8] sm:$0xff] %v2564_v54  ;;  %v1066_v32 = vpop.f32.mrb[56].mxu1 }
 0x194   :  { %v2669_v49 = vpack.c.bf16 %v1175_v34, %v1173_v11  ;;  %v767_v50 = vadd.f32 %v766_v41, %v3287_v46  ;;  %v768_v51 = vpop.f32.mrb[89].mxu0  ;;  %v2565_v27 = vpack.c.bf16 %v1274_v18, %v1273_v1  ;;  %v1276_v30 = vmax.f32 %v1063_v19, 0.0  ;;  %v1068_v38 = vpop.f32.mrb[57].mxu1 }
 0x195   :  { %v2516_v58 = vpack.c.bf16 %v1176_v39, %v1175_v34  ;;  %v2667_v60 = vpack.c.bf16 %v1176_v39, %v1174_v16  ;;  %v769_v62 = vadd.f32 %v768_v51, %v3290_v47  ;;  %v3778_v36 = vpack.c.bf16 %v1275_v25, %v1273_v1 }
 0x196   :  { %v1177_v63 = vmax.f32 %v767_v50, 0.0  ;;  %v1067_v37 = vadd.f32 %v1066_v32, %v3287_v46  ;;  %1965 = vst [vmem:[%s3973_s4 + $0x2e0] sm:$0xff] %v2565_v27  ;;  %v2566_v45 = vpack.c.bf16 %v1276_v30, %v1275_v25 }
 0x197   :  { %1916 = vst [vmem:[%s3973_s4 + $0x158] sm:$0xff] %v2516_v58  ;;  %v1178_v9 = vmax.f32 %v769_v62, 0.0  ;;  %v772_v11 = vpop.f32.mrb[90].mxu0  ;;  %2668 = vmatprep.subr.bf16.mxu1 %v2667_v60  ;;  %v1069_v62 = vadd.f32 %v1068_v38, %v3290_v47 }
 0x198   :  { %v773_v14 = vadd.f32 %v772_v11, %v3287_v46  ;;  %v774_v16 = vpop.f32.mrb[91].mxu0  ;;  %2670 = vmatpush1.bf16.msra.mxu1 %v2669_v49  ;;  %v3785_v49 = vpack.c.bf16 %v1276_v30, %v1274_v18  ;;  %1966 = vst [vmem:[%s3973_s4 + $0x2e8] sm:$0xff] %v2566_v45  ;;  %v1277_v60 = vmax.f32 %v1067_v37, 0.0 }
 0x199   :  { %v2517_v21 = vpack.c.bf16 %v1178_v9, %v1177_v63  ;;  %v775_v23 = vadd.f32 %v774_v16, %v3290_v47  ;;  %v1278_v13 = vmax.f32 %v1069_v62, 0.0 }
 0x19a   :  { %v1179_v26 = vmax.f32 %v773_v14, 0.0 }
 0x19b   :  { %1917 = vst [vmem:[%s3973_s4 + $0x160] sm:$0xff] %v2517_v21  ;;  %v1180_v33 = vmax.f32 %v775_v23, 0.0  ;;  %v778_v34 = vpop.f32.mrb[92].mxu0  ;;  %v2567_v23 = vpack.c.bf16 %v1278_v13, %v1277_v60 }
 0x19c   :  { %v2673_v39 = vpack.c.bf16 %v1179_v26, %v1177_v63  ;;  %v779_v41 = vadd.f32 %v778_v34, %v3287_v46  ;;  %v780_v43 = vpop.f32.mrb[93].mxu0  ;;  %v1072_v63 = vpop.f32.mrb[58].mxu1 }
 0x19d   :  { %v2518_v50 = vpack.c.bf16 %v1180_v33, %v1179_v26  ;;  %v2671_v51 = vpack.c.bf16 %v1180_v33, %v1178_v9  ;;  %v781_v54 = vadd.f32 %v780_v43, %v3290_v47  ;;  %v1073_v8 = vadd.f32 %v1072_v63, %v3287_v46  ;;  %v1074_v9 = vpop.f32.mrb[59].mxu1  ;;  %1967 = vst [vmem:[%s3973_s4 + $0x2f0] sm:$0xff] %v2567_v23 }
 0x19e   :  { %v1181_v58 = vmax.f32 %v779_v41, 0.0  ;;  %v1075_v14 = vadd.f32 %v1074_v9, %v3290_v47  ;;  %v1078_v26 = vpop.f32.mrb[60].mxu1 }
 0x19f   :  { %1918 = vst [vmem:[%s3973_s4 + $0x168] sm:$0xff] %v2518_v50  ;;  %v1182_v1 = vmax.f32 %v781_v54, 0.0  ;;  %v784_v5 = vpop.f32.mrb[94].mxu0  ;;  %2672 = vmatprep.subr.bf16.mxu1 %v2671_v51  ;;  %v1279_v19 = vmax.f32 %v1073_v8, 0.0  ;;  %v1079_v33 = vadd.f32 %v1078_v26, %v3287_v46  ;;  %v1080_v34 = vpop.f32.mrb[61].mxu1 }
 0x1a0   :  { %v785_v11 = vadd.f32 %v784_v5, %v3287_v46  ;;  %v786_v12 = vpop.f32.mrb[95].mxu0  ;;  %2674 = vmatpush1.bf16.msra.mxu1 %v2673_v39  ;;  %v1280_v25 = vmax.f32 %v1075_v14, 0.0  ;;  %v1084_v62 = vpop.f32.mrb[62].mxu1 }
 0x1a1   :  { %v2519_v16 = vpack.c.bf16 %v1182_v1, %v1181_v58  ;;  %v787_v18 = vadd.f32 %v786_v12, %v3290_v47  ;;  %v3802_v32 = vpack.c.bf16 %v1279_v19, %v1277_v60  ;;  %v1081_v60 = vadd.f32 %v1080_v34, %v3290_v47  ;;  %v1086_v8 = vpop.f32.mrb[63].mxu1 }
 0x1a2   :  { %v1183_v21 = vmax.f32 %v785_v11, 0.0  ;;  %v2568_v41 = vpack.c.bf16 %v1280_v25, %v1279_v19  ;;  %v3809_v43 = vpack.c.bf16 %v1280_v25, %v1278_v13  ;;  %v1087_v13 = vadd.f32 %v1086_v8, %v3290_v47 }
 0x1a3   :  { %1919 = vst [vmem:[%s3973_s4 + $0x170] sm:$0xff] %v2519_v16  ;;  %v1184_v27 = vmax.f32 %v787_v18, 0.0  ;;  %v790_v30 = vpop.f32.mrb[96].mxu0  ;;  %v1282_v12 = vmax.f32 %v1081_v60, 0.0 }
 0x1a4   :  { %v2677_v37 = vpack.c.bf16 %v1183_v21, %v1181_v58  ;;  %v791_v38 = vadd.f32 %v790_v30, %v3287_v46  ;;  %v792_v39 = vpop.f32.mrb[97].mxu0  ;;  %1968 = vst [vmem:[%s3973_s4 + $0x2f8] sm:$0xff] %v2568_v41  ;;  %v1281_v58 = vmax.f32 %v1079_v33, 0.0  ;;  %v1284_v23 = vmax.f32 %v1087_v13, 0.0 }
 0x1a5   :  { %v2520_v45 = vpack.c.bf16 %v1184_v27, %v1183_v21  ;;  %v2675_v50 = vpack.c.bf16 %v1184_v27, %v1182_v1  ;;  %v793_v51 = vadd.f32 %v792_v39, %v3290_v47  ;;  %v1085_v1 = vadd.f32 %v1084_v62, %v3287_v46 }
 0x1a6   :  { %v1185_v54 = vmax.f32 %v791_v38, 0.0  ;;  %v2569_v21 = vpack.c.bf16 %v1282_v12, %v1281_v58  ;;  %v3832_v38 = vpack.c.bf16 %v1284_v23, %v1282_v12 }
 0x1a7   :  { %1920 = vst [vmem:[%s3973_s4 + $0x178] sm:$0xff] %v2520_v45  ;;  %v1186_v63 = vmax.f32 %v793_v51, 0.0  ;;  %v796_v5 = vpop.f32.mrb[98].mxu0  ;;  %2676 = vmatprep.subr.bf16.mxu1 %v2675_v50  ;;  %v1283_v18 = vmax.f32 %v1085_v1, 0.0 }
 0x1a8   :  { %v797_v9 = vadd.f32 %v796_v5, %v3287_v46  ;;  %v798_v11 = vpop.f32.mrb[99].mxu0  ;;  %2678 = vmatpush1.bf16.msra.mxu1 %v2677_v37  ;;  %1969 = vst [vmem:[%s3973_s4 + $0x300] sm:$0xff] %v2569_v21 }
 0x1a9   :  { %v2521_v14 = vpack.c.bf16 %v1186_v63, %v1185_v54  ;;  %v799_v16 = vadd.f32 %v798_v11, %v3290_v47  ;;  %v3826_v27 = vpack.c.bf16 %v1283_v18, %v1281_v58  ;;  %v2570_v37 = vpack.c.bf16 %v1284_v23, %v1283_v18 }
 0x1aa   :  { %v1187_v19 = vmax.f32 %v797_v9, 0.0 }
 0x1ab   :  { %1921 = vst [vmem:[%s3973_s4 + $0x180] sm:$0xff] %v2521_v14  ;;  %v1188_v25 = vmax.f32 %v799_v16, 0.0  ;;  %v802_v26 = vpop.f32.mrb[100].mxu0  ;;  %1970 = vst [vmem:[%s3973_s4 + $0x308] sm:$0xff] %v2570_v37 }
 0x1ac   :  { %v2681_v30 = vpack.c.bf16 %v1187_v19, %v1185_v54  ;;  %v803_v33 = vadd.f32 %v802_v26, %v3287_v46  ;;  %v804_v34 = vpop.f32.mrb[101].mxu0 }
 0x1ad   :  { %v2522_v39 = vpack.c.bf16 %v1188_v25, %v1187_v19  ;;  %v2679_v41 = vpack.c.bf16 %v1188_v25, %v1186_v63  ;;  %v805_v45 = vadd.f32 %v804_v34, %v3290_v47 }
 0x1ae   :  { %v1189_v50 = vmax.f32 %v803_v33, 0.0 }
 0x1af   :  { %1922 = vst [vmem:[%s3973_s4 + $0x188] sm:$0xff] %v2522_v39  ;;  %v1190_v51 = vmax.f32 %v805_v45, 0.0  ;;  %v808_v54 = vpop.f32.mrb[102].mxu0  ;;  %2680 = vmatprep.subr.bf16.mxu1 %v2679_v41 }
 0x1b0   :  { %v809_v58 = vadd.f32 %v808_v54, %v3287_v46  ;;  %v810_v60 = vpop.f32.mrb[103].mxu0  ;;  %2682 = vmatpush1.bf16.msra.mxu1 %v2681_v30 }
 0x1b1   :  { %v2523_v62 = vpack.c.bf16 %v1190_v51, %v1189_v50  ;;  %v811_v63 = vadd.f32 %v810_v60, %v3290_v47 }
 0x1b2   :  { %v1191_v5 = vmax.f32 %v809_v58, 0.0 }
 0x1b3   :  { %1923 = vst [vmem:[%s3973_s4 + $0x190] sm:$0xff] %v2523_v62  ;;  %v1192_v1 = vmax.f32 %v811_v63, 0.0  ;;  %v814_v8 = vpop.f32.mrb[104].mxu0 }
 0x1b4   :  { %v2685_v9 = vpack.c.bf16 %v1191_v5, %v1189_v50  ;;  %v815_v11 = vadd.f32 %v814_v8, %v3287_v46  ;;  %v816_v12 = vpop.f32.mrb[105].mxu0 }
 0x1b5   :  { %v2524_v13 = vpack.c.bf16 %v1192_v1, %v1191_v5  ;;  %v2683_v14 = vpack.c.bf16 %v1192_v1, %v1190_v51  ;;  %v817_v16 = vadd.f32 %v816_v12, %v3290_v47 }
 0x1b6   :  { %v1193_v18 = vmax.f32 %v815_v11, 0.0 }
 0x1b7   :  { %1924 = vst [vmem:[%s3973_s4 + $0x198] sm:$0xff] %v2524_v13  ;;  %v1194_v19 = vmax.f32 %v817_v16, 0.0  ;;  %v820_v21 = vpop.f32.mrb[106].mxu0  ;;  %2684 = vmatprep.subr.bf16.mxu1 %v2683_v14 }
 0x1b8   :  { %v821_v23 = vadd.f32 %v820_v21, %v3287_v46  ;;  %v822_v25 = vpop.f32.mrb[107].mxu0  ;;  %2686 = vmatpush1.bf16.msra.mxu1 %v2685_v9 }
 0x1b9   :  { %v2525_v26 = vpack.c.bf16 %v1194_v19, %v1193_v18  ;;  %v823_v30 = vadd.f32 %v822_v25, %v3290_v47 }
 0x1ba   :  { %v1195_v33 = vmax.f32 %v821_v23, 0.0 }
 0x1bb   :  { %1925 = vst [vmem:[%s3973_s4 + $0x1a0] sm:$0xff] %v2525_v26  ;;  %v1196_v34 = vmax.f32 %v823_v30, 0.0  ;;  %v826_v37 = vpop.f32.mrb[108].mxu0 }
 0x1bc   :  { %v2689_v39 = vpack.c.bf16 %v1195_v33, %v1193_v18  ;;  %v827_v41 = vadd.f32 %v826_v37, %v3287_v46  ;;  %v828_v45 = vpop.f32.mrb[109].mxu0 }
 0x1bd   :  { %v2526_v50 = vpack.c.bf16 %v1196_v34, %v1195_v33  ;;  %v2687_v51 = vpack.c.bf16 %v1196_v34, %v1194_v19  ;;  %v829_v54 = vadd.f32 %v828_v45, %v3290_v47 }
 0x1be   :  { %v1197_v58 = vmax.f32 %v827_v41, 0.0 }
 0x1bf   :  { %1926 = vst [vmem:[%s3973_s4 + $0x1a8] sm:$0xff] %v2526_v50  ;;  %v1198_v60 = vmax.f32 %v829_v54, 0.0  ;;  %v832_v62 = vpop.f32.mrb[110].mxu0  ;;  %2688 = vmatprep.subr.bf16.mxu1 %v2687_v51 }
 0x1c0   :  { %v833_v63 = vadd.f32 %v832_v62, %v3287_v46  ;;  %v834_v5 = vpop.f32.mrb[111].mxu0  ;;  %2690 = vmatpush1.bf16.msra.mxu1 %v2689_v39 }
 0x1c1   :  { %v2527_v1 = vpack.c.bf16 %v1198_v60, %v1197_v58  ;;  %v835_v8 = vadd.f32 %v834_v5, %v3290_v47 }
 0x1c2   :  { %v1199_v9 = vmax.f32 %v833_v63, 0.0 }
 0x1c3   :  { %1927 = vst [vmem:[%s3973_s4 + $0x1b0] sm:$0xff] %v2527_v1  ;;  %v1200_v11 = vmax.f32 %v835_v8, 0.0  ;;  %v838_v12 = vpop.f32.mrb[112].mxu0 }
 0x1c4   :  { %v2693_v13 = vpack.c.bf16 %v1199_v9, %v1197_v58  ;;  %v839_v14 = vadd.f32 %v838_v12, %v3287_v46  ;;  %v840_v16 = vpop.f32.mrb[113].mxu0 }
 0x1c5   :  { %v2528_v18 = vpack.c.bf16 %v1200_v11, %v1199_v9  ;;  %v2691_v19 = vpack.c.bf16 %v1200_v11, %v1198_v60  ;;  %v841_v21 = vadd.f32 %v840_v16, %v3290_v47 }
 0x1c6   :  { %v1201_v23 = vmax.f32 %v839_v14, 0.0 }
 0x1c7   :  { %1928 = vst [vmem:[%s3973_s4 + $0x1b8] sm:$0xff] %v2528_v18  ;;  %v1202_v25 = vmax.f32 %v841_v21, 0.0  ;;  %v844_v26 = vpop.f32.mrb[114].mxu0  ;;  %2692 = vmatprep.subr.bf16.mxu1 %v2691_v19 }
 0x1c8   :  { %v845_v30 = vadd.f32 %v844_v26, %v3287_v46  ;;  %v846_v33 = vpop.f32.mrb[115].mxu0  ;;  %2694 = vmatpush1.bf16.msra.mxu1 %v2693_v13 }
 0x1c9   :  { %v2529_v34 = vpack.c.bf16 %v1202_v25, %v1201_v23  ;;  %v847_v37 = vadd.f32 %v846_v33, %v3290_v47 }
 0x1ca   :  { %v1203_v39 = vmax.f32 %v845_v30, 0.0 }
 0x1cb   :  { %1929 = vst [vmem:[%s3973_s4 + $0x1c0] sm:$0xff] %v2529_v34  ;;  %v1204_v41 = vmax.f32 %v847_v37, 0.0  ;;  %v850_v45 = vpop.f32.mrb[116].mxu0 }
 0x1cc   :  { %v2697_v50 = vpack.c.bf16 %v1203_v39, %v1201_v23  ;;  %v851_v51 = vadd.f32 %v850_v45, %v3287_v46  ;;  %v852_v54 = vpop.f32.mrb[117].mxu0 }
 0x1cd   :  { %v2530_v58 = vpack.c.bf16 %v1204_v41, %v1203_v39  ;;  %v2695_v60 = vpack.c.bf16 %v1204_v41, %v1202_v25  ;;  %v853_v62 = vadd.f32 %v852_v54, %v3290_v47 }
 0x1ce   :  { %v1205_v63 = vmax.f32 %v851_v51, 0.0 }
 0x1cf   :  { %1930 = vst [vmem:[%s3973_s4 + $0x1c8] sm:$0xff] %v2530_v58  ;;  %v1206_v5 = vmax.f32 %v853_v62, 0.0  ;;  %v856_v1 = vpop.f32.mrb[118].mxu0  ;;  %2696 = vmatprep.subr.bf16.mxu1 %v2695_v60 }
 0x1d0   :  { %v857_v8 = vadd.f32 %v856_v1, %v3287_v46  ;;  %v858_v9 = vpop.f32.mrb[119].mxu0  ;;  %2698 = vmatpush1.bf16.msra.mxu1 %v2697_v50 }
 0x1d1   :  { %v2531_v11 = vpack.c.bf16 %v1206_v5, %v1205_v63  ;;  %v859_v12 = vadd.f32 %v858_v9, %v3290_v47 }
 0x1d2   :  { %v1207_v13 = vmax.f32 %v857_v8, 0.0 }
 0x1d3   :  { %1931 = vst [vmem:[%s3973_s4 + $0x1d0] sm:$0xff] %v2531_v11  ;;  %v1208_v14 = vmax.f32 %v859_v12, 0.0  ;;  %v862_v16 = vpop.f32.mrb[120].mxu0 }
 0x1d4   :  { %v2701_v18 = vpack.c.bf16 %v1207_v13, %v1205_v63  ;;  %v863_v19 = vadd.f32 %v862_v16, %v3287_v46  ;;  %v864_v21 = vpop.f32.mrb[121].mxu0 }
 0x1d5   :  { %v2532_v23 = vpack.c.bf16 %v1208_v14, %v1207_v13  ;;  %v2699_v25 = vpack.c.bf16 %v1208_v14, %v1206_v5  ;;  %v865_v26 = vadd.f32 %v864_v21, %v3290_v47 }
 0x1d6   :  { %v1209_v30 = vmax.f32 %v863_v19, 0.0 }
 0x1d7   :  { %1932 = vst [vmem:[%s3973_s4 + $0x1d8] sm:$0xff] %v2532_v23  ;;  %v1210_v33 = vmax.f32 %v865_v26, 0.0  ;;  %v868_v34 = vpop.f32.mrb[122].mxu0  ;;  %2700 = vmatprep.subr.bf16.mxu1 %v2699_v25 }
 0x1d8   :  { %v869_v37 = vadd.f32 %v868_v34, %v3287_v46  ;;  %v870_v39 = vpop.f32.mrb[123].mxu0  ;;  %2702 = vmatpush1.bf16.msra.mxu1 %v2701_v18 }
 0x1d9   :  { %v2533_v41 = vpack.c.bf16 %v1210_v33, %v1209_v30  ;;  %v871_v45 = vadd.f32 %v870_v39, %v3290_v47 }
 0x1da   :  { %v1211_v50 = vmax.f32 %v869_v37, 0.0 }
 0x1db   :  { %1933 = vst [vmem:[%s3973_s4 + $0x1e0] sm:$0xff] %v2533_v41  ;;  %v1212_v51 = vmax.f32 %v871_v45, 0.0  ;;  %v874_v54 = vpop.f32.mrb[124].mxu0 }
 0x1dc   :  { %v2705_v58 = vpack.c.bf16 %v1211_v50, %v1209_v30  ;;  %v875_v60 = vadd.f32 %v874_v54, %v3287_v46  ;;  %v876_v62 = vpop.f32.mrb[125].mxu0 }
 0x1dd   :  { %v2534_v63 = vpack.c.bf16 %v1212_v51, %v1211_v50  ;;  %v2703_v5 = vpack.c.bf16 %v1212_v51, %v1210_v33  ;;  %v877_v1 = vadd.f32 %v876_v62, %v3290_v47  ;;  %v1973_v51 = vld [vmem:[%s3974_s3 + $0x10] sm:$0xff] }
 0x1de   :  { %v1213_v8 = vmax.f32 %v875_v60, 0.0  ;;  %v1976_v60 = vld [vmem:[%s3974_s3 + $0x28] sm:$0xff] }
 0x1df   :  { %1934 = vst [vmem:[%s3973_s4 + $0x1e8] sm:$0xff] %v2534_v63  ;;  %v1214_v9 = vmax.f32 %v877_v1, 0.0  ;;  %v880_v11 = vpop.f32.mrb[126].mxu0  ;;  %2704 = vmatprep.subr.bf16.mxu1 %v2703_v5 }
 0x1e0   :  { %v881_v12 = vadd.f32 %v880_v11, %v3287_v46  ;;  %v882_v13 = vpop.f32.mrb[127].mxu0  ;;  %2706 = vmatpush1.bf16.msra.mxu1 %v2705_v58 }
 0x1e1   :  { %v2535_v14 = vpack.c.bf16 %v1214_v9, %v1213_v8  ;;  %v883_v16 = vadd.f32 %v882_v13, %v3290_v47 }
 0x1e2   :  { %v1215_v18 = vmax.f32 %v881_v12, 0.0 }
 0x1e3   :  { %1935 = vst [vmem:[%s3973_s4 + $0x1f0] sm:$0xff] %v2535_v14  ;;  %v1216_v19 = vmax.f32 %v883_v16, 0.0  ;;  %v886_v21 = vpop.f32.mrb[128].mxu0 }
 0x1e4   :  { %v2709_v23 = vpack.c.bf16 %v1215_v18, %v1213_v8  ;;  %v887_v25 = vadd.f32 %v886_v21, %v3287_v46  ;;  %v888_v26 = vpop.f32.mrb[129].mxu0 }
 0x1e5   :  { %v2536_v30 = vpack.c.bf16 %v1216_v19, %v1215_v18  ;;  %v2707_v33 = vpack.c.bf16 %v1216_v19, %v1214_v9  ;;  %v889_v34 = vadd.f32 %v888_v26, %v3290_v47 }
 0x1e6   :  { %v1217_v37 = vmax.f32 %v887_v25, 0.0 }
 0x1e7   :  { %1936 = vst [vmem:[%s3973_s4 + $0x1f8] sm:$0xff] %v2536_v30  ;;  %v1218_v39 = vmax.f32 %v889_v34, 0.0  ;;  %v892_v41 = vpop.f32.mrb[130].mxu0  ;;  %2708 = vmatprep.subr.bf16.mxu1 %v2707_v33 }
 0x1e8   :  { %v893_v45 = vadd.f32 %v892_v41, %v3287_v46  ;;  %v894_v50 = vpop.f32.mrb[131].mxu0  ;;  %2710 = vmatpush1.bf16.msra.mxu1 %v2709_v23 }
 0x1e9   :  { %v2537_v54 = vpack.c.bf16 %v1218_v39, %v1217_v37  ;;  %v895_v58 = vadd.f32 %v894_v50, %v3290_v47  ;;  %v1975_v47 = vld [vmem:[%s3974_s3 + $0x20] sm:$0xff] }
 0x1ea   :  { %v1219_v62 = vmax.f32 %v893_v45, 0.0 }
 0x1eb   :  { %1937 = vst [vmem:[%s3973_s4 + $0x200] sm:$0xff] %v2537_v54  ;;  %v1220_v63 = vmax.f32 %v895_v58, 0.0  ;;  %2118 = vmatmul.mubr.f32.vlgmr.msra.gmra.mrb[64].mxu1 %v1973_v51 }
 0x1ec   :  { %v2713_v46 = vpack.c.bf16 %v1219_v62, %v1217_v37  ;;  %2188 = vmatprep.mubr.f32.mxu1 %v1976_v60 }
 0x1ed   :  { %v2538_v5 = vpack.c.bf16 %v1220_v63, %v1219_v62  ;;  %v2711_v1 = vpack.c.bf16 %v1220_v63, %v1218_v39 }
 0x1ef   :  { %1938 = vst [vmem:[%s3973_s4 + $0x208] sm:$0xff] %v2538_v5  ;;  %2712 = vmatprep.subr.bf16.mxu1 %v2711_v1 }
 0x1f0   :  { %2714 = vmatpush1.bf16.msra.mxu1 %v2713_v46 }
 0x1f1   :  { %2716 = vmatprep.subr.bf16.mxu1 %v3467_v59 }
 0x1f4   :  { %2718 = vmatpush1.bf16.msra.mxu1 %v3461_v53  ;;  %v1977_v53 = vld [vmem:[%s3974_s3 + $0x30] sm:$0xff] }
 0x1f5   :  { %2720 = vmatprep.subr.bf16.mxu1 %v3491_v28 }
 0x1f8   :  { %2722 = vmatpush1.bf16.msra.mxu1 %v3485_v22 }
 0x1f9   :  { %2724 = vmatprep.subr.bf16.mxu1 %v3515_v0 }
 0x1fc   :  { %2726 = vmatpush1.bf16.msra.mxu1 %v3509_v57 }
 0x1fd   :  { %2728 = vmatprep.subr.bf16.mxu1 %v3539_v35 }
 0x200   :  { %2730 = vmatpush1.bf16.msra.mxu1 %v3533_v29 }
 0x201   :  { %2732 = vmatprep.subr.bf16.mxu1 %v3563_v10 }
 0x204   :  { %2734 = vmatpush1.bf16.msra.mxu1 %v3557_v4 }
 0x205   :  { %2736 = vmatprep.subr.bf16.mxu1 %v3587_v48 }
 0x208   :  { %2738 = vmatpush1.bf16.msra.mxu1 %v3581_v40 }
 0x209   :  { %2740 = vmatprep.subr.bf16.mxu1 %v3611_v24 }
 0x20c   :  { %2742 = vmatpush1.bf16.msra.mxu1 %v3605_v17 }
 0x20d   :  { %2744 = vmatprep.subr.bf16.mxu1 %v3638_v6 }
 0x210   :  { %2746 = vmatpush1.bf16.msra.mxu1 %v3632_v61 }
 0x211   :  { %2748 = vmatprep.subr.bf16.mxu1 %v3666_v52 }
 0x214   :  { %2750 = vmatpush1.bf16.msra.mxu1 %v3660_v44 }
 0x215   :  { %2752 = vmatprep.subr.bf16.mxu1 %v3689_v31 }
 0x218   :  { %2754 = vmatpush1.bf16.msra.mxu1 %v3682_v20 }
 0x219   :  { %2756 = vmatprep.subr.bf16.mxu1 %v3713_v15 }
 0x21c   :  { %2758 = vmatpush1.bf16.msra.mxu1 %v3706_v7 }
 0x21d   :  { %2760 = vmatprep.subr.bf16.mxu1 %v3737_v2 }
 0x220   :  { %2762 = vmatpush1.bf16.msra.mxu1 %v3730_v55 }
 0x221   :  { %2764 = vmatprep.subr.bf16.mxu1 %v3761_v56 }
 0x224   :  { %2766 = vmatpush1.bf16.msra.mxu1 %v3754_v42 }
 0x225   :  { %2768 = vmatprep.subr.bf16.mxu1 %v3785_v49 }
 0x228   :  { %2770 = vmatpush1.bf16.msra.mxu1 %v3778_v36 }
 0x229   :  { %2772 = vmatprep.subr.bf16.mxu1 %v3809_v43 }
 0x22c   :  { %2774 = vmatpush1.bf16.msra.mxu1 %v3802_v32 }
 0x22d   :  { %2776 = vmatprep.subr.bf16.mxu1 %v3832_v38 }
 0x22f   :  { %2189 = vmatmul.mubr.f32.vlgmr.msra.gmra.mrb[64].mxu1 %v1975_v47 }
 0x230   :  { %2778 = vmatpush1.bf16.msra.mxu1 %v3826_v27  ;;  %2259 = vmatprep.mubr.f32.mxu1 %v2792_v3 }
 0x237   :  { %2472 = vmatmul.mubr.msk.f32.vlgmr.msra.gmra.mrb[64].mxu1 %vm1978_vm1, %v1977_v53 }
 0x30a   :  { %v2261_v59 = vpop.f32.mrb[64].mxu1 }
 0x30b   :  { %2266 = vst [vmem:[%s3975_s5] sm:$0xff] %v2261_v59  ;;  %v2263_v22 = vpop.f32.mrb[65].mxu1 }
 0x30c   :  { %2267 = vst [vmem:[%s3975_s5 + $0x8] sm:$0xff] %v2263_v22 }

// kernel: forward.3
= control target key start
LH: loop header
LB: loop body
LE: loop exit
PB: predicated region body
PF: predicated region fallthrough
CT: control target
= control target key end

     0   :  { %s14386_s0 = inlined_call_operand.vmem [shape: bf16[8,25088], index: 0, kind: input, shape index: {}]   ;;  %s14387_s1 = inlined_call_operand.vmem [shape: bf16[25088,64], index: 1, kind: input, shape index: {}]   ;;  %s14388_s2 = inlined_call_operand.vmem [shape: f32[1,64], index: 2, kind: input, shape index: {}]   ;;  %s14389_s3 = inlined_call_operand.vmem [shape: f32[256,4], index: 3, kind: input, shape index: {}]   ;;  %s14390_s4 = inlined_call_operand.<no memory space> [shape: f32[1,1], index: 4, kind: input, shape index: {}]   ;;  %s14391_s5 = inlined_call_operand.vmem [shape: f32[2,4,256], index: 5, kind: input, shape index: {}]   ;;  %s14392_s6 = inlined_call_operand.vmem [shape: f32[1,256], index: 6, kind: input, shape index: {}]   ;;  %s14393_s7 = inlined_call_operand.vmem [shape: f32[1,256], index: 7, kind: input, shape index: {}]   ;;  %s14394_s8 = inlined_call_operand.vmem [shape: f32[1,256], index: 8, kind: input, shape index: {}]   ;;  %s14395_s9 = inlined_call_operand.vmem [shape: f32[1,256], index: 9, kind: input, shape index: {}]   ;;  %s14396_s10 = inlined_call_operand.vmem [shape: f32[256,16], index: 10, kind: input, shape index: {}]   ;;  %s14397_s11 = inlined_call_operand.hbm [shape: f32[2,16], index: 11, kind: output, shape index: {0}]   ;;  %s14398_s12 = inlined_call_operand.hbm [shape: f32[2,256], index: 12, kind: output, shape index: {1}]   ;;  %s14399_s13 = inlined_call_operand.hbm [shape: f32[2,4], index: 13, kind: output, shape index: {2}]  }
   0x1   :  { %v19_v0 = vstv %s14390_s4 }
   0x2   :  { %20 = vst [vmem:[#allocation3] sm:$0x1] %v19_v0 }
   0x3   :  { %21 = vsyncpa [#allocation5], 0 }
   0x4   :  { %22 = vsyncpa [#allocation7], 0  ;;  %s13148_s27 = smov 0  }
   0x5 LB: > { %s13154_s28 = sadd.s32 4294967295, %s13063_s27   ;;  %p9840_p0 = scmp.ge.s32.totalorder %s13063_s27, 1  ;;  %s13063_s27 = sphi %s13148_s27, %s28_s27  }
   0x6   : > { %p393_p1 = scmp.lt.s32.totalorder %s13063_s27, 3 }
   0x8   : > { %p394_p2 = pnand %p9840_p0, %p393_p1 }
   0x9   : > { %s437_s4 = smul.u32 (!%p394_p2), 98, %s13154_s28  ;;  %p9843_p5 = scmp.ne.s32.totalorder (!%p394_p2), %s13154_s28, 0 }
   0xa   : > { %397 = sbr.rel (%p394_p2) target bundleno = 2069 (0x815), region = 64 }
   0xb   : > { %s443_s29 = smul.u32 (!%p394_p2), 1568, %s13154_s28  ;;  %p438_p3 = scmp.lt.s32.totalorder (!%p394_p2), %s437_s4, 195 }
   0xd   : > { %p444_p4 = scmp.lt.s32.totalorder (!%p394_p2), %s443_s29, 3135 }
  0x11   : > { %s14401_s4 = smov (!%p438_p3, %s437_s4), 195  ;;  %s14403_s29 = smov (!%p444_p4, %s443_s29), 3135 }
  0x12   : > { %s9841_s30 = sshll.u32 %s14401_s4, 2  ;;  %s9842_s17 = sshll.u32 %s14403_s29, 2  ;;  %vm454_vm0 = vcmask (!%p9843_p5), 523264   ;;  %v13065_v1 = vmov (!%p9843_p5), 0.0  }
  0x13   : > { %s13163_s16 = scalar_lea.vmem %s14386_s0, %s9841_s30  ;;  %s13168_s20 = scalar_lea.vmem %s14387_s1, %s9842_s17  ;;  %455 = vst.msk [vmem:[#allocation2] sm:$0xff] (!%p9843_p5), %vm454_vm0, %v13065_v1 }
  0x14   : > { %453 = sbr.rel (%p9843_p5) target bundleno = 27 (0x1b), region = 68 }
  0x1b PF: > { %v12082_v2 = vld [vmem:[%s13168_s20 + $0x40] sm:$0xff]   ;;  %v12086_v6 = vld [vmem:[%s13168_s20 + $0x48] sm:$0xff]   ;;  %v12090_v10 = vld [vmem:[%s13168_s20 + $0x50] sm:$0xff]   ;;  %vm9082_vm1 = vcmask 523264   ;;  %p10726_p6 = scmp.ne.s32.totalorder %s13154_s28, 1 }
  0x1c   : > { %v12083_v3 = vld [vmem:[%s13168_s20 + $0xc0] sm:$0xff]   ;;  %10741 = vmatprep.subr.bf16.mxu0 %v12082_v2  ;;  %v12087_v7 = vld [vmem:[%s13168_s20 + $0xc8] sm:$0xff]   ;;  %v12091_v11 = vld [vmem:[%s13168_s20 + $0xd0] sm:$0xff]   ;;  %vm13067_vm2 = vmmov (!%p10726_p6), 0   ;;  %vm9441_vm3 = vcmask (!%p10726_p6), 25600   ;;  %vm9496_vm4 = vcmask (!%p10726_p6), 1043456  }
  0x1d   : > { %v12084_v4 = vld [vmem:[%s13168_s20] sm:$0xff]   ;;  %10763 = vmatprep.subr.bf16.mxu1 %v12083_v3  ;;  %v12088_v8 = vld [vmem:[%s13168_s20 + $0x8] sm:$0xff]   ;;  %v12092_v12 = vld [vmem:[%s13168_s20 + $0x10] sm:$0xff]   ;;  %vm9616_vm5 = vcmask (!%p10726_p6), 1041409   ;;  %vm9618_vm6 = vcmask (!%p10726_p6), 1043459   ;;  %vm9620_vm7 = vcmask (!%p10726_p6), 1045509  }
  0x1e   : > { %v12085_v5 = vld [vmem:[%s13168_s20 + $0x80] sm:$0xff]   ;;  %10742 = vmatpush3.bf16.msra.mxu0 %v12084_v4  ;;  %v12089_v9 = vld [vmem:[%s13168_s20 + $0x88] sm:$0xff]   ;;  %v12093_v13 = vld [vmem:[%s13168_s20 + $0x90] sm:$0xff]   ;;  %vm9622_vm8 = vcmask (!%p10726_p6), 1047559   ;;  %vm9734_vm9 = vcmask (!%p10726_p6), 123904  }
  0x1f   : > { %10764 = vmatpush3.bf16.msra.mxu1 %v12085_v5  ;;  %10743 = vmatprep.subr.bf16.mxu0 %v12086_v6  ;;  %v12094_v14 = vld [vmem:[%s13168_s20 + $0x58] sm:$0xff]   ;;  %v12098_v18 = vld [vmem:[%s13168_s20 + $0x60] sm:$0xff]   ;;  %v12102_v22 = vld [vmem:[%s13168_s20 + $0x68] sm:$0xff]  }
  0x20   : > { %10765 = vmatprep.subr.bf16.mxu1 %v12087_v7  ;;  %v12095_v15 = vld [vmem:[%s13168_s20 + $0xd8] sm:$0xff]   ;;  %v12099_v19 = vld [vmem:[%s13168_s20 + $0xe0] sm:$0xff]   ;;  %v12103_v23 = vld [vmem:[%s13168_s20 + $0xe8] sm:$0xff]  }
  0x21   : > { %v12096_v16 = vld [vmem:[%s13168_s20 + $0x18] sm:$0xff]   ;;  %v12100_v20 = vld [vmem:[%s13168_s20 + $0x20] sm:$0xff]   ;;  %v12104_v24 = vld [vmem:[%s13168_s20 + $0x28] sm:$0xff]  }
  0x22   : > { %10744 = vmatpush3.bf16.msra.mxu0 %v12088_v8  ;;  %v12097_v17 = vld [vmem:[%s13168_s20 + $0x98] sm:$0xff]   ;;  %v12101_v21 = vld [vmem:[%s13168_s20 + $0xa0] sm:$0xff]   ;;  %v12105_v25 = vld [vmem:[%s13168_s20 + $0xa8] sm:$0xff]  }
  0x23   : > { %10766 = vmatpush3.bf16.msra.mxu1 %v12089_v9  ;;  %10745 = vmatprep.subr.bf16.mxu0 %v12090_v10  ;;  %v12106_v26 = vld [vmem:[%s13168_s20 + $0x70] sm:$0xff]   ;;  %v12110_v30 = vld [vmem:[%s13168_s20 + $0x78] sm:$0xff]   ;;  %v457_v34 = vld [vmem:[%s13163_s16] sm:$0xff] }
  0x24   : > { %10767 = vmatprep.subr.bf16.mxu1 %v12091_v11  ;;  %v12107_v27 = vld [vmem:[%s13168_s20 + $0xf0] sm:$0xff]   ;;  %v12111_v31 = vld [vmem:[%s13168_s20 + $0xf8] sm:$0xff]   ;;  %v458_v35 = vld [vmem:[%s13163_s16 + $0x8] sm:$0xff]  ;;  %v9844_v36 = vcombine.low %v457_v34, %v457_v34  ;;  %v9845_v37 = vcombine.high %v457_v34, %v457_v34 }
  0x25   : > { %v12108_v28 = vld [vmem:[%s13168_s20 + $0x30] sm:$0xff]   ;;  %v12112_v32 = vld [vmem:[%s13168_s20 + $0x38] sm:$0xff]   ;;  %v9846_v38 = vcombine.low %v458_v35, %v458_v35  ;;  %v9847_v39 = vcombine.high %v458_v35, %v458_v35  ;;  %v12118_v40 = vld [vmem:[%s13168_s20 + $0x140] sm:$0xff]  }
  0x26   : > { %10746 = vmatpush3.bf16.msra.mxu0 %v12092_v12  ;;  %v12109_v29 = vld [vmem:[%s13168_s20 + $0xb0] sm:$0xff]   ;;  %v12113_v33 = vld [vmem:[%s13168_s20 + $0xb8] sm:$0xff]   ;;  %v12119_v41 = vld [vmem:[%s13168_s20 + $0x100] sm:$0xff]   ;;  %7153 = vmatprep.mubr.bf16.mxu0 %v9845_v37 }
  0x27   : > { %10768 = vmatpush3.bf16.msra.mxu1 %v12093_v13  ;;  %10747 = vmatprep.subr.bf16.mxu0 %v12094_v14  ;;  %v12120_v42 = vld [vmem:[%s13168_s20 + $0x1c0] sm:$0xff]   ;;  %v12122_v44 = vld [vmem:[%s13168_s20 + $0x148] sm:$0xff]   ;;  %v12126_v48 = vld [vmem:[%s13168_s20 + $0x150] sm:$0xff]  }
  0x28   : > { %10769 = vmatprep.subr.bf16.mxu1 %v12095_v15  ;;  %7193 = vmatprep.mubr.bf16.mxu1 %v9847_v39  ;;  %v12121_v43 = vld [vmem:[%s13168_s20 + $0x180] sm:$0xff]   ;;  %v12123_v45 = vld [vmem:[%s13168_s20 + $0x108] sm:$0xff]   ;;  %v12127_v49 = vld [vmem:[%s13168_s20 + $0x110] sm:$0xff]  }
  0x29   : > { %v12124_v46 = vld [vmem:[%s13168_s20 + $0x1c8] sm:$0xff]   ;;  %v12128_v50 = vld [vmem:[%s13168_s20 + $0x1d0] sm:$0xff]   ;;  %v12130_v52 = vld [vmem:[%s13168_s20 + $0x158] sm:$0xff]  }
  0x2a   : > { %10748 = vmatpush3.bf16.msra.mxu0 %v12096_v16  ;;  %v12125_v47 = vld [vmem:[%s13168_s20 + $0x188] sm:$0xff]   ;;  %v12129_v51 = vld [vmem:[%s13168_s20 + $0x190] sm:$0xff]   ;;  %v12131_v53 = vld [vmem:[%s13168_s20 + $0x118] sm:$0xff]  }
  0x2b   : > { %10770 = vmatpush3.bf16.msra.mxu1 %v12097_v17  ;;  %10749 = vmatprep.subr.bf16.mxu0 %v12098_v18  ;;  %v12132_v54 = vld [vmem:[%s13168_s20 + $0x1d8] sm:$0xff]   ;;  %v12134_v56 = vld [vmem:[%s13168_s20 + $0x160] sm:$0xff]   ;;  %v12138_v60 = vld [vmem:[%s13168_s20 + $0x168] sm:$0xff]  }
  0x2c   : > { %10771 = vmatprep.subr.bf16.mxu1 %v12099_v19  ;;  %v12133_v55 = vld [vmem:[%s13168_s20 + $0x198] sm:$0xff]   ;;  %v12135_v57 = vld [vmem:[%s13168_s20 + $0x120] sm:$0xff]   ;;  %v12139_v61 = vld [vmem:[%s13168_s20 + $0x128] sm:$0xff]  }
  0x2d   : > { %v12136_v58 = vld [vmem:[%s13168_s20 + $0x1e0] sm:$0xff]   ;;  %v12140_v62 = vld [vmem:[%s13168_s20 + $0x1e8] sm:$0xff]   ;;  %v12142_v0 = vld [vmem:[%s13168_s20 + $0x170] sm:$0xff]  }
  0x2e   : > { %10750 = vmatpush3.bf16.msra.mxu0 %v12100_v20  ;;  %v12137_v59 = vld [vmem:[%s13168_s20 + $0x1a0] sm:$0xff]   ;;  %v12141_v63 = vld [vmem:[%s13168_s20 + $0x1a8] sm:$0xff]   ;;  %v12143_v1 = vld [vmem:[%s13168_s20 + $0x130] sm:$0xff]  }
  0x2f   : > { %10772 = vmatpush3.bf16.msra.mxu1 %v12101_v21  ;;  %10751 = vmatprep.subr.bf16.mxu0 %v12102_v22  ;;  %v12144_v2 = vld [vmem:[%s13168_s20 + $0x1f0] sm:$0xff]   ;;  %v12146_v4 = vld [vmem:[%s13168_s20 + $0x178] sm:$0xff]   ;;  %v12152_v11 = vld [vmem:[%s13168_s20 + $0x240] sm:$0xff]  }
  0x30   : > { %10773 = vmatprep.subr.bf16.mxu1 %v12103_v23  ;;  %v12145_v3 = vld [vmem:[%s13168_s20 + $0x1b0] sm:$0xff]   ;;  %v12147_v5 = vld [vmem:[%s13168_s20 + $0x138] sm:$0xff]   ;;  %v12155_v15 = vld [vmem:[%s13168_s20 + $0x200] sm:$0xff]  }
  0x31   : > { %v12148_v6 = vld [vmem:[%s13168_s20 + $0x1f8] sm:$0xff]   ;;  %v459_v7 = vld [vmem:[%s13163_s16 + $0x10] sm:$0xff]  ;;  %v12156_v16 = vld [vmem:[%s13168_s20 + $0x2c0] sm:$0xff]  }
  0x32   : > { %10752 = vmatpush3.bf16.msra.mxu0 %v12104_v24  ;;  %v9849_v8 = vcombine.high %v459_v7, %v459_v7  ;;  %v12151_v9 = vld [vmem:[%s13168_s20 + $0x1b8] sm:$0xff]   ;;  %v9848_v10 = vcombine.low %v459_v7, %v459_v7  ;;  %v12157_v17 = vld [vmem:[%s13168_s20 + $0x280] sm:$0xff]   ;;  %v12158_v18 = vld [vmem:[%s13168_s20 + $0x248] sm:$0xff]  }
  0x33   : > { %10774 = vmatpush3.bf16.msra.mxu1 %v12105_v25  ;;  %10753 = vmatprep.subr.bf16.mxu0 %v12106_v26  ;;  %v460_v12 = vld [vmem:[%s13163_s16 + $0x18] sm:$0xff]  ;;  %v12159_v19 = vld [vmem:[%s13168_s20 + $0x208] sm:$0xff]   ;;  %v12162_v22 = vld [vmem:[%s13168_s20 + $0x250] sm:$0xff]  }
  0x34   : > { %10775 = vmatprep.subr.bf16.mxu1 %v12107_v27  ;;  %v9850_v13 = vcombine.low %v460_v12, %v460_v12  ;;  %v9851_v14 = vcombine.high %v460_v12, %v460_v12  ;;  %v12160_v20 = vld [vmem:[%s13168_s20 + $0x2c8] sm:$0xff]   ;;  %v12163_v23 = vld [vmem:[%s13168_s20 + $0x210] sm:$0xff]   ;;  %v12166_v26 = vld [vmem:[%s13168_s20 + $0x258] sm:$0xff]  }
  0x35   : > { %v12161_v21 = vld [vmem:[%s13168_s20 + $0x288] sm:$0xff]   ;;  %v12164_v24 = vld [vmem:[%s13168_s20 + $0x2d0] sm:$0xff]   ;;  %v12167_v27 = vld [vmem:[%s13168_s20 + $0x218] sm:$0xff]  }
  0x36   : > { %10754 = vmatpush3.bf16.msra.mxu0 %v12108_v28  ;;  %v12165_v25 = vld [vmem:[%s13168_s20 + $0x290] sm:$0xff]   ;;  %v12168_v28 = vld [vmem:[%s13168_s20 + $0x2d8] sm:$0xff]   ;;  %v12174_v34 = vld [vmem:[%s13168_s20 + $0x268] sm:$0xff]  }
  0x37   : > { %10776 = vmatpush3.bf16.msra.mxu1 %v12109_v29  ;;  %10755 = vmatprep.subr.bf16.mxu0 %v12110_v30  ;;  %v12169_v29 = vld [vmem:[%s13168_s20 + $0x298] sm:$0xff]   ;;  %v12170_v30 = vld [vmem:[%s13168_s20 + $0x260] sm:$0xff]   ;;  %v12175_v35 = vld [vmem:[%s13168_s20 + $0x228] sm:$0xff]  }
  0x38   : > { %10777 = vmatprep.subr.bf16.mxu1 %v12111_v31  ;;  %v12171_v31 = vld [vmem:[%s13168_s20 + $0x220] sm:$0xff]   ;;  %v12177_v37 = vld [vmem:[%s13168_s20 + $0x2a8] sm:$0xff]   ;;  %v12179_v39 = vld [vmem:[%s13168_s20 + $0x230] sm:$0xff]  }
  0x39   : > { %v12209_v7 = vld [vmem:[%s13168_s20 + $0x3a0] sm:$0xff]   ;;  %v12214_v12 = vld [vmem:[%s13168_s20 + $0x370] sm:$0xff]  }
  0x3a   : > { %10756 = vmatpush3.bf16.msra.mxu0 %v12112_v32  ;;  %v12172_v32 = vld [vmem:[%s13168_s20 + $0x2e0] sm:$0xff]  }
  0x3b   : > { %10778 = vmatpush3.bf16.msra.mxu1 %v12113_v33  ;;  %10785 = vmatprep.subr.bf16.mxu0 %v12118_v40  ;;  %v12173_v33 = vld [vmem:[%s13168_s20 + $0x2a0] sm:$0xff]   ;;  %v12180_v40 = vld [vmem:[%s13168_s20 + $0x2f0] sm:$0xff]  }
  0x3c   : > { %10807 = vmatprep.subr.bf16.mxu1 %v12120_v42  ;;  %v12182_v42 = vld [vmem:[%s13168_s20 + $0x278] sm:$0xff]  }
  0x3d   : > { %7154 = vmatmul.mubr.bf16.vlgmr.msra.gmra.mrb[0].mxu0 %v9844_v36  ;;  %v12176_v36 = vld [vmem:[%s13168_s20 + $0x2e8] sm:$0xff]  }
  0x3e   : > { %7194 = vmatmul.mubr.bf16.vlgmr.msra.gmra.mrb[0].mxu1 %v9846_v38  ;;  %10786 = vmatpush3.bf16.msra.mxu0 %v12119_v41  ;;  %v12178_v38 = vld [vmem:[%s13168_s20 + $0x270] sm:$0xff]  }
  0x3f   : > { %10808 = vmatpush3.bf16.msra.mxu1 %v12121_v43  ;;  %10787 = vmatprep.subr.bf16.mxu0 %v12122_v44  ;;  %v12181_v41 = vld [vmem:[%s13168_s20 + $0x2b0] sm:$0xff]   ;;  %v12183_v43 = vld [vmem:[%s13168_s20 + $0x238] sm:$0xff]  }
  0x40   : > { %10809 = vmatprep.subr.bf16.mxu1 %v12124_v46  ;;  %7233 = vmatprep.mubr.bf16.mxu0 %v9849_v8  ;;  %v12184_v44 = vld [vmem:[%s13168_s20 + $0x2f8] sm:$0xff]   ;;  %v12210_v8 = vld [vmem:[%s13168_s20 + $0x368] sm:$0xff]  }
  0x41   : > { %7273 = vmatprep.mubr.bf16.mxu1 %v9851_v14  ;;  %v12216_v14 = vld [vmem:[%s13168_s20 + $0x3f0] sm:$0xff]  }
  0x42   : > { %10788 = vmatpush3.bf16.msra.mxu0 %v12123_v45  ;;  %v461_v45 = vld [vmem:[%s13163_s16 + $0x20] sm:$0xff] }
  0x43   : > { %10810 = vmatpush3.bf16.msra.mxu1 %v12125_v47  ;;  %10789 = vmatprep.subr.bf16.mxu0 %v12126_v48  ;;  %v9852_v46 = vcombine.low %v461_v45, %v461_v45  ;;  %v9853_v47 = vcombine.high %v461_v45, %v461_v45  ;;  %v12187_v48 = vld [vmem:[%s13168_s20 + $0x2b8] sm:$0xff]   ;;  %v12245_v45 = vld [vmem:[%s13168_s20 + $0x4a0] sm:$0xff]  }
  0x44   : > { %10811 = vmatprep.subr.bf16.mxu1 %v12128_v50  ;;  %v462_v50 = vld [vmem:[%s13163_s16 + $0x28] sm:$0xff] }
  0x46   : > { %10790 = vmatpush3.bf16.msra.mxu0 %v12127_v49  ;;  %v12188_v49 = vld [vmem:[%s13168_s20 + $0x340] sm:$0xff]  }
  0x47   : > { %10812 = vmatpush3.bf16.msra.mxu1 %v12129_v51  ;;  %10791 = vmatprep.subr.bf16.mxu0 %v12130_v52  ;;  %v9854_v51 = vcombine.low %v462_v50, %v462_v50  ;;  %v9855_v52 = vcombine.high %v462_v50, %v462_v50  ;;  %v12250_v50 = vld [vmem:[%s13168_s20 + $0x470] sm:$0xff]  }
  0x48   : > { %10813 = vmatprep.subr.bf16.mxu1 %v12132_v54  ;;  %v12192_v54 = vld [vmem:[%s13168_s20 + $0x3c0] sm:$0xff]  }
  0x4a   : > { %10792 = vmatpush3.bf16.msra.mxu0 %v12131_v53  ;;  %v12191_v53 = vld [vmem:[%s13168_s20 + $0x300] sm:$0xff]  }
  0x4b   : > { %10814 = vmatpush3.bf16.msra.mxu1 %v12133_v55  ;;  %10793 = vmatprep.subr.bf16.mxu0 %v12134_v56  ;;  %v12193_v55 = vld [vmem:[%s13168_s20 + $0x380] sm:$0xff]   ;;  %v12194_v56 = vld [vmem:[%s13168_s20 + $0x348] sm:$0xff]  }
  0x4c   : > { %10815 = vmatprep.subr.bf16.mxu1 %v12136_v58  ;;  %v12196_v58 = vld [vmem:[%s13168_s20 + $0x3c8] sm:$0xff]  }
  0x4e   : > { %10794 = vmatpush3.bf16.msra.mxu0 %v12135_v57  ;;  %v12195_v57 = vld [vmem:[%s13168_s20 + $0x308] sm:$0xff]  }
  0x4f   : > { %10816 = vmatpush3.bf16.msra.mxu1 %v12137_v59  ;;  %10795 = vmatprep.subr.bf16.mxu0 %v12138_v60  ;;  %v12197_v59 = vld [vmem:[%s13168_s20 + $0x388] sm:$0xff]   ;;  %v12198_v60 = vld [vmem:[%s13168_s20 + $0x350] sm:$0xff]  }
  0x50   : > { %10817 = vmatprep.subr.bf16.mxu1 %v12140_v62  ;;  %v12200_v62 = vld [vmem:[%s13168_s20 + $0x3d0] sm:$0xff]  }
  0x52   : > { %10796 = vmatpush3.bf16.msra.mxu0 %v12139_v61  ;;  %v12199_v61 = vld [vmem:[%s13168_s20 + $0x310] sm:$0xff]  }
  0x53   : > { %10818 = vmatpush3.bf16.msra.mxu1 %v12141_v63  ;;  %10797 = vmatprep.subr.bf16.mxu0 %v12142_v0  ;;  %v12201_v63 = vld [vmem:[%s13168_s20 + $0x390] sm:$0xff]   ;;  %v12202_v0 = vld [vmem:[%s13168_s20 + $0x358] sm:$0xff]  }
  0x54   : > { %10819 = vmatprep.subr.bf16.mxu1 %v12144_v2  ;;  %v12204_v2 = vld [vmem:[%s13168_s20 + $0x3d8] sm:$0xff]  }
  0x56   : > { %10798 = vmatpush3.bf16.msra.mxu0 %v12143_v1  ;;  %v12203_v1 = vld [vmem:[%s13168_s20 + $0x318] sm:$0xff]  }
  0x57   : > { %10820 = vmatpush3.bf16.msra.mxu1 %v12145_v3  ;;  %10799 = vmatprep.subr.bf16.mxu0 %v12146_v4  ;;  %v12205_v3 = vld [vmem:[%s13168_s20 + $0x398] sm:$0xff]   ;;  %v12206_v4 = vld [vmem:[%s13168_s20 + $0x360] sm:$0xff]  }
  0x58   : > { %10821 = vmatprep.subr.bf16.mxu1 %v12148_v6  ;;  %v12208_v6 = vld [vmem:[%s13168_s20 + $0x3e0] sm:$0xff]  }
  0x5a   : > { %10800 = vmatpush3.bf16.msra.mxu0 %v12147_v5  ;;  %v12207_v5 = vld [vmem:[%s13168_s20 + $0x320] sm:$0xff]  }
  0x5b   : > { %10822 = vmatpush3.bf16.msra.mxu1 %v12151_v9  ;;  %10829 = vmatprep.subr.bf16.mxu0 %v12152_v11  ;;  %v12211_v9 = vld [vmem:[%s13168_s20 + $0x328] sm:$0xff]  }
  0x5c   : > { %10851 = vmatprep.subr.bf16.mxu1 %v12156_v16  ;;  %v12213_v11 = vld [vmem:[%s13168_s20 + $0x3a8] sm:$0xff]   ;;  %v12218_v16 = vld [vmem:[%s13168_s20 + $0x378] sm:$0xff]  }
  0x5d   : > { %7234 = vmatmul.mubr.bf16.vlgmr.msra.gmra.mrb[4].mxu0 %v9848_v10  ;;  %v12212_v10 = vld [vmem:[%s13168_s20 + $0x3e8] sm:$0xff]  }
  0x5e   : > { %10830 = vmatpush3.bf16.msra.mxu0 %v12155_v15  ;;  %7274 = vmatmul.mubr.bf16.vlgmr.msra.gmra.mrb[4].mxu1 %v9850_v13  ;;  %v12215_v13 = vld [vmem:[%s13168_s20 + $0x330] sm:$0xff]  }
  0x5f   : > { %10852 = vmatpush3.bf16.msra.mxu1 %v12157_v17  ;;  %10831 = vmatprep.subr.bf16.mxu0 %v12158_v18  ;;  %v12217_v15 = vld [vmem:[%s13168_s20 + $0x3b0] sm:$0xff]   ;;  %v12219_v17 = vld [vmem:[%s13168_s20 + $0x338] sm:$0xff]  }
  0x60   : > { %10853 = vmatprep.subr.bf16.mxu1 %v12160_v20  ;;  %7313 = vmatprep.mubr.bf16.mxu0 %v9853_v47  ;;  %v12220_v18 = vld [vmem:[%s13168_s20 + $0x3f8] sm:$0xff]   ;;  %v12247_v47 = vld [vmem:[%s13168_s20 + $0x428] sm:$0xff]  }
  0x61   : > { %7353 = vmatprep.mubr.bf16.mxu1 %v9855_v52  ;;  %v12252_v52 = vld [vmem:[%s13168_s20 + $0x4f0] sm:$0xff]  }
  0x62   : > { %10832 = vmatpush3.bf16.msra.mxu0 %v12159_v19  ;;  %v463_v19 = vld [vmem:[%s13163_s16 + $0x30] sm:$0xff] }
  0x63   : > { %10854 = vmatpush3.bf16.msra.mxu1 %v12161_v21  ;;  %10833 = vmatprep.subr.bf16.mxu0 %v12162_v22  ;;  %v9856_v20 = vcombine.low %v463_v19, %v463_v19  ;;  %v9857_v21 = vcombine.high %v463_v19, %v463_v19  ;;  %v12223_v22 = vld [vmem:[%s13168_s20 + $0x3b8] sm:$0xff]   ;;  %v12281_v19 = vld [vmem:[%s13168_s20 + $0x5a0] sm:$0xff]  }
  0x64   : > { %10855 = vmatprep.subr.bf16.mxu1 %v12164_v24  ;;  %v464_v24 = vld [vmem:[%s13163_s16 + $0x38] sm:$0xff] }
  0x66   : > { %10834 = vmatpush3.bf16.msra.mxu0 %v12163_v23  ;;  %v12224_v23 = vld [vmem:[%s13168_s20 + $0x440] sm:$0xff]  }
  0x67   : > { %10856 = vmatpush3.bf16.msra.mxu1 %v12165_v25  ;;  %10835 = vmatprep.subr.bf16.mxu0 %v12166_v26  ;;  %v9858_v25 = vcombine.low %v464_v24, %v464_v24  ;;  %v9859_v26 = vcombine.high %v464_v24, %v464_v24  ;;  %v12286_v24 = vld [vmem:[%s13168_s20 + $0x570] sm:$0xff]  }
  0x68   : > { %10857 = vmatprep.subr.bf16.mxu1 %v12168_v28  ;;  %v12228_v28 = vld [vmem:[%s13168_s20 + $0x4c0] sm:$0xff]  }
  0x6a   : > { %10836 = vmatpush3.bf16.msra.mxu0 %v12167_v27  ;;  %v12227_v27 = vld [vmem:[%s13168_s20 + $0x400] sm:$0xff]  }
  0x6b   : > { %10858 = vmatpush3.bf16.msra.mxu1 %v12169_v29  ;;  %10837 = vmatprep.subr.bf16.mxu0 %v12170_v30  ;;  %v12229_v29 = vld [vmem:[%s13168_s20 + $0x480] sm:$0xff]   ;;  %v12230_v30 = vld [vmem:[%s13168_s20 + $0x448] sm:$0xff]  }
  0x6c   : > { %10859 = vmatprep.subr.bf16.mxu1 %v12172_v32  ;;  %v12232_v32 = vld [vmem:[%s13168_s20 + $0x4c8] sm:$0xff]  }
  0x6e   : > { %10838 = vmatpush3.bf16.msra.mxu0 %v12171_v31  ;;  %v12231_v31 = vld [vmem:[%s13168_s20 + $0x408] sm:$0xff]  }
  0x6f   : > { %10860 = vmatpush3.bf16.msra.mxu1 %v12173_v33  ;;  %10839 = vmatprep.subr.bf16.mxu0 %v12174_v34  ;;  %v12233_v33 = vld [vmem:[%s13168_s20 + $0x488] sm:$0xff]   ;;  %v12234_v34 = vld [vmem:[%s13168_s20 + $0x450] sm:$0xff]  }
  0x70   : > { %10861 = vmatprep.subr.bf16.mxu1 %v12176_v36  ;;  %v12236_v36 = vld [vmem:[%s13168_s20 + $0x4d0] sm:$0xff]  }
  0x72   : > { %10840 = vmatpush3.bf16.msra.mxu0 %v12175_v35  ;;  %v12235_v35 = vld [vmem:[%s13168_s20 + $0x410] sm:$0xff]  }
  0x73   : > { %10862 = vmatpush3.bf16.msra.mxu1 %v12177_v37  ;;  %10841 = vmatprep.subr.bf16.mxu0 %v12178_v38  ;;  %v12237_v37 = vld [vmem:[%s13168_s20 + $0x490] sm:$0xff]   ;;  %v12238_v38 = vld [vmem:[%s13168_s20 + $0x458] sm:$0xff]  }
  0x74   : > { %10863 = vmatprep.subr.bf16.mxu1 %v12180_v40  ;;  %v12240_v40 = vld [vmem:[%s13168_s20 + $0x4d8] sm:$0xff]  }
  0x76   : > { %10842 = vmatpush3.bf16.msra.mxu0 %v12179_v39  ;;  %v12239_v39 = vld [vmem:[%s13168_s20 + $0x418] sm:$0xff]  }
  0x77   : > { %10864 = vmatpush3.bf16.msra.mxu1 %v12181_v41  ;;  %10843 = vmatprep.subr.bf16.mxu0 %v12182_v42  ;;  %v12241_v41 = vld [vmem:[%s13168_s20 + $0x498] sm:$0xff]   ;;  %v12242_v42 = vld [vmem:[%s13168_s20 + $0x460] sm:$0xff]  }
  0x78   : > { %10865 = vmatprep.subr.bf16.mxu1 %v12184_v44  ;;  %v12244_v44 = vld [vmem:[%s13168_s20 + $0x4e0] sm:$0xff]  }
  0x7a   : > { %10844 = vmatpush3.bf16.msra.mxu0 %v12183_v43  ;;  %v12243_v43 = vld [vmem:[%s13168_s20 + $0x420] sm:$0xff]  }
  0x7b   : > { %10866 = vmatpush3.bf16.msra.mxu1 %v12187_v48  ;;  %10873 = vmatprep.subr.bf16.mxu0 %v12188_v49  ;;  %v12248_v48 = vld [vmem:[%s13168_s20 + $0x4e8] sm:$0xff]  }
  0x7c   : > { %10895 = vmatprep.subr.bf16.mxu1 %v12192_v54  ;;  %v12249_v49 = vld [vmem:[%s13168_s20 + $0x4a8] sm:$0xff]   ;;  %v12254_v54 = vld [vmem:[%s13168_s20 + $0x478] sm:$0xff]  }
  0x7d   : > { %7314 = vmatmul.mubr.bf16.vlgmr.msra.gmra.mrb[8].mxu0 %v9852_v46  ;;  %v12246_v46 = vld [vmem:[%s13168_s20 + $0x468] sm:$0xff]  }
  0x7e   : > { %10874 = vmatpush3.bf16.msra.mxu0 %v12191_v53  ;;  %7354 = vmatmul.mubr.bf16.vlgmr.msra.gmra.mrb[8].mxu1 %v9854_v51  ;;  %v12251_v51 = vld [vmem:[%s13168_s20 + $0x430] sm:$0xff]  }
  0x7f   : > { %10896 = vmatpush3.bf16.msra.mxu1 %v12193_v55  ;;  %10875 = vmatprep.subr.bf16.mxu0 %v12194_v56  ;;  %v12253_v53 = vld [vmem:[%s13168_s20 + $0x4b0] sm:$0xff]   ;;  %v12255_v55 = vld [vmem:[%s13168_s20 + $0x438] sm:$0xff]  }
  0x80   : > { %10897 = vmatprep.subr.bf16.mxu1 %v12196_v58  ;;  %7393 = vmatprep.mubr.bf16.mxu0 %v9857_v21  ;;  %v12256_v56 = vld [vmem:[%s13168_s20 + $0x4f8] sm:$0xff]   ;;  %v12283_v21 = vld [vmem:[%s13168_s20 + $0x528] sm:$0xff]  }
  0x81   : > { %7433 = vmatprep.mubr.bf16.mxu1 %v9859_v26  ;;  %v12288_v26 = vld [vmem:[%s13168_s20 + $0x5f0] sm:$0xff]  }
  0x82   : > { %10876 = vmatpush3.bf16.msra.mxu0 %v12195_v57  ;;  %v465_v57 = vld [vmem:[%s13163_s16 + $0x40] sm:$0xff] }
  0x83   : > { %10898 = vmatpush3.bf16.msra.mxu1 %v12197_v59  ;;  %10877 = vmatprep.subr.bf16.mxu0 %v12198_v60  ;;  %v9860_v58 = vcombine.low %v465_v57, %v465_v57  ;;  %v9861_v59 = vcombine.high %v465_v57, %v465_v57  ;;  %v12259_v60 = vld [vmem:[%s13168_s20 + $0x4b8] sm:$0xff]   ;;  %v12317_v57 = vld [vmem:[%s13168_s20 + $0x6a0] sm:$0xff]  }
  0x84   : > { %10899 = vmatprep.subr.bf16.mxu1 %v12200_v62  ;;  %v466_v62 = vld [vmem:[%s13163_s16 + $0x48] sm:$0xff] }
  0x86   : > { %10878 = vmatpush3.bf16.msra.mxu0 %v12199_v61  ;;  %v12260_v61 = vld [vmem:[%s13168_s20 + $0x540] sm:$0xff]  }
  0x87   : > { %10900 = vmatpush3.bf16.msra.mxu1 %v12201_v63  ;;  %10879 = vmatprep.subr.bf16.mxu0 %v12202_v0  ;;  %v9862_v63 = vcombine.low %v466_v62, %v466_v62  ;;  %v9863_v0 = vcombine.high %v466_v62, %v466_v62  ;;  %v12322_v62 = vld [vmem:[%s13168_s20 + $0x670] sm:$0xff]  }
  0x88   : > { %10901 = vmatprep.subr.bf16.mxu1 %v12204_v2  ;;  %v12264_v2 = vld [vmem:[%s13168_s20 + $0x5c0] sm:$0xff]  }
  0x8a   : > { %10880 = vmatpush3.bf16.msra.mxu0 %v12203_v1  ;;  %v12263_v1 = vld [vmem:[%s13168_s20 + $0x500] sm:$0xff]  }
  0x8b   : > { %10902 = vmatpush3.bf16.msra.mxu1 %v12205_v3  ;;  %10881 = vmatprep.subr.bf16.mxu0 %v12206_v4  ;;  %v12265_v3 = vld [vmem:[%s13168_s20 + $0x580] sm:$0xff]   ;;  %v12266_v4 = vld [vmem:[%s13168_s20 + $0x548] sm:$0xff]  }
  0x8c   : > { %10903 = vmatprep.subr.bf16.mxu1 %v12208_v6  ;;  %v12268_v6 = vld [vmem:[%s13168_s20 + $0x5c8] sm:$0xff]  }
  0x8e   : > { %10882 = vmatpush3.bf16.msra.mxu0 %v12207_v5  ;;  %v12267_v5 = vld [vmem:[%s13168_s20 + $0x508] sm:$0xff]  }
  0x8f   : > { %10904 = vmatpush3.bf16.msra.mxu1 %v12209_v7  ;;  %10883 = vmatprep.subr.bf16.mxu0 %v12210_v8  ;;  %v12269_v7 = vld [vmem:[%s13168_s20 + $0x588] sm:$0xff]   ;;  %v12270_v8 = vld [vmem:[%s13168_s20 + $0x550] sm:$0xff]  }
  0x90   : > { %10905 = vmatprep.subr.bf16.mxu1 %v12212_v10  ;;  %v12272_v10 = vld [vmem:[%s13168_s20 + $0x5d0] sm:$0xff]  }
  0x92   : > { %10884 = vmatpush3.bf16.msra.mxu0 %v12211_v9  ;;  %v12271_v9 = vld [vmem:[%s13168_s20 + $0x510] sm:$0xff]  }
  0x93   : > { %10906 = vmatpush3.bf16.msra.mxu1 %v12213_v11  ;;  %10885 = vmatprep.subr.bf16.mxu0 %v12214_v12  ;;  %v12273_v11 = vld [vmem:[%s13168_s20 + $0x590] sm:$0xff]   ;;  %v12274_v12 = vld [vmem:[%s13168_s20 + $0x558] sm:$0xff]  }
  0x94   : > { %10907 = vmatprep.subr.bf16.mxu1 %v12216_v14  ;;  %v12276_v14 = vld [vmem:[%s13168_s20 + $0x5d8] sm:$0xff]  }
  0x96   : > { %10886 = vmatpush3.bf16.msra.mxu0 %v12215_v13  ;;  %v12275_v13 = vld [vmem:[%s13168_s20 + $0x518] sm:$0xff]  }
  0x97   : > { %10908 = vmatpush3.bf16.msra.mxu1 %v12217_v15  ;;  %10887 = vmatprep.subr.bf16.mxu0 %v12218_v16  ;;  %v12277_v15 = vld [vmem:[%s13168_s20 + $0x598] sm:$0xff]   ;;  %v12278_v16 = vld [vmem:[%s13168_s20 + $0x560] sm:$0xff]  }
  0x98   : > { %10909 = vmatprep.subr.bf16.mxu1 %v12220_v18  ;;  %v12280_v18 = vld [vmem:[%s13168_s20 + $0x5e0] sm:$0xff]  }
  0x9a   : > { %10888 = vmatpush3.bf16.msra.mxu0 %v12219_v17  ;;  %v12279_v17 = vld [vmem:[%s13168_s20 + $0x520] sm:$0xff]  }
  0x9b   : > { %10910 = vmatpush3.bf16.msra.mxu1 %v12223_v22  ;;  %10917 = vmatprep.subr.bf16.mxu0 %v12224_v23  ;;  %v12284_v22 = vld [vmem:[%s13168_s20 + $0x5e8] sm:$0xff]  }
  0x9c   : > { %10939 = vmatprep.subr.bf16.mxu1 %v12228_v28  ;;  %v12285_v23 = vld [vmem:[%s13168_s20 + $0x5a8] sm:$0xff]   ;;  %v12290_v28 = vld [vmem:[%s13168_s20 + $0x578] sm:$0xff]  }
  0x9d   : > { %7394 = vmatmul.mubr.bf16.vlgmr.msra.gmra.mrb[12].mxu0 %v9856_v20  ;;  %v12282_v20 = vld [vmem:[%s13168_s20 + $0x568] sm:$0xff]  }
  0x9e   : > { %10918 = vmatpush3.bf16.msra.mxu0 %v12227_v27  ;;  %7434 = vmatmul.mubr.bf16.vlgmr.msra.gmra.mrb[12].mxu1 %v9858_v25  ;;  %v12287_v25 = vld [vmem:[%s13168_s20 + $0x530] sm:$0xff]  }
  0x9f   : > { %10940 = vmatpush3.bf16.msra.mxu1 %v12229_v29  ;;  %10919 = vmatprep.subr.bf16.mxu0 %v12230_v30  ;;  %v12289_v27 = vld [vmem:[%s13168_s20 + $0x5b0] sm:$0xff]   ;;  %v12291_v29 = vld [vmem:[%s13168_s20 + $0x538] sm:$0xff]  }
  0xa0   : > { %10941 = vmatprep.subr.bf16.mxu1 %v12232_v32  ;;  %7473 = vmatprep.mubr.bf16.mxu0 %v9861_v59  ;;  %v12292_v30 = vld [vmem:[%s13168_s20 + $0x5f8] sm:$0xff]   ;;  %v12319_v59 = vld [vmem:[%s13168_s20 + $0x628] sm:$0xff]  }
  0xa1   : > { %7513 = vmatprep.mubr.bf16.mxu1 %v9863_v0  ;;  %v12324_v0 = vld [vmem:[%s13168_s20 + $0x6f0] sm:$0xff]  }
  0xa2   : > { %10920 = vmatpush3.bf16.msra.mxu0 %v12231_v31  ;;  %v467_v31 = vld [vmem:[%s13163_s16 + $0x50] sm:$0xff] }
  0xa3   : > { %10942 = vmatpush3.bf16.msra.mxu1 %v12233_v33  ;;  %10921 = vmatprep.subr.bf16.mxu0 %v12234_v34  ;;  %v9864_v32 = vcombine.low %v467_v31, %v467_v31  ;;  %v9865_v33 = vcombine.high %v467_v31, %v467_v31  ;;  %v12295_v34 = vld [vmem:[%s13168_s20 + $0x5b8] sm:$0xff]  }
  0xa4   : > { %10943 = vmatprep.subr.bf16.mxu1 %v12236_v36  ;;  %v468_v36 = vld [vmem:[%s13163_s16 + $0x58] sm:$0xff] }
  0xa6   : > { %10922 = vmatpush3.bf16.msra.mxu0 %v12235_v35  ;;  %v12296_v35 = vld [vmem:[%s13168_s20 + $0x640] sm:$0xff]  }
  0xa7   : > { %10944 = vmatpush3.bf16.msra.mxu1 %v12237_v37  ;;  %10923 = vmatprep.subr.bf16.mxu0 %v12238_v38  ;;  %v9866_v37 = vcombine.low %v468_v36, %v468_v36  ;;  %v9867_v38 = vcombine.high %v468_v36, %v468_v36 }
  0xa8   : > { %10945 = vmatprep.subr.bf16.mxu1 %v12240_v40  ;;  %v12300_v40 = vld [vmem:[%s13168_s20 + $0x6c0] sm:$0xff]  }
  0xaa   : > { %10924 = vmatpush3.bf16.msra.mxu0 %v12239_v39  ;;  %v12299_v39 = vld [vmem:[%s13168_s20 + $0x600] sm:$0xff]  }
  0xab   : > { %10946 = vmatpush3.bf16.msra.mxu1 %v12241_v41  ;;  %10925 = vmatprep.subr.bf16.mxu0 %v12242_v42  ;;  %v12301_v41 = vld [vmem:[%s13168_s20 + $0x680] sm:$0xff]   ;;  %v12302_v42 = vld [vmem:[%s13168_s20 + $0x648] sm:$0xff]  }
  0xac   : > { %10947 = vmatprep.subr.bf16.mxu1 %v12244_v44  ;;  %v12304_v44 = vld [vmem:[%s13168_s20 + $0x6c8] sm:$0xff]  }
  0xae   : > { %10926 = vmatpush3.bf16.msra.mxu0 %v12243_v43  ;;  %v12303_v43 = vld [vmem:[%s13168_s20 + $0x608] sm:$0xff]  }
  0xaf   : > { %10948 = vmatpush3.bf16.msra.mxu1 %v12245_v45  ;;  %10927 = vmatprep.subr.bf16.mxu0 %v12246_v46  ;;  %v12305_v45 = vld [vmem:[%s13168_s20 + $0x688] sm:$0xff]   ;;  %v12306_v46 = vld [vmem:[%s13168_s20 + $0x650] sm:$0xff]  }
  0xb0   : > { %10949 = vmatprep.subr.bf16.mxu1 %v12248_v48  ;;  %v12308_v48 = vld [vmem:[%s13168_s20 + $0x6d0] sm:$0xff]  }
  0xb2   : > { %10928 = vmatpush3.bf16.msra.mxu0 %v12247_v47  ;;  %v12307_v47 = vld [vmem:[%s13168_s20 + $0x610] sm:$0xff]  }
  0xb3   : > { %10950 = vmatpush3.bf16.msra.mxu1 %v12249_v49  ;;  %10929 = vmatprep.subr.bf16.mxu0 %v12250_v50  ;;  %v12309_v49 = vld [vmem:[%s13168_s20 + $0x690] sm:$0xff]   ;;  %v12310_v50 = vld [vmem:[%s13168_s20 + $0x658] sm:$0xff]  }
  0xb4   : > { %10951 = vmatprep.subr.bf16.mxu1 %v12252_v52  ;;  %v12312_v52 = vld [vmem:[%s13168_s20 + $0x6d8] sm:$0xff]  }
  0xb6   : > { %10930 = vmatpush3.bf16.msra.mxu0 %v12251_v51  ;;  %v12311_v51 = vld [vmem:[%s13168_s20 + $0x618] sm:$0xff]  }
  0xb7   : > { %10952 = vmatpush3.bf16.msra.mxu1 %v12253_v53  ;;  %10931 = vmatprep.subr.bf16.mxu0 %v12254_v54  ;;  %v12313_v53 = vld [vmem:[%s13168_s20 + $0x698] sm:$0xff]   ;;  %v12314_v54 = vld [vmem:[%s13168_s20 + $0x660] sm:$0xff]  }
  0xb8   : > { %10953 = vmatprep.subr.bf16.mxu1 %v12256_v56  ;;  %v12316_v56 = vld [vmem:[%s13168_s20 + $0x6e0] sm:$0xff]  }
  0xba   : > { %10932 = vmatpush3.bf16.msra.mxu0 %v12255_v55  ;;  %v12315_v55 = vld [vmem:[%s13168_s20 + $0x620] sm:$0xff]  }
  0xbb   : > { %10954 = vmatpush3.bf16.msra.mxu1 %v12259_v60  ;;  %10961 = vmatprep.subr.bf16.mxu0 %v12260_v61  ;;  %v12320_v60 = vld [vmem:[%s13168_s20 + $0x6e8] sm:$0xff]  }
  0xbc   : > { %10983 = vmatprep.subr.bf16.mxu1 %v12264_v2  ;;  %v12321_v61 = vld [vmem:[%s13168_s20 + $0x6a8] sm:$0xff]   ;;  %v12326_v2 = vld [vmem:[%s13168_s20 + $0x678] sm:$0xff]  }
  0xbd   : > { %7474 = vmatmul.mubr.bf16.vlgmr.msra.gmra.mrb[16].mxu0 %v9860_v58  ;;  %v12318_v58 = vld [vmem:[%s13168_s20 + $0x668] sm:$0xff]  }
  0xbe   : > { %10962 = vmatpush3.bf16.msra.mxu0 %v12263_v1  ;;  %7514 = vmatmul.mubr.bf16.vlgmr.msra.gmra.mrb[16].mxu1 %v9862_v63  ;;  %v12323_v63 = vld [vmem:[%s13168_s20 + $0x630] sm:$0xff]  }
  0xbf   : > { %10984 = vmatpush3.bf16.msra.mxu1 %v12265_v3  ;;  %10963 = vmatprep.subr.bf16.mxu0 %v12266_v4  ;;  %v12325_v1 = vld [vmem:[%s13168_s20 + $0x6b0] sm:$0xff]   ;;  %v12327_v3 = vld [vmem:[%s13168_s20 + $0x638] sm:$0xff]  }
  0xc0   : > { %10985 = vmatprep.subr.bf16.mxu1 %v12268_v6  ;;  %7553 = vmatprep.mubr.bf16.mxu0 %v9865_v33  ;;  %v12328_v4 = vld [vmem:[%s13168_s20 + $0x6f8] sm:$0xff]   ;;  %v12353_v33 = vld [vmem:[%s13168_s20 + $0x7a0] sm:$0xff]  }
  0xc1   : > { %7593 = vmatprep.mubr.bf16.mxu1 %v9867_v38  ;;  %v12354_v38 = vld [vmem:[%s13168_s20 + $0x768] sm:$0xff]  }
  0xc2   : > { %10964 = vmatpush3.bf16.msra.mxu0 %v12267_v5  ;;  %v469_v5 = vld [vmem:[%s13163_s16 + $0x60] sm:$0xff] }
  0xc3   : > { %10986 = vmatpush3.bf16.msra.mxu1 %v12269_v7  ;;  %10965 = vmatprep.subr.bf16.mxu0 %v12270_v8  ;;  %v9868_v6 = vcombine.low %v469_v5, %v469_v5  ;;  %v9869_v7 = vcombine.high %v469_v5, %v469_v5  ;;  %v12331_v8 = vld [vmem:[%s13168_s20 + $0x6b8] sm:$0xff]   ;;  %v12378_v5 = vld [vmem:[%s13168_s20 + $0x850] sm:$0xff]  }
  0xc4   : > { %10987 = vmatprep.subr.bf16.mxu1 %v12272_v10  ;;  %v470_v10 = vld [vmem:[%s13163_s16 + $0x68] sm:$0xff] }
  0xc6   : > { %10966 = vmatpush3.bf16.msra.mxu0 %v12271_v9  ;;  %v12332_v9 = vld [vmem:[%s13168_s20 + $0x740] sm:$0xff]  }
  0xc7   : > { %10988 = vmatpush3.bf16.msra.mxu1 %v12273_v11  ;;  %10967 = vmatprep.subr.bf16.mxu0 %v12274_v12  ;;  %v9870_v11 = vcombine.low %v470_v10, %v470_v10  ;;  %v9871_v12 = vcombine.high %v470_v10, %v470_v10  ;;  %v12383_v10 = vld [vmem:[%s13168_s20 + $0x818] sm:$0xff]  }
  0xc8   : > { %10989 = vmatprep.subr.bf16.mxu1 %v12276_v14  ;;  %v12336_v14 = vld [vmem:[%s13168_s20 + $0x7c0] sm:$0xff]  }
  0xca   : > { %10968 = vmatpush3.bf16.msra.mxu0 %v12275_v13  ;;  %v12335_v13 = vld [vmem:[%s13168_s20 + $0x700] sm:$0xff]  }
  0xcb   : > { %10990 = vmatpush3.bf16.msra.mxu1 %v12277_v15  ;;  %10969 = vmatprep.subr.bf16.mxu0 %v12278_v16  ;;  %v12337_v15 = vld [vmem:[%s13168_s20 + $0x780] sm:$0xff]   ;;  %v12338_v16 = vld [vmem:[%s13168_s20 + $0x748] sm:$0xff]  }
  0xcc   : > { %10991 = vmatprep.subr.bf16.mxu1 %v12280_v18  ;;  %v12340_v18 = vld [vmem:[%s13168_s20 + $0x7c8] sm:$0xff]  }
  0xce   : > { %10970 = vmatpush3.bf16.msra.mxu0 %v12279_v17  ;;  %v12339_v17 = vld [vmem:[%s13168_s20 + $0x708] sm:$0xff]  }
  0xcf   : > { %10992 = vmatpush3.bf16.msra.mxu1 %v12281_v19  ;;  %10971 = vmatprep.subr.bf16.mxu0 %v12282_v20  ;;  %v12341_v19 = vld [vmem:[%s13168_s20 + $0x788] sm:$0xff]   ;;  %v12342_v20 = vld [vmem:[%s13168_s20 + $0x750] sm:$0xff]  }
  0xd0   : > { %10993 = vmatprep.subr.bf16.mxu1 %v12284_v22  ;;  %v12344_v22 = vld [vmem:[%s13168_s20 + $0x7d0] sm:$0xff]  }
  0xd2   : > { %10972 = vmatpush3.bf16.msra.mxu0 %v12283_v21  ;;  %v12343_v21 = vld [vmem:[%s13168_s20 + $0x710] sm:$0xff]  }
  0xd3   : > { %10994 = vmatpush3.bf16.msra.mxu1 %v12285_v23  ;;  %10973 = vmatprep.subr.bf16.mxu0 %v12286_v24  ;;  %v12345_v23 = vld [vmem:[%s13168_s20 + $0x790] sm:$0xff]   ;;  %v12346_v24 = vld [vmem:[%s13168_s20 + $0x758] sm:$0xff]  }
  0xd4   : > { %10995 = vmatprep.subr.bf16.mxu1 %v12288_v26  ;;  %v12348_v26 = vld [vmem:[%s13168_s20 + $0x7d8] sm:$0xff]  }
  0xd6   : > { %10974 = vmatpush3.bf16.msra.mxu0 %v12287_v25  ;;  %v12347_v25 = vld [vmem:[%s13168_s20 + $0x718] sm:$0xff]  }
  0xd7   : > { %10996 = vmatpush3.bf16.msra.mxu1 %v12289_v27  ;;  %10975 = vmatprep.subr.bf16.mxu0 %v12290_v28  ;;  %v12349_v27 = vld [vmem:[%s13168_s20 + $0x798] sm:$0xff]   ;;  %v12350_v28 = vld [vmem:[%s13168_s20 + $0x760] sm:$0xff]  }
  0xd8   : > { %10997 = vmatprep.subr.bf16.mxu1 %v12292_v30  ;;  %v12352_v30 = vld [vmem:[%s13168_s20 + $0x7e0] sm:$0xff]  }
  0xda   : > { %10976 = vmatpush3.bf16.msra.mxu0 %v12291_v29  ;;  %v12351_v29 = vld [vmem:[%s13168_s20 + $0x720] sm:$0xff]  }
  0xdb   : > { %10998 = vmatpush3.bf16.msra.mxu1 %v12295_v34  ;;  %11005 = vmatprep.subr.bf16.mxu0 %v12296_v35 }
  0xdc   : > { %11027 = vmatprep.subr.bf16.mxu1 %v12300_v40  ;;  %v12355_v40 = vld [vmem:[%s13168_s20 + $0x728] sm:$0xff]  }
  0xdd   : > { %7554 = vmatmul.mubr.bf16.vlgmr.msra.gmra.mrb[20].mxu0 %v9864_v32 }
  0xde   : > { %11006 = vmatpush3.bf16.msra.mxu0 %v12299_v39  ;;  %7594 = vmatmul.mubr.bf16.vlgmr.msra.gmra.mrb[20].mxu1 %v9866_v37 }
  0xdf   : > { %11028 = vmatpush3.bf16.msra.mxu1 %v12301_v41  ;;  %11007 = vmatprep.subr.bf16.mxu0 %v12302_v42 }
  0xe0   : > { %11029 = vmatprep.subr.bf16.mxu1 %v12304_v44  ;;  %7633 = vmatprep.mubr.bf16.mxu0 %v9869_v7  ;;  %v12380_v7 = vld [vmem:[%s13168_s20 + $0x8d0] sm:$0xff]  }
  0xe1   : > { %7673 = vmatprep.mubr.bf16.mxu1 %v9871_v12  ;;  %v12385_v12 = vld [vmem:[%s13168_s20 + $0x898] sm:$0xff]  }
  0xe2   : > { %11008 = vmatpush3.bf16.msra.mxu0 %v12303_v43  ;;  %v12356_v43 = vld [vmem:[%s13168_s20 + $0x7e8] sm:$0xff]  }
  0xe3   : > { %11030 = vmatpush3.bf16.msra.mxu1 %v12305_v45  ;;  %11009 = vmatprep.subr.bf16.mxu0 %v12306_v46  ;;  %v12357_v45 = vld [vmem:[%s13168_s20 + $0x7a8] sm:$0xff]  }
  0xe4   : > { %11031 = vmatprep.subr.bf16.mxu1 %v12308_v48  ;;  %v12359_v48 = vld [vmem:[%s13168_s20 + $0x730] sm:$0xff]  }
  0xe6   : > { %11010 = vmatpush3.bf16.msra.mxu0 %v12307_v47  ;;  %v12358_v47 = vld [vmem:[%s13168_s20 + $0x770] sm:$0xff]  }
  0xe7   : > { %11032 = vmatpush3.bf16.msra.mxu1 %v12309_v49  ;;  %11011 = vmatprep.subr.bf16.mxu0 %v12310_v50  ;;  %v12360_v49 = vld [vmem:[%s13168_s20 + $0x7f0] sm:$0xff]  }
  0xe8   : > { %11033 = vmatprep.subr.bf16.mxu1 %v12312_v52  ;;  %v12361_v50 = vld [vmem:[%s13168_s20 + $0x7b0] sm:$0xff]   ;;  %v12363_v52 = vld [vmem:[%s13168_s20 + $0x738] sm:$0xff]  }
  0xea   : > { %11012 = vmatpush3.bf16.msra.mxu0 %v12311_v51  ;;  %v12362_v51 = vld [vmem:[%s13168_s20 + $0x778] sm:$0xff]  }
  0xeb   : > { %11034 = vmatpush3.bf16.msra.mxu1 %v12313_v53  ;;  %11013 = vmatprep.subr.bf16.mxu0 %v12314_v54  ;;  %v12364_v53 = vld [vmem:[%s13168_s20 + $0x7f8] sm:$0xff]   ;;  %v471_v54 = vld [vmem:[%s13163_s16 + $0x70] sm:$0xff] }
  0xec   : > { %11035 = vmatprep.subr.bf16.mxu1 %v12316_v56  ;;  %v9873_v56 = vcombine.high %v471_v54, %v471_v54 }
  0xee   : > { %11014 = vmatpush3.bf16.msra.mxu0 %v12315_v55  ;;  %v9872_v55 = vcombine.low %v471_v54, %v471_v54  ;;  %v12413_v54 = vld [vmem:[%s13168_s20 + $0x988] sm:$0xff]  }
  0xef   : > { %11036 = vmatpush3.bf16.msra.mxu1 %v12317_v57  ;;  %11015 = vmatprep.subr.bf16.mxu0 %v12318_v58  ;;  %v12367_v57 = vld [vmem:[%s13168_s20 + $0x7b8] sm:$0xff]   ;;  %v12368_v58 = vld [vmem:[%s13168_s20 + $0x840] sm:$0xff]  }
  0xf0   : > { %11037 = vmatprep.subr.bf16.mxu1 %v12320_v60 }
  0xf2   : > { %11016 = vmatpush3.bf16.msra.mxu0 %v12319_v59  ;;  %v472_v59 = vld [vmem:[%s13163_s16 + $0x78] sm:$0xff] }
  0xf3   : > { %11038 = vmatpush3.bf16.msra.mxu1 %v12321_v61  ;;  %11017 = vmatprep.subr.bf16.mxu0 %v12322_v62  ;;  %v9874_v60 = vcombine.low %v472_v59, %v472_v59  ;;  %v9875_v61 = vcombine.high %v472_v59, %v472_v59  ;;  %v12371_v62 = vld [vmem:[%s13168_s20 + $0x800] sm:$0xff]   ;;  %v12418_v59 = vld [vmem:[%s13168_s20 + $0x958] sm:$0xff]  }
  0xf4   : > { %11039 = vmatprep.subr.bf16.mxu1 %v12324_v0  ;;  %v12373_v0 = vld [vmem:[%s13168_s20 + $0x880] sm:$0xff]  }
  0xf6   : > { %11018 = vmatpush3.bf16.msra.mxu0 %v12323_v63  ;;  %v12372_v63 = vld [vmem:[%s13168_s20 + $0x8c0] sm:$0xff]  }
  0xf7   : > { %11040 = vmatpush3.bf16.msra.mxu1 %v12325_v1  ;;  %11019 = vmatprep.subr.bf16.mxu0 %v12326_v2  ;;  %v12374_v1 = vld [vmem:[%s13168_s20 + $0x848] sm:$0xff]  }
  0xf8   : > { %11041 = vmatprep.subr.bf16.mxu1 %v12328_v4  ;;  %v12375_v2 = vld [vmem:[%s13168_s20 + $0x808] sm:$0xff]  }
  0xf9   : > { %v12377_v4 = vld [vmem:[%s13168_s20 + $0x888] sm:$0xff]  }
  0xfa   : > { %11020 = vmatpush3.bf16.msra.mxu0 %v12327_v3  ;;  %v12376_v3 = vld [vmem:[%s13168_s20 + $0x8c8] sm:$0xff]  }
  0xfb   : > { %11042 = vmatpush3.bf16.msra.mxu1 %v12331_v8  ;;  %11049 = vmatprep.subr.bf16.mxu0 %v12332_v9  ;;  %v12381_v8 = vld [vmem:[%s13168_s20 + $0x890] sm:$0xff]   ;;  %v12382_v9 = vld [vmem:[%s13168_s20 + $0x858] sm:$0xff]  }
  0xfc   : > { %11071 = vmatprep.subr.bf16.mxu1 %v12336_v14  ;;  %v12387_v14 = vld [vmem:[%s13168_s20 + $0x820] sm:$0xff]  }
  0xfd   : > { %7634 = vmatmul.mubr.bf16.vlgmr.msra.gmra.mrb[24].mxu0 %v9868_v6  ;;  %v12379_v6 = vld [vmem:[%s13168_s20 + $0x810] sm:$0xff]  }
  0xfe   : > { %11050 = vmatpush3.bf16.msra.mxu0 %v12335_v13  ;;  %7674 = vmatmul.mubr.bf16.vlgmr.msra.gmra.mrb[24].mxu1 %v9870_v11  ;;  %v12384_v11 = vld [vmem:[%s13168_s20 + $0x8d8] sm:$0xff]   ;;  %v12386_v13 = vld [vmem:[%s13168_s20 + $0x860] sm:$0xff]  }
  0xff   : > { %11072 = vmatpush3.bf16.msra.mxu1 %v12337_v15  ;;  %11051 = vmatprep.subr.bf16.mxu0 %v12338_v16  ;;  %v12388_v15 = vld [vmem:[%s13168_s20 + $0x8e0] sm:$0xff]  }
 0x100   : > { %11073 = vmatprep.subr.bf16.mxu1 %v12340_v18  ;;  %7713 = vmatprep.mubr.bf16.mxu0 %v9873_v56  ;;  %v12415_v56 = vld [vmem:[%s13168_s20 + $0x910] sm:$0xff]  }
 0x101   : > { %7753 = vmatprep.mubr.bf16.mxu1 %v9875_v61  ;;  %v12420_v61 = vld [vmem:[%s13168_s20 + $0x9d8] sm:$0xff]  }
 0x102   : > { %11052 = vmatpush3.bf16.msra.mxu0 %v12339_v17  ;;  %v12389_v17 = vld [vmem:[%s13168_s20 + $0x8a0] sm:$0xff]  }
 0x103   : > { %11074 = vmatpush3.bf16.msra.mxu1 %v12341_v19  ;;  %11053 = vmatprep.subr.bf16.mxu0 %v12342_v20  ;;  %v12390_v20 = vld [vmem:[%s13168_s20 + $0x868] sm:$0xff]  }
 0x104   : > { %11075 = vmatprep.subr.bf16.mxu1 %v12344_v22 }
 0x106   : > { %11054 = vmatpush3.bf16.msra.mxu0 %v12343_v21 }
 0x107   : > { %11076 = vmatpush3.bf16.msra.mxu1 %v12345_v23  ;;  %11055 = vmatprep.subr.bf16.mxu0 %v12346_v24  ;;  %v12391_v23 = vld [vmem:[%s13168_s20 + $0x828] sm:$0xff]  }
 0x108   : > { %11077 = vmatprep.subr.bf16.mxu1 %v12348_v26 }
 0x10a   : > { %11056 = vmatpush3.bf16.msra.mxu0 %v12347_v25 }
 0x10b   : > { %11078 = vmatpush3.bf16.msra.mxu1 %v12349_v27  ;;  %11057 = vmatprep.subr.bf16.mxu0 %v12350_v28  ;;  %v12392_v28 = vld [vmem:[%s13168_s20 + $0x8e8] sm:$0xff]  }
 0x10c   : > { %11079 = vmatprep.subr.bf16.mxu1 %v12352_v30  ;;  %v12393_v30 = vld [vmem:[%s13168_s20 + $0x8a8] sm:$0xff]  }
 0x10e   : > { %11058 = vmatpush3.bf16.msra.mxu0 %v12351_v29 }
 0x10f   : > { %11080 = vmatpush3.bf16.msra.mxu1 %v12353_v33  ;;  %11059 = vmatprep.subr.bf16.mxu0 %v12354_v38  ;;  %v12394_v33 = vld [vmem:[%s13168_s20 + $0x870] sm:$0xff]   ;;  %v12399_v38 = vld [vmem:[%s13168_s20 + $0x838] sm:$0xff]  }
 0x110   : > { %v10757_v31 = vpop.f32.mrb[0].mxu0  ;;  %11081 = vmatprep.subr.bf16.mxu1 %v12356_v43  ;;  %v12403_v43 = vld [vmem:[%s13168_s20 + $0x8b8] sm:$0xff]  }
 0x111   : > { %v10779_v32 = vpop.f32.mrb[0].mxu1  ;;  %v10758_v34 = vpop.f32.mrb[1].mxu0 }
 0x112   : > { %v10780_v35 = vpop.f32.mrb[1].mxu1  ;;  %v10759_v36 = vadd.f32 %v10758_v34, %v10757_v31  ;;  %v10760_v39 = vpop.f32.mrb[2].mxu0  ;;  %11060 = vmatpush3.bf16.msra.mxu0 %v12355_v40  ;;  %v12395_v34 = vld [vmem:[%s13168_s20 + $0x830] sm:$0xff]   ;;  %v473_v40 = vld [vmem:[%s13163_s16 + $0x80] sm:$0xff] }
 0x113   : > { %v10781_v37 = vadd.f32 %v10780_v35, %v10779_v32  ;;  %v10761_v41 = vpop.f32.mrb[3].mxu0  ;;  %v10782_v44 = vpop.f32.mrb[2].mxu1  ;;  %11082 = vmatpush3.bf16.msra.mxu1 %v12357_v45  ;;  %11061 = vmatprep.subr.bf16.mxu0 %v12358_v47  ;;  %v12396_v35 = vld [vmem:[%s13168_s20 + $0x8f0] sm:$0xff]   ;;  %v12400_v39 = vld [vmem:[%s13168_s20 + $0x8f8] sm:$0xff]   ;;  %v474_v45 = vld [vmem:[%s13163_s16 + $0x88] sm:$0xff] }
 0x114   : > { %v10783_v46 = vpop.f32.mrb[3].mxu1  ;;  %11083 = vmatprep.subr.bf16.mxu1 %v12360_v49  ;;  %v9876_v41 = vcombine.low %v473_v40, %v473_v40  ;;  %v12404_v44 = vld [vmem:[%s13168_s20 + $0x940] sm:$0xff]   ;;  %v9879_v47 = vcombine.high %v474_v45, %v474_v45 }
 0x115   : > { %v13431_v42 = vadd.f32 %v10781_v37, %v10759_v36  ;;  %v12397_v36 = vld [vmem:[%s13168_s20 + $0x8b0] sm:$0xff]   ;;  %v12398_v37 = vld [vmem:[%s13168_s20 + $0x878] sm:$0xff]   ;;  %v9878_v46 = vcombine.low %v474_v45, %v474_v45  ;;  %v12408_v49 = vld [vmem:[%s13168_s20 + $0x9c0] sm:$0xff]  }
 0x116   : > { %11062 = vmatpush3.bf16.msra.mxu0 %v12359_v48  ;;  %v12407_v48 = vld [vmem:[%s13168_s20 + $0x900] sm:$0xff]   ;;  %v12454_v45 = vld [vmem:[%s13168_s20 + $0xa58] sm:$0xff]  }
 0x117   : > { %11084 = vmatpush3.bf16.msra.mxu1 %v12361_v50  ;;  %11063 = vmatprep.subr.bf16.mxu0 %v12362_v51  ;;  %v12409_v50 = vld [vmem:[%s13168_s20 + $0x980] sm:$0xff]   ;;  %v12410_v51 = vld [vmem:[%s13168_s20 + $0x948] sm:$0xff]  }
 0x118   : > { %11085 = vmatprep.subr.bf16.mxu1 %v12364_v53  ;;  %v12412_v53 = vld [vmem:[%s13168_s20 + $0x9c8] sm:$0xff]  }
 0x11a   : > { %11064 = vmatpush3.bf16.msra.mxu0 %v12363_v52  ;;  %v12411_v52 = vld [vmem:[%s13168_s20 + $0x908] sm:$0xff]  }
 0x11b   : > { %11086 = vmatpush3.bf16.msra.mxu1 %v12367_v57  ;;  %11093 = vmatprep.subr.bf16.mxu0 %v12368_v58  ;;  %v12416_v57 = vld [vmem:[%s13168_s20 + $0x9d0] sm:$0xff]  }
 0x11c   : > { %11115 = vmatprep.subr.bf16.mxu1 %v12372_v63  ;;  %v12417_v58 = vld [vmem:[%s13168_s20 + $0x990] sm:$0xff]   ;;  %v12422_v63 = vld [vmem:[%s13168_s20 + $0x960] sm:$0xff]  }
 0x11d   : > { %7714 = vmatmul.mubr.bf16.vlgmr.msra.gmra.mrb[28].mxu0 %v9872_v55  ;;  %v12414_v55 = vld [vmem:[%s13168_s20 + $0x950] sm:$0xff]  }
 0x11e   : > { %11094 = vmatpush3.bf16.msra.mxu0 %v12371_v62  ;;  %7754 = vmatmul.mubr.bf16.vlgmr.msra.gmra.mrb[28].mxu1 %v9874_v60  ;;  %v12419_v60 = vld [vmem:[%s13168_s20 + $0x918] sm:$0xff]  }
 0x11f   : > { %11116 = vmatpush3.bf16.msra.mxu1 %v12373_v0  ;;  %11095 = vmatprep.subr.bf16.mxu0 %v12374_v1  ;;  %v12421_v62 = vld [vmem:[%s13168_s20 + $0x998] sm:$0xff]   ;;  %v12423_v0 = vld [vmem:[%s13168_s20 + $0x920] sm:$0xff]  }
 0x120   : > { %11117 = vmatprep.subr.bf16.mxu1 %v12376_v3  ;;  %7833 = vmatprep.mubr.bf16.mxu1 %v9879_v47  ;;  %v12456_v47 = vld [vmem:[%s13168_s20 + $0xad8] sm:$0xff]  }
 0x122   : > { %11096 = vmatpush3.bf16.msra.mxu0 %v12375_v2  ;;  %v12424_v2 = vld [vmem:[%s13168_s20 + $0x9e0] sm:$0xff]  }
 0x123   : > { %11118 = vmatpush3.bf16.msra.mxu1 %v12377_v4  ;;  %11097 = vmatprep.subr.bf16.mxu0 %v12378_v5  ;;  %v12425_v4 = vld [vmem:[%s13168_s20 + $0x9a0] sm:$0xff]  }
 0x124   : > { %11119 = vmatprep.subr.bf16.mxu1 %v12380_v7  ;;  %v12426_v7 = vld [vmem:[%s13168_s20 + $0x968] sm:$0xff]  }
 0x126   : > { %11098 = vmatpush3.bf16.msra.mxu0 %v12379_v6 }
 0x127   : > { %11120 = vmatpush3.bf16.msra.mxu1 %v12381_v8  ;;  %11099 = vmatprep.subr.bf16.mxu0 %v12382_v9 }
 0x128   : > { %11121 = vmatprep.subr.bf16.mxu1 %v12384_v11 }
 0x12a   : > { %11100 = vmatpush3.bf16.msra.mxu0 %v12383_v10  ;;  %v12427_v10 = vld [vmem:[%s13168_s20 + $0x928] sm:$0xff]  }
 0x12b   : > { %11122 = vmatpush3.bf16.msra.mxu1 %v12385_v12  ;;  %11101 = vmatprep.subr.bf16.mxu0 %v12386_v13  ;;  %v12428_v13 = vld [vmem:[%s13168_s20 + $0x9e8] sm:$0xff]  }
 0x12c   : > { %11123 = vmatprep.subr.bf16.mxu1 %v12388_v15  ;;  %v12429_v15 = vld [vmem:[%s13168_s20 + $0x9a8] sm:$0xff]  }
 0x12e   : > { %11102 = vmatpush3.bf16.msra.mxu0 %v12387_v14 }
 0x12f   : > { %11124 = vmatpush3.bf16.msra.mxu1 %v12389_v17  ;;  %11103 = vmatprep.subr.bf16.mxu0 %v12390_v20  ;;  %v12431_v20 = vld [vmem:[%s13168_s20 + $0x930] sm:$0xff]  }
 0x130   : > { %v10801_v16 = vpop.f32.mrb[4].mxu0  ;;  %11125 = vmatprep.subr.bf16.mxu1 %v12392_v28 }
 0x131   : > { %v10802_v18 = vpop.f32.mrb[5].mxu0  ;;  %v10823_v22 = vpop.f32.mrb[4].mxu1 }
 0x132   : > { %v10803_v19 = vadd.f32 %v10802_v18, %v10801_v16  ;;  %v10804_v21 = vpop.f32.mrb[6].mxu0  ;;  %v10824_v25 = vpop.f32.mrb[5].mxu1  ;;  %11104 = vmatpush3.bf16.msra.mxu0 %v12391_v23  ;;  %v12430_v18 = vld [vmem:[%s13168_s20 + $0x970] sm:$0xff]   ;;  %v12434_v23 = vld [vmem:[%s13168_s20 + $0x978] sm:$0xff]  }
 0x133   : > { %v10805_v24 = vpop.f32.mrb[7].mxu0  ;;  %v10825_v27 = vadd.f32 %v10824_v25, %v10823_v22  ;;  %v10826_v29 = vpop.f32.mrb[6].mxu1  ;;  %11126 = vmatpush3.bf16.msra.mxu1 %v12393_v30  ;;  %11105 = vmatprep.subr.bf16.mxu0 %v12394_v33  ;;  %v12432_v21 = vld [vmem:[%s13168_s20 + $0x9f0] sm:$0xff]   ;;  %v12436_v25 = vld [vmem:[%s13168_s20 + $0x9f8] sm:$0xff]   ;;  %v12440_v30 = vld [vmem:[%s13168_s20 + $0xa40] sm:$0xff]  }
 0x134   : > { %v7236_v26 = vadd.f32 %v10803_v19, %v13431_v42  ;;  %v10827_v31 = vpop.f32.mrb[7].mxu1  ;;  %11127 = vmatprep.subr.bf16.mxu1 %v12396_v35  ;;  %v9877_v42 = vcombine.high %v473_v40, %v473_v40  ;;  %v12433_v22 = vld [vmem:[%s13168_s20 + $0x9b0] sm:$0xff]   ;;  %v12435_v24 = vld [vmem:[%s13168_s20 + $0x938] sm:$0xff]   ;;  %v12444_v35 = vld [vmem:[%s13168_s20 + $0xac0] sm:$0xff]  }
 0x135   : > { %v12439_v29 = vld [vmem:[%s13168_s20 + $0x9b8] sm:$0xff]   ;;  %v12449_v40 = vld [vmem:[%s13168_s20 + $0xa88] sm:$0xff]  }
 0x136   : > { %v13470_v32 = vadd.f32 %v10825_v27, %v7236_v26  ;;  %11106 = vmatpush3.bf16.msra.mxu0 %v12395_v34  ;;  %7793 = vmatprep.mubr.bf16.mxu0 %v9877_v42  ;;  %v475_v26 = vld [vmem:[%s13163_s16 + $0x90] sm:$0xff]  ;;  %v476_v31 = vld [vmem:[%s13163_s16 + $0x98] sm:$0xff]  ;;  %v12443_v34 = vld [vmem:[%s13168_s20 + $0xa00] sm:$0xff]  }
 0x137   : > { %11128 = vmatpush3.bf16.msra.mxu1 %v12397_v36  ;;  %11107 = vmatprep.subr.bf16.mxu0 %v12398_v37  ;;  %v9880_v27 = vcombine.low %v475_v26, %v475_v26  ;;  %v9881_v28 = vcombine.high %v475_v26, %v475_v26  ;;  %v9883_v33 = vcombine.high %v476_v31, %v476_v31  ;;  %v12445_v36 = vld [vmem:[%s13168_s20 + $0xa80] sm:$0xff]   ;;  %v12446_v37 = vld [vmem:[%s13168_s20 + $0xa48] sm:$0xff]   ;;  %v12451_v42 = vld [vmem:[%s13168_s20 + $0xa10] sm:$0xff]  }
 0x138   : > { %11129 = vmatprep.subr.bf16.mxu1 %v12400_v39  ;;  %v12448_v39 = vld [vmem:[%s13168_s20 + $0xac8] sm:$0xff]  }
 0x139   : > { %v12485_v26 = vld [vmem:[%s13168_s20 + $0xb88] sm:$0xff]  }
 0x13a   : > { %11108 = vmatpush3.bf16.msra.mxu0 %v12399_v38  ;;  %v12447_v38 = vld [vmem:[%s13168_s20 + $0xa08] sm:$0xff]  }
 0x13b   : > { %11130 = vmatpush3.bf16.msra.mxu1 %v12403_v43  ;;  %11137 = vmatprep.subr.bf16.mxu0 %v12404_v44  ;;  %v12452_v43 = vld [vmem:[%s13168_s20 + $0xad0] sm:$0xff]  }
 0x13c   : > { %11159 = vmatprep.subr.bf16.mxu1 %v12408_v49  ;;  %v12453_v44 = vld [vmem:[%s13168_s20 + $0xa90] sm:$0xff]   ;;  %v12458_v49 = vld [vmem:[%s13168_s20 + $0xa60] sm:$0xff]  }
 0x13d   : > { %7794 = vmatmul.mubr.bf16.vlgmr.msra.gmra.mrb[32].mxu0 %v9876_v41  ;;  %v12450_v41 = vld [vmem:[%s13168_s20 + $0xa50] sm:$0xff]  }
 0x13e   : > { %11138 = vmatpush3.bf16.msra.mxu0 %v12407_v48  ;;  %7834 = vmatmul.mubr.bf16.vlgmr.msra.gmra.mrb[32].mxu1 %v9878_v46  ;;  %v12455_v46 = vld [vmem:[%s13168_s20 + $0xa18] sm:$0xff]  }
 0x13f   : > { %11160 = vmatpush3.bf16.msra.mxu1 %v12409_v50  ;;  %11139 = vmatprep.subr.bf16.mxu0 %v12410_v51  ;;  %v12457_v48 = vld [vmem:[%s13168_s20 + $0xa98] sm:$0xff]   ;;  %v12459_v51 = vld [vmem:[%s13168_s20 + $0xa20] sm:$0xff]  }
 0x140   : > { %11161 = vmatprep.subr.bf16.mxu1 %v12412_v53  ;;  %7873 = vmatprep.mubr.bf16.mxu0 %v9881_v28  ;;  %v12460_v53 = vld [vmem:[%s13168_s20 + $0xae0] sm:$0xff]   ;;  %v12487_v28 = vld [vmem:[%s13168_s20 + $0xb10] sm:$0xff]  }
 0x141   : > { %7913 = vmatprep.mubr.bf16.mxu1 %v9883_v33  ;;  %v12492_v33 = vld [vmem:[%s13168_s20 + $0xbd8] sm:$0xff]  }
 0x142   : > { %11140 = vmatpush3.bf16.msra.mxu0 %v12411_v52 }
 0x143   : > { %11162 = vmatpush3.bf16.msra.mxu1 %v12413_v54  ;;  %11141 = vmatprep.subr.bf16.mxu0 %v12414_v55 }
 0x144   : > { %11163 = vmatprep.subr.bf16.mxu1 %v12416_v57 }
 0x146   : > { %11142 = vmatpush3.bf16.msra.mxu0 %v12415_v56  ;;  %v12461_v56 = vld [vmem:[%s13168_s20 + $0xaa0] sm:$0xff]  }
 0x147   : > { %11164 = vmatpush3.bf16.msra.mxu1 %v12417_v58  ;;  %11143 = vmatprep.subr.bf16.mxu0 %v12418_v59  ;;  %v12462_v59 = vld [vmem:[%s13168_s20 + $0xa68] sm:$0xff]  }
 0x148   : > { %11165 = vmatprep.subr.bf16.mxu1 %v12420_v61  ;;  %v12463_v61 = vld [vmem:[%s13168_s20 + $0xa28] sm:$0xff]  }
 0x14a   : > { %11144 = vmatpush3.bf16.msra.mxu0 %v12419_v60 }
 0x14b   : > { %11166 = vmatpush3.bf16.msra.mxu1 %v12421_v62  ;;  %11145 = vmatprep.subr.bf16.mxu0 %v12422_v63 }
 0x14c   : > { %11167 = vmatprep.subr.bf16.mxu1 %v12424_v2  ;;  %v12465_v2 = vld [vmem:[%s13168_s20 + $0xaa8] sm:$0xff]  }
 0x14e   : > { %11146 = vmatpush3.bf16.msra.mxu0 %v12423_v0  ;;  %v12464_v0 = vld [vmem:[%s13168_s20 + $0xae8] sm:$0xff]  }
 0x14f   : > { %11168 = vmatpush3.bf16.msra.mxu1 %v12425_v4  ;;  %11147 = vmatprep.subr.bf16.mxu0 %v12426_v7  ;;  %v12468_v7 = vld [vmem:[%s13168_s20 + $0xaf0] sm:$0xff]  }
 0x150   : > { %v10845_v1 = vpop.f32.mrb[8].mxu0  ;;  %11169 = vmatprep.subr.bf16.mxu1 %v12428_v13 }
 0x151   : > { %v10846_v3 = vpop.f32.mrb[9].mxu0  ;;  %v10867_v8 = vpop.f32.mrb[8].mxu1 }
 0x152   : > { %v10847_v5 = vadd.f32 %v10846_v3, %v10845_v1  ;;  %v10848_v6 = vpop.f32.mrb[10].mxu0  ;;  %v10868_v12 = vpop.f32.mrb[9].mxu1  ;;  %11148 = vmatpush3.bf16.msra.mxu0 %v12427_v10  ;;  %v12471_v10 = vld [vmem:[%s13168_s20 + $0xa38] sm:$0xff]  }
 0x153   : > { %v10849_v11 = vpop.f32.mrb[11].mxu0  ;;  %v10869_v14 = vadd.f32 %v10868_v12, %v10867_v8  ;;  %v10870_v16 = vpop.f32.mrb[10].mxu1  ;;  %11170 = vmatpush3.bf16.msra.mxu1 %v12429_v15  ;;  %11149 = vmatprep.subr.bf16.mxu0 %v12430_v18  ;;  %v12467_v6 = vld [vmem:[%s13168_s20 + $0xa30] sm:$0xff]   ;;  %v477_v12 = vld [vmem:[%s13163_s16 + $0xa0] sm:$0xff]  ;;  %v12475_v15 = vld [vmem:[%s13168_s20 + $0xab8] sm:$0xff]  }
 0x154   : > { %v7316_v9 = vadd.f32 %v10847_v5, %v13470_v32  ;;  %v10871_v19 = vpop.f32.mrb[11].mxu1  ;;  %11171 = vmatprep.subr.bf16.mxu1 %v12432_v21  ;;  %v9882_v32 = vcombine.low %v476_v31, %v476_v31  ;;  %v12466_v5 = vld [vmem:[%s13168_s20 + $0xa70] sm:$0xff]   ;;  %v12472_v11 = vld [vmem:[%s13168_s20 + $0xaf8] sm:$0xff]   ;;  %v9884_v13 = vcombine.low %v477_v12, %v477_v12  ;;  %v12476_v16 = vld [vmem:[%s13168_s20 + $0xb40] sm:$0xff]  }
 0x155   : > { %v12469_v8 = vld [vmem:[%s13168_s20 + $0xab0] sm:$0xff]   ;;  %v12480_v21 = vld [vmem:[%s13168_s20 + $0xbc0] sm:$0xff]   ;;  %v12490_v31 = vld [vmem:[%s13168_s20 + $0xb58] sm:$0xff]  }
 0x156   : > { %v13507_v17 = vadd.f32 %v10869_v14, %v7316_v9  ;;  %11150 = vmatpush3.bf16.msra.mxu0 %v12431_v20  ;;  %v12470_v9 = vld [vmem:[%s13168_s20 + $0xa78] sm:$0xff]   ;;  %v9885_v14 = vcombine.high %v477_v12, %v477_v12  ;;  %v12479_v20 = vld [vmem:[%s13168_s20 + $0xb00] sm:$0xff]   ;;  %v12521_v12 = vld [vmem:[%s13168_s20 + $0xc88] sm:$0xff]  }
 0x157   : > { %11172 = vmatpush3.bf16.msra.mxu1 %v12433_v22  ;;  %11151 = vmatprep.subr.bf16.mxu0 %v12434_v23  ;;  %v12481_v22 = vld [vmem:[%s13168_s20 + $0xb80] sm:$0xff]   ;;  %v12482_v23 = vld [vmem:[%s13168_s20 + $0xb48] sm:$0xff]  }
 0x158   : > { %11173 = vmatprep.subr.bf16.mxu1 %v12436_v25  ;;  %v12484_v25 = vld [vmem:[%s13168_s20 + $0xbc8] sm:$0xff]  }
 0x15a   : > { %11152 = vmatpush3.bf16.msra.mxu0 %v12435_v24  ;;  %v12483_v24 = vld [vmem:[%s13168_s20 + $0xb08] sm:$0xff]  }
 0x15b   : > { %11174 = vmatpush3.bf16.msra.mxu1 %v12439_v29  ;;  %11181 = vmatprep.subr.bf16.mxu0 %v12440_v30  ;;  %v12488_v29 = vld [vmem:[%s13168_s20 + $0xbd0] sm:$0xff]  }
 0x15c   : > { %11203 = vmatprep.subr.bf16.mxu1 %v12444_v35  ;;  %v12489_v30 = vld [vmem:[%s13168_s20 + $0xb90] sm:$0xff]   ;;  %v12494_v35 = vld [vmem:[%s13168_s20 + $0xb60] sm:$0xff]  }
 0x15d   : > { %7874 = vmatmul.mubr.bf16.vlgmr.msra.gmra.mrb[36].mxu0 %v9880_v27  ;;  %v12486_v27 = vld [vmem:[%s13168_s20 + $0xb50] sm:$0xff]  }
 0x15e   : > { %11182 = vmatpush3.bf16.msra.mxu0 %v12443_v34  ;;  %7914 = vmatmul.mubr.bf16.vlgmr.msra.gmra.mrb[36].mxu1 %v9882_v32  ;;  %v12491_v32 = vld [vmem:[%s13168_s20 + $0xb18] sm:$0xff]  }
 0x15f   : > { %11204 = vmatpush3.bf16.msra.mxu1 %v12445_v36  ;;  %11183 = vmatprep.subr.bf16.mxu0 %v12446_v37  ;;  %v12493_v34 = vld [vmem:[%s13168_s20 + $0xb98] sm:$0xff]   ;;  %v12495_v37 = vld [vmem:[%s13168_s20 + $0xb20] sm:$0xff]  }
 0x160   : > { %11205 = vmatprep.subr.bf16.mxu1 %v12448_v39  ;;  %7953 = vmatprep.mubr.bf16.mxu0 %v9885_v14  ;;  %v12496_v39 = vld [vmem:[%s13168_s20 + $0xbe0] sm:$0xff]   ;;  %v12523_v14 = vld [vmem:[%s13168_s20 + $0xc10] sm:$0xff]  }
 0x162   : > { %11184 = vmatpush3.bf16.msra.mxu0 %v12447_v38 }
 0x163   : > { %11206 = vmatpush3.bf16.msra.mxu1 %v12449_v40  ;;  %11185 = vmatprep.subr.bf16.mxu0 %v12450_v41 }
 0x164   : > { %11207 = vmatprep.subr.bf16.mxu1 %v12452_v43 }
 0x166   : > { %11186 = vmatpush3.bf16.msra.mxu0 %v12451_v42  ;;  %v12497_v42 = vld [vmem:[%s13168_s20 + $0xba0] sm:$0xff]  }
 0x167   : > { %11208 = vmatpush3.bf16.msra.mxu1 %v12453_v44  ;;  %11187 = vmatprep.subr.bf16.mxu0 %v12454_v45  ;;  %v12498_v45 = vld [vmem:[%s13168_s20 + $0xb68] sm:$0xff]  }
 0x168   : > { %11209 = vmatprep.subr.bf16.mxu1 %v12456_v47  ;;  %v12499_v47 = vld [vmem:[%s13168_s20 + $0xb28] sm:$0xff]  }
 0x16a   : > { %11188 = vmatpush3.bf16.msra.mxu0 %v12455_v46 }
 0x16b   : > { %11210 = vmatpush3.bf16.msra.mxu1 %v12457_v48  ;;  %11189 = vmatprep.subr.bf16.mxu0 %v12458_v49 }
 0x16c   : > { %11211 = vmatprep.subr.bf16.mxu1 %v12460_v53 }
 0x16e   : > { %11190 = vmatpush3.bf16.msra.mxu0 %v12459_v51 }
 0x16f   : > { %11212 = vmatpush3.bf16.msra.mxu1 %v12461_v56  ;;  %11191 = vmatprep.subr.bf16.mxu0 %v12462_v59  ;;  %v12503_v56 = vld [vmem:[%s13168_s20 + $0xb30] sm:$0xff]   ;;  %v12506_v59 = vld [vmem:[%s13168_s20 + $0xb78] sm:$0xff]  }
 0x170   : > { %v10889_v50 = vpop.f32.mrb[12].mxu0  ;;  %11213 = vmatprep.subr.bf16.mxu1 %v12464_v0 }
 0x171   : > { %v10890_v52 = vpop.f32.mrb[13].mxu0  ;;  %v10911_v57 = vpop.f32.mrb[12].mxu1 }
 0x172   : > { %v10891_v54 = vadd.f32 %v10890_v52, %v10889_v50  ;;  %v10892_v55 = vpop.f32.mrb[14].mxu0  ;;  %v10912_v62 = vpop.f32.mrb[13].mxu1  ;;  %11192 = vmatpush3.bf16.msra.mxu0 %v12463_v61  ;;  %v12500_v50 = vld [vmem:[%s13168_s20 + $0xbe8] sm:$0xff]   ;;  %v12508_v61 = vld [vmem:[%s13168_s20 + $0xbf8] sm:$0xff]  }
 0x173   : > { %v10893_v60 = vpop.f32.mrb[15].mxu0  ;;  %v10913_v63 = vadd.f32 %v10912_v62, %v10911_v57  ;;  %v10914_v1 = vpop.f32.mrb[14].mxu1  ;;  %11214 = vmatpush3.bf16.msra.mxu1 %v12465_v2  ;;  %11193 = vmatprep.subr.bf16.mxu0 %v12466_v5  ;;  %v12501_v52 = vld [vmem:[%s13168_s20 + $0xba8] sm:$0xff]   ;;  %v12502_v55 = vld [vmem:[%s13168_s20 + $0xb70] sm:$0xff]   ;;  %v12512_v2 = vld [vmem:[%s13168_s20 + $0xc40] sm:$0xff]  }
 0x174   : > { %v7396_v58 = vadd.f32 %v10891_v54, %v13507_v17  ;;  %v10915_v3 = vpop.f32.mrb[15].mxu1  ;;  %11215 = vmatprep.subr.bf16.mxu1 %v12468_v7  ;;  %v478_v17 = vld [vmem:[%s13163_s16 + $0xa8] sm:$0xff]  ;;  %v12504_v57 = vld [vmem:[%s13168_s20 + $0xbf0] sm:$0xff]   ;;  %v12507_v60 = vld [vmem:[%s13168_s20 + $0xb38] sm:$0xff]  }
 0x175   : > { %v9886_v18 = vcombine.low %v478_v17, %v478_v17  ;;  %v9887_v19 = vcombine.high %v478_v17, %v478_v17  ;;  %v479_v62 = vld [vmem:[%s13163_s16 + $0xb0] sm:$0xff]  ;;  %v12511_v1 = vld [vmem:[%s13168_s20 + $0xbb8] sm:$0xff]   ;;  %v12516_v7 = vld [vmem:[%s13168_s20 + $0xcc0] sm:$0xff]  }
 0x176   : > { %v13544_v4 = vadd.f32 %v10913_v63, %v7396_v58  ;;  %11194 = vmatpush3.bf16.msra.mxu0 %v12467_v6  ;;  %v12505_v58 = vld [vmem:[%s13168_s20 + $0xbb0] sm:$0xff]   ;;  %v9888_v63 = vcombine.low %v479_v62, %v479_v62  ;;  %v9889_v0 = vcombine.high %v479_v62, %v479_v62  ;;  %v480_v3 = vld [vmem:[%s13163_s16 + $0xb8] sm:$0xff]  ;;  %v12515_v6 = vld [vmem:[%s13168_s20 + $0xc00] sm:$0xff]  }
 0x177   : > { %11216 = vmatpush3.bf16.msra.mxu1 %v12469_v8  ;;  %11195 = vmatprep.subr.bf16.mxu0 %v12470_v9  ;;  %v9891_v5 = vcombine.high %v480_v3, %v480_v3  ;;  %v12517_v8 = vld [vmem:[%s13168_s20 + $0xc80] sm:$0xff]   ;;  %v12518_v9 = vld [vmem:[%s13168_s20 + $0xc48] sm:$0xff]   ;;  %v12526_v17 = vld [vmem:[%s13168_s20 + $0xc58] sm:$0xff]  }
 0x178   : > { %11217 = vmatprep.subr.bf16.mxu1 %v12472_v11  ;;  %7993 = vmatprep.mubr.bf16.mxu1 %v9887_v19  ;;  %v12520_v11 = vld [vmem:[%s13168_s20 + $0xcc8] sm:$0xff]   ;;  %v12528_v19 = vld [vmem:[%s13168_s20 + $0xcd8] sm:$0xff]  }
 0x179   : > { %v12557_v62 = vld [vmem:[%s13168_s20 + $0xd88] sm:$0xff]  }
 0x17a   : > { %11196 = vmatpush3.bf16.msra.mxu0 %v12471_v10  ;;  %v12519_v10 = vld [vmem:[%s13168_s20 + $0xc08] sm:$0xff]  }
 0x17b   : > { %11218 = vmatpush3.bf16.msra.mxu1 %v12475_v15  ;;  %11225 = vmatprep.subr.bf16.mxu0 %v12476_v16  ;;  %v12524_v15 = vld [vmem:[%s13168_s20 + $0xcd0] sm:$0xff]  }
 0x17c   : > { %11247 = vmatprep.subr.bf16.mxu1 %v12480_v21  ;;  %v12525_v16 = vld [vmem:[%s13168_s20 + $0xc90] sm:$0xff]   ;;  %v12530_v21 = vld [vmem:[%s13168_s20 + $0xc60] sm:$0xff]  }
 0x17d   : > { %7954 = vmatmul.mubr.bf16.vlgmr.msra.gmra.mrb[40].mxu0 %v9884_v13  ;;  %v12522_v13 = vld [vmem:[%s13168_s20 + $0xc50] sm:$0xff]  }
 0x17e   : > { %11226 = vmatpush3.bf16.msra.mxu0 %v12479_v20  ;;  %7994 = vmatmul.mubr.bf16.vlgmr.msra.gmra.mrb[40].mxu1 %v9886_v18  ;;  %v12527_v18 = vld [vmem:[%s13168_s20 + $0xc18] sm:$0xff]  }
 0x17f   : > { %11248 = vmatpush3.bf16.msra.mxu1 %v12481_v22  ;;  %11227 = vmatprep.subr.bf16.mxu0 %v12482_v23  ;;  %v12529_v20 = vld [vmem:[%s13168_s20 + $0xc98] sm:$0xff]   ;;  %v12531_v23 = vld [vmem:[%s13168_s20 + $0xc20] sm:$0xff]  }
 0x180   : > { %11249 = vmatprep.subr.bf16.mxu1 %v12484_v25  ;;  %8033 = vmatprep.mubr.bf16.mxu0 %v9889_v0  ;;  %v12532_v25 = vld [vmem:[%s13168_s20 + $0xce0] sm:$0xff]   ;;  %v12559_v0 = vld [vmem:[%s13168_s20 + $0xd10] sm:$0xff]  }
 0x181   : > { %8073 = vmatprep.mubr.bf16.mxu1 %v9891_v5  ;;  %v12564_v5 = vld [vmem:[%s13168_s20 + $0xdd8] sm:$0xff]  }
 0x182   : > { %11228 = vmatpush3.bf16.msra.mxu0 %v12483_v24 }
 0x183   : > { %11250 = vmatpush3.bf16.msra.mxu1 %v12485_v26  ;;  %11229 = vmatprep.subr.bf16.mxu0 %v12486_v27 }
 0x184   : > { %11251 = vmatprep.subr.bf16.mxu1 %v12488_v29 }
 0x186   : > { %11230 = vmatpush3.bf16.msra.mxu0 %v12487_v28  ;;  %v12533_v28 = vld [vmem:[%s13168_s20 + $0xca0] sm:$0xff]  }
 0x187   : > { %11252 = vmatpush3.bf16.msra.mxu1 %v12489_v30  ;;  %11231 = vmatprep.subr.bf16.mxu0 %v12490_v31  ;;  %v12534_v31 = vld [vmem:[%s13168_s20 + $0xc68] sm:$0xff]  }
 0x188   : > { %11253 = vmatprep.subr.bf16.mxu1 %v12492_v33  ;;  %v12535_v33 = vld [vmem:[%s13168_s20 + $0xc28] sm:$0xff]  }
 0x18a   : > { %11232 = vmatpush3.bf16.msra.mxu0 %v12491_v32 }
 0x18b   : > { %11254 = vmatpush3.bf16.msra.mxu1 %v12493_v34  ;;  %11233 = vmatprep.subr.bf16.mxu0 %v12494_v35 }
 0x18c   : > { %11255 = vmatprep.subr.bf16.mxu1 %v12496_v39 }
 0x18e   : > { %11234 = vmatpush3.bf16.msra.mxu0 %v12495_v37 }
 0x18f   : > { %11256 = vmatpush3.bf16.msra.mxu1 %v12497_v42  ;;  %11235 = vmatprep.subr.bf16.mxu0 %v12498_v45  ;;  %v12539_v42 = vld [vmem:[%s13168_s20 + $0xc30] sm:$0xff]   ;;  %v12542_v45 = vld [vmem:[%s13168_s20 + $0xc78] sm:$0xff]  }
 0x190   : > { %v10933_v36 = vpop.f32.mrb[16].mxu0  ;;  %11257 = vmatprep.subr.bf16.mxu1 %v12500_v50 }
 0x191   : > { %v10934_v38 = vpop.f32.mrb[17].mxu0  ;;  %v10955_v43 = vpop.f32.mrb[16].mxu1 }
 0x192   : > { %v10935_v40 = vadd.f32 %v10934_v38, %v10933_v36  ;;  %v10936_v41 = vpop.f32.mrb[18].mxu0  ;;  %v10956_v48 = vpop.f32.mrb[17].mxu1  ;;  %11236 = vmatpush3.bf16.msra.mxu0 %v12499_v47  ;;  %v12536_v36 = vld [vmem:[%s13168_s20 + $0xce8] sm:$0xff]   ;;  %v12544_v47 = vld [vmem:[%s13168_s20 + $0xcf8] sm:$0xff]  }
 0x193   : > { %v10937_v46 = vpop.f32.mrb[19].mxu0  ;;  %v10957_v49 = vadd.f32 %v10956_v48, %v10955_v43  ;;  %v10958_v51 = vpop.f32.mrb[18].mxu1  ;;  %11258 = vmatpush3.bf16.msra.mxu1 %v12501_v52  ;;  %11237 = vmatprep.subr.bf16.mxu0 %v12502_v55  ;;  %v12537_v38 = vld [vmem:[%s13168_s20 + $0xca8] sm:$0xff]   ;;  %v12538_v41 = vld [vmem:[%s13168_s20 + $0xc70] sm:$0xff]   ;;  %v481_v48 = vld [vmem:[%s13163_s16 + $0xc0] sm:$0xff] }
 0x194   : > { %v7476_v44 = vadd.f32 %v10935_v40, %v13544_v4  ;;  %v10959_v53 = vpop.f32.mrb[19].mxu1  ;;  %11259 = vmatprep.subr.bf16.mxu1 %v12504_v57  ;;  %v9890_v4 = vcombine.low %v480_v3, %v480_v3  ;;  %v12540_v43 = vld [vmem:[%s13168_s20 + $0xcf0] sm:$0xff]   ;;  %v12543_v46 = vld [vmem:[%s13168_s20 + $0xc38] sm:$0xff]   ;;  %v9893_v50 = vcombine.high %v481_v48, %v481_v48  ;;  %v12548_v52 = vld [vmem:[%s13168_s20 + $0xd40] sm:$0xff]  }
 0x195   : > { %v12547_v51 = vld [vmem:[%s13168_s20 + $0xcb8] sm:$0xff]   ;;  %v482_v53 = vld [vmem:[%s13163_s16 + $0xc8] sm:$0xff]  ;;  %v12552_v57 = vld [vmem:[%s13168_s20 + $0xdc0] sm:$0xff]  }
 0x196   : > { %v13581_v54 = vadd.f32 %v10957_v49, %v7476_v44  ;;  %11238 = vmatpush3.bf16.msra.mxu0 %v12503_v56  ;;  %v12541_v44 = vld [vmem:[%s13168_s20 + $0xcb0] sm:$0xff]   ;;  %v9892_v49 = vcombine.low %v481_v48, %v481_v48  ;;  %v9895_v55 = vcombine.high %v482_v53, %v482_v53  ;;  %v12551_v56 = vld [vmem:[%s13168_s20 + $0xd00] sm:$0xff]   ;;  %v12562_v3 = vld [vmem:[%s13168_s20 + $0xd58] sm:$0xff]  }
 0x197   : > { %11260 = vmatpush3.bf16.msra.mxu1 %v12505_v58  ;;  %11239 = vmatprep.subr.bf16.mxu0 %v12506_v59  ;;  %v12553_v58 = vld [vmem:[%s13168_s20 + $0xd80] sm:$0xff]   ;;  %v12554_v59 = vld [vmem:[%s13168_s20 + $0xd48] sm:$0xff]  }
 0x198   : > { %11261 = vmatprep.subr.bf16.mxu1 %v12508_v61  ;;  %v12556_v61 = vld [vmem:[%s13168_s20 + $0xdc8] sm:$0xff]  }
 0x199   : > { %v12593_v48 = vld [vmem:[%s13168_s20 + $0xe88] sm:$0xff]  }
 0x19a   : > { %11240 = vmatpush3.bf16.msra.mxu0 %v12507_v60  ;;  %v12555_v60 = vld [vmem:[%s13168_s20 + $0xd08] sm:$0xff]  }
 0x19b   : > { %11262 = vmatpush3.bf16.msra.mxu1 %v12511_v1  ;;  %11269 = vmatprep.subr.bf16.mxu0 %v12512_v2  ;;  %v12560_v1 = vld [vmem:[%s13168_s20 + $0xdd0] sm:$0xff]  }
 0x19c   : > { %11291 = vmatprep.subr.bf16.mxu1 %v12516_v7  ;;  %v12561_v2 = vld [vmem:[%s13168_s20 + $0xd90] sm:$0xff]   ;;  %v12566_v7 = vld [vmem:[%s13168_s20 + $0xd60] sm:$0xff]  }
 0x19d   : > { %8034 = vmatmul.mubr.bf16.vlgmr.msra.gmra.mrb[44].mxu0 %v9888_v63  ;;  %v12558_v63 = vld [vmem:[%s13168_s20 + $0xd50] sm:$0xff]  }
 0x19e   : > { %11270 = vmatpush3.bf16.msra.mxu0 %v12515_v6  ;;  %8074 = vmatmul.mubr.bf16.vlgmr.msra.gmra.mrb[44].mxu1 %v9890_v4  ;;  %v12563_v4 = vld [vmem:[%s13168_s20 + $0xd18] sm:$0xff]  }
 0x19f   : > { %11292 = vmatpush3.bf16.msra.mxu1 %v12517_v8  ;;  %11271 = vmatprep.subr.bf16.mxu0 %v12518_v9  ;;  %v12565_v6 = vld [vmem:[%s13168_s20 + $0xd98] sm:$0xff]   ;;  %v12567_v9 = vld [vmem:[%s13168_s20 + $0xd20] sm:$0xff]  }
 0x1a0   : > { %11293 = vmatprep.subr.bf16.mxu1 %v12520_v11  ;;  %8113 = vmatprep.mubr.bf16.mxu0 %v9893_v50  ;;  %v12568_v11 = vld [vmem:[%s13168_s20 + $0xde0] sm:$0xff]   ;;  %v12595_v50 = vld [vmem:[%s13168_s20 + $0xe10] sm:$0xff]  }
 0x1a1   : > { %8153 = vmatprep.mubr.bf16.mxu1 %v9895_v55  ;;  %v12600_v55 = vld [vmem:[%s13168_s20 + $0xed8] sm:$0xff]  }
 0x1a2   : > { %11272 = vmatpush3.bf16.msra.mxu0 %v12519_v10 }
 0x1a3   : > { %11294 = vmatpush3.bf16.msra.mxu1 %v12521_v12  ;;  %11273 = vmatprep.subr.bf16.mxu0 %v12522_v13 }
 0x1a4   : > { %11295 = vmatprep.subr.bf16.mxu1 %v12524_v15 }
 0x1a6   : > { %11274 = vmatpush3.bf16.msra.mxu0 %v12523_v14  ;;  %v12569_v14 = vld [vmem:[%s13168_s20 + $0xda0] sm:$0xff]  }
 0x1a7   : > { %11296 = vmatpush3.bf16.msra.mxu1 %v12525_v16  ;;  %11275 = vmatprep.subr.bf16.mxu0 %v12526_v17  ;;  %v12570_v17 = vld [vmem:[%s13168_s20 + $0xd68] sm:$0xff]  }
 0x1a8   : > { %11297 = vmatprep.subr.bf16.mxu1 %v12528_v19  ;;  %v12571_v19 = vld [vmem:[%s13168_s20 + $0xd28] sm:$0xff]  }
 0x1aa   : > { %11276 = vmatpush3.bf16.msra.mxu0 %v12527_v18 }
 0x1ab   : > { %11298 = vmatpush3.bf16.msra.mxu1 %v12529_v20  ;;  %11277 = vmatprep.subr.bf16.mxu0 %v12530_v21 }
 0x1ac   : > { %11299 = vmatprep.subr.bf16.mxu1 %v12532_v25 }
 0x1ae   : > { %11278 = vmatpush3.bf16.msra.mxu0 %v12531_v23 }
 0x1af   : > { %11300 = vmatpush3.bf16.msra.mxu1 %v12533_v28  ;;  %11279 = vmatprep.subr.bf16.mxu0 %v12534_v31  ;;  %v12575_v28 = vld [vmem:[%s13168_s20 + $0xd30] sm:$0xff]   ;;  %v12578_v31 = vld [vmem:[%s13168_s20 + $0xd78] sm:$0xff]  }
 0x1b0   : > { %v10977_v22 = vpop.f32.mrb[20].mxu0  ;;  %11301 = vmatprep.subr.bf16.mxu1 %v12536_v36 }
 0x1b1   : > { %v10978_v24 = vpop.f32.mrb[21].mxu0  ;;  %v10999_v29 = vpop.f32.mrb[20].mxu1 }
 0x1b2   : > { %v10979_v26 = vadd.f32 %v10978_v24, %v10977_v22  ;;  %v10980_v27 = vpop.f32.mrb[22].mxu0  ;;  %v11000_v34 = vpop.f32.mrb[21].mxu1  ;;  %11280 = vmatpush3.bf16.msra.mxu0 %v12535_v33  ;;  %v12572_v22 = vld [vmem:[%s13168_s20 + $0xde8] sm:$0xff]   ;;  %v12580_v33 = vld [vmem:[%s13168_s20 + $0xdf8] sm:$0xff]  }
 0x1b3   : > { %v10981_v32 = vpop.f32.mrb[23].mxu0  ;;  %v11001_v35 = vadd.f32 %v11000_v34, %v10999_v29  ;;  %v11002_v37 = vpop.f32.mrb[22].mxu1  ;;  %11302 = vmatpush3.bf16.msra.mxu1 %v12537_v38  ;;  %11281 = vmatprep.subr.bf16.mxu0 %v12538_v41  ;;  %v12573_v24 = vld [vmem:[%s13168_s20 + $0xda8] sm:$0xff]   ;;  %v12574_v27 = vld [vmem:[%s13168_s20 + $0xd70] sm:$0xff]   ;;  %v12584_v38 = vld [vmem:[%s13168_s20 + $0xe40] sm:$0xff]  }
 0x1b4   : > { %v7556_v30 = vadd.f32 %v10979_v26, %v13581_v54  ;;  %v11003_v39 = vpop.f32.mrb[23].mxu1  ;;  %11303 = vmatprep.subr.bf16.mxu1 %v12540_v43  ;;  %v9894_v54 = vcombine.low %v482_v53, %v482_v53  ;;  %v12576_v29 = vld [vmem:[%s13168_s20 + $0xdf0] sm:$0xff]   ;;  %v12579_v32 = vld [vmem:[%s13168_s20 + $0xd38] sm:$0xff]   ;;  %v12588_v43 = vld [vmem:[%s13168_s20 + $0xec0] sm:$0xff]  }
 0x1b5   : > { %v483_v34 = vld [vmem:[%s13163_s16 + $0xd0] sm:$0xff]  ;;  %v12583_v37 = vld [vmem:[%s13168_s20 + $0xdb8] sm:$0xff]  }
 0x1b6   : > { %v13618_v40 = vadd.f32 %v11001_v35, %v7556_v30  ;;  %11282 = vmatpush3.bf16.msra.mxu0 %v12539_v42  ;;  %v12577_v30 = vld [vmem:[%s13168_s20 + $0xdb0] sm:$0xff]   ;;  %v9896_v35 = vcombine.low %v483_v34, %v483_v34  ;;  %v9897_v36 = vcombine.high %v483_v34, %v483_v34  ;;  %v484_v39 = vld [vmem:[%s13163_s16 + $0xd8] sm:$0xff]  ;;  %v12587_v42 = vld [vmem:[%s13168_s20 + $0xe00] sm:$0xff]  }
 0x1b7   : > { %11304 = vmatpush3.bf16.msra.mxu1 %v12541_v44  ;;  %11283 = vmatprep.subr.bf16.mxu0 %v12542_v45  ;;  %v9899_v41 = vcombine.high %v484_v39, %v484_v39  ;;  %v12589_v44 = vld [vmem:[%s13168_s20 + $0xe80] sm:$0xff]   ;;  %v12590_v45 = vld [vmem:[%s13168_s20 + $0xe48] sm:$0xff]   ;;  %v12598_v53 = vld [vmem:[%s13168_s20 + $0xe58] sm:$0xff]  }
 0x1b8   : > { %11305 = vmatprep.subr.bf16.mxu1 %v12544_v47  ;;  %v12592_v47 = vld [vmem:[%s13168_s20 + $0xec8] sm:$0xff]  }
 0x1b9   : > { %v12629_v34 = vld [vmem:[%s13168_s20 + $0xf88] sm:$0xff]  }
 0x1ba   : > { %11284 = vmatpush3.bf16.msra.mxu0 %v12543_v46  ;;  %v12591_v46 = vld [vmem:[%s13168_s20 + $0xe08] sm:$0xff]  }
 0x1bb   : > { %11306 = vmatpush3.bf16.msra.mxu1 %v12547_v51  ;;  %11313 = vmatprep.subr.bf16.mxu0 %v12548_v52  ;;  %v12596_v51 = vld [vmem:[%s13168_s20 + $0xed0] sm:$0xff]  }
 0x1bc   : > { %11335 = vmatprep.subr.bf16.mxu1 %v12552_v57  ;;  %v12597_v52 = vld [vmem:[%s13168_s20 + $0xe90] sm:$0xff]   ;;  %v12602_v57 = vld [vmem:[%s13168_s20 + $0xe60] sm:$0xff]  }
 0x1bd   : > { %8114 = vmatmul.mubr.bf16.vlgmr.msra.gmra.mrb[48].mxu0 %v9892_v49  ;;  %v12594_v49 = vld [vmem:[%s13168_s20 + $0xe50] sm:$0xff]  }
 0x1be   : > { %11314 = vmatpush3.bf16.msra.mxu0 %v12551_v56  ;;  %8154 = vmatmul.mubr.bf16.vlgmr.msra.gmra.mrb[48].mxu1 %v9894_v54  ;;  %v12599_v54 = vld [vmem:[%s13168_s20 + $0xe18] sm:$0xff]  }
 0x1bf   : > { %11336 = vmatpush3.bf16.msra.mxu1 %v12553_v58  ;;  %11315 = vmatprep.subr.bf16.mxu0 %v12554_v59  ;;  %v12601_v56 = vld [vmem:[%s13168_s20 + $0xe98] sm:$0xff]   ;;  %v12603_v58 = vld [vmem:[%s13168_s20 + $0xe20] sm:$0xff]  }
 0x1c0   : > { %11337 = vmatprep.subr.bf16.mxu1 %v12556_v61  ;;  %8193 = vmatprep.mubr.bf16.mxu0 %v9897_v36  ;;  %v12631_v36 = vld [vmem:[%s13168_s20 + $0xf10] sm:$0xff]  }
 0x1c1   : > { %8233 = vmatprep.mubr.bf16.mxu1 %v9899_v41  ;;  %v12636_v41 = vld [vmem:[%s13168_s20 + $0xfd8] sm:$0xff]  }
 0x1c2   : > { %11316 = vmatpush3.bf16.msra.mxu0 %v12555_v60  ;;  %v12604_v60 = vld [vmem:[%s13168_s20 + $0xee0] sm:$0xff]  }
 0x1c3   : > { %11338 = vmatpush3.bf16.msra.mxu1 %v12557_v62  ;;  %11317 = vmatprep.subr.bf16.mxu0 %v12558_v63  ;;  %v12605_v62 = vld [vmem:[%s13168_s20 + $0xea0] sm:$0xff]  }
 0x1c4   : > { %11339 = vmatprep.subr.bf16.mxu1 %v12560_v1  ;;  %v12606_v1 = vld [vmem:[%s13168_s20 + $0xe68] sm:$0xff]  }
 0x1c6   : > { %11318 = vmatpush3.bf16.msra.mxu0 %v12559_v0 }
 0x1c7   : > { %11340 = vmatpush3.bf16.msra.mxu1 %v12561_v2  ;;  %11319 = vmatprep.subr.bf16.mxu0 %v12562_v3 }
 0x1c8   : > { %11341 = vmatprep.subr.bf16.mxu1 %v12564_v5 }
 0x1ca   : > { %11320 = vmatpush3.bf16.msra.mxu0 %v12563_v4  ;;  %v12607_v4 = vld [vmem:[%s13168_s20 + $0xe28] sm:$0xff]  }
 0x1cb   : > { %11342 = vmatpush3.bf16.msra.mxu1 %v12565_v6  ;;  %11321 = vmatprep.subr.bf16.mxu0 %v12566_v7  ;;  %v12608_v7 = vld [vmem:[%s13168_s20 + $0xee8] sm:$0xff]  }
 0x1cc   : > { %11343 = vmatprep.subr.bf16.mxu1 %v12568_v11  ;;  %v12610_v11 = vld [vmem:[%s13168_s20 + $0xe70] sm:$0xff]  }
 0x1ce   : > { %11322 = vmatpush3.bf16.msra.mxu0 %v12567_v9  ;;  %v12609_v9 = vld [vmem:[%s13168_s20 + $0xea8] sm:$0xff]  }
 0x1cf   : > { %11344 = vmatpush3.bf16.msra.mxu1 %v12569_v14  ;;  %11323 = vmatprep.subr.bf16.mxu0 %v12570_v17  ;;  %v12611_v14 = vld [vmem:[%s13168_s20 + $0xe30] sm:$0xff]   ;;  %v12614_v17 = vld [vmem:[%s13168_s20 + $0xe78] sm:$0xff]  }
 0x1d0   : > { %v11021_v8 = vpop.f32.mrb[24].mxu0  ;;  %11345 = vmatprep.subr.bf16.mxu1 %v12572_v22 }
 0x1d1   : > { %v11022_v10 = vpop.f32.mrb[25].mxu0  ;;  %v11043_v15 = vpop.f32.mrb[24].mxu1 }
 0x1d2   : > { %v11023_v12 = vadd.f32 %v11022_v10, %v11021_v8  ;;  %v11024_v13 = vpop.f32.mrb[26].mxu0  ;;  %v11044_v20 = vpop.f32.mrb[25].mxu1  ;;  %11324 = vmatpush3.bf16.msra.mxu0 %v12571_v19  ;;  %v12616_v19 = vld [vmem:[%s13168_s20 + $0xef8] sm:$0xff]  }
 0x1d3   : > { %v11025_v18 = vpop.f32.mrb[27].mxu0  ;;  %v11045_v21 = vadd.f32 %v11044_v20, %v11043_v15  ;;  %v11046_v23 = vpop.f32.mrb[26].mxu1  ;;  %11346 = vmatpush3.bf16.msra.mxu1 %v12573_v24  ;;  %11325 = vmatprep.subr.bf16.mxu0 %v12574_v27  ;;  %v12612_v15 = vld [vmem:[%s13168_s20 + $0xef0] sm:$0xff]   ;;  %v485_v20 = vld [vmem:[%s13163_s16 + $0xe0] sm:$0xff] }
 0x1d4   : > { %v7636_v16 = vadd.f32 %v11023_v12, %v13618_v40  ;;  %v11047_v25 = vpop.f32.mrb[27].mxu1  ;;  %11347 = vmatprep.subr.bf16.mxu1 %v12576_v29  ;;  %v9898_v40 = vcombine.low %v484_v39, %v484_v39  ;;  %v12615_v18 = vld [vmem:[%s13168_s20 + $0xe38] sm:$0xff]   ;;  %v9901_v22 = vcombine.high %v485_v20, %v485_v20  ;;  %v12620_v24 = vld [vmem:[%s13168_s20 + $0xf40] sm:$0xff]  }
 0x1d5   : > { %v12619_v23 = vld [vmem:[%s13168_s20 + $0xeb8] sm:$0xff]   ;;  %v486_v25 = vld [vmem:[%s13163_s16 + $0xe8] sm:$0xff]  ;;  %v12624_v29 = vld [vmem:[%s13168_s20 + $0xfc0] sm:$0xff]  }
 0x1d6   : > { %v13655_v26 = vadd.f32 %v11045_v21, %v7636_v16  ;;  %11326 = vmatpush3.bf16.msra.mxu0 %v12575_v28  ;;  %v12613_v16 = vld [vmem:[%s13168_s20 + $0xeb0] sm:$0xff]   ;;  %v9900_v21 = vcombine.low %v485_v20, %v485_v20  ;;  %v9903_v27 = vcombine.high %v486_v25, %v486_v25  ;;  %v12623_v28 = vld [vmem:[%s13168_s20 + $0xf00] sm:$0xff]   ;;  %v12634_v39 = vld [vmem:[%s13168_s20 + $0xf58] sm:$0xff]  }
 0x1d7   : > { %11348 = vmatpush3.bf16.msra.mxu1 %v12577_v30  ;;  %11327 = vmatprep.subr.bf16.mxu0 %v12578_v31  ;;  %v12625_v30 = vld [vmem:[%s13168_s20 + $0xf80] sm:$0xff]   ;;  %v12626_v31 = vld [vmem:[%s13168_s20 + $0xf48] sm:$0xff]  }
 0x1d8   : > { %11349 = vmatprep.subr.bf16.mxu1 %v12580_v33  ;;  %v12628_v33 = vld [vmem:[%s13168_s20 + $0xfc8] sm:$0xff]  }
 0x1d9   : > { %v12665_v20 = vld [vmem:[%s13168_s20 + $0x1088] sm:$0xff]  }
 0x1da   : > { %11328 = vmatpush3.bf16.msra.mxu0 %v12579_v32  ;;  %v12627_v32 = vld [vmem:[%s13168_s20 + $0xf08] sm:$0xff]  }
 0x1db   : > { %11350 = vmatpush3.bf16.msra.mxu1 %v12583_v37  ;;  %11357 = vmatprep.subr.bf16.mxu0 %v12584_v38  ;;  %v12632_v37 = vld [vmem:[%s13168_s20 + $0xfd0] sm:$0xff]  }
 0x1dc   : > { %11379 = vmatprep.subr.bf16.mxu1 %v12588_v43  ;;  %v12633_v38 = vld [vmem:[%s13168_s20 + $0xf90] sm:$0xff]   ;;  %v12638_v43 = vld [vmem:[%s13168_s20 + $0xf60] sm:$0xff]  }
 0x1dd   : > { %8194 = vmatmul.mubr.bf16.vlgmr.msra.gmra.mrb[52].mxu0 %v9896_v35  ;;  %v12630_v35 = vld [vmem:[%s13168_s20 + $0xf50] sm:$0xff]  }
 0x1de   : > { %11358 = vmatpush3.bf16.msra.mxu0 %v12587_v42  ;;  %8234 = vmatmul.mubr.bf16.vlgmr.msra.gmra.mrb[52].mxu1 %v9898_v40  ;;  %v12635_v40 = vld [vmem:[%s13168_s20 + $0xf18] sm:$0xff]  }
 0x1df   : > { %11380 = vmatpush3.bf16.msra.mxu1 %v12589_v44  ;;  %11359 = vmatprep.subr.bf16.mxu0 %v12590_v45  ;;  %v12637_v42 = vld [vmem:[%s13168_s20 + $0xf98] sm:$0xff]   ;;  %v12639_v44 = vld [vmem:[%s13168_s20 + $0xf20] sm:$0xff]  }
 0x1e0   : > { %11381 = vmatprep.subr.bf16.mxu1 %v12592_v47  ;;  %8273 = vmatprep.mubr.bf16.mxu0 %v9901_v22  ;;  %v12667_v22 = vld [vmem:[%s13168_s20 + $0x1010] sm:$0xff]  }
 0x1e1   : > { %8313 = vmatprep.mubr.bf16.mxu1 %v9903_v27  ;;  %v12672_v27 = vld [vmem:[%s13168_s20 + $0x10d8] sm:$0xff]  }
 0x1e2   : > { %11360 = vmatpush3.bf16.msra.mxu0 %v12591_v46  ;;  %v12640_v46 = vld [vmem:[%s13168_s20 + $0xfe0] sm:$0xff]  }
 0x1e3   : > { %11382 = vmatpush3.bf16.msra.mxu1 %v12593_v48  ;;  %11361 = vmatprep.subr.bf16.mxu0 %v12594_v49  ;;  %v12641_v48 = vld [vmem:[%s13168_s20 + $0xfa0] sm:$0xff]  }
 0x1e4   : > { %11383 = vmatprep.subr.bf16.mxu1 %v12596_v51  ;;  %v12642_v51 = vld [vmem:[%s13168_s20 + $0xf68] sm:$0xff]  }
 0x1e6   : > { %11362 = vmatpush3.bf16.msra.mxu0 %v12595_v50 }
 0x1e7   : > { %11384 = vmatpush3.bf16.msra.mxu1 %v12597_v52  ;;  %11363 = vmatprep.subr.bf16.mxu0 %v12598_v53 }
 0x1e8   : > { %11385 = vmatprep.subr.bf16.mxu1 %v12600_v55 }
 0x1ea   : > { %11364 = vmatpush3.bf16.msra.mxu0 %v12599_v54  ;;  %v12643_v54 = vld [vmem:[%s13168_s20 + $0xf28] sm:$0xff]  }
 0x1eb   : > { %11386 = vmatpush3.bf16.msra.mxu1 %v12601_v56  ;;  %11365 = vmatprep.subr.bf16.mxu0 %v12602_v57  ;;  %v12644_v57 = vld [vmem:[%s13168_s20 + $0xfe8] sm:$0xff]  }
 0x1ec   : > { %11387 = vmatprep.subr.bf16.mxu1 %v12604_v60 }
 0x1ee   : > { %11366 = vmatpush3.bf16.msra.mxu0 %v12603_v58 }
 0x1ef   : > { %11388 = vmatpush3.bf16.msra.mxu1 %v12605_v62  ;;  %11367 = vmatprep.subr.bf16.mxu0 %v12606_v1  ;;  %v12646_v62 = vld [vmem:[%s13168_s20 + $0xf70] sm:$0xff]  }
 0x1f0   : > { %v11065_v59 = vpop.f32.mrb[28].mxu0  ;;  %11389 = vmatprep.subr.bf16.mxu1 %v12608_v7  ;;  %v12648_v1 = vld [vmem:[%s13168_s20 + $0xff0] sm:$0xff]  }
 0x1f1   : > { %v11066_v61 = vpop.f32.mrb[29].mxu0  ;;  %v11087_v2 = vpop.f32.mrb[28].mxu1 }
 0x1f2   : > { %v11067_v63 = vadd.f32 %v11066_v61, %v11065_v59  ;;  %v11068_v0 = vpop.f32.mrb[30].mxu0  ;;  %v11088_v6 = vpop.f32.mrb[29].mxu1  ;;  %11368 = vmatpush3.bf16.msra.mxu0 %v12607_v4  ;;  %v12645_v59 = vld [vmem:[%s13168_s20 + $0xfa8] sm:$0xff]   ;;  %v12651_v4 = vld [vmem:[%s13168_s20 + $0xf38] sm:$0xff]  }
 0x1f3   : > { %v11069_v5 = vpop.f32.mrb[31].mxu0  ;;  %v11089_v8 = vadd.f32 %v11088_v6, %v11087_v2  ;;  %v11090_v10 = vpop.f32.mrb[30].mxu1  ;;  %11390 = vmatpush3.bf16.msra.mxu1 %v12609_v9  ;;  %11369 = vmatprep.subr.bf16.mxu0 %v12610_v11  ;;  %v12647_v0 = vld [vmem:[%s13168_s20 + $0xf30] sm:$0xff]   ;;  %v12655_v9 = vld [vmem:[%s13168_s20 + $0xfb8] sm:$0xff]  }
 0x1f4   : > { %v7716_v3 = vadd.f32 %v11067_v63, %v13655_v26  ;;  %v11091_v12 = vpop.f32.mrb[31].mxu1  ;;  %11391 = vmatprep.subr.bf16.mxu1 %v12612_v15  ;;  %v9902_v26 = vcombine.low %v486_v25, %v486_v25  ;;  %v12649_v2 = vld [vmem:[%s13168_s20 + $0xfb0] sm:$0xff]   ;;  %v12652_v5 = vld [vmem:[%s13168_s20 + $0xff8] sm:$0xff]   ;;  %v12656_v10 = vld [vmem:[%s13168_s20 + $0x1040] sm:$0xff]  }
 0x1f5   : > { %v487_v6 = vld [vmem:[%s13163_s16 + $0xf0] sm:$0xff]  ;;  %v488_v11 = vld [vmem:[%s13163_s16 + $0xf8] sm:$0xff]  ;;  %v12660_v15 = vld [vmem:[%s13168_s20 + $0x10c0] sm:$0xff]  }
 0x1f6   : > { %v13693_v13 = vadd.f32 %v11089_v8, %v7716_v3  ;;  %11370 = vmatpush3.bf16.msra.mxu0 %v12611_v14  ;;  %v12650_v3 = vld [vmem:[%s13168_s20 + $0xf78] sm:$0xff]   ;;  %v9904_v7 = vcombine.low %v487_v6, %v487_v6  ;;  %v9905_v8 = vcombine.high %v487_v6, %v487_v6  ;;  %v9906_v12 = vcombine.low %v488_v11, %v488_v11  ;;  %v12659_v14 = vld [vmem:[%s13168_s20 + $0x1000] sm:$0xff]   ;;  %v12701_v6 = vld [vmem:[%s13168_s20 + $0x1188] sm:$0xff]  }
 0x1f7   : > { %11392 = vmatpush3.bf16.msra.mxu1 %v12613_v16  ;;  %11371 = vmatprep.subr.bf16.mxu0 %v12614_v17  ;;  %v12661_v16 = vld [vmem:[%s13168_s20 + $0x1080] sm:$0xff]   ;;  %v12662_v17 = vld [vmem:[%s13168_s20 + $0x1048] sm:$0xff]   ;;  %v12670_v25 = vld [vmem:[%s13168_s20 + $0x1058] sm:$0xff]  }
 0x1f8   : > { %11393 = vmatprep.subr.bf16.mxu1 %v12616_v19  ;;  %v12664_v19 = vld [vmem:[%s13168_s20 + $0x10c8] sm:$0xff]  }
 0x1fa   : > { %11372 = vmatpush3.bf16.msra.mxu0 %v12615_v18  ;;  %v12663_v18 = vld [vmem:[%s13168_s20 + $0x1008] sm:$0xff]  }
 0x1fb   : > { %11394 = vmatpush3.bf16.msra.mxu1 %v12619_v23  ;;  %11401 = vmatprep.subr.bf16.mxu0 %v12620_v24  ;;  %v12668_v23 = vld [vmem:[%s13168_s20 + $0x10d0] sm:$0xff]  }
 0x1fc   : > { %11423 = vmatprep.subr.bf16.mxu1 %v12624_v29  ;;  %v12669_v24 = vld [vmem:[%s13168_s20 + $0x1090] sm:$0xff]   ;;  %v12674_v29 = vld [vmem:[%s13168_s20 + $0x1060] sm:$0xff]  }
 0x1fd   : > { %8274 = vmatmul.mubr.bf16.vlgmr.msra.gmra.mrb[56].mxu0 %v9900_v21  ;;  %v12666_v21 = vld [vmem:[%s13168_s20 + $0x1050] sm:$0xff]  }
 0x1fe   : > { %11402 = vmatpush3.bf16.msra.mxu0 %v12623_v28  ;;  %8314 = vmatmul.mubr.bf16.vlgmr.msra.gmra.mrb[56].mxu1 %v9902_v26  ;;  %v12671_v26 = vld [vmem:[%s13168_s20 + $0x1018] sm:$0xff]  }
 0x1ff   : > { %11424 = vmatpush3.bf16.msra.mxu1 %v12625_v30  ;;  %11403 = vmatprep.subr.bf16.mxu0 %v12626_v31  ;;  %v12673_v28 = vld [vmem:[%s13168_s20 + $0x1098] sm:$0xff]   ;;  %v12675_v31 = vld [vmem:[%s13168_s20 + $0x1020] sm:$0xff]  }
 0x200   : > { %11425 = vmatprep.subr.bf16.mxu1 %v12628_v33  ;;  %8353 = vmatprep.mubr.bf16.mxu0 %v9905_v8  ;;  %v12676_v33 = vld [vmem:[%s13168_s20 + $0x10e0] sm:$0xff]   ;;  %v12703_v8 = vld [vmem:[%s13168_s20 + $0x1110] sm:$0xff]  }
 0x202   : > { %11404 = vmatpush3.bf16.msra.mxu0 %v12627_v32 }
 0x203   : > { %11426 = vmatpush3.bf16.msra.mxu1 %v12629_v34  ;;  %11405 = vmatprep.subr.bf16.mxu0 %v12630_v35 }
 0x204   : > { %11427 = vmatprep.subr.bf16.mxu1 %v12632_v37 }
 0x206   : > { %11406 = vmatpush3.bf16.msra.mxu0 %v12631_v36  ;;  %v12677_v36 = vld [vmem:[%s13168_s20 + $0x10a0] sm:$0xff]  }
 0x207   : > { %11428 = vmatpush3.bf16.msra.mxu1 %v12633_v38  ;;  %11407 = vmatprep.subr.bf16.mxu0 %v12634_v39  ;;  %v12678_v39 = vld [vmem:[%s13168_s20 + $0x1068] sm:$0xff]  }
 0x208   : > { %11429 = vmatprep.subr.bf16.mxu1 %v12636_v41  ;;  %v12679_v41 = vld [vmem:[%s13168_s20 + $0x1028] sm:$0xff]  }
 0x20a   : > { %11408 = vmatpush3.bf16.msra.mxu0 %v12635_v40 }
 0x20b   : > { %11430 = vmatpush3.bf16.msra.mxu1 %v12637_v42  ;;  %11409 = vmatprep.subr.bf16.mxu0 %v12638_v43 }
 0x20c   : > { %11431 = vmatprep.subr.bf16.mxu1 %v12640_v46  ;;  %v12681_v46 = vld [vmem:[%s13168_s20 + $0x10a8] sm:$0xff]  }
 0x20e   : > { %11410 = vmatpush3.bf16.msra.mxu0 %v12639_v44  ;;  %v12680_v44 = vld [vmem:[%s13168_s20 + $0x10e8] sm:$0xff]  }
 0x20f   : > { %11432 = vmatpush3.bf16.msra.mxu1 %v12641_v48  ;;  %11411 = vmatprep.subr.bf16.mxu0 %v12642_v51  ;;  %v12684_v51 = vld [vmem:[%s13168_s20 + $0x10f0] sm:$0xff]  }
 0x210   : > { %v11109_v45 = vpop.f32.mrb[32].mxu0  ;;  %11433 = vmatprep.subr.bf16.mxu1 %v12644_v57 }
 0x211   : > { %v11110_v47 = vpop.f32.mrb[33].mxu0  ;;  %v11131_v52 = vpop.f32.mrb[32].mxu1 }
 0x212   : > { %v11111_v49 = vadd.f32 %v11110_v47, %v11109_v45  ;;  %v11112_v50 = vpop.f32.mrb[34].mxu0  ;;  %v11132_v56 = vpop.f32.mrb[33].mxu1  ;;  %11412 = vmatpush3.bf16.msra.mxu0 %v12643_v54  ;;  %v12687_v54 = vld [vmem:[%s13168_s20 + $0x1038] sm:$0xff]  }
 0x213   : > { %v11113_v55 = vpop.f32.mrb[35].mxu0  ;;  %v11133_v58 = vadd.f32 %v11132_v56, %v11131_v52  ;;  %v11134_v60 = vpop.f32.mrb[34].mxu1  ;;  %11434 = vmatpush3.bf16.msra.mxu1 %v12645_v59  ;;  %11413 = vmatprep.subr.bf16.mxu0 %v12646_v62  ;;  %v12683_v50 = vld [vmem:[%s13168_s20 + $0x1030] sm:$0xff]   ;;  %v489_v56 = vld [vmem:[%s13163_s16 + $0x100] sm:$0xff]  ;;  %v12691_v59 = vld [vmem:[%s13168_s20 + $0x10b8] sm:$0xff]  }
 0x214   : > { %v7796_v53 = vadd.f32 %v11111_v49, %v13693_v13  ;;  %v11135_v63 = vpop.f32.mrb[35].mxu1  ;;  %11435 = vmatprep.subr.bf16.mxu1 %v12648_v1  ;;  %v9907_v13 = vcombine.high %v488_v11, %v488_v11  ;;  %v12682_v49 = vld [vmem:[%s13168_s20 + $0x1070] sm:$0xff]   ;;  %v12688_v55 = vld [vmem:[%s13168_s20 + $0x10f8] sm:$0xff]   ;;  %v9908_v57 = vcombine.low %v489_v56, %v489_v56  ;;  %v12692_v60 = vld [vmem:[%s13168_s20 + $0x1140] sm:$0xff]  }
 0x215   : > { %v12685_v52 = vld [vmem:[%s13168_s20 + $0x10b0] sm:$0xff]   ;;  %v12696_v1 = vld [vmem:[%s13168_s20 + $0x11c0] sm:$0xff]   ;;  %v12706_v11 = vld [vmem:[%s13168_s20 + $0x1158] sm:$0xff]  }
 0x216   : > { %v13729_v61 = vadd.f32 %v11133_v58, %v7796_v53  ;;  %11414 = vmatpush3.bf16.msra.mxu0 %v12647_v0  ;;  %8393 = vmatprep.mubr.bf16.mxu1 %v9907_v13  ;;  %v12686_v53 = vld [vmem:[%s13168_s20 + $0x1078] sm:$0xff]   ;;  %v9909_v58 = vcombine.high %v489_v56, %v489_v56  ;;  %v12695_v0 = vld [vmem:[%s13168_s20 + $0x1100] sm:$0xff]   ;;  %v12737_v56 = vld [vmem:[%s13168_s20 + $0x1288] sm:$0xff]  }
 0x217   : > { %11436 = vmatpush3.bf16.msra.mxu1 %v12649_v2  ;;  %11415 = vmatprep.subr.bf16.mxu0 %v12650_v3  ;;  %v12697_v2 = vld [vmem:[%s13168_s20 + $0x1180] sm:$0xff]   ;;  %v12698_v3 = vld [vmem:[%s13168_s20 + $0x1148] sm:$0xff]   ;;  %v12708_v13 = vld [vmem:[%s13168_s20 + $0x11d8] sm:$0xff]  }
 0x218   : > { %11437 = vmatprep.subr.bf16.mxu1 %v12652_v5  ;;  %v12700_v5 = vld [vmem:[%s13168_s20 + $0x11c8] sm:$0xff]  }
 0x21a   : > { %11416 = vmatpush3.bf16.msra.mxu0 %v12651_v4  ;;  %v12699_v4 = vld [vmem:[%s13168_s20 + $0x1108] sm:$0xff]  }
 0x21b   : > { %11438 = vmatpush3.bf16.msra.mxu1 %v12655_v9  ;;  %11445 = vmatprep.subr.bf16.mxu0 %v12656_v10  ;;  %v12704_v9 = vld [vmem:[%s13168_s20 + $0x11d0] sm:$0xff]  }
 0x21c   : > { %11467 = vmatprep.subr.bf16.mxu1 %v12660_v15  ;;  %v12705_v10 = vld [vmem:[%s13168_s20 + $0x1190] sm:$0xff]   ;;  %v12710_v15 = vld [vmem:[%s13168_s20 + $0x1160] sm:$0xff]  }
 0x21d   : > { %8354 = vmatmul.mubr.bf16.vlgmr.msra.gmra.mrb[60].mxu0 %v9904_v7  ;;  %v12702_v7 = vld [vmem:[%s13168_s20 + $0x1150] sm:$0xff]  }
 0x21e   : > { %11446 = vmatpush3.bf16.msra.mxu0 %v12659_v14  ;;  %8394 = vmatmul.mubr.bf16.vlgmr.msra.gmra.mrb[60].mxu1 %v9906_v12  ;;  %v12707_v12 = vld [vmem:[%s13168_s20 + $0x1118] sm:$0xff]  }
 0x21f   : > { %11468 = vmatpush3.bf16.msra.mxu1 %v12661_v16  ;;  %11447 = vmatprep.subr.bf16.mxu0 %v12662_v17  ;;  %v12709_v14 = vld [vmem:[%s13168_s20 + $0x1198] sm:$0xff]   ;;  %v12711_v16 = vld [vmem:[%s13168_s20 + $0x1120] sm:$0xff]  }
 0x220   : > { %11469 = vmatprep.subr.bf16.mxu1 %v12664_v19  ;;  %8433 = vmatprep.mubr.bf16.mxu0 %v9909_v58  ;;  %v12739_v58 = vld [vmem:[%s13168_s20 + $0x1210] sm:$0xff]  }
 0x222   : > { %11448 = vmatpush3.bf16.msra.mxu0 %v12663_v18  ;;  %v12712_v18 = vld [vmem:[%s13168_s20 + $0x11e0] sm:$0xff]  }
 0x223   : > { %11470 = vmatpush3.bf16.msra.mxu1 %v12665_v20  ;;  %11449 = vmatprep.subr.bf16.mxu0 %v12666_v21  ;;  %v12713_v20 = vld [vmem:[%s13168_s20 + $0x11a0] sm:$0xff]  }
 0x224   : > { %11471 = vmatprep.subr.bf16.mxu1 %v12668_v23  ;;  %v12714_v23 = vld [vmem:[%s13168_s20 + $0x1168] sm:$0xff]  }
 0x226   : > { %11450 = vmatpush3.bf16.msra.mxu0 %v12667_v22 }
 0x227   : > { %11472 = vmatpush3.bf16.msra.mxu1 %v12669_v24  ;;  %11451 = vmatprep.subr.bf16.mxu0 %v12670_v25 }
 0x228   : > { %11473 = vmatprep.subr.bf16.mxu1 %v12672_v27 }
 0x22a   : > { %11452 = vmatpush3.bf16.msra.mxu0 %v12671_v26  ;;  %v12715_v26 = vld [vmem:[%s13168_s20 + $0x1128] sm:$0xff]  }
 0x22b   : > { %11474 = vmatpush3.bf16.msra.mxu1 %v12673_v28  ;;  %11453 = vmatprep.subr.bf16.mxu0 %v12674_v29  ;;  %v12716_v29 = vld [vmem:[%s13168_s20 + $0x11e8] sm:$0xff]  }
 0x22c   : > { %11475 = vmatprep.subr.bf16.mxu1 %v12676_v33  ;;  %v12718_v33 = vld [vmem:[%s13168_s20 + $0x1170] sm:$0xff]  }
 0x22e   : > { %11454 = vmatpush3.bf16.msra.mxu0 %v12675_v31  ;;  %v12717_v31 = vld [vmem:[%s13168_s20 + $0x11a8] sm:$0xff]  }
 0x22f   : > { %11476 = vmatpush3.bf16.msra.mxu1 %v12677_v36  ;;  %11455 = vmatprep.subr.bf16.mxu0 %v12678_v39  ;;  %v12719_v36 = vld [vmem:[%s13168_s20 + $0x1130] sm:$0xff]   ;;  %v12722_v39 = vld [vmem:[%s13168_s20 + $0x1178] sm:$0xff]  }
 0x230   : > { %v11153_v30 = vpop.f32.mrb[36].mxu0  ;;  %11477 = vmatprep.subr.bf16.mxu1 %v12680_v44 }
 0x231   : > { %v11154_v32 = vpop.f32.mrb[37].mxu0  ;;  %v11175_v37 = vpop.f32.mrb[36].mxu1 }
 0x232   : > { %v11155_v34 = vadd.f32 %v11154_v32, %v11153_v30  ;;  %v11156_v35 = vpop.f32.mrb[38].mxu0  ;;  %v11176_v42 = vpop.f32.mrb[37].mxu1  ;;  %11456 = vmatpush3.bf16.msra.mxu0 %v12679_v41  ;;  %v12724_v41 = vld [vmem:[%s13168_s20 + $0x11f8] sm:$0xff]  }
 0x233   : > { %v11157_v40 = vpop.f32.mrb[39].mxu0  ;;  %v11177_v43 = vadd.f32 %v11176_v42, %v11175_v37  ;;  %v11178_v45 = vpop.f32.mrb[38].mxu1  ;;  %11478 = vmatpush3.bf16.msra.mxu1 %v12681_v46  ;;  %11457 = vmatprep.subr.bf16.mxu0 %v12682_v49  ;;  %v12720_v37 = vld [vmem:[%s13168_s20 + $0x11f0] sm:$0xff]   ;;  %v12728_v46 = vld [vmem:[%s13168_s20 + $0x1240] sm:$0xff]  }
 0x234   : > { %v7876_v38 = vadd.f32 %v11155_v34, %v13729_v61  ;;  %v11179_v47 = vpop.f32.mrb[39].mxu1  ;;  %11479 = vmatprep.subr.bf16.mxu1 %v12684_v51  ;;  %v490_v61 = vld [vmem:[%s13163_s16 + $0x108] sm:$0xff]  ;;  %v12723_v40 = vld [vmem:[%s13168_s20 + $0x1138] sm:$0xff]   ;;  %v491_v42 = vld [vmem:[%s13163_s16 + $0x110] sm:$0xff] }
 0x235   : > { %v9910_v62 = vcombine.low %v490_v61, %v490_v61  ;;  %v9911_v63 = vcombine.high %v490_v61, %v490_v61  ;;  %v9913_v44 = vcombine.high %v491_v42, %v491_v42  ;;  %v12727_v45 = vld [vmem:[%s13168_s20 + $0x11b8] sm:$0xff]   ;;  %v12732_v51 = vld [vmem:[%s13168_s20 + $0x12c0] sm:$0xff]  }
 0x236   : > { %v13766_v48 = vadd.f32 %v11177_v43, %v7876_v38  ;;  %11458 = vmatpush3.bf16.msra.mxu0 %v12683_v50  ;;  %v12721_v38 = vld [vmem:[%s13168_s20 + $0x11b0] sm:$0xff]   ;;  %v9912_v43 = vcombine.low %v491_v42, %v491_v42  ;;  %v492_v47 = vld [vmem:[%s13163_s16 + $0x118] sm:$0xff]  ;;  %v12731_v50 = vld [vmem:[%s13168_s20 + $0x1200] sm:$0xff]  }
 0x237   : > { %11480 = vmatpush3.bf16.msra.mxu1 %v12685_v52  ;;  %11459 = vmatprep.subr.bf16.mxu0 %v12686_v53  ;;  %v9915_v49 = vcombine.high %v492_v47, %v492_v47  ;;  %v12733_v52 = vld [vmem:[%s13168_s20 + $0x1280] sm:$0xff]   ;;  %v12734_v53 = vld [vmem:[%s13168_s20 + $0x1248] sm:$0xff]   ;;  %v12742_v61 = vld [vmem:[%s13168_s20 + $0x1258] sm:$0xff]  }
 0x238   : > { %11481 = vmatprep.subr.bf16.mxu1 %v12688_v55  ;;  %8473 = vmatprep.mubr.bf16.mxu1 %v9911_v63  ;;  %v12736_v55 = vld [vmem:[%s13168_s20 + $0x12c8] sm:$0xff]   ;;  %v12744_v63 = vld [vmem:[%s13168_s20 + $0x12d8] sm:$0xff]  }
 0x239   : > { %v12773_v42 = vld [vmem:[%s13168_s20 + $0x1388] sm:$0xff]  }
 0x23a   : > { %11460 = vmatpush3.bf16.msra.mxu0 %v12687_v54  ;;  %v12735_v54 = vld [vmem:[%s13168_s20 + $0x1208] sm:$0xff]  }
 0x23b   : > { %11482 = vmatpush3.bf16.msra.mxu1 %v12691_v59  ;;  %11489 = vmatprep.subr.bf16.mxu0 %v12692_v60  ;;  %v12740_v59 = vld [vmem:[%s13168_s20 + $0x12d0] sm:$0xff]  }
 0x23c   : > { %11511 = vmatprep.subr.bf16.mxu1 %v12696_v1  ;;  %v12741_v60 = vld [vmem:[%s13168_s20 + $0x1290] sm:$0xff]   ;;  %v12746_v1 = vld [vmem:[%s13168_s20 + $0x1260] sm:$0xff]  }
 0x23d   : > { %8434 = vmatmul.mubr.bf16.vlgmr.msra.gmra.mrb[64].mxu0 %v9908_v57  ;;  %v12738_v57 = vld [vmem:[%s13168_s20 + $0x1250] sm:$0xff]  }
 0x23e   : > { %11490 = vmatpush3.bf16.msra.mxu0 %v12695_v0  ;;  %8474 = vmatmul.mubr.bf16.vlgmr.msra.gmra.mrb[64].mxu1 %v9910_v62  ;;  %v12743_v62 = vld [vmem:[%s13168_s20 + $0x1218] sm:$0xff]  }
 0x23f   : > { %11512 = vmatpush3.bf16.msra.mxu1 %v12697_v2  ;;  %11491 = vmatprep.subr.bf16.mxu0 %v12698_v3  ;;  %v12745_v0 = vld [vmem:[%s13168_s20 + $0x1298] sm:$0xff]   ;;  %v12747_v2 = vld [vmem:[%s13168_s20 + $0x1220] sm:$0xff]  }
 0x240   : > { %11513 = vmatprep.subr.bf16.mxu1 %v12700_v5  ;;  %8513 = vmatprep.mubr.bf16.mxu0 %v9913_v44  ;;  %v12775_v44 = vld [vmem:[%s13168_s20 + $0x1310] sm:$0xff]  }
 0x241   : > { %8553 = vmatprep.mubr.bf16.mxu1 %v9915_v49  ;;  %v12780_v49 = vld [vmem:[%s13168_s20 + $0x13d8] sm:$0xff]  }
 0x242   : > { %11492 = vmatpush3.bf16.msra.mxu0 %v12699_v4  ;;  %v12748_v4 = vld [vmem:[%s13168_s20 + $0x12e0] sm:$0xff]  }
 0x243   : > { %11514 = vmatpush3.bf16.msra.mxu1 %v12701_v6  ;;  %11493 = vmatprep.subr.bf16.mxu0 %v12702_v7  ;;  %v12749_v6 = vld [vmem:[%s13168_s20 + $0x12a0] sm:$0xff]  }
 0x244   : > { %11515 = vmatprep.subr.bf16.mxu1 %v12704_v9  ;;  %v12750_v9 = vld [vmem:[%s13168_s20 + $0x1268] sm:$0xff]  }
 0x246   : > { %11494 = vmatpush3.bf16.msra.mxu0 %v12703_v8 }
 0x247   : > { %11516 = vmatpush3.bf16.msra.mxu1 %v12705_v10  ;;  %11495 = vmatprep.subr.bf16.mxu0 %v12706_v11 }
 0x248   : > { %11517 = vmatprep.subr.bf16.mxu1 %v12708_v13 }
 0x24a   : > { %11496 = vmatpush3.bf16.msra.mxu0 %v12707_v12  ;;  %v12751_v12 = vld [vmem:[%s13168_s20 + $0x1228] sm:$0xff]  }
 0x24b   : > { %11518 = vmatpush3.bf16.msra.mxu1 %v12709_v14  ;;  %11497 = vmatprep.subr.bf16.mxu0 %v12710_v15  ;;  %v12752_v15 = vld [vmem:[%s13168_s20 + $0x12e8] sm:$0xff]  }
 0x24c   : > { %11519 = vmatprep.subr.bf16.mxu1 %v12712_v18 }
 0x24e   : > { %11498 = vmatpush3.bf16.msra.mxu0 %v12711_v16 }
 0x24f   : > { %11520 = vmatpush3.bf16.msra.mxu1 %v12713_v20  ;;  %11499 = vmatprep.subr.bf16.mxu0 %v12714_v23  ;;  %v12754_v20 = vld [vmem:[%s13168_s20 + $0x1270] sm:$0xff]  }
 0x250   : > { %v11197_v17 = vpop.f32.mrb[40].mxu0  ;;  %11521 = vmatprep.subr.bf16.mxu1 %v12716_v29  ;;  %v12756_v23 = vld [vmem:[%s13168_s20 + $0x12f0] sm:$0xff]  }
 0x251   : > { %v11198_v19 = vpop.f32.mrb[41].mxu0  ;;  %v11219_v24 = vpop.f32.mrb[40].mxu1 }
 0x252   : > { %v11199_v21 = vadd.f32 %v11198_v19, %v11197_v17  ;;  %v11200_v22 = vpop.f32.mrb[42].mxu0  ;;  %v11220_v28 = vpop.f32.mrb[41].mxu1  ;;  %11500 = vmatpush3.bf16.msra.mxu0 %v12715_v26  ;;  %v12753_v17 = vld [vmem:[%s13168_s20 + $0x12a8] sm:$0xff]   ;;  %v12759_v26 = vld [vmem:[%s13168_s20 + $0x1238] sm:$0xff]  }
 0x253   : > { %v11201_v27 = vpop.f32.mrb[43].mxu0  ;;  %v11221_v30 = vadd.f32 %v11220_v28, %v11219_v24  ;;  %v11222_v32 = vpop.f32.mrb[42].mxu1  ;;  %11522 = vmatpush3.bf16.msra.mxu1 %v12717_v31  ;;  %11501 = vmatprep.subr.bf16.mxu0 %v12718_v33  ;;  %v12755_v22 = vld [vmem:[%s13168_s20 + $0x1230] sm:$0xff]   ;;  %v493_v28 = vld [vmem:[%s13163_s16 + $0x120] sm:$0xff]  ;;  %v12763_v31 = vld [vmem:[%s13168_s20 + $0x12b8] sm:$0xff]  }
 0x254   : > { %v7956_v25 = vadd.f32 %v11199_v21, %v13766_v48  ;;  %v11223_v34 = vpop.f32.mrb[43].mxu1  ;;  %11523 = vmatprep.subr.bf16.mxu1 %v12720_v37  ;;  %v9914_v48 = vcombine.low %v492_v47, %v492_v47  ;;  %v12757_v24 = vld [vmem:[%s13168_s20 + $0x12b0] sm:$0xff]   ;;  %v12760_v27 = vld [vmem:[%s13168_s20 + $0x12f8] sm:$0xff]   ;;  %v9916_v29 = vcombine.low %v493_v28, %v493_v28  ;;  %v12764_v32 = vld [vmem:[%s13168_s20 + $0x1340] sm:$0xff]  }
 0x255   : > { %v494_v33 = vld [vmem:[%s13163_s16 + $0x128] sm:$0xff]  ;;  %v12768_v37 = vld [vmem:[%s13168_s20 + $0x13c0] sm:$0xff]   ;;  %v12778_v47 = vld [vmem:[%s13168_s20 + $0x1358] sm:$0xff]  }
 0x256   : > { %v13804_v35 = vadd.f32 %v11221_v30, %v7956_v25  ;;  %11502 = vmatpush3.bf16.msra.mxu0 %v12719_v36  ;;  %v12758_v25 = vld [vmem:[%s13168_s20 + $0x1278] sm:$0xff]   ;;  %v9917_v30 = vcombine.high %v493_v28, %v493_v28  ;;  %v9918_v34 = vcombine.low %v494_v33, %v494_v33  ;;  %v12767_v36 = vld [vmem:[%s13168_s20 + $0x1300] sm:$0xff]   ;;  %v12809_v28 = vld [vmem:[%s13168_s20 + $0x1488] sm:$0xff]  }
 0x257   : > { %11524 = vmatpush3.bf16.msra.mxu1 %v12721_v38  ;;  %11503 = vmatprep.subr.bf16.mxu0 %v12722_v39  ;;  %v12769_v38 = vld [vmem:[%s13168_s20 + $0x1380] sm:$0xff]   ;;  %v12770_v39 = vld [vmem:[%s13168_s20 + $0x1348] sm:$0xff]  }
 0x258   : > { %11525 = vmatprep.subr.bf16.mxu1 %v12724_v41  ;;  %v12772_v41 = vld [vmem:[%s13168_s20 + $0x13c8] sm:$0xff]  }
 0x25a   : > { %11504 = vmatpush3.bf16.msra.mxu0 %v12723_v40  ;;  %v12771_v40 = vld [vmem:[%s13168_s20 + $0x1308] sm:$0xff]  }
 0x25b   : > { %11526 = vmatpush3.bf16.msra.mxu1 %v12727_v45  ;;  %11533 = vmatprep.subr.bf16.mxu0 %v12728_v46  ;;  %v12776_v45 = vld [vmem:[%s13168_s20 + $0x13d0] sm:$0xff]  }
 0x25c   : > { %11555 = vmatprep.subr.bf16.mxu1 %v12732_v51  ;;  %v12777_v46 = vld [vmem:[%s13168_s20 + $0x1390] sm:$0xff]   ;;  %v12782_v51 = vld [vmem:[%s13168_s20 + $0x1360] sm:$0xff]  }
 0x25d   : > { %8514 = vmatmul.mubr.bf16.vlgmr.msra.gmra.mrb[68].mxu0 %v9912_v43  ;;  %v12774_v43 = vld [vmem:[%s13168_s20 + $0x1350] sm:$0xff]  }
 0x25e   : > { %11534 = vmatpush3.bf16.msra.mxu0 %v12731_v50  ;;  %8554 = vmatmul.mubr.bf16.vlgmr.msra.gmra.mrb[68].mxu1 %v9914_v48  ;;  %v12779_v48 = vld [vmem:[%s13168_s20 + $0x1318] sm:$0xff]  }
 0x25f   : > { %11556 = vmatpush3.bf16.msra.mxu1 %v12733_v52  ;;  %11535 = vmatprep.subr.bf16.mxu0 %v12734_v53  ;;  %v12781_v50 = vld [vmem:[%s13168_s20 + $0x1398] sm:$0xff]   ;;  %v12783_v53 = vld [vmem:[%s13168_s20 + $0x1320] sm:$0xff]  }
 0x260   : > { %11557 = vmatprep.subr.bf16.mxu1 %v12736_v55  ;;  %8593 = vmatprep.mubr.bf16.mxu0 %v9917_v30  ;;  %v12784_v55 = vld [vmem:[%s13168_s20 + $0x13e0] sm:$0xff]   ;;  %v12811_v30 = vld [vmem:[%s13168_s20 + $0x1410] sm:$0xff]  }
 0x262   : > { %11536 = vmatpush3.bf16.msra.mxu0 %v12735_v54 }
 0x263   : > { %11558 = vmatpush3.bf16.msra.mxu1 %v12737_v56  ;;  %11537 = vmatprep.subr.bf16.mxu0 %v12738_v57 }
 0x264   : > { %11559 = vmatprep.subr.bf16.mxu1 %v12740_v59 }
 0x266   : > { %11538 = vmatpush3.bf16.msra.mxu0 %v12739_v58  ;;  %v12785_v58 = vld [vmem:[%s13168_s20 + $0x13a0] sm:$0xff]  }
 0x267   : > { %11560 = vmatpush3.bf16.msra.mxu1 %v12741_v60  ;;  %11539 = vmatprep.subr.bf16.mxu0 %v12742_v61  ;;  %v12786_v61 = vld [vmem:[%s13168_s20 + $0x1368] sm:$0xff]  }
 0x268   : > { %11561 = vmatprep.subr.bf16.mxu1 %v12744_v63  ;;  %v12787_v63 = vld [vmem:[%s13168_s20 + $0x1328] sm:$0xff]  }
 0x26a   : > { %11540 = vmatpush3.bf16.msra.mxu0 %v12743_v62 }
 0x26b   : > { %11562 = vmatpush3.bf16.msra.mxu1 %v12745_v0  ;;  %11541 = vmatprep.subr.bf16.mxu0 %v12746_v1 }
 0x26c   : > { %11563 = vmatprep.subr.bf16.mxu1 %v12748_v4  ;;  %v12789_v4 = vld [vmem:[%s13168_s20 + $0x13a8] sm:$0xff]  }
 0x26e   : > { %11542 = vmatpush3.bf16.msra.mxu0 %v12747_v2  ;;  %v12788_v2 = vld [vmem:[%s13168_s20 + $0x13e8] sm:$0xff]  }
 0x26f   : > { %11564 = vmatpush3.bf16.msra.mxu1 %v12749_v6  ;;  %11543 = vmatprep.subr.bf16.mxu0 %v12750_v9  ;;  %v12792_v9 = vld [vmem:[%s13168_s20 + $0x13f0] sm:$0xff]  }
 0x270   : > { %v11241_v3 = vpop.f32.mrb[44].mxu0  ;;  %11565 = vmatprep.subr.bf16.mxu1 %v12752_v15 }
 0x271   : > { %v11242_v5 = vpop.f32.mrb[45].mxu0  ;;  %v11263_v10 = vpop.f32.mrb[44].mxu1 }
 0x272   : > { %v11243_v7 = vadd.f32 %v11242_v5, %v11241_v3  ;;  %v11244_v8 = vpop.f32.mrb[46].mxu0  ;;  %v11264_v14 = vpop.f32.mrb[45].mxu1  ;;  %11544 = vmatpush3.bf16.msra.mxu0 %v12751_v12  ;;  %v12795_v12 = vld [vmem:[%s13168_s20 + $0x1338] sm:$0xff]  }
 0x273   : > { %v11245_v13 = vpop.f32.mrb[47].mxu0  ;;  %v11265_v16 = vadd.f32 %v11264_v14, %v11263_v10  ;;  %v11266_v18 = vpop.f32.mrb[46].mxu1  ;;  %11566 = vmatpush3.bf16.msra.mxu1 %v12753_v17  ;;  %11545 = vmatprep.subr.bf16.mxu0 %v12754_v20  ;;  %v12791_v8 = vld [vmem:[%s13168_s20 + $0x1330] sm:$0xff]   ;;  %v12799_v17 = vld [vmem:[%s13168_s20 + $0x13b8] sm:$0xff]  }
 0x274   : > { %v8036_v11 = vadd.f32 %v11243_v7, %v13804_v35  ;;  %v11267_v21 = vpop.f32.mrb[47].mxu1  ;;  %11567 = vmatprep.subr.bf16.mxu1 %v12756_v23  ;;  %v9919_v35 = vcombine.high %v494_v33, %v494_v33  ;;  %v12790_v7 = vld [vmem:[%s13168_s20 + $0x1370] sm:$0xff]   ;;  %v12796_v13 = vld [vmem:[%s13168_s20 + $0x13f8] sm:$0xff]   ;;  %v12800_v18 = vld [vmem:[%s13168_s20 + $0x1440] sm:$0xff]  }
 0x275   : > { %v12793_v10 = vld [vmem:[%s13168_s20 + $0x13b0] sm:$0xff]   ;;  %v12804_v23 = vld [vmem:[%s13168_s20 + $0x14c0] sm:$0xff]   ;;  %v12814_v33 = vld [vmem:[%s13168_s20 + $0x1458] sm:$0xff]  }
 0x276   : > { %v13840_v19 = vadd.f32 %v11265_v16, %v8036_v11  ;;  %11546 = vmatpush3.bf16.msra.mxu0 %v12755_v22  ;;  %8633 = vmatprep.mubr.bf16.mxu1 %v9919_v35  ;;  %v12794_v11 = vld [vmem:[%s13168_s20 + $0x1378] sm:$0xff]   ;;  %v495_v14 = vld [vmem:[%s13163_s16 + $0x130] sm:$0xff]  ;;  %v12803_v22 = vld [vmem:[%s13168_s20 + $0x1400] sm:$0xff]  }
 0x277   : > { %11568 = vmatpush3.bf16.msra.mxu1 %v12757_v24  ;;  %11547 = vmatprep.subr.bf16.mxu0 %v12758_v25  ;;  %v9920_v15 = vcombine.low %v495_v14, %v495_v14  ;;  %v9921_v16 = vcombine.high %v495_v14, %v495_v14  ;;  %v12805_v24 = vld [vmem:[%s13168_s20 + $0x1480] sm:$0xff]   ;;  %v12806_v25 = vld [vmem:[%s13168_s20 + $0x1448] sm:$0xff]   ;;  %v12816_v35 = vld [vmem:[%s13168_s20 + $0x14d8] sm:$0xff]  }
 0x278   : > { %11569 = vmatprep.subr.bf16.mxu1 %v12760_v27  ;;  %v12808_v27 = vld [vmem:[%s13168_s20 + $0x14c8] sm:$0xff]  }
 0x279   : > { %v12845_v14 = vld [vmem:[%s13168_s20 + $0x1588] sm:$0xff]  }
 0x27a   : > { %11548 = vmatpush3.bf16.msra.mxu0 %v12759_v26  ;;  %v12807_v26 = vld [vmem:[%s13168_s20 + $0x1408] sm:$0xff]  }
 0x27b   : > { %11570 = vmatpush3.bf16.msra.mxu1 %v12763_v31  ;;  %11577 = vmatprep.subr.bf16.mxu0 %v12764_v32  ;;  %v12812_v31 = vld [vmem:[%s13168_s20 + $0x14d0] sm:$0xff]  }
 0x27c   : > { %11599 = vmatprep.subr.bf16.mxu1 %v12768_v37  ;;  %v12813_v32 = vld [vmem:[%s13168_s20 + $0x1490] sm:$0xff]   ;;  %v12818_v37 = vld [vmem:[%s13168_s20 + $0x1460] sm:$0xff]  }
 0x27d   : > { %8594 = vmatmul.mubr.bf16.vlgmr.msra.gmra.mrb[72].mxu0 %v9916_v29  ;;  %v12810_v29 = vld [vmem:[%s13168_s20 + $0x1450] sm:$0xff]  }
 0x27e   : > { %11578 = vmatpush3.bf16.msra.mxu0 %v12767_v36  ;;  %8634 = vmatmul.mubr.bf16.vlgmr.msra.gmra.mrb[72].mxu1 %v9918_v34  ;;  %v12815_v34 = vld [vmem:[%s13168_s20 + $0x1418] sm:$0xff]  }
 0x27f   : > { %11600 = vmatpush3.bf16.msra.mxu1 %v12769_v38  ;;  %11579 = vmatprep.subr.bf16.mxu0 %v12770_v39  ;;  %v12817_v36 = vld [vmem:[%s13168_s20 + $0x1498] sm:$0xff]   ;;  %v12819_v38 = vld [vmem:[%s13168_s20 + $0x1420] sm:$0xff]  }
 0x280   : > { %11601 = vmatprep.subr.bf16.mxu1 %v12772_v41  ;;  %8673 = vmatprep.mubr.bf16.mxu0 %v9921_v16  ;;  %v12847_v16 = vld [vmem:[%s13168_s20 + $0x1510] sm:$0xff]  }
 0x282   : > { %11580 = vmatpush3.bf16.msra.mxu0 %v12771_v40  ;;  %v12820_v40 = vld [vmem:[%s13168_s20 + $0x14e0] sm:$0xff]  }
 0x283   : > { %11602 = vmatpush3.bf16.msra.mxu1 %v12773_v42  ;;  %11581 = vmatprep.subr.bf16.mxu0 %v12774_v43  ;;  %v12821_v42 = vld [vmem:[%s13168_s20 + $0x14a0] sm:$0xff]  }
 0x284   : > { %11603 = vmatprep.subr.bf16.mxu1 %v12776_v45  ;;  %v12822_v45 = vld [vmem:[%s13168_s20 + $0x1468] sm:$0xff]  }
 0x286   : > { %11582 = vmatpush3.bf16.msra.mxu0 %v12775_v44 }
 0x287   : > { %11604 = vmatpush3.bf16.msra.mxu1 %v12777_v46  ;;  %11583 = vmatprep.subr.bf16.mxu0 %v12778_v47 }
 0x288   : > { %11605 = vmatprep.subr.bf16.mxu1 %v12780_v49 }
 0x28a   : > { %11584 = vmatpush3.bf16.msra.mxu0 %v12779_v48  ;;  %v12823_v48 = vld [vmem:[%s13168_s20 + $0x1428] sm:$0xff]  }
 0x28b   : > { %11606 = vmatpush3.bf16.msra.mxu1 %v12781_v50  ;;  %11585 = vmatprep.subr.bf16.mxu0 %v12782_v51  ;;  %v12824_v51 = vld [vmem:[%s13168_s20 + $0x14e8] sm:$0xff]  }
 0x28c   : > { %11607 = vmatprep.subr.bf16.mxu1 %v12784_v55  ;;  %v12826_v55 = vld [vmem:[%s13168_s20 + $0x1470] sm:$0xff]  }
 0x28e   : > { %11586 = vmatpush3.bf16.msra.mxu0 %v12783_v53  ;;  %v12825_v53 = vld [vmem:[%s13168_s20 + $0x14a8] sm:$0xff]  }
 0x28f   : > { %11608 = vmatpush3.bf16.msra.mxu1 %v12785_v58  ;;  %11587 = vmatprep.subr.bf16.mxu0 %v12786_v61  ;;  %v12827_v58 = vld [vmem:[%s13168_s20 + $0x1430] sm:$0xff]   ;;  %v12830_v61 = vld [vmem:[%s13168_s20 + $0x1478] sm:$0xff]  }
 0x290   : > { %v11285_v52 = vpop.f32.mrb[48].mxu0  ;;  %11609 = vmatprep.subr.bf16.mxu1 %v12788_v2 }
 0x291   : > { %v11286_v54 = vpop.f32.mrb[49].mxu0  ;;  %v11307_v59 = vpop.f32.mrb[48].mxu1 }
 0x292   : > { %v11287_v56 = vadd.f32 %v11286_v54, %v11285_v52  ;;  %v11288_v57 = vpop.f32.mrb[50].mxu0  ;;  %v11308_v0 = vpop.f32.mrb[49].mxu1  ;;  %11588 = vmatpush3.bf16.msra.mxu0 %v12787_v63  ;;  %v12832_v63 = vld [vmem:[%s13168_s20 + $0x14f8] sm:$0xff]  }
 0x293   : > { %v11289_v62 = vpop.f32.mrb[51].mxu0  ;;  %v11309_v1 = vadd.f32 %v11308_v0, %v11307_v59  ;;  %v11310_v3 = vpop.f32.mrb[50].mxu1  ;;  %11610 = vmatpush3.bf16.msra.mxu1 %v12789_v4  ;;  %11589 = vmatprep.subr.bf16.mxu0 %v12790_v7  ;;  %v12828_v59 = vld [vmem:[%s13168_s20 + $0x14f0] sm:$0xff]   ;;  %v497_v0 = vld [vmem:[%s13163_s16 + $0x140] sm:$0xff] }
 0x294   : > { %v8116_v60 = vadd.f32 %v11287_v56, %v13840_v19  ;;  %v11311_v5 = vpop.f32.mrb[51].mxu1  ;;  %11611 = vmatprep.subr.bf16.mxu1 %v12792_v9  ;;  %v496_v19 = vld [vmem:[%s13163_s16 + $0x138] sm:$0xff]  ;;  %v9925_v2 = vcombine.high %v497_v0, %v497_v0  ;;  %v12836_v4 = vld [vmem:[%s13168_s20 + $0x1540] sm:$0xff]  }
 0x295   : > { %v9922_v20 = vcombine.low %v496_v19, %v496_v19  ;;  %v9923_v21 = vcombine.high %v496_v19, %v496_v19  ;;  %v12831_v62 = vld [vmem:[%s13168_s20 + $0x1438] sm:$0xff]   ;;  %v498_v5 = vld [vmem:[%s13163_s16 + $0x148] sm:$0xff]  ;;  %v12840_v9 = vld [vmem:[%s13168_s20 + $0x15c0] sm:$0xff]  }
 0x296   : > { %v13877_v6 = vadd.f32 %v11309_v1, %v8116_v60  ;;  %11590 = vmatpush3.bf16.msra.mxu0 %v12791_v8  ;;  %v12829_v60 = vld [vmem:[%s13168_s20 + $0x14b0] sm:$0xff]   ;;  %v9924_v1 = vcombine.low %v497_v0, %v497_v0  ;;  %v12835_v3 = vld [vmem:[%s13168_s20 + $0x14b8] sm:$0xff]   ;;  %v9927_v7 = vcombine.high %v498_v5, %v498_v5  ;;  %v12839_v8 = vld [vmem:[%s13168_s20 + $0x1500] sm:$0xff]  }
 0x297   : > { %11612 = vmatpush3.bf16.msra.mxu1 %v12793_v10  ;;  %11591 = vmatprep.subr.bf16.mxu0 %v12794_v11  ;;  %v12841_v10 = vld [vmem:[%s13168_s20 + $0x1580] sm:$0xff]   ;;  %v12842_v11 = vld [vmem:[%s13168_s20 + $0x1548] sm:$0xff]   ;;  %v12850_v19 = vld [vmem:[%s13168_s20 + $0x1558] sm:$0xff]  }
 0x298   : > { %11613 = vmatprep.subr.bf16.mxu1 %v12796_v13  ;;  %8713 = vmatprep.mubr.bf16.mxu1 %v9923_v21  ;;  %v12844_v13 = vld [vmem:[%s13168_s20 + $0x15c8] sm:$0xff]   ;;  %v12852_v21 = vld [vmem:[%s13168_s20 + $0x15d8] sm:$0xff]  }
 0x299   : > { %v12881_v0 = vld [vmem:[%s13168_s20 + $0x1688] sm:$0xff]  }
 0x29a   : > { %11592 = vmatpush3.bf16.msra.mxu0 %v12795_v12  ;;  %v12843_v12 = vld [vmem:[%s13168_s20 + $0x1508] sm:$0xff]  }
 0x29b   : > { %11614 = vmatpush3.bf16.msra.mxu1 %v12799_v17  ;;  %11621 = vmatprep.subr.bf16.mxu0 %v12800_v18  ;;  %v12848_v17 = vld [vmem:[%s13168_s20 + $0x15d0] sm:$0xff]  }
 0x29c   : > { %11643 = vmatprep.subr.bf16.mxu1 %v12804_v23  ;;  %v12849_v18 = vld [vmem:[%s13168_s20 + $0x1590] sm:$0xff]   ;;  %v12854_v23 = vld [vmem:[%s13168_s20 + $0x1560] sm:$0xff]  }
 0x29d   : > { %8674 = vmatmul.mubr.bf16.vlgmr.msra.gmra.mrb[76].mxu0 %v9920_v15  ;;  %v12846_v15 = vld [vmem:[%s13168_s20 + $0x1550] sm:$0xff]  }
 0x29e   : > { %11622 = vmatpush3.bf16.msra.mxu0 %v12803_v22  ;;  %8714 = vmatmul.mubr.bf16.vlgmr.msra.gmra.mrb[76].mxu1 %v9922_v20  ;;  %v12851_v20 = vld [vmem:[%s13168_s20 + $0x1518] sm:$0xff]  }
 0x29f   : > { %11644 = vmatpush3.bf16.msra.mxu1 %v12805_v24  ;;  %11623 = vmatprep.subr.bf16.mxu0 %v12806_v25  ;;  %v12853_v22 = vld [vmem:[%s13168_s20 + $0x1598] sm:$0xff]   ;;  %v12855_v24 = vld [vmem:[%s13168_s20 + $0x1520] sm:$0xff]  }
 0x2a0   : > { %11645 = vmatprep.subr.bf16.mxu1 %v12808_v27  ;;  %8753 = vmatprep.mubr.bf16.mxu0 %v9925_v2  ;;  %v12883_v2 = vld [vmem:[%s13168_s20 + $0x1610] sm:$0xff]  }
 0x2a1   : > { %8793 = vmatprep.mubr.bf16.mxu1 %v9927_v7  ;;  %v12888_v7 = vld [vmem:[%s13168_s20 + $0x16d8] sm:$0xff]  }
 0x2a2   : > { %11624 = vmatpush3.bf16.msra.mxu0 %v12807_v26  ;;  %v12856_v26 = vld [vmem:[%s13168_s20 + $0x15e0] sm:$0xff]  }
 0x2a3   : > { %11646 = vmatpush3.bf16.msra.mxu1 %v12809_v28  ;;  %11625 = vmatprep.subr.bf16.mxu0 %v12810_v29  ;;  %v12857_v28 = vld [vmem:[%s13168_s20 + $0x15a0] sm:$0xff]  }
 0x2a4   : > { %11647 = vmatprep.subr.bf16.mxu1 %v12812_v31  ;;  %v12858_v31 = vld [vmem:[%s13168_s20 + $0x1568] sm:$0xff]  }
 0x2a6   : > { %11626 = vmatpush3.bf16.msra.mxu0 %v12811_v30 }
 0x2a7   : > { %11648 = vmatpush3.bf16.msra.mxu1 %v12813_v32  ;;  %11627 = vmatprep.subr.bf16.mxu0 %v12814_v33 }
 0x2a8   : > { %11649 = vmatprep.subr.bf16.mxu1 %v12816_v35 }
 0x2aa   : > { %11628 = vmatpush3.bf16.msra.mxu0 %v12815_v34  ;;  %v12859_v34 = vld [vmem:[%s13168_s20 + $0x1528] sm:$0xff]  }
 0x2ab   : > { %11650 = vmatpush3.bf16.msra.mxu1 %v12817_v36  ;;  %11629 = vmatprep.subr.bf16.mxu0 %v12818_v37  ;;  %v12860_v37 = vld [vmem:[%s13168_s20 + $0x15e8] sm:$0xff]  }
 0x2ac   : > { %11651 = vmatprep.subr.bf16.mxu1 %v12820_v40 }
 0x2ae   : > { %11630 = vmatpush3.bf16.msra.mxu0 %v12819_v38 }
 0x2af   : > { %11652 = vmatpush3.bf16.msra.mxu1 %v12821_v42  ;;  %11631 = vmatprep.subr.bf16.mxu0 %v12822_v45  ;;  %v12862_v42 = vld [vmem:[%s13168_s20 + $0x1570] sm:$0xff]  }
 0x2b0   : > { %v11329_v39 = vpop.f32.mrb[52].mxu0  ;;  %11653 = vmatprep.subr.bf16.mxu1 %v12824_v51  ;;  %v12864_v45 = vld [vmem:[%s13168_s20 + $0x15f0] sm:$0xff]  }
 0x2b1   : > { %v11330_v41 = vpop.f32.mrb[53].mxu0  ;;  %v11351_v46 = vpop.f32.mrb[52].mxu1 }
 0x2b2   : > { %v11331_v43 = vadd.f32 %v11330_v41, %v11329_v39  ;;  %v11332_v44 = vpop.f32.mrb[54].mxu0  ;;  %v11352_v50 = vpop.f32.mrb[53].mxu1  ;;  %11632 = vmatpush3.bf16.msra.mxu0 %v12823_v48  ;;  %v12861_v39 = vld [vmem:[%s13168_s20 + $0x15a8] sm:$0xff]   ;;  %v12867_v48 = vld [vmem:[%s13168_s20 + $0x1538] sm:$0xff]  }
 0x2b3   : > { %v11333_v49 = vpop.f32.mrb[55].mxu0  ;;  %v11353_v52 = vadd.f32 %v11352_v50, %v11351_v46  ;;  %v11354_v54 = vpop.f32.mrb[54].mxu1  ;;  %11654 = vmatpush3.bf16.msra.mxu1 %v12825_v53  ;;  %11633 = vmatprep.subr.bf16.mxu0 %v12826_v55  ;;  %v12863_v44 = vld [vmem:[%s13168_s20 + $0x1530] sm:$0xff]   ;;  %v12871_v53 = vld [vmem:[%s13168_s20 + $0x15b8] sm:$0xff]  }
 0x2b4   : > { %v8196_v47 = vadd.f32 %v11331_v43, %v13877_v6  ;;  %v11355_v56 = vpop.f32.mrb[55].mxu1  ;;  %11655 = vmatprep.subr.bf16.mxu1 %v12828_v59  ;;  %v9926_v6 = vcombine.low %v498_v5, %v498_v5  ;;  %v12865_v46 = vld [vmem:[%s13168_s20 + $0x15b0] sm:$0xff]   ;;  %v12868_v49 = vld [vmem:[%s13168_s20 + $0x15f8] sm:$0xff]   ;;  %v12872_v54 = vld [vmem:[%s13168_s20 + $0x1640] sm:$0xff]  }
 0x2b5   : > { %v499_v50 = vld [vmem:[%s13163_s16 + $0x150] sm:$0xff]  ;;  %v500_v55 = vld [vmem:[%s13163_s16 + $0x158] sm:$0xff]  ;;  %v12876_v59 = vld [vmem:[%s13168_s20 + $0x16c0] sm:$0xff]  }
 0x2b6   : > { %v13915_v57 = vadd.f32 %v11353_v52, %v8196_v47  ;;  %11634 = vmatpush3.bf16.msra.mxu0 %v12827_v58  ;;  %v12866_v47 = vld [vmem:[%s13168_s20 + $0x1578] sm:$0xff]   ;;  %v9928_v51 = vcombine.low %v499_v50, %v499_v50  ;;  %v9929_v52 = vcombine.high %v499_v50, %v499_v50  ;;  %v9930_v56 = vcombine.low %v500_v55, %v500_v55  ;;  %v12875_v58 = vld [vmem:[%s13168_s20 + $0x1600] sm:$0xff]   ;;  %v12917_v50 = vld [vmem:[%s13168_s20 + $0x1788] sm:$0xff]  }
 0x2b7   : > { %11656 = vmatpush3.bf16.msra.mxu1 %v12829_v60  ;;  %11635 = vmatprep.subr.bf16.mxu0 %v12830_v61  ;;  %v12877_v60 = vld [vmem:[%s13168_s20 + $0x1680] sm:$0xff]   ;;  %v12878_v61 = vld [vmem:[%s13168_s20 + $0x1648] sm:$0xff]   ;;  %v12886_v5 = vld [vmem:[%s13168_s20 + $0x1658] sm:$0xff]  }
 0x2b8   : > { %11657 = vmatprep.subr.bf16.mxu1 %v12832_v63  ;;  %v12880_v63 = vld [vmem:[%s13168_s20 + $0x16c8] sm:$0xff]  }
 0x2ba   : > { %11636 = vmatpush3.bf16.msra.mxu0 %v12831_v62  ;;  %v12879_v62 = vld [vmem:[%s13168_s20 + $0x1608] sm:$0xff]  }
 0x2bb   : > { %11658 = vmatpush3.bf16.msra.mxu1 %v12835_v3  ;;  %11665 = vmatprep.subr.bf16.mxu0 %v12836_v4  ;;  %v12884_v3 = vld [vmem:[%s13168_s20 + $0x16d0] sm:$0xff]  }
 0x2bc   : > { %11687 = vmatprep.subr.bf16.mxu1 %v12840_v9  ;;  %v12885_v4 = vld [vmem:[%s13168_s20 + $0x1690] sm:$0xff]   ;;  %v12890_v9 = vld [vmem:[%s13168_s20 + $0x1660] sm:$0xff]  }
 0x2bd   : > { %8754 = vmatmul.mubr.bf16.vlgmr.msra.gmra.mrb[80].mxu0 %v9924_v1  ;;  %v12882_v1 = vld [vmem:[%s13168_s20 + $0x1650] sm:$0xff]  }
 0x2be   : > { %11666 = vmatpush3.bf16.msra.mxu0 %v12839_v8  ;;  %8794 = vmatmul.mubr.bf16.vlgmr.msra.gmra.mrb[80].mxu1 %v9926_v6  ;;  %v12887_v6 = vld [vmem:[%s13168_s20 + $0x1618] sm:$0xff]  }
 0x2bf   : > { %11688 = vmatpush3.bf16.msra.mxu1 %v12841_v10  ;;  %11667 = vmatprep.subr.bf16.mxu0 %v12842_v11  ;;  %v12889_v8 = vld [vmem:[%s13168_s20 + $0x1698] sm:$0xff]   ;;  %v12891_v11 = vld [vmem:[%s13168_s20 + $0x1620] sm:$0xff]  }
 0x2c0   : > { %11689 = vmatprep.subr.bf16.mxu1 %v12844_v13  ;;  %8833 = vmatprep.mubr.bf16.mxu0 %v9929_v52  ;;  %v12892_v13 = vld [vmem:[%s13168_s20 + $0x16e0] sm:$0xff]   ;;  %v12919_v52 = vld [vmem:[%s13168_s20 + $0x1710] sm:$0xff]  }
 0x2c2   : > { %11668 = vmatpush3.bf16.msra.mxu0 %v12843_v12 }
 0x2c3   : > { %11690 = vmatpush3.bf16.msra.mxu1 %v12845_v14  ;;  %11669 = vmatprep.subr.bf16.mxu0 %v12846_v15 }
 0x2c4   : > { %11691 = vmatprep.subr.bf16.mxu1 %v12848_v17 }
 0x2c6   : > { %11670 = vmatpush3.bf16.msra.mxu0 %v12847_v16  ;;  %v12893_v16 = vld [vmem:[%s13168_s20 + $0x16a0] sm:$0xff]  }
 0x2c7   : > { %11692 = vmatpush3.bf16.msra.mxu1 %v12849_v18  ;;  %11671 = vmatprep.subr.bf16.mxu0 %v12850_v19  ;;  %v12894_v19 = vld [vmem:[%s13168_s20 + $0x1668] sm:$0xff]  }
 0x2c8   : > { %11693 = vmatprep.subr.bf16.mxu1 %v12852_v21  ;;  %v12895_v21 = vld [vmem:[%s13168_s20 + $0x1628] sm:$0xff]  }
 0x2ca   : > { %11672 = vmatpush3.bf16.msra.mxu0 %v12851_v20 }
 0x2cb   : > { %11694 = vmatpush3.bf16.msra.mxu1 %v12853_v22  ;;  %11673 = vmatprep.subr.bf16.mxu0 %v12854_v23 }
 0x2cc   : > { %11695 = vmatprep.subr.bf16.mxu1 %v12856_v26  ;;  %v12897_v26 = vld [vmem:[%s13168_s20 + $0x16a8] sm:$0xff]  }
 0x2ce   : > { %11674 = vmatpush3.bf16.msra.mxu0 %v12855_v24  ;;  %v12896_v24 = vld [vmem:[%s13168_s20 + $0x16e8] sm:$0xff]  }
 0x2cf   : > { %11696 = vmatpush3.bf16.msra.mxu1 %v12857_v28  ;;  %11675 = vmatprep.subr.bf16.mxu0 %v12858_v31  ;;  %v12900_v31 = vld [vmem:[%s13168_s20 + $0x16f0] sm:$0xff]  }
 0x2d0   : > { %v11373_v25 = vpop.f32.mrb[56].mxu0  ;;  %11697 = vmatprep.subr.bf16.mxu1 %v12860_v37 }
 0x2d1   : > { %v11374_v27 = vpop.f32.mrb[57].mxu0  ;;  %v11395_v32 = vpop.f32.mrb[56].mxu1 }
 0x2d2   : > { %v11375_v29 = vadd.f32 %v11374_v27, %v11373_v25  ;;  %v11376_v30 = vpop.f32.mrb[58].mxu0  ;;  %v11396_v36 = vpop.f32.mrb[57].mxu1  ;;  %11676 = vmatpush3.bf16.msra.mxu0 %v12859_v34  ;;  %v12903_v34 = vld [vmem:[%s13168_s20 + $0x1638] sm:$0xff]  }
 0x2d3   : > { %v11377_v35 = vpop.f32.mrb[59].mxu0  ;;  %v11397_v38 = vadd.f32 %v11396_v36, %v11395_v32  ;;  %v11398_v40 = vpop.f32.mrb[58].mxu1  ;;  %11698 = vmatpush3.bf16.msra.mxu1 %v12861_v39  ;;  %11677 = vmatprep.subr.bf16.mxu0 %v12862_v42  ;;  %v12899_v30 = vld [vmem:[%s13168_s20 + $0x1630] sm:$0xff]   ;;  %v501_v36 = vld [vmem:[%s13163_s16 + $0x160] sm:$0xff]  ;;  %v12907_v39 = vld [vmem:[%s13168_s20 + $0x16b8] sm:$0xff]  }
 0x2d4   : > { %v8276_v33 = vadd.f32 %v11375_v29, %v13915_v57  ;;  %v11399_v43 = vpop.f32.mrb[59].mxu1  ;;  %11699 = vmatprep.subr.bf16.mxu1 %v12864_v45  ;;  %v9931_v57 = vcombine.high %v500_v55, %v500_v55  ;;  %v12898_v29 = vld [vmem:[%s13168_s20 + $0x1670] sm:$0xff]   ;;  %v12904_v35 = vld [vmem:[%s13168_s20 + $0x16f8] sm:$0xff]   ;;  %v9932_v37 = vcombine.low %v501_v36, %v501_v36  ;;  %v12908_v40 = vld [vmem:[%s13168_s20 + $0x1740] sm:$0xff]  }
 0x2d5   : > { %v12901_v32 = vld [vmem:[%s13168_s20 + $0x16b0] sm:$0xff]   ;;  %v12912_v45 = vld [vmem:[%s13168_s20 + $0x17c0] sm:$0xff]   ;;  %v12922_v55 = vld [vmem:[%s13168_s20 + $0x1758] sm:$0xff]  }
 0x2d6   : > { %v13951_v41 = vadd.f32 %v11397_v38, %v8276_v33  ;;  %11678 = vmatpush3.bf16.msra.mxu0 %v12863_v44  ;;  %8873 = vmatprep.mubr.bf16.mxu1 %v9931_v57  ;;  %v12902_v33 = vld [vmem:[%s13168_s20 + $0x1678] sm:$0xff]   ;;  %v9933_v38 = vcombine.high %v501_v36, %v501_v36  ;;  %v12911_v44 = vld [vmem:[%s13168_s20 + $0x1700] sm:$0xff]  }
 0x2d7   : > { %11700 = vmatpush3.bf16.msra.mxu1 %v12865_v46  ;;  %11679 = vmatprep.subr.bf16.mxu0 %v12866_v47  ;;  %v12913_v46 = vld [vmem:[%s13168_s20 + $0x1780] sm:$0xff]   ;;  %v12914_v47 = vld [vmem:[%s13168_s20 + $0x1748] sm:$0xff]   ;;  %v12924_v57 = vld [vmem:[%s13168_s20 + $0x17d8] sm:$0xff]  }
 0x2d8   : > { %11701 = vmatprep.subr.bf16.mxu1 %v12868_v49  ;;  %v12916_v49 = vld [vmem:[%s13168_s20 + $0x17c8] sm:$0xff]   ;;  %v12953_v36 = vld [vmem:[%s13168_s20 + $0x1818] sm:$0xff]  }
 0x2da   : > { %11680 = vmatpush3.bf16.msra.mxu0 %v12867_v48  ;;  %v12915_v48 = vld [vmem:[%s13168_s20 + $0x1708] sm:$0xff]  }
 0x2db   : > { %11702 = vmatpush3.bf16.msra.mxu1 %v12871_v53  ;;  %11709 = vmatprep.subr.bf16.mxu0 %v12872_v54  ;;  %v12920_v53 = vld [vmem:[%s13168_s20 + $0x17d0] sm:$0xff]  }
 0x2dc   : > { %11731 = vmatprep.subr.bf16.mxu1 %v12876_v59  ;;  %v12921_v54 = vld [vmem:[%s13168_s20 + $0x1790] sm:$0xff]   ;;  %v12926_v59 = vld [vmem:[%s13168_s20 + $0x1760] sm:$0xff]  }
 0x2dd   : > { %8834 = vmatmul.mubr.bf16.vlgmr.msra.gmra.mrb[84].mxu0 %v9928_v51  ;;  %v12918_v51 = vld [vmem:[%s13168_s20 + $0x1750] sm:$0xff]  }
 0x2de   : > { %11710 = vmatpush3.bf16.msra.mxu0 %v12875_v58  ;;  %8874 = vmatmul.mubr.bf16.vlgmr.msra.gmra.mrb[84].mxu1 %v9930_v56  ;;  %v12923_v56 = vld [vmem:[%s13168_s20 + $0x1718] sm:$0xff]  }
 0x2df   : > { %11732 = vmatpush3.bf16.msra.mxu1 %v12877_v60  ;;  %11711 = vmatprep.subr.bf16.mxu0 %v12878_v61  ;;  %v12925_v58 = vld [vmem:[%s13168_s20 + $0x1798] sm:$0xff]   ;;  %v12927_v60 = vld [vmem:[%s13168_s20 + $0x1720] sm:$0xff]  }
 0x2e0   : > { %11733 = vmatprep.subr.bf16.mxu1 %v12880_v63  ;;  %8913 = vmatprep.mubr.bf16.mxu0 %v9933_v38  ;;  %v12955_v38 = vld [vmem:[%s13168_s20 + $0x1820] sm:$0xff]  }
 0x2e2   : > { %11712 = vmatpush3.bf16.msra.mxu0 %v12879_v62  ;;  %v12928_v62 = vld [vmem:[%s13168_s20 + $0x17e0] sm:$0xff]  }
 0x2e3   : > { %11734 = vmatpush3.bf16.msra.mxu1 %v12881_v0  ;;  %11713 = vmatprep.subr.bf16.mxu0 %v12882_v1  ;;  %v12929_v0 = vld [vmem:[%s13168_s20 + $0x17a0] sm:$0xff]  }
 0x2e4   : > { %11735 = vmatprep.subr.bf16.mxu1 %v12884_v3  ;;  %v12930_v3 = vld [vmem:[%s13168_s20 + $0x1768] sm:$0xff]  }
 0x2e6   : > { %11714 = vmatpush3.bf16.msra.mxu0 %v12883_v2 }
 0x2e7   : > { %11736 = vmatpush3.bf16.msra.mxu1 %v12885_v4  ;;  %11715 = vmatprep.subr.bf16.mxu0 %v12886_v5 }
 0x2e8   : > { %11737 = vmatprep.subr.bf16.mxu1 %v12888_v7 }
 0x2ea   : > { %11716 = vmatpush3.bf16.msra.mxu0 %v12887_v6  ;;  %v12931_v6 = vld [vmem:[%s13168_s20 + $0x1728] sm:$0xff]  }
 0x2eb   : > { %11738 = vmatpush3.bf16.msra.mxu1 %v12889_v8  ;;  %11717 = vmatprep.subr.bf16.mxu0 %v12890_v9  ;;  %v12932_v9 = vld [vmem:[%s13168_s20 + $0x17e8] sm:$0xff]  }
 0x2ec   : > { %11739 = vmatprep.subr.bf16.mxu1 %v12892_v13  ;;  %v12934_v13 = vld [vmem:[%s13168_s20 + $0x1770] sm:$0xff]  }
 0x2ee   : > { %11718 = vmatpush3.bf16.msra.mxu0 %v12891_v11  ;;  %v12933_v11 = vld [vmem:[%s13168_s20 + $0x17a8] sm:$0xff]  }
 0x2ef   : > { %11740 = vmatpush3.bf16.msra.mxu1 %v12893_v16  ;;  %11719 = vmatprep.subr.bf16.mxu0 %v12894_v19  ;;  %v12935_v16 = vld [vmem:[%s13168_s20 + $0x1730] sm:$0xff]   ;;  %v12938_v19 = vld [vmem:[%s13168_s20 + $0x1778] sm:$0xff]  }
 0x2f0   : > { %v11417_v10 = vpop.f32.mrb[60].mxu0  ;;  %11741 = vmatprep.subr.bf16.mxu1 %v12896_v24 }
 0x2f1   : > { %v11418_v12 = vpop.f32.mrb[61].mxu0  ;;  %v11439_v17 = vpop.f32.mrb[60].mxu1 }
 0x2f2   : > { %v11419_v14 = vadd.f32 %v11418_v12, %v11417_v10  ;;  %v11420_v15 = vpop.f32.mrb[62].mxu0  ;;  %v11440_v22 = vpop.f32.mrb[61].mxu1  ;;  %11720 = vmatpush3.bf16.msra.mxu0 %v12895_v21  ;;  %v12940_v21 = vld [vmem:[%s13168_s20 + $0x17f8] sm:$0xff]  }
 0x2f3   : > { %v11421_v20 = vpop.f32.mrb[63].mxu0  ;;  %v11441_v23 = vadd.f32 %v11440_v22, %v11439_v17  ;;  %v11442_v25 = vpop.f32.mrb[62].mxu1  ;;  %11742 = vmatpush3.bf16.msra.mxu1 %v12897_v26  ;;  %11721 = vmatprep.subr.bf16.mxu0 %v12898_v29  ;;  %v12936_v17 = vld [vmem:[%s13168_s20 + $0x17f0] sm:$0xff]   ;;  %v12944_v26 = vld [vmem:[%s13168_s20 + $0x1840] sm:$0xff]  }
 0x2f4   : > { %v8356_v18 = vadd.f32 %v11419_v14, %v13951_v41  ;;  %v11443_v27 = vpop.f32.mrb[63].mxu1  ;;  %11743 = vmatprep.subr.bf16.mxu1 %v12900_v31  ;;  %v502_v41 = vld [vmem:[%s13163_s16 + $0x168] sm:$0xff]  ;;  %v12939_v20 = vld [vmem:[%s13168_s20 + $0x1738] sm:$0xff]   ;;  %v503_v22 = vld [vmem:[%s13163_s16 + $0x170] sm:$0xff] }
 0x2f5   : > { %v9934_v42 = vcombine.low %v502_v41, %v502_v41  ;;  %v9935_v43 = vcombine.high %v502_v41, %v502_v41  ;;  %v9937_v24 = vcombine.high %v503_v22, %v503_v22  ;;  %v12943_v25 = vld [vmem:[%s13168_s20 + $0x17b8] sm:$0xff]   ;;  %v12948_v31 = vld [vmem:[%s13168_s20 + $0x1848] sm:$0xff]  }
 0x2f6   : > { %v13988_v28 = vadd.f32 %v11441_v23, %v8356_v18  ;;  %11722 = vmatpush3.bf16.msra.mxu0 %v12899_v30  ;;  %v12937_v18 = vld [vmem:[%s13168_s20 + $0x17b0] sm:$0xff]   ;;  %v9936_v23 = vcombine.low %v503_v22, %v503_v22  ;;  %v504_v27 = vld [vmem:[%s13163_s16 + $0x178] sm:$0xff]  ;;  %v12947_v30 = vld [vmem:[%s13168_s20 + $0x1800] sm:$0xff]  }
 0x2f7   : > { %11744 = vmatpush3.bf16.msra.mxu1 %v12901_v32  ;;  %11723 = vmatprep.subr.bf16.mxu0 %v12902_v33  ;;  %v9939_v29 = vcombine.high %v504_v27, %v504_v27  ;;  %v12949_v32 = vld [vmem:[%s13168_s20 + $0x1808] sm:$0xff]   ;;  %v12950_v33 = vld [vmem:[%s13168_s20 + $0x1850] sm:$0xff]  }
 0x2f8   : > { %11745 = vmatprep.subr.bf16.mxu1 %v12904_v35  ;;  %8953 = vmatprep.mubr.bf16.mxu1 %v9935_v43  ;;  %v12952_v35 = vld [vmem:[%s13168_s20 + $0x1858] sm:$0xff]  }
 0x2fa   : > { %11724 = vmatpush3.bf16.msra.mxu0 %v12903_v34  ;;  %v12951_v34 = vld [vmem:[%s13168_s20 + $0x1810] sm:$0xff]  }
 0x2fb   : > { %11746 = vmatpush3.bf16.msra.mxu1 %v12907_v39  ;;  %11753 = vmatprep.subr.bf16.mxu0 %v12908_v40  ;;  %v505_v39 = vld [vmem:[%s13163_s16 + $0x180] sm:$0xff]  ;;  %v12956_v40 = vld [vmem:[%s13168_s20 + $0x1868] sm:$0xff]  }
 0x2fc   : > { %11775 = vmatprep.subr.bf16.mxu1 %v12912_v45  ;;  %v9941_v41 = vcombine.high %v505_v39, %v505_v39 }
 0x2fd   : > { %8914 = vmatmul.mubr.bf16.vlgmr.msra.gmra.mrb[88].mxu0 %v9932_v37  ;;  %v12954_v37 = vld [vmem:[%s13168_s20 + $0x1860] sm:$0xff]  }
 0x2fe   : > { %11754 = vmatpush3.bf16.msra.mxu0 %v12911_v44  ;;  %8954 = vmatmul.mubr.bf16.vlgmr.msra.gmra.mrb[88].mxu1 %v9934_v42 }
 0x2ff   : > { %11776 = vmatpush3.bf16.msra.mxu1 %v12913_v46  ;;  %11755 = vmatprep.subr.bf16.mxu0 %v12914_v47  ;;  %v12957_v47 = vld [vmem:[%s13168_s20 + $0x1828] sm:$0xff]  }
 0x300   : > { %11777 = vmatprep.subr.bf16.mxu1 %v12916_v49  ;;  %8993 = vmatprep.mubr.bf16.mxu0 %v9937_v24 }
 0x301   : > { %9033 = vmatprep.mubr.bf16.mxu1 %v9939_v29 }
 0x302   : > { %11756 = vmatpush3.bf16.msra.mxu0 %v12915_v48 }
 0x303   : > { %11778 = vmatpush3.bf16.msra.mxu1 %v12917_v50  ;;  %11757 = vmatprep.subr.bf16.mxu0 %v12918_v51  ;;  %v12958_v50 = vld [vmem:[%s13168_s20 + $0x1870] sm:$0xff]  }
 0x304   : > { %11779 = vmatprep.subr.bf16.mxu1 %v12920_v53 }
 0x306   : > { %11758 = vmatpush3.bf16.msra.mxu0 %v12919_v52 }
 0x307   : > { %11780 = vmatpush3.bf16.msra.mxu1 %v12921_v54  ;;  %11759 = vmatprep.subr.bf16.mxu0 %v12922_v55 }
 0x308   : > { %11781 = vmatprep.subr.bf16.mxu1 %v12924_v57  ;;  %v12960_v57 = vld [vmem:[%s13168_s20 + $0x1878] sm:$0xff]  }
 0x30a   : > { %11760 = vmatpush3.bf16.msra.mxu0 %v12923_v56  ;;  %v12959_v56 = vld [vmem:[%s13168_s20 + $0x1830] sm:$0xff]  }
 0x30b   : > { %11782 = vmatpush3.bf16.msra.mxu1 %v12925_v58  ;;  %11761 = vmatprep.subr.bf16.mxu0 %v12926_v59  ;;  %v12961_v58 = vld [vmem:[%s13168_s20 + $0x1838] sm:$0xff]   ;;  %v9940_v59 = vcombine.low %v505_v39, %v505_v39 }
 0x30c   : > { %11783 = vmatprep.subr.bf16.mxu1 %v12928_v62 }
 0x30e   : > { %11762 = vmatpush3.bf16.msra.mxu0 %v12927_v60 }
 0x30f   : > { %11784 = vmatpush3.bf16.msra.mxu1 %v12929_v0  ;;  %11763 = vmatprep.subr.bf16.mxu0 %v12930_v3 }
 0x310   : > { %v11461_v61 = vpop.f32.mrb[64].mxu0  ;;  %11785 = vmatprep.subr.bf16.mxu1 %v12932_v9 }
 0x311   : > { %v11462_v63 = vpop.f32.mrb[65].mxu0  ;;  %v11483_v4 = vpop.f32.mrb[64].mxu1 }
 0x312   : > { %v11463_v1 = vadd.f32 %v11462_v63, %v11461_v61  ;;  %v11464_v2 = vpop.f32.mrb[66].mxu0  ;;  %v11484_v8 = vpop.f32.mrb[65].mxu1  ;;  %11764 = vmatpush3.bf16.msra.mxu0 %v12931_v6 }
 0x313   : > { %v11465_v7 = vpop.f32.mrb[67].mxu0  ;;  %v11485_v10 = vadd.f32 %v11484_v8, %v11483_v4  ;;  %v11486_v12 = vpop.f32.mrb[66].mxu1  ;;  %11786 = vmatpush3.bf16.msra.mxu1 %v12933_v11  ;;  %11765 = vmatprep.subr.bf16.mxu0 %v12934_v13 }
 0x314   : > { %v8436_v5 = vadd.f32 %v11463_v1, %v13988_v28  ;;  %v11487_v14 = vpop.f32.mrb[67].mxu1  ;;  %11787 = vmatprep.subr.bf16.mxu1 %v12936_v17  ;;  %v9938_v28 = vcombine.low %v504_v27, %v504_v27 }
 0x316   : > { %v8476_v15 = vadd.f32 %v11485_v10, %v8436_v5  ;;  %11766 = vmatpush3.bf16.msra.mxu0 %v12935_v16 }
 0x317   : > { %11788 = vmatpush3.bf16.msra.mxu1 %v12937_v18  ;;  %11767 = vmatprep.subr.bf16.mxu0 %v12938_v19 }
 0x318   : > { %11789 = vmatprep.subr.bf16.mxu1 %v12940_v21 }
 0x31a   : > { %11768 = vmatpush3.bf16.msra.mxu0 %v12939_v20 }
 0x31b   : > { %11790 = vmatpush3.bf16.msra.mxu1 %v12943_v25  ;;  %11797 = vmatprep.subr.bf16.mxu0 %v12944_v26 }
 0x31d   : > { %8994 = vmatmul.mubr.bf16.vlgmr.msra.gmra.mrb[92].mxu0 %v9936_v23 }
 0x31e   : > { %11798 = vmatpush3.bf16.msra.mxu0 %v12947_v30  ;;  %9034 = vmatmul.mubr.bf16.vlgmr.msra.gmra.mrb[92].mxu1 %v9938_v28 }
 0x31f   : > { %11799 = vmatprep.subr.bf16.mxu0 %v12948_v31  ;;  %9073 = vmatprep.mubr.bf16.mxu0 %v9941_v41 }
 0x322   : > { %11800 = vmatpush3.bf16.msra.mxu0 %v12949_v32 }
 0x323   : > { %11801 = vmatprep.subr.bf16.mxu0 %v12950_v33 }
 0x326   : > { %11802 = vmatpush3.bf16.msra.mxu0 %v12951_v34 }
 0x327   : > { %11803 = vmatprep.subr.bf16.mxu0 %v12952_v35 }
 0x32a   : > { %11804 = vmatpush3.bf16.msra.mxu0 %v12953_v36 }
 0x32b   : > { %11805 = vmatprep.subr.bf16.mxu0 %v12954_v37 }
 0x32e   : > { %11806 = vmatpush3.bf16.msra.mxu0 %v12955_v38 }
 0x32f   : > { %11807 = vmatprep.subr.bf16.mxu0 %v12956_v40 }
 0x330   : > { %v11505_v42 = vpop.f32.mrb[68].mxu0 }
 0x331   : > { %v11506_v43 = vpop.f32.mrb[69].mxu0  ;;  %v11527_v46 = vpop.f32.mrb[68].mxu1 }
 0x332   : > { %v11507_v44 = vadd.f32 %v11506_v43, %v11505_v42  ;;  %v11508_v45 = vpop.f32.mrb[70].mxu0  ;;  %v11528_v49 = vpop.f32.mrb[69].mxu1  ;;  %11808 = vmatpush3.bf16.msra.mxu0 %v12957_v47 }
 0x333   : > { %v11509_v48 = vpop.f32.mrb[71].mxu0  ;;  %v11529_v52 = vadd.f32 %v11528_v49, %v11527_v46  ;;  %v11530_v53 = vpop.f32.mrb[70].mxu1  ;;  %11809 = vmatprep.subr.bf16.mxu0 %v12958_v50 }
 0x334   : > { %v8516_v51 = vadd.f32 %v11507_v44, %v8476_v15  ;;  %v11531_v54 = vpop.f32.mrb[71].mxu1 }
 0x336   : > { %v8556_v55 = vadd.f32 %v11529_v52, %v8516_v51  ;;  %11810 = vmatpush3.bf16.msra.mxu0 %v12959_v56 }
 0x337   : > { %11811 = vmatprep.subr.bf16.mxu0 %v12960_v57 }
 0x33a   : > { %11812 = vmatpush3.bf16.msra.mxu0 %v12961_v58 }
 0x33d   : > { %9074 = vmatmul.mubr.bf16.vlgmr.msra.gmra.mrb[96].mxu0 %v9940_v59 }
 0x350   : > { %v11549_v60 = vpop.f32.mrb[72].mxu0 }
 0x351   : > { %v11550_v61 = vpop.f32.mrb[73].mxu0  ;;  %v11571_v0 = vpop.f32.mrb[72].mxu1 }
 0x352   : > { %v11551_v62 = vadd.f32 %v11550_v61, %v11549_v60  ;;  %v11552_v63 = vpop.f32.mrb[74].mxu0  ;;  %v11572_v3 = vpop.f32.mrb[73].mxu1 }
 0x353   : > { %v11553_v1 = vpop.f32.mrb[75].mxu0  ;;  %v11573_v4 = vadd.f32 %v11572_v3, %v11571_v0  ;;  %v11574_v5 = vpop.f32.mrb[74].mxu1 }
 0x354   : > { %v8596_v2 = vadd.f32 %v11551_v62, %v8556_v55  ;;  %v11575_v6 = vpop.f32.mrb[75].mxu1 }
 0x356   : > { %v8636_v7 = vadd.f32 %v11573_v4, %v8596_v2 }
 0x370   : > { %v11593_v8 = vpop.f32.mrb[76].mxu0 }
 0x371   : > { %v11594_v9 = vpop.f32.mrb[77].mxu0  ;;  %v11615_v12 = vpop.f32.mrb[76].mxu1 }
 0x372   : > { %v11595_v10 = vadd.f32 %v11594_v9, %v11593_v8  ;;  %v11596_v11 = vpop.f32.mrb[78].mxu0  ;;  %v11616_v14 = vpop.f32.mrb[77].mxu1  ;;  %v456_v8 = vld [vmem:[#allocation2] sm:$0xff] }
 0x373   : > { %v11597_v13 = vpop.f32.mrb[79].mxu0  ;;  %v11617_v16 = vadd.f32 %v11616_v14, %v11615_v12  ;;  %v11618_v17 = vpop.f32.mrb[78].mxu1  ;;  %v9109_v12 = vld [vmem:[%s14389_s3 + $0x40] sm:$0xff] (!%p10726_p6)  ;;  %v9111_v14 = vld [vmem:[%s14389_s3 + $0x50] sm:$0xff] (!%p10726_p6) }
 0x374   : > { %v8676_v15 = vadd.f32 %v11595_v10, %v8636_v7  ;;  %v11619_v18 = vpop.f32.mrb[79].mxu1  ;;  %v9110_v13 = vld [vmem:[%s14389_s3 + $0x48] sm:$0xff] (!%p10726_p6)  ;;  %v9112_v17 = vld [vmem:[%s14389_s3 + $0x58] sm:$0xff] (!%p10726_p6) }
 0x375   : > { %v13068_v18 = vmov (!%p10726_p6), 0.0  }
 0x376   : > { %v8716_v19 = vadd.f32 %v11617_v16, %v8676_v15  ;;  %v13066_v15 = vmov (!%p10726_p6), 0.0|0.0   ;;  %v11967_v16 = vpack.c.bf16 (!%p10726_p6), %v9110_v13, %v9109_v12  ;;  %11906 = vmatprep.mubr.msk.f32.mxu1 (!%p10726_p6), %vm13067_vm2, %v13068_v18  ;;  %11944 = vmatprep.mubr.msk.f32.mxu0 (!%p10726_p6), %vm13067_vm2, %v13068_v18 }
 0x377   : > { %11966 = vmatprep.subr.bf16.mxu1 (!%p10726_p6), %v13066_v15  ;;  %11990 = vmatprep.subr.bf16.mxu0 (!%p10726_p6), %v13066_v15 }
 0x378   : > { %11968 = vmatpush3.bf16.msra.mxu1 (!%p10726_p6), %v11967_v16 }
 0x379   : > { %11969 = vmatprep.subr.bf16.mxu1 (!%p10726_p6), %v13066_v15 }
 0x390   : > { %v11637_v20 = vpop.f32.mrb[80].mxu0 }
 0x391   : > { %v11638_v21 = vpop.f32.mrb[81].mxu0  ;;  %v11659_v24 = vpop.f32.mrb[80].mxu1 }
 0x392   : > { %v11639_v22 = vadd.f32 %v11638_v21, %v11637_v20  ;;  %v11640_v23 = vpop.f32.mrb[82].mxu0  ;;  %v11660_v26 = vpop.f32.mrb[81].mxu1  ;;  %v11970_v20 = vpack.c.bf16 (!%p10726_p6), %v9112_v17, %v9111_v14  ;;  %v9113_v21 = vld [vmem:[%s14389_s3 + $0x60] sm:$0xff] (!%p10726_p6) }
 0x393   : > { %v11641_v25 = vpop.f32.mrb[83].mxu0  ;;  %v11661_v28 = vadd.f32 %v11660_v26, %v11659_v24  ;;  %v11662_v29 = vpop.f32.mrb[82].mxu1  ;;  %v13069_v23 = vmov (!%p10726_p6), 0   ;;  %v9114_v24 = vld [vmem:[%s14389_s3 + $0x68] sm:$0xff] (!%p10726_p6)  ;;  %v9264_v26 = vld [vmem:[%s14389_s3 + $0x80] sm:$0xff] (!%p10726_p6) }
 0x394   : > { %v8756_v27 = vadd.f32 %v11639_v22, %v8716_v19  ;;  %v11663_v30 = vpop.f32.mrb[83].mxu1  ;;  %v10727_v22 = vld [vmem:[%s14388_s2] ss:$0 sm:$0xff] (!%p10726_p6)  ;;  %12964 = vset.pattern.permute.xlu0 (!%p10726_p6), %v13069_v23  ;;  %v9266_v29 = vld [vmem:[%s14389_s3 + $0x90] sm:$0xff] (!%p10726_p6)  ;;  %11971 = vmatpush3.bf16.msra.mxu1 (!%p10726_p6), %v11970_v20 }
 0x395   : > { %v9267_v30 = vld [vmem:[%s14389_s3 + $0x98] sm:$0xff] (!%p10726_p6)  ;;  %11972 = vmatprep.subr.bf16.mxu1 (!%p10726_p6), %v13066_v15 }
 0x396   : > { %v8796_v31 = vadd.f32 %v11661_v28, %v8756_v27  ;;  %v9265_v27 = vld [vmem:[%s14389_s3 + $0x88] sm:$0xff] (!%p10726_p6) }
 0x397   : > { %v11991_v28 = vpack.c.bf16 (!%p10726_p6), %v9265_v27, %v9264_v26 }
 0x399   : > { %11992 = vmatpush3.bf16.msra.mxu0 (!%p10726_p6), %v11991_v28 }
 0x39a   : > { %11993 = vmatprep.subr.bf16.mxu0 (!%p10726_p6), %v13066_v15 }
 0x3b0   : > { %v11681_v32 = vpop.f32.mrb[84].mxu0 }
 0x3b1   : > { %v11682_v33 = vpop.f32.mrb[85].mxu0  ;;  %v11703_v36 = vpop.f32.mrb[84].mxu1 }
 0x3b2   : > { %v11683_v34 = vadd.f32 %v11682_v33, %v11681_v32  ;;  %v11684_v35 = vpop.f32.mrb[86].mxu0  ;;  %v11704_v39 = vpop.f32.mrb[85].mxu1  ;;  %v11973_v32 = vpack.c.bf16 (!%p10726_p6), %v9114_v24, %v9113_v21  ;;  %v9115_v33 = vld [vmem:[%s14389_s3 + $0x70] sm:$0xff] (!%p10726_p6) }
 0x3b3   : > { %v11685_v37 = vpop.f32.mrb[87].mxu0  ;;  %v11705_v40 = vadd.f32 %v11704_v39, %v11703_v36  ;;  %v11706_v41 = vpop.f32.mrb[86].mxu1  ;;  %v9116_v35 = vld [vmem:[%s14389_s3 + $0x78] sm:$0xff] (!%p10726_p6)  ;;  %v9268_v36 = vld [vmem:[%s14389_s3 + $0xa0] sm:$0xff] (!%p10726_p6) }
 0x3b4   : > { %v8836_v38 = vadd.f32 %v11683_v34, %v8796_v31  ;;  %v11707_v42 = vpop.f32.mrb[87].mxu1  ;;  %v11994_v34 = vpack.c.bf16 (!%p10726_p6), %v9267_v30, %v9266_v29  ;;  %v9269_v37 = vld [vmem:[%s14389_s3 + $0xa8] sm:$0xff] (!%p10726_p6)  ;;  %11974 = vmatpush3.bf16.msra.mxu1 (!%p10726_p6), %v11973_v32  ;;  %v9100_v41 = vld [vmem:[%s14389_s3] sm:$0xff] (!%p10726_p6) }
 0x3b5   : > { %v11997_v39 = vpack.c.bf16 (!%p10726_p6), %v9269_v37, %v9268_v36  ;;  %11975 = vmatprep.subr.bf16.mxu1 (!%p10726_p6), %v13066_v15  ;;  %v9101_v42 = vld [vmem:[%s14389_s3 + $0x8] sm:$0xff] (!%p10726_p6)  ;;  %v9642_v29 = vld [vmem:[%s14396_s10 + $0x80] sm:$0xff] (!%p10726_p6)  ;;  %v9644_v36 = vld [vmem:[%s14396_s10 + $0x90] sm:$0xff] (!%p10726_p6) }
 0x3b6   : > { %v8876_v43 = vadd.f32 %v11705_v40, %v8836_v38  ;;  %v11976_v38 = vpack.c.bf16 (!%p10726_p6), %v9116_v35, %v9115_v33  ;;  %11995 = vmatpush3.bf16.msra.mxu0 (!%p10726_p6), %v11994_v34  ;;  %v10732_v40 = vld [vmem:[#allocation3] ss:$0 sm:$0xff] (!%p10726_p6)  ;;  %v9626_v33 = vld [vmem:[%s14396_s10] sm:$0xff] (!%p10726_p6)  ;;  %v9645_v37 = vld [vmem:[%s14396_s10 + $0x98] sm:$0xff] (!%p10726_p6) }
 0x3b7   : > { %11996 = vmatprep.subr.bf16.mxu0 (!%p10726_p6), %v13066_v15  ;;  %9436 = vperm.xlu0 (!%p10726_p6), %12964, %v10732_v40   ;;  %v9643_v30 = vld [vmem:[%s14396_s10 + $0x88] sm:$0xff] (!%p10726_p6)  ;;  %v9628_v40 = vld [vmem:[%s14396_s10 + $0x10] sm:$0xff] (!%p10726_p6) }
 0x3b8   : > { %11977 = vmatpush3.bf16.msra.mxu1 (!%p10726_p6), %v11976_v38  ;;  %v12014_v32 = vpack.c.bf16 (!%p10726_p6), %v9643_v30, %v9642_v29  ;;  %v9627_v34 = vld [vmem:[%s14396_s10 + $0x8] sm:$0xff] (!%p10726_p6) }
 0x3b9   : > { %11978 = vmatprep.subr.bf16.mxu1 (!%p10726_p6), %v13066_v15  ;;  %v12016_v35 = vpack.c.bf16 (!%p10726_p6), %v9627_v34, %v9626_v33 }
 0x3ba   : > { %11998 = vmatpush3.bf16.msra.mxu0 (!%p10726_p6), %v11997_v39  ;;  %v12018_v39 = vpack.c.bf16 (!%p10726_p6), %v9645_v37, %v9644_v36 }
 0x3bb   : > { %11999 = vmatprep.subr.bf16.mxu0 (!%p10726_p6), %v13066_v15 }
 0x3d0   : > { %v11725_v44 = vpop.f32.mrb[88].mxu0 }
 0x3d1   : > { %v11726_v45 = vpop.f32.mrb[89].mxu0  ;;  %v11747_v48 = vpop.f32.mrb[88].mxu1 }
 0x3d2   : > { %v11727_v46 = vadd.f32 %v11726_v45, %v11725_v44  ;;  %v11728_v47 = vpop.f32.mrb[90].mxu0  ;;  %v11748_v50 = vpop.f32.mrb[89].mxu1  ;;  %v9271_v44 = vld [vmem:[%s14389_s3 + $0xb8] sm:$0xff] (!%p10726_p6) }
 0x3d3   : > { %v11729_v49 = vpop.f32.mrb[91].mxu0  ;;  %v11749_v52 = vadd.f32 %v11748_v50, %v11747_v48  ;;  %v11750_v53 = vpop.f32.mrb[90].mxu1  ;;  %v9102_v47 = vld [vmem:[%s14389_s3 + $0x10] sm:$0xff] (!%p10726_p6)  ;;  %v9103_v48 = vld [vmem:[%s14389_s3 + $0x18] sm:$0xff] (!%p10726_p6) }
 0x3d4   : > { %v8916_v51 = vadd.f32 %v11727_v46, %v8876_v43  ;;  %v11751_v54 = vpop.f32.mrb[91].mxu1  ;;  %v9270_v43 = vld [vmem:[%s14389_s3 + $0xb0] sm:$0xff] (!%p10726_p6)  ;;  %v11979_v46 = vpack.c.bf16 (!%p10726_p6), %v9101_v42, %v9100_v41  ;;  %v11982_v50 = vpack.c.bf16 (!%p10726_p6), %v9103_v48, %v9102_v47  ;;  %v9629_v41 = vld [vmem:[%s14396_s10 + $0x18] sm:$0xff] (!%p10726_p6)  ;;  %v9630_v47 = vld [vmem:[%s14396_s10 + $0x20] sm:$0xff] (!%p10726_p6) }
 0x3d5   : > { %v12000_v49 = vpack.c.bf16 (!%p10726_p6), %v9271_v44, %v9270_v43  ;;  %v12020_v42 = vpack.c.bf16 (!%p10726_p6), %v9629_v41, %v9628_v40  ;;  %v9646_v43 = vld [vmem:[%s14396_s10 + $0xa0] sm:$0xff] (!%p10726_p6)  ;;  %v9647_v44 = vld [vmem:[%s14396_s10 + $0xa8] sm:$0xff] (!%p10726_p6) }
 0x3d6   : > { %v8956_v55 = vadd.f32 %v11749_v52, %v8916_v51  ;;  %v9104_v51 = vld [vmem:[%s14389_s3 + $0x20] sm:$0xff] (!%p10726_p6)  ;;  %v9105_v52 = vld [vmem:[%s14389_s3 + $0x28] sm:$0xff] (!%p10726_p6) }
 0x3d7   : > { %12001 = vmatpush3.bf16.msra.mxu0 (!%p10726_p6), %v12000_v49  ;;  %v11985_v54 = vpack.c.bf16 (!%p10726_p6), %v9105_v52, %v9104_v51  ;;  %v9631_v48 = vld [vmem:[%s14396_s10 + $0x28] sm:$0xff] (!%p10726_p6)  ;;  %v9648_v52 = vld [vmem:[%s14396_s10 + $0xb0] sm:$0xff] (!%p10726_p6) }
 0x3d8   : > { %12015 = vmatprep.subr.bf16.mxu0 (!%p10726_p6), %v12014_v32 }
 0x3f0   : > { %v11769_v56 = vpop.f32.mrb[92].mxu0 }
 0x3f1   : > { %v11770_v57 = vpop.f32.mrb[93].mxu0  ;;  %v11791_v60 = vpop.f32.mrb[92].mxu1 }
 0x3f2   : > { %v11771_v58 = vadd.f32 %v11770_v57, %v11769_v56  ;;  %v11772_v59 = vpop.f32.mrb[94].mxu0  ;;  %v11792_v62 = vpop.f32.mrb[93].mxu1  ;;  %v9107_v56 = vld [vmem:[%s14389_s3 + $0x38] sm:$0xff] (!%p10726_p6) }
 0x3f3   : > { %v11773_v61 = vpop.f32.mrb[95].mxu0  ;;  %v11793_v0 = vadd.f32 %v11792_v62, %v11791_v60  ;;  %v11794_v1 = vpop.f32.mrb[94].mxu1  ;;  %v9348_v59 = vld [vmem:[%s14389_s3 + $0xc8] sm:$0xff] (!%p10726_p6)  ;;  %v9349_v62 = vld [vmem:[%s14389_s3 + $0xd0] sm:$0xff] (!%p10726_p6) }
 0x3f4   : > { %v8996_v63 = vadd.f32 %v11771_v58, %v8956_v55  ;;  %v11795_v2 = vpop.f32.mrb[95].mxu1  ;;  %v9106_v55 = vld [vmem:[%s14389_s3 + $0x30] sm:$0xff] (!%p10726_p6)  ;;  %v9347_v58 = vld [vmem:[%s14389_s3 + $0xc0] sm:$0xff] (!%p10726_p6) }
 0x3f5   : > { %v11988_v57 = vpack.c.bf16 (!%p10726_p6), %v9107_v56, %v9106_v55  ;;  %v12003_v61 = vpack.c.bf16 (!%p10726_p6), %v9348_v59, %v9347_v58  ;;  %v9351_v1 = vld [vmem:[%s14389_s3 + $0xe0] sm:$0xff] (!%p10726_p6)  ;;  %v9352_v2 = vld [vmem:[%s14389_s3 + $0xe8] sm:$0xff] (!%p10726_p6)  ;;  %v9633_v58 = vld [vmem:[%s14396_s10 + $0x38] sm:$0xff] (!%p10726_p6) }
 0x3f6   : > { %v9036_v3 = vadd.f32 %v11793_v0, %v8996_v63  ;;  %v9350_v63 = vld [vmem:[%s14389_s3 + $0xd8] sm:$0xff] (!%p10726_p6) }
 0x3f7   : > { %v12006_v0 = vpack.c.bf16 (!%p10726_p6), %v9350_v63, %v9349_v62 }
 0x410   : > { %v11813_v4 = vpop.f32.mrb[96].mxu0 }
 0x411   : > { %v11814_v5 = vpop.f32.mrb[97].mxu0 }
 0x412   : > { %v11815_v6 = vadd.f32 %v11814_v5, %v11813_v4  ;;  %v11816_v7 = vpop.f32.mrb[98].mxu0  ;;  %9087 = sbr.rel (%p10726_p6) target bundleno = 1998 (0x7ce), region = 72  ;;  %v9353_v4 = vld [vmem:[%s14389_s3 + $0xf0] sm:$0xff] (!%p10726_p6)  ;;  %v9354_v5 = vld [vmem:[%s14389_s3 + $0xf8] sm:$0xff] (!%p10726_p6) }
 0x413   : > { %v11817_v9 = vpop.f32.mrb[99].mxu0 }
 0x414   : > { %v9076_v10 = vadd.f32 %v11815_v6, %v9036_v3  ;;  %v12009_v3 = vpack.c.bf16 (!%p10726_p6), %v9352_v2, %v9351_v1  ;;  %v12012_v6 = vpack.c.bf16 (!%p10726_p6), %v9354_v5, %v9353_v4  ;;  %v9635_v1 = vld [vmem:[%s14396_s10 + $0x48] sm:$0xff] (!%p10726_p6)  ;;  %v9653_v4 = vld [vmem:[%s14396_s10 + $0xd8] sm:$0xff] (!%p10726_p6) }
 0x416   : > { %v9081_v11 = vadd.f32 %v9076_v10, %v456_v8 }
 0x418   : > { %9083 = vst.msk [vmem:[#allocation2] sm:$0xff] %vm9082_vm1, %v9081_v11 }
 0x41f   : > { %v9088_v19 = vld [vmem:[#allocation2] sm:$0xff] }
 0x420   : > { %v9096_v25 = vadd.f32 %v10727_v22, %v9088_v19 }
 0x422   : > { %v9097_v31 = vmax.f32 %v9096_v25, 0.0 }
 0x424   : > { %9098 = vst.msk [vmem:[#allocation2] sm:$0xff] %vm9082_vm1, %v9097_v31  ;;  %v9456_v31 = vlaneseq }
 0x426   : > { %v14200_v38 = vshrl.u32 %v9456_v31, 7  ;;  %v9454_v31 = vld [vmem:[%s14391_s5] sm:$0xff] }
 0x428   : > { %v14231_v55 = vsub.s32 0, %v14200_v38 }
 0x42b   : > { %v9108_v45 = vld [vmem:[#allocation2 + $0x2] sm:$0x3]  ;;  %v9263_v53 = vld [vmem:[#allocation2 + $0x4] sm:$0x3]  ;;  %v9099_v60 = vld [vmem:[#allocation2] sm:$0x3] }
 0x42c   : > { %11907 = vmatmul.mubr.msk.f32.vlgmr.msra.gmra.mrb[0].mxu1 %vm9082_vm1, %v9108_v45  ;;  %11945 = vmatmul.mubr.msk.f32.vlgmr.msra.gmra.mrb[0].mxu0 %vm9082_vm1, %v9263_v53  ;;  %v9346_v7 = vld [vmem:[#allocation2 + $0x6] sm:$0x3]  ;;  %v14215_v45 = vsub.s32 1, %v14200_v38  ;;  %v9649_v53 = vld [vmem:[%s14396_s10 + $0xb8] sm:$0xff] }
 0x42d   : > { %11980 = vmatpush3.bf16.msra.mxu1 %v11979_v46  ;;  %11925 = vmatprep.mubr.msk.f32.mxu1 %vm13067_vm2, %v13068_v18  ;;  %v12022_v46 = vpack.c.bf16 %v9647_v44, %v9646_v43  ;;  %v12026_v56 = vpack.c.bf16 %v9649_v53, %v9648_v52  ;;  %v9528_v44 = vld [vmem:[%s14394_s8] sm:$0x3] }
 0x42e   : > { %11981 = vmatprep.subr.bf16.mxu1 %v13066_v15  ;;  %12017 = vmatpush3.bf16.msra.mxu0 %v12016_v35 }
 0x42f   : > { %12019 = vmatprep.subr.bf16.mxu0 %v12018_v39 }
 0x431   : > { %11983 = vmatpush3.bf16.msra.mxu1 %v11982_v50  ;;  %v12024_v50 = vpack.c.bf16 %v9631_v48, %v9630_v47 }
 0x432   : > { %11984 = vmatprep.subr.bf16.mxu1 %v13066_v15  ;;  %12021 = vmatpush3.bf16.msra.mxu0 %v12020_v42 }
 0x433   : > { %12023 = vmatprep.subr.bf16.mxu0 %v12022_v46 }
 0x435   : > { %11986 = vmatpush3.bf16.msra.mxu1 %v11985_v54 }
 0x436   : > { %11987 = vmatprep.subr.bf16.mxu1 %v13066_v15  ;;  %12025 = vmatpush3.bf16.msra.mxu0 %v12024_v50 }
 0x437   : > { %12027 = vmatprep.subr.bf16.mxu0 %v12026_v56  ;;  %v9533_v56 = vrot.slane %v9528_v44, %v14231_v55 }
 0x439   : > { %11989 = vmatpush3.bf16.msra.mxu1 %v11988_v57  ;;  %v9632_v57 = vld [vmem:[%s14396_s10 + $0x30] sm:$0xff] }
 0x43a   : > { %12002 = vmatprep.subr.bf16.mxu1 %v13066_v15  ;;  %v12028_v59 = vpack.c.bf16 %v9633_v58, %v9632_v57 }
 0x43c   : > { %11926 = vmatmul.mubr.msk.f32.vlgmr.msra.gmra.mrb[2].mxu1 %vm9082_vm1, %v9099_v60  ;;  %12029 = vmatpush3.bf16.msra.mxu0 %v12028_v59  ;;  %v9650_v60 = vld [vmem:[%s14396_s10 + $0xc0] sm:$0xff] }
 0x43d   : > { %12004 = vmatpush3.bf16.msra.mxu1 %v12003_v61  ;;  %11963 = vmatprep.mubr.msk.f32.mxu1 %vm13067_vm2, %v13068_v18  ;;  %v9437_v18 = vpop.permute.xlu0 %9436  ;;  %v9651_v61 = vld [vmem:[%s14396_s10 + $0xc8] sm:$0xff]  ;;  %v9559_v59 = vld [vmem:[%s14392_s6] sm:$0x3] }
 0x43e   : > { %12005 = vmatprep.subr.bf16.mxu1 %v13066_v15  ;;  %v12030_v63 = vpack.c.bf16 %v9651_v61, %v9650_v60 }
 0x440   : > { %12031 = vmatprep.subr.bf16.mxu0 %v12030_v63 }
 0x441   : > { %12007 = vmatpush3.bf16.msra.mxu1 %v12006_v0  ;;  %v9634_v0 = vld [vmem:[%s14396_s10 + $0x40] sm:$0xff] }
 0x442   : > { %12008 = vmatprep.subr.bf16.mxu1 %v13066_v15  ;;  %v12032_v2 = vpack.c.bf16 %v9635_v1, %v9634_v0 }
 0x444   : > { %12033 = vmatpush3.bf16.msra.mxu0 %v12032_v2 }
 0x445   : > { %12010 = vmatpush3.bf16.msra.mxu1 %v12009_v3  ;;  %v9652_v3 = vld [vmem:[%s14396_s10 + $0xd0] sm:$0xff] }
 0x446   : > { %12011 = vmatprep.subr.bf16.mxu1 %v13066_v15  ;;  %v12034_v5 = vpack.c.bf16 %v9653_v4, %v9652_v3  ;;  %v9564_v4 = vrot.slane %v9559_v59, %v14231_v55 }
 0x448   : > { %12035 = vmatprep.subr.bf16.mxu0 %v12034_v5 }
 0x449   : > { %12013 = vmatpush3.bf16.msra.mxu1 %v12012_v6  ;;  %v9636_v6 = vld [vmem:[%s14396_s10 + $0x50] sm:$0xff] }
 0x44c   : > { %11964 = vmatmul.mubr.msk.f32.vlgmr.msra.gmra.mrb[4].mxu1 %vm9082_vm1, %v9346_v7  ;;  %v9637_v7 = vld [vmem:[%s14396_s10 + $0x58] sm:$0xff] }
 0x4ff   : > { %v9186_v8 = vpop.f32.mrb[0].mxu1  ;;  %v9341_v10 = vpop.f32.mrb[0].mxu0 }
 0x500   : > { %v11908_v9 = vpop.f32.mrb[1].mxu1  ;;  %v11946_v11 = vpop.f32.mrb[1].mxu0 }
 0x501   : > { %v9654_v9 = vld [vmem:[%s14396_s10 + $0xe0] sm:$0xff] }
 0x50f   : > { %v9259_v12 = vpop.f32.mrb[2].mxu1 }
 0x510   : > { %v9260_v13 = vadd.f32 %v9259_v12, %v9186_v8  ;;  %v11927_v14 = vpop.f32.mrb[3].mxu1  ;;  %v12036_v8 = vpack.c.bf16 %v9637_v7, %v9636_v6  ;;  %v9638_v12 = vld [vmem:[%s14396_s10 + $0x60] sm:$0xff]  ;;  %v13071_v6 = vmov 1983009808  }
 0x511   : > { %v9597_v7 = vunpack.c.l.s4 %v13071_v6 }
 0x512   : > { %v9345_v16 = vadd.f32 %v9341_v10, %v9260_v13  ;;  %12037 = vmatpush3.bf16.msra.mxu0 %v12036_v8  ;;  %v9655_v10 = vld [vmem:[%s14396_s10 + $0xe8] sm:$0xff] }
 0x513   : > { %v12038_v11 = vpack.c.bf16 %v9655_v10, %v9654_v9  ;;  %v9639_v13 = vld [vmem:[%s14396_s10 + $0x68] sm:$0xff] }
 0x514   : > { %v12040_v14 = vpack.c.bf16 %v9639_v13, %v9638_v12  ;;  %v9575_v12 = vld [vmem:[%s14393_s7] sm:$0x3]  ;;  %v9568_v13 = vrot.slane %v9559_v59, %v14215_v45 }
 0x515   : > { %12039 = vmatprep.subr.bf16.mxu0 %v12038_v11 }
 0x516   : > { %12041 = vmatpush3.bf16.msra.mxu0 %v12040_v14 }
 0x51f   : > { %v9424_v17 = vpop.f32.mrb[4].mxu1 }
 0x520   : > { %v9428_v19 = vadd.f32 %v9424_v17, %v9345_v16  ;;  %v11965_v20 = vpop.f32.mrb[5].mxu1  ;;  %v9656_v16 = vld [vmem:[%s14396_s10 + $0xf0] sm:$0xff]  ;;  %v9657_v17 = vld [vmem:[%s14396_s10 + $0xf8] sm:$0xff] }
 0x521   : > { %v9641_v20 = vld [vmem:[%s14396_s10 + $0x78] sm:$0xff] }
 0x522   : > { %v9439_v21 = vadd.f32 %v9437_v18, %v9428_v19  ;;  %v9640_v18 = vld [vmem:[%s14396_s10 + $0x70] sm:$0xff]  ;;  %v12042_v19 = vpack.c.bf16 %v9657_v17, %v9656_v16 }
 0x524   : > { %v9440_v22 = vmax.f32 %v9439_v21, 0.0  ;;  %v12044_v21 = vpack.c.bf16 %v9641_v20, %v9640_v18  ;;  %12043 = vmatprep.subr.bf16.mxu0 %v12042_v19  ;;  %v9580_v19 = vrot.slane %v9575_v12, %v14231_v55  ;;  %v9584_v20 = vrot.slane %v9575_v12, %v14215_v45 }
 0x526   : > { %v9443_v15 = vsel %vm9441_vm3, %v9440_v22, -inf  ;;  %9442 = vst.msk [vmem:[#allocation8] sm:$0x3] %vm9441_vm3, %v9440_v22  ;;  %12045 = vmatpush3.bf16.msra.mxu0 %v12044_v21  ;;  %v9598_v21 = vunpack.c.0.s8 %v9597_v7 }
 0x527   : > { %9444 = vmax.xlane.f32.xlu0 %v9443_v15 }
 0x5b4   : > { %v9445_v23 = vpop.xlane.xlu0 %9444 }
 0x5b5   : > { %v9446_v24 = vsub.f32 %v9440_v22, %v9445_v23  ;;  %v13070_v22 = vmov 839922192  }
 0x5b6   : > { %v9473_v15 = vunpack.c.l.s4 %v13070_v22 }
 0x5b7   : > { %v9447_v25 = vmul.f32 1.442695, %v9446_v24  ;;  %v9525_v24 = vld [vmem:[%s14395_s9] sm:$0x3] }
 0x5b8   : > { %v9474_v23 = vunpack.c.0.s8 %v9473_v15 }
 0x5b9   : > { %12965 = vpow2.f32 %v9447_v25 }
 0x5ba   : > { %v9477_v25 = vsub.s32 %v9474_v23, %v14200_v38 }
 0x5c3   : > { %v12966_v26 = vpop.eup %12965 }
 0x5c4   : > { %v9449_v27 = vsel %vm9441_vm3, %v12966_v26, 0.0 }
 0x5c5   : > { %9450 = vadd.xlane.f32.xlu1 %v9449_v27  ;;  %v9455_v27 = vld [vmem:[%s14391_s5 + $0x8] sm:$0xff] }
 0x652   : > { %v9451_v28 = vpop.xlane.xlu1 %9450 }
 0x653   : > { %12967 = vrcp.f32 %v9451_v28 }
 0x65d   : > { %v12968_v49 = vpop.eup %12967 }
 0x65e   : > { %v9453_v51 = vmul.f32 %v12968_v49, %v12966_v26  ;;  %v9526_v26 = vadd.f32 1e-05, %v9525_v24 }
 0x660   : > { %v9466_v54 = vrot.slane %v9453_v51, %v14215_v45  ;;  %v9459_v62 = vrot.slane %v9453_v51, %v14231_v55  ;;  %12969 = vrsqrt.f32 %v9526_v26 }
 0x662   : > { %9468 = vbcast.lane.b32.xlu1 %v9466_v54, 256 }
 0x666   : > { %9461 = vbcast.lane.b32.xlu1 %v9459_v62, 256  ;;  %v9537_v62 = vrot.slane %v9528_v44, %v14215_v45 }
 0x66a   : > { %v12970_v50 = vpop.eup %12969 }
 0x66b   : > { %v9548_v63 = vrot.slane %v12970_v50, %v14231_v55  ;;  %v9552_v5 = vrot.slane %v12970_v50, %v14215_v45 }
 0x6d4   : > { %v9469_v28 = vpop.permute.xlu1 %9468 }
 0x6d5   : > { %v9485_v29 = vrot.slane %v9469_v28, %v9477_v25  ;;  %v9601_v28 = vsub.s32 %v9598_v21, %v14200_v38 }
 0x6d7   : > { %v9489_v30 = vmul.f32 %v9485_v29, %v9455_v27 }
 0x6d8   : > { %v9462_v32 = vpop.permute.xlu1 %9461 }
 0x6d9   : > { %v9493_v33 = vcombine.high %v9489_v30, %v9489_v30  ;;  %v9511_v34 = vsel %vm9496_vm4, %v9489_v30, 0.0  ;;  %v9478_v35 = vrot.slane %v9462_v32, %v9477_v25 }
 0x6da   : > { %v9512_v36 = vrot.slane %v9511_v34, 4 }
 0x6db   : > { %v9518_v37 = vsel %vm9496_vm4, %v9493_v33, 0.0  ;;  %v9488_v39 = vmul.f32 %v9478_v35, %v9454_v31 }
 0x6dc   : > { %v9513_v40 = vadd.f32 %v9512_v36, %v9511_v34  ;;  %v9519_v41 = vrot.slane %v9518_v37, 4 }
 0x6dd   : > { %v9492_v42 = vcombine.high %v9488_v39, %v9488_v39  ;;  %v9497_v43 = vsel %vm9496_vm4, %v9488_v39, 0.0 }
 0x6de   : > { %v9514_v46 = vrot.slane %v9513_v40, 2  ;;  %v9520_v47 = vadd.f32 %v9519_v41, %v9518_v37  ;;  %v9498_v48 = vrot.slane %v9497_v43, 4 }
 0x6df   : > { %v9504_v49 = vsel %vm9496_vm4, %v9492_v42, 0.0 }
 0x6e0   : > { %v9515_v51 = vadd.f32 %v9514_v46, %v9513_v40  ;;  %v9521_v52 = vrot.slane %v9520_v47, 2  ;;  %v9499_v53 = vadd.f32 %v9498_v48, %v9497_v43  ;;  %v9505_v54 = vrot.slane %v9504_v49, 4 }
 0x6e2   : > { %v9516_v57 = vrot.slane %v9515_v51, 1  ;;  %v9522_v58 = vadd.f32 %v9521_v52, %v9520_v47  ;;  %v9500_v60 = vrot.slane %v9499_v53, 2  ;;  %v9506_v61 = vadd.f32 %v9505_v54, %v9504_v49 }
 0x6e4   : > { %v9517_v0 = vadd.f32 %v9516_v57, %v9515_v51  ;;  %v9523_v1 = vrot.slane %v9522_v58, 1  ;;  %v9501_v2 = vadd.f32 %v9500_v60, %v9499_v53  ;;  %v9507_v3 = vrot.slane %v9506_v61, 2 }
 0x6e6   : > { %v9524_v8 = vadd.f32 %v9523_v1, %v9522_v58  ;;  %v9542_v9 = vsub.f32 %v9517_v0, %v9533_v56  ;;  %v9502_v10 = vrot.slane %v9501_v2, 1  ;;  %v9508_v11 = vadd.f32 %v9507_v3, %v9506_v61 }
 0x6e8   : > { %v9543_v14 = vsub.f32 %v9524_v8, %v9537_v62  ;;  %v9557_v16 = vmul.f32 %v9548_v63, %v9542_v9  ;;  %v9503_v17 = vadd.f32 %v9502_v10, %v9501_v2  ;;  %v9509_v18 = vrot.slane %v9508_v11, 1 }
 0x6ea   : > { %v9510_v22 = vadd.f32 %v9509_v18, %v9508_v11  ;;  %v9540_v15 = vsub.f32 %v9503_v17, %v9533_v56  ;;  %v9558_v23 = vmul.f32 %v9552_v5, %v9543_v14  ;;  %v9573_v24 = vmul.f32 %v9564_v4, %v9557_v16 }
 0x6ec   : > { %v9555_v25 = vmul.f32 %v9548_v63, %v9540_v15  ;;  %v9541_v26 = vsub.f32 %v9510_v22, %v9537_v62  ;;  %v9574_v27 = vmul.f32 %v9568_v13, %v9558_v23  ;;  %v9589_v31 = vadd.f32 %v9580_v19, %v9573_v24 }
 0x6ee   : > { %v9571_v29 = vmul.f32 %v9564_v4, %v9555_v25  ;;  %v9556_v30 = vmul.f32 %v9552_v5, %v9541_v26  ;;  %v9590_v32 = vadd.f32 %v9584_v20, %v9574_v27  ;;  %v9658_v37 = vrot.slane %v9589_v31, 7 }
 0x6f0   : > { %v9572_v33 = vmul.f32 %v9568_v13, %v9556_v30  ;;  %v9603_v34 = vcombine.low %v9589_v31, %v9590_v32  ;;  %v9587_v35 = vadd.f32 %v9580_v19, %v9571_v29  ;;  %v9660_v45 = vrot.slane %v9590_v32, 7 }
 0x6f2   : > { %v9588_v55 = vadd.f32 %v9584_v20, %v9572_v33  ;;  %v9610_v36 = vrot.slane %v9603_v34, %v9601_v28  ;;  %v9659_v41 = vsel %vm9616_vm5, %v9658_v37, %v9587_v35 }
 0x6f4   : > { %v9595_v39 = vcombine.low %v9587_v35, %v9588_v55  ;;  %v9661_v40 = vsel %vm9616_vm5, %v9660_v45, %v9588_v55  ;;  %v9615_v43 = vrot.slane %v9610_v36, 7 }
 0x6f5   : > { %9728 = vmatprep.mubr.f32.mxu0 %v9661_v40 }
 0x6f6   : > { %v9602_v42 = vrot.slane %v9595_v39, %v9601_v28  ;;  %9729 = vmatmul.mubr.f32.vlgmr.msra.gmra.mrb[2].mxu0 %v9659_v41 }
 0x6f8   : > { %v9617_v38 = vsel %vm9616_vm5, %v9615_v43, %v9602_v42 }
 0x6f9   : > { %v9619_v44 = vsel %vm9618_vm6, %v9615_v43, %v9617_v38 }
 0x6fa   : > { %v9621_v46 = vsel %vm9620_vm7, %v9615_v43, %v9619_v44 }
 0x6fb   : > { %v9623_v47 = vsel %vm9622_vm8, %v9615_v43, %v9621_v46 }
 0x6fc   : > { %9625 = vst [vmem:[#allocation6] sm:$0xf] %v9623_v47 }
 0x7c9   : > { %v11887_v48 = vpop.f32.mrb[2].mxu0 }
 0x7ca   : > { %v11888_v49 = vpop.f32.mrb[3].mxu0 }
 0x7cb   : > { %v11889_v50 = vadd.f32 %v11888_v49, %v11887_v48 }
 0x7cd   : > { %9735 = vst.msk [vmem:[#allocation4] sm:$0x3] %vm9734_vm9, %v11889_v50 }
 0x7ce PF: > { %p12058_p7 = scmp.eq.s32.totalorder %s13154_s28, 1  ;;  %s13072_s19 = smov [#allocation6]  }
 0x7cf   : > { %s9754_s20 = sshll.u32 %s13072_s19, 4  ;;  %s13073_s21 = smov [#allocation4]   ;;  %s9755_s20 = int_to_ptr.vmem [resolvable:$true] %s9754_s20 }
 0x7d0   : > { %s9743_s22 = sshll.u32 %s13073_s21, 4  ;;  %s12971_s23 = scalar_lea.vmem %s9755_s20, 64  ;;  %s9744_s22 = int_to_ptr.vmem [resolvable:$true] %s9743_s22 }
 0x7d1   : > { %p12972_p8 = scmp.ne.s32.totalorder %s9755_s20, %s12971_s23  ;;  %p12978_p11 = scmp.lt.s32.totalorder %s9755_s20, %s9755_s20 }
 0x7d2   : > { %p12979_p12 = scmp.lt.s32.totalorder %s12971_s23, %s12971_s23 }
 0x7d3   : > { %p12973_p9 = pnand %p12972_p8, %p12058_p7 }
 0x7d4   : > { %p12980_p13 = por %p12979_p12, %p12978_p11 }
 0x7d5   : > { %p12974_p10 = pneg %p12973_p9 }
 0x7d7   : > { %p12981_p0 = pnand %p12980_p13, %p12974_p10 }
 0x7d9   : > { %12984 = shalt.err (!%p12981_p0)
}
 0x7da   : > { %s12985_s26 = scalar_lea.hbm %s14398_s12, 64 }
 0x7db   : > { %p12986_p1 = scmp.ne.s32.totalorder %s14398_s12, %s12985_s26  ;;  %p12991_p4 = scmp.lt.u32.totalorder %s12985_s26, %s14398_s12 }
 0x7dd   : > { %p12987_p2 = pnand %p12986_p1, %p12058_p7 }
 0x7df   : > { %p12988_p3 = pneg %p12987_p2 }
 0x7e1   : > { %p12993_p5 = pnand %p12991_p4, %p12988_p3 }
 0x7e3   : > { %12996 = shalt.err (!%p12993_p5)
}
 0x7e4   : > { %12049 = dma.vmem_to_hbm [thread:$0]  (%p12058_p7), %s9755_s20, 64, %s14398_s12, [#allocation7]  }
 0x7e5   : > { %s12997_s17 = scalar_lea.vmem %s9744_s22, 32  ;;  %p13004_p10 = scmp.lt.s32.totalorder %s9744_s22, %s9744_s22 }
 0x7e6   : > { %p12998_p6 = scmp.ne.s32.totalorder %s9744_s22, %s12997_s17  ;;  %p13005_p11 = scmp.lt.s32.totalorder %s12997_s17, %s12997_s17 }
 0x7e8   : > { %p12999_p8 = pnand %p12998_p6, %p12058_p7  ;;  %p13006_p12 = por %p13005_p11, %p13004_p10 }
 0x7ea   : > { %p13000_p9 = pneg %p12999_p8 }
 0x7ec   : > { %p13007_p13 = pnand %p13006_p12, %p13000_p9 }
 0x7ee   : > { %13010 = shalt.err (!%p13007_p13)
}
 0x7ef   : > { %s13011_s21 = scalar_lea.hbm %s14397_s11, 32 }
 0x7f0   : > { %p13012_p0 = scmp.ne.s32.totalorder %s14397_s11, %s13011_s21  ;;  %p13017_p3 = scmp.lt.u32.totalorder %s13011_s21, %s14397_s11 }
 0x7f2   : > { %p13013_p1 = pnand %p13012_p0, %p12058_p7 }
 0x7f4   : > { %p13014_p2 = pneg %p13013_p1 }
 0x7f6   : > { %p13019_p4 = pnand %p13017_p3, %p13014_p2 }
 0x7f8   : > { %13022 = shalt.err (!%p13019_p4)
}
 0x7f9   : > { %12047 = dma.vmem_to_hbm [thread:$0]  (%p12058_p7), %s9744_s22, 32, %s14397_s11, [#allocation5]  }
 0x7fa   : > { %s13074_s29 = smov [#allocation8]  }
 0x7fb   : > { %s9765_s30 = sshll.u32 %s13074_s29, 4  ;;  %s9766_s30 = int_to_ptr.vmem [resolvable:$true] %s9765_s30 }
 0x7fc   : > { %s13023_s14 = scalar_lea.vmem %s9766_s30, 32  ;;  %p13030_p9 = scmp.lt.s32.totalorder %s9766_s30, %s9766_s30 }
 0x7fd   : > { %p13024_p5 = scmp.ne.s32.totalorder %s9766_s30, %s13023_s14  ;;  %p13031_p10 = scmp.lt.s32.totalorder %s13023_s14, %s13023_s14 }
 0x7ff   : > { %p13025_p6 = pnand %p13024_p5, %p12058_p7  ;;  %p13032_p11 = por %p13031_p10, %p13030_p9 }
 0x801   : > { %p13026_p8 = pneg %p13025_p6 }
 0x803   : > { %p13033_p12 = pnand %p13032_p11, %p13026_p8 }
 0x805   : > { %13036 = shalt.err (!%p13033_p12)
}
 0x806   : > { %s13037_s17 = scalar_lea.hbm %s14399_s13, 32 }
 0x807   : > { %p13038_p13 = scmp.ne.s32.totalorder %s14399_s13, %s13037_s17  ;;  %p13043_p2 = scmp.lt.u32.totalorder %s13037_s17, %s14399_s13 }
 0x809   : > { %p13039_p0 = pnand %p13038_p13, %p12058_p7 }
 0x80b   : > { %p13040_p1 = pneg %p13039_p0 }
 0x80d   : > { %p13045_p3 = pnand %p13043_p2, %p13040_p1 }
 0x80f   : > { %13048 = shalt.err (!%p13045_p3)
}
 0x810   : > { %12051 = dma.vmem_to_hbm [thread:$0]  (%p12058_p7), %s9766_s30, 32, %s14399_s13, [#allocation7]  }
 0x811   : > { %13054 = dma.done.wait (%p12058_p7), [#allocation5], 32  }
 0x812   : > { %13056 = vsyncadd (%p12058_p7), [#allocation5], 4294967264 }
 0x813   : > { %13058 = dma.done.wait (%p12058_p7), [#allocation7], 96  }
 0x814   : > { %13060 = vsyncadd (%p12058_p7), [#allocation7], 4294967200 }
 0x815 PF: > { %s28_s27 = sadd.s32 1, %s13063_s27  }
 0x816   : > { %p25_p4 = scmp.ge.s32.totalorder %s28_s27, 4  }
 0x818   :  { %27 = sbr.rel (!%p25_p4) target bundleno = 5 (0x5), region = 118 }
 0x81f   :  { %9786 = vsyncpa [#allocation5], 1 }
 0x820   :  { %9788 = vsyncpa [#allocation5 + $0x1], 1 }
 0x821   :  { %9789 = vsyncpa [#allocation7], 1 }

</bundles_post_ra>
